<compile_context>
chip_gen: v7x
topology: tpu7x:2x2x1
jax: 0.10.0
libtpu: 0.0.40
codegen_flags: <defaults>
</compile_context>

<pallas_src>
import functools

import numpy as np

import jax
import jax.numpy as jnp
from jax import lax
from jax.experimental import pallas as pl
from jax.experimental.pallas import tpu as pltpu

# ----------------------------------------------------------------------------
# Stand-ins for current_dataset.configs (small & consistent)
# ----------------------------------------------------------------------------
DRUG_EMBEDDING_DIM = 32
TARGET_EMBEDDING_DIM = 32
DRUG_FILTER_SIZES = [2, 3]
TARGET_FILTER_SIZES = [2, 3]
GRAPH_ENCODER_IN_LENGTH = 32
GRAPH_ENCODER_NUM_LAYERS = 2
GRAPH_ENCODER_NODE_DROPOUT = 0.0  # => F.dropout is the identity


# ----------------------------------------------------------------------------
# In-kernel helpers
# ----------------------------------------------------------------------------
def _conv_tapsum(h, w_ref, b_ref):
    """Conv1d (stride 1, valid) over stacked sequences as tap-sum matmuls.

    h: (M, Cin) value, all sequences stacked on sublanes.
    w_ref: (k, Cin, Cout) VMEM ref.  Returns (M - k + 1, Cout).
    Rows whose window straddles a sequence boundary are garbage and must be
    dropped by the caller (pool/selection matrices or max-window selection).
    """
    k = w_ref.shape[0]
    m = h.shape[0] - k + 1
    acc = jnp.dot(h[0:m, :], w_ref[0], preferred_element_type=jnp.float32)
    for t in range(1, k):
        acc = acc + jnp.dot(h[t:t + m, :], w_ref[t],
                            preferred_element_type=jnp.float32)
    return acc + b_ref[...]


def _seq_pipeline(refs, batch):
    """SeqFilter forward for one stacked token batch, fully VMEM-resident."""
    (tok_ref, emb_ref, c1w, c1b, p1, c2w, c2b, p2,
     f0w, f0b, f1w, f1b, l1w, l1b, l2w, l2b) = refs
    rows = tok_ref.shape[0]              # batch * seq_len
    vocab = emb_ref.shape[0]

    # NOTE: SeqFilter defines nn.MultiheadAttention but never calls it in
    # forward(), so it is intentionally omitted here.

    # Embedding lookup as a one-hot MXU matmul (no XLA gather / HBM (B,L,D)).
    tok = tok_ref[...]                                               # (rows, 1)
    onehot = (lax.broadcasted_iota(jnp.int32, (rows, vocab), 1) == tok
              ).astype(jnp.float32)                                  # (rows, V)
    x = jnp.dot(onehot, emb_ref[...], preferred_element_type=jnp.float32)

    # conv1(k=5) -> avgpool(3)+relu -> conv2(k=3) -> avgpool(3)+relu,
    # all sequences in one pass; p1/p2 are fused pool + boundary-row-drop mats.
    h = _conv_tapsum(x, c1w, c1b)                                    # (B*L-4, D/2)
    h = jnp.maximum(jnp.dot(p1[...], h, preferred_element_type=jnp.float32), 0.0)
    h = _conv_tapsum(h, c2w, c2b)                                    # (B*20-2, D/4)
    h = jnp.maximum(jnp.dot(p2[...], h, preferred_element_type=jnp.float32), 0.0)

    seg = p2.shape[0] // batch            # per-sequence length after pool2 (=6)
    lsel = seg * (batch - 1) + 1
    sel = (lax.broadcasted_iota(jnp.int32, (batch, lsel), 1)
           == seg * lax.broadcasted_iota(jnp.int32, (batch, lsel), 0)
           ).astype(jnp.float32)          # picks row seg*b of the running max

    feats = []
    for fw, fb in ((f0w, f0b), (f1w, f1b)):
        y = _conv_tapsum(h, fw, fb)                                  # (B*seg-k+1, out)
        # Per-sequence max over time: shifted pairwise maxes + one selection
        # matmul (batch-size independent, no strided slicing).
        win = seg - fw.shape[0] + 1
        acc = y[0:lsel, :]
        for j in range(1, win):
            acc = jnp.maximum(acc, y[j:j + lsel, :])
        feats.append(jnp.dot(sel, acc, preferred_element_type=jnp.float32))

    # Linear(2*out -> out) with pre-split weight halves (avoids a 32-wide,
    # non-128-aligned lane concat), ReLU, Linear(out -> out).
    hmid = jnp.maximum(
        jnp.dot(feats[0], l1w[0], preferred_element_type=jnp.float32)
        + jnp.dot(feats[1], l1w[1], preferred_element_type=jnp.float32)
        + l1b[...], 0.0)
    return jnp.dot(hmid, l2w[...], preferred_element_type=jnp.float32) + l2b[...]


def _fused_kernel(*refs, n_drug, n_target):
    """Whole AllModel forward in one kernel invocation."""
    edges_sm = refs[0]                    # (2, E) int32, SMEM (scalar prefetch)
    d_refs = refs[1:17]
    t_refs = refs[17:33]
    (adj_ref, an_ref, wx_ref, asrc_ref, adst_ref, gatb_ref,
     swl_ref, sbl_ref, lw_ref, lb_ref) = refs[33:43]
    o_ref = refs[43]                      # (1, E) lane-major output
    node_ref = refs[44]                   # (N, F) VMEM scratch

    f_dim = wx_ref.shape[1]
    num_layers = wx_ref.shape[0]
    n_edges = edges_sm.shape[1]

    # --- sequence encoders (features never leave VMEM) ---
    drug_f = _seq_pipeline(d_refs, n_drug)        # (n_drug,  F)
    target_f = _seq_pipeline(t_refs, n_target)    # (n_target, F)

    # --- graph encoder: GAT + SAGE + Linear + tanh, both layers unrolled ---
    x = jnp.concatenate([drug_f, target_f], axis=0)               # (N, F)
    adj_mask = adj_ref[...] > 0.0                                  # reused by all layers
    an = an_ref[...]                                               # row-normalized adjacency
    for l in range(num_layers):
        # Packed matmul: [GATConv.lin | SAGEConv.lin_r] in one (F, 2F) pass.
        xw = jnp.dot(x, wx_ref[l], preferred_element_type=jnp.float32)
        xp = xw[:, :f_dim]
        xr = xw[:, f_dim:]
        # GAT single-head attention over dense adjacency (self-loops included,
        # so every softmax row has at least one valid entry).
        s = jnp.sum(xp * asrc_ref[l], axis=-1, keepdims=True)      # (N, 1)
        d = jnp.sum(xp * adst_ref[l], axis=-1, keepdims=True)      # (N, 1)
        e = d + jnp.transpose(s)          # (N,N); single tiny (N,1) XLU transpose
        e = jnp.where(adj_mask, jnp.where(e > 0, e, 0.2 * e), -1e30)
        e = e - jnp.max(e, axis=-1, keepdims=True)
        p = jnp.where(adj_mask, jnp.exp(e), 0.0)
        attn = p / jnp.sum(p, axis=-1, keepdims=True)              # exact division
        gat = jnp.dot(attn, xp, preferred_element_type=jnp.float32) + gatb_ref[l]
        # SAGE (mean aggregation): lin_l(mean_nbr x) + lin_r(x) + bias
        agg = jnp.dot(an, x, preferred_element_type=jnp.float32)
        sage = (jnp.dot(agg, swl_ref[l], preferred_element_type=jnp.float32)
                + xr + sbl_ref[l])
        # TODO(synk): F.dropout with p=graph_encoder_node_dropout=0.0 is the
        # identity; stochastic dropout for p>0 is not reproduced.
        # Linear over cat([x, gat, sage]) done as 3 accumulated matmuls
        # (no (N, 3F) lane concat).
        lw = lw_ref[l]
        x = jnp.tanh(
            jnp.dot(x, lw[0:f_dim, :], preferred_element_type=jnp.float32)
            + jnp.dot(gat, lw[f_dim:2 * f_dim, :], preferred_element_type=jnp.float32)
            + jnp.dot(sage, lw[2 * f_dim:3 * f_dim, :], preferred_element_type=jnp.float32)
            + lb_ref[l])

    # --- decoder: gather edge endpoints via SMEM indices + pl.ds, dot, sigmoid
    node_ref[...] = x
    vals = []
    for ei in range(n_edges):
        si = edges_sm[0, ei]
        di = edges_sm[1, ei]
        sr = node_ref[pl.ds(si, 1), :]
        dr = node_ref[pl.ds(di, 1), :]
        vals.append(jnp.sum(sr * dr, axis=-1, keepdims=True))
    o_ref[...] = jax.nn.sigmoid(jnp.concatenate(vals, axis=1))     # (1, E)


# ----------------------------------------------------------------------------
# Host-side constant builders & wrapper
# ----------------------------------------------------------------------------
def _pool_select(batch, in_block, out_block, k, in_rows):
    """Fused AvgPool1d(k, stride=k) + per-sequence row selection matrix."""
    mat = np.zeros((batch * out_block, in_rows), np.float32)
    for b in range(batch):
        for j in range(out_block):
            c = b * in_block + k * j
            mat[b * out_block + j, c:c + k] = 1.0 / k
    return jnp.asarray(mat)


def _seq_args(tokens, p):
    batch, length = tokens.shape
    l1 = length - 5 + 1            # after Conv1d(k=5)
    p1_out = l1 // 3               # after AvgPool1d(3)
    l2 = p1_out - 3 + 1            # after Conv1d(k=3)
    p2_out = l2 // 3               # after AvgPool1d(3)
    pool1 = _pool_select(batch, length, p1_out, 3, batch * length - 4)
    pool2 = _pool_select(batch, p1_out, p2_out, 3, batch * p1_out - 2)
    return (tokens.reshape(batch * length, 1).astype(jnp.int32), p["embedding"],
            p["conv1_w"], p["conv1_b"], pool1,
            p["conv2_w"], p["conv2_b"], pool2,
            p["filter0_w"], p["filter0_b"], p["filter1_w"], p["filter1_b"],
            p["lin1_w"], p["lin1_b"], p["lin2_w"], p["lin2_b"])


def _whole_spec(shape):
    nd = len(shape)
    # index_map arity = 1 grid dim + 1 scalar-prefetch ref
    return pl.BlockSpec(shape, lambda i, es, _nd=nd: (0,) * _nd)


def all_model_forward(params, drug_tokens, target_tokens, edges):
    d_args = _seq_args(drug_tokens, params["drug"])
    t_args = _seq_args(target_tokens, params["target"])
    gp = params["graph"]
    g_args = (params["adj_gat"], params["a_norm"], gp["wx"], gp["a_src"],
              gp["a_dst"], gp["gat_b"], gp["sage_wl"], gp["sage_bl"],
              gp["lin_w"], gp["lin_b"])
    vmem_args = list(d_args) + list(t_args) + list(g_args)

    n_edges = edges.shape[1]
    n_nodes = params["adj_gat"].shape[0]
    f_dim = gp["wx"].shape[1]

    kernel = functools.partial(_fused_kernel,
                               n_drug=drug_tokens.shape[0],
                               n_target=target_tokens.shape[0])
    grid_spec = pltpu.PrefetchScalarGridSpec(
        num_scalar_prefetch=1,                      # edges -> SMEM
        grid=(1,),
        in_specs=[_whole_spec(a.shape) for a in vmem_args],
        out_specs=pl.BlockSpec((1, n_edges), lambda i, es: (0, 0)),
        scratch_shapes=[pltpu.VMEM((n_nodes, f_dim), jnp.float32)],
    )
    # TODO(synk): on v7x a 2-wide "parallel" grid axis could split the two
    # independent SeqFilter paths across TensorCores; kept single-step here
    # since the graph stage consumes both feature sets.
    out = pl.pallas_call(
        kernel,
        out_shape=jax.ShapeDtypeStruct((1, n_edges), jnp.float32),
        grid_spec=grid_spec,
        compiler_params=pltpu.CompilerParams(
            dimension_semantics=("arbitrary",)),
    )(edges.astype(jnp.int32), *vmem_args)
    return out[0]


# ----------------------------------------------------------------------------
# Deterministic parameter initialization
# ----------------------------------------------------------------------------
def init_seq_filter_params(key, num_embeddings, D, out_length, filter_sizes):
    assert len(filter_sizes) == 2, "kernel is specialized to 2 filter sizes"
    keys = jax.random.split(key, 10)
    p = {}
    p["embedding"] = jax.random.normal(keys[0], (num_embeddings, D), jnp.float32) * 0.1
    # Conv weights stored tap-major as (k, C_in, C_out).
    p["conv1_w"] = jax.random.normal(keys[1], (5, D, D // 2), jnp.float32) * 0.1
    p["conv1_b"] = jnp.zeros((1, D // 2), jnp.float32)          # bias init 0
    p["conv2_w"] = jax.random.normal(keys[2], (3, D // 2, D // 4), jnp.float32) * 0.1
    p["conv2_b"] = jnp.zeros((1, D // 4), jnp.float32)
    for i, k in enumerate(filter_sizes):
        p[f"filter{i}_w"] = jax.random.normal(keys[3 + i], (k, D // 4, out_length),
                                              jnp.float32) * 0.1
        p[f"filter{i}_b"] = jnp.zeros((1, out_length), jnp.float32)
    # Faithful to the PyTorch spec: len(all_filter_size) // 2 * out_length.
    hid = (len(filter_sizes) // 2) * out_length
    # lin1 weight pre-split into per-filter halves (2, out_length, hid).
    p["lin1_w"] = jax.random.normal(keys[6], (len(filter_sizes), out_length, hid),
                                    jnp.float32) * 0.1
    p["lin1_b"] = jnp.zeros((1, hid), jnp.float32)
    p["lin2_w"] = jax.random.normal(keys[7], (hid, out_length), jnp.float32) * 0.1
    p["lin2_b"] = jnp.zeros((1, out_length), jnp.float32)
    return p


def init_graph_params(key, F_dim, num_layers):
    wx, a_src, a_dst, gat_b, sage_wl, sage_bl, lin_w, lin_b = ([] for _ in range(8))
    for l in range(num_layers):
        ks = jax.random.split(jax.random.fold_in(key, l), 6)
        gat_w = jax.random.normal(ks[0], (F_dim, F_dim), jnp.float32) * 0.1
        sage_wr = jax.random.normal(ks[4], (F_dim, F_dim), jnp.float32) * 0.1
        # Pack GATConv.lin and SAGEConv.lin_r into one (F, 2F) weight.
        wx.append(jnp.concatenate([gat_w, sage_wr], axis=1))
        a_src.append(jax.random.normal(ks[1], (1, F_dim), jnp.float32) * 0.1)
        a_dst.append(jax.random.normal(ks[2], (1, F_dim), jnp.float32) * 0.1)
        gat_b.append(jnp.zeros((1, F_dim), jnp.float32))
        sage_wl.append(jax.random.normal(ks[3], (F_dim, F_dim), jnp.float32) * 0.1)
        sage_bl.append(jnp.zeros((1, F_dim), jnp.float32))
        lin_w.append(jax.random.normal(ks[5], (3 * F_dim, F_dim), jnp.float32) * 0.1)
        lin_b.append(jnp.zeros((1, F_dim), jnp.float32))
    return {"wx": jnp.stack(wx), "a_src": jnp.stack(a_src), "a_dst": jnp.stack(a_dst),
            "gat_b": jnp.stack(gat_b), "sage_wl": jnp.stack(sage_wl),
            "sage_bl": jnp.stack(sage_bl), "lin_w": jnp.stack(lin_w),
            "lin_b": jnp.stack(lin_b)}


def build_graph_mats(edges, num_nodes):
    # all_edge_weights initialized to 1.0 -> sigmoid(1) > 0.5 -> all edges kept.
    src, dst = edges[0], edges[1]
    adj = jnp.zeros((num_nodes, num_nodes), jnp.float32).at[dst, src].set(1.0)
    adj_gat = jnp.maximum(adj, jnp.eye(num_nodes, dtype=jnp.float32))  # + self loops (GAT)
    deg = jnp.sum(adj, axis=1, keepdims=True)
    a_norm = adj / jnp.maximum(deg, 1.0)                               # mean aggregation (SAGE)
    return adj_gat, a_norm


# ----------------------------------------------------------------------------
if __name__ == "__main__":
    key = jax.random.PRNGKey(0)
    k_drug_p, k_target_p, k_graph_p, k_drug_x, k_target_x = jax.random.split(key, 5)

    DRUG_NUM_EMBEDDINGS = 30
    TARGET_NUM_EMBEDDINGS = 26
    NUM_DRUGS, NUM_TARGETS, SEQ_LEN = 4, 6, 64
    NUM_NODES = NUM_DRUGS + NUM_TARGETS

    params = {
        "drug": init_seq_filter_params(k_drug_p, DRUG_NUM_EMBEDDINGS,
                                       DRUG_EMBEDDING_DIM, GRAPH_ENCODER_IN_LENGTH,
                                       DRUG_FILTER_SIZES),
        "target": init_seq_filter_params(k_target_p, TARGET_NUM_EMBEDDINGS,
                                         TARGET_EMBEDDING_DIM, GRAPH_ENCODER_IN_LENGTH,
                                         TARGET_FILTER_SIZES),
        "graph": init_graph_params(k_graph_p, GRAPH_ENCODER_IN_LENGTH,
                                   GRAPH_ENCODER_NUM_LAYERS),
    }

    # Graph structure (drug nodes 0..3, target nodes 4..9)
    drug_edges = jnp.array([[0, 1, 2], [1, 2, 3]], jnp.int32)
    target_edges = jnp.array([[4, 5, 6, 7], [5, 6, 7, 8]], jnp.int32)
    train_positive_edges = jnp.array([[0, 1, 2, 3], [4, 5, 6, 7]], jnp.int32)
    all_edges = jnp.concatenate([drug_edges, target_edges, train_positive_edges], axis=-1)
    adj_gat, a_norm = build_graph_mats(all_edges, NUM_NODES)
    params["adj_gat"] = adj_gat
    params["a_norm"] = a_norm

    # Inputs
    drug_tokens = jax.random.randint(k_drug_x, (NUM_DRUGS, SEQ_LEN), 0,
                                     DRUG_NUM_EMBEDDINGS, dtype=jnp.int32)
    target_tokens = jax.random.randint(k_target_x, (NUM_TARGETS, SEQ_LEN), 0,
                                       TARGET_NUM_EMBEDDINGS, dtype=jnp.int32)
    pred_edges = jnp.array([[0, 1, 2], [8, 9, 4]], jnp.int32)

    # jit(partial(...)) keeps params static and wraps the ONE pallas_call.
    fwd = jax.jit(functools.partial(all_model_forward, params))
    out = jax.block_until_ready(fwd(drug_tokens, target_tokens, pred_edges))

    assert out.shape == (3,), out.shape
    assert bool(jnp.all(jnp.isfinite(out)))
    assert bool(jnp.all((out >= 0.0) & (out <= 1.0)))
    print("KERNEL_OK")
</pallas_src>

<mosaic_0001>
module attributes {stable_mosaic.version = 11 : i64} {
  func.func @_fused_kernel(%arg0: i32, %arg1: memref<2x3xi32, #tpu.memory_space<smem>>, %arg2: memref<256x1xi32, #tpu.memory_space<vmem>>, %arg3: memref<30x32xf32, #tpu.memory_space<vmem>>, %arg4: memref<5x32x16xf32, #tpu.memory_space<vmem>>, %arg5: memref<1x16xf32, #tpu.memory_space<vmem>>, %arg6: memref<80x252xf32, #tpu.memory_space<vmem>>, %arg7: memref<3x16x8xf32, #tpu.memory_space<vmem>>, %arg8: memref<1x8xf32, #tpu.memory_space<vmem>>, %arg9: memref<24x78xf32, #tpu.memory_space<vmem>>, %arg10: memref<2x8x32xf32, #tpu.memory_space<vmem>>, %arg11: memref<1x32xf32, #tpu.memory_space<vmem>>, %arg12: memref<3x8x32xf32, #tpu.memory_space<vmem>>, %arg13: memref<1x32xf32, #tpu.memory_space<vmem>>, %arg14: memref<2x32x32xf32, #tpu.memory_space<vmem>>, %arg15: memref<1x32xf32, #tpu.memory_space<vmem>>, %arg16: memref<32x32xf32, #tpu.memory_space<vmem>>, %arg17: memref<1x32xf32, #tpu.memory_space<vmem>>, %arg18: memref<384x1xi32, #tpu.memory_space<vmem>>, %arg19: memref<26x32xf32, #tpu.memory_space<vmem>>, %arg20: memref<5x32x16xf32, #tpu.memory_space<vmem>>, %arg21: memref<1x16xf32, #tpu.memory_space<vmem>>, %arg22: memref<120x380xf32, #tpu.memory_space<vmem>>, %arg23: memref<3x16x8xf32, #tpu.memory_space<vmem>>, %arg24: memref<1x8xf32, #tpu.memory_space<vmem>>, %arg25: memref<36x118xf32, #tpu.memory_space<vmem>>, %arg26: memref<2x8x32xf32, #tpu.memory_space<vmem>>, %arg27: memref<1x32xf32, #tpu.memory_space<vmem>>, %arg28: memref<3x8x32xf32, #tpu.memory_space<vmem>>, %arg29: memref<1x32xf32, #tpu.memory_space<vmem>>, %arg30: memref<2x32x32xf32, #tpu.memory_space<vmem>>, %arg31: memref<1x32xf32, #tpu.memory_space<vmem>>, %arg32: memref<32x32xf32, #tpu.memory_space<vmem>>, %arg33: memref<1x32xf32, #tpu.memory_space<vmem>>, %arg34: memref<10x10xf32, #tpu.memory_space<vmem>>, %arg35: memref<10x10xf32, #tpu.memory_space<vmem>>, %arg36: memref<2x32x64xf32, #tpu.memory_space<vmem>>, %arg37: memref<2x1x32xf32, #tpu.memory_space<vmem>>, %arg38: memref<2x1x32xf32, #tpu.memory_space<vmem>>, %arg39: memref<2x1x32xf32, #tpu.memory_space<vmem>>, %arg40: memref<2x32x32xf32, #tpu.memory_space<vmem>>, %arg41: memref<2x1x32xf32, #tpu.memory_space<vmem>>, %arg42: memref<2x96x32xf32, #tpu.memory_space<vmem>>, %arg43: memref<2x1x32xf32, #tpu.memory_space<vmem>>, %arg44: memref<1x3xf32, #tpu.memory_space<vmem>>, %arg45: memref<10x32xf32, #tpu.memory_space<vmem>>) attributes {dimension_semantics = [#tpu.dimension_semantics<arbitrary>], iteration_bounds = array<i64: 1>, scalar_prefetch = 1 : i64, scratch_operands = 1 : i64, tpu.core_type = #tpu.core_type<tc>, window_params = [{pipeline_mode = #tpu.pipeline_mode<synchronous>, transform_indices = @transform_0, window_bounds = array<i64: 256, 1>}, {pipeline_mode = #tpu.pipeline_mode<synchronous>, transform_indices = @transform_1, window_bounds = array<i64: 30, 32>}, {pipeline_mode = #tpu.pipeline_mode<synchronous>, transform_indices = @transform_2, window_bounds = array<i64: 5, 32, 16>}, {pipeline_mode = #tpu.pipeline_mode<synchronous>, transform_indices = @transform_3, window_bounds = array<i64: 1, 16>}, {pipeline_mode = #tpu.pipeline_mode<synchronous>, transform_indices = @transform_4, window_bounds = array<i64: 80, 252>}, {pipeline_mode = #tpu.pipeline_mode<synchronous>, transform_indices = @transform_5, window_bounds = array<i64: 3, 16, 8>}, {pipeline_mode = #tpu.pipeline_mode<synchronous>, transform_indices = @transform_6, window_bounds = array<i64: 1, 8>}, {pipeline_mode = #tpu.pipeline_mode<synchronous>, transform_indices = @transform_7, window_bounds = array<i64: 24, 78>}, {pipeline_mode = #tpu.pipeline_mode<synchronous>, transform_indices = @transform_8, window_bounds = array<i64: 2, 8, 32>}, {pipeline_mode = #tpu.pipeline_mode<synchronous>, transform_indices = @transform_9, window_bounds = array<i64: 1, 32>}, {pipeline_mode = #tpu.pipeline_mode<synchronous>, transform_indices = @transform_10, window_bounds = array<i64: 3, 8, 32>}, {pipeline_mode = #tpu.pipeline_mode<synchronous>, transform_indices = @transform_11, window_bounds = array<i64: 1, 32>}, {pipeline_mode = #tpu.pipeline_mode<synchronous>, transform_indices = @transform_12, window_bounds = array<i64: 2, 32, 32>}, {pipeline_mode = #tpu.pipeline_mode<synchronous>, transform_indices = @transform_13, window_bounds = array<i64: 1, 32>}, {pipeline_mode = #tpu.pipeline_mode<synchronous>, transform_indices = @transform_14, window_bounds = array<i64: 32, 32>}, {pipeline_mode = #tpu.pipeline_mode<synchronous>, transform_indices = @transform_15, window_bounds = array<i64: 1, 32>}, {pipeline_mode = #tpu.pipeline_mode<synchronous>, transform_indices = @transform_16, window_bounds = array<i64: 384, 1>}, {pipeline_mode = #tpu.pipeline_mode<synchronous>, transform_indices = @transform_17, window_bounds = array<i64: 26, 32>}, {pipeline_mode = #tpu.pipeline_mode<synchronous>, transform_indices = @transform_18, window_bounds = array<i64: 5, 32, 16>}, {pipeline_mode = #tpu.pipeline_mode<synchronous>, transform_indices = @transform_19, window_bounds = array<i64: 1, 16>}, {pipeline_mode = #tpu.pipeline_mode<synchronous>, transform_indices = @transform_20, window_bounds = array<i64: 120, 380>}, {pipeline_mode = #tpu.pipeline_mode<synchronous>, transform_indices = @transform_21, window_bounds = array<i64: 3, 16, 8>}, {pipeline_mode = #tpu.pipeline_mode<synchronous>, transform_indices = @transform_22, window_bounds = array<i64: 1, 8>}, {pipeline_mode = #tpu.pipeline_mode<synchronous>, transform_indices = @transform_23, window_bounds = array<i64: 36, 118>}, {pipeline_mode = #tpu.pipeline_mode<synchronous>, transform_indices = @transform_24, window_bounds = array<i64: 2, 8, 32>}, {pipeline_mode = #tpu.pipeline_mode<synchronous>, transform_indices = @transform_25, window_bounds = array<i64: 1, 32>}, {pipeline_mode = #tpu.pipeline_mode<synchronous>, transform_indices = @transform_26, window_bounds = array<i64: 3, 8, 32>}, {pipeline_mode = #tpu.pipeline_mode<synchronous>, transform_indices = @transform_27, window_bounds = array<i64: 1, 32>}, {pipeline_mode = #tpu.pipeline_mode<synchronous>, transform_indices = @transform_28, window_bounds = array<i64: 2, 32, 32>}, {pipeline_mode = #tpu.pipeline_mode<synchronous>, transform_indices = @transform_29, window_bounds = array<i64: 1, 32>}, {pipeline_mode = #tpu.pipeline_mode<synchronous>, transform_indices = @transform_30, window_bounds = array<i64: 32, 32>}, {pipeline_mode = #tpu.pipeline_mode<synchronous>, transform_indices = @transform_31, window_bounds = array<i64: 1, 32>}, {pipeline_mode = #tpu.pipeline_mode<synchronous>, transform_indices = @transform_32, window_bounds = array<i64: 10, 10>}, {pipeline_mode = #tpu.pipeline_mode<synchronous>, transform_indices = @transform_33, window_bounds = array<i64: 10, 10>}, {pipeline_mode = #tpu.pipeline_mode<synchronous>, transform_indices = @transform_34, window_bounds = array<i64: 2, 32, 64>}, {pipeline_mode = #tpu.pipeline_mode<synchronous>, transform_indices = @transform_35, window_bounds = array<i64: 2, 1, 32>}, {pipeline_mode = #tpu.pipeline_mode<synchronous>, transform_indices = @transform_36, window_bounds = array<i64: 2, 1, 32>}, {pipeline_mode = #tpu.pipeline_mode<synchronous>, transform_indices = @transform_37, window_bounds = array<i64: 2, 1, 32>}, {pipeline_mode = #tpu.pipeline_mode<synchronous>, transform_indices = @transform_38, window_bounds = array<i64: 2, 32, 32>}, {pipeline_mode = #tpu.pipeline_mode<synchronous>, transform_indices = @transform_39, window_bounds = array<i64: 2, 1, 32>}, {pipeline_mode = #tpu.pipeline_mode<synchronous>, transform_indices = @transform_40, window_bounds = array<i64: 2, 96, 32>}, {pipeline_mode = #tpu.pipeline_mode<synchronous>, transform_indices = @transform_41, window_bounds = array<i64: 2, 1, 32>}, {pipeline_mode = #tpu.pipeline_mode<synchronous>, transform_indices = @transform_42, window_bounds = array<i64: 1, 3>}]} {
    %c0 = arith.constant 0 : index
    %c0_0 = arith.constant 0 : index
    %0 = vector.load %arg2[%c0, %c0_0] : memref<256x1xi32, #tpu.memory_space<vmem>>, vector<256x1xi32>
    %1 = tpu.iota {dimensions = array<i32: 1>} : vector<256x30xi32>
    %2 = vector.broadcast %0 : vector<256x1xi32> to vector<256x30xi32>
    %3 = arith.cmpi eq, %1, %2 : vector<256x30xi32>
    %4 = arith.extui %3 : vector<256x30xi1> to vector<256x30xi32>
    %5 = arith.sitofp %4 : vector<256x30xi32> to vector<256x30xf32>
    %c0_1 = arith.constant 0 : index
    %c0_2 = arith.constant 0 : index
    %6 = vector.load %arg3[%c0_1, %c0_2] : memref<30x32xf32, #tpu.memory_space<vmem>>, vector<30x32xf32>
    %cst = arith.constant dense<0.000000e+00> : vector<256x32xf32>
    %7 = tpu.matmul %5, %6, %cst {dimension_numbers = #tpu.dot_dimension_numbers<[1], [0], [0], [1], [0, 0, 1, 1], [], []>} : vector<256x30xf32>, vector<30x32xf32>, vector<256x32xf32> -> vector<256x32xf32>
    %8 = vector.extract_strided_slice %7 {offsets = [0, 0], sizes = [252, 32], strides = [1, 1]} : vector<256x32xf32> to vector<252x32xf32>
    %c0_3 = arith.constant 0 : index
    %c0_4 = arith.constant 0 : index
    %c0_5 = arith.constant 0 : index
    %9 = vector.load %arg4[%c0_3, %c0_4, %c0_5] : memref<5x32x16xf32, #tpu.memory_space<vmem>>, vector<1x32x16xf32>
    %10 = vector.shape_cast %9 : vector<1x32x16xf32> to vector<32x16xf32>
    %cst_6 = arith.constant dense<0.000000e+00> : vector<252x16xf32>
    %11 = tpu.matmul %8, %10, %cst_6 {dimension_numbers = #tpu.dot_dimension_numbers<[1], [0], [0], [1], [0, 0, 1, 1], [], []>} : vector<252x32xf32>, vector<32x16xf32>, vector<252x16xf32> -> vector<252x16xf32>
    %12 = vector.extract_strided_slice %7 {offsets = [1, 0], sizes = [252, 32], strides = [1, 1]} : vector<256x32xf32> to vector<252x32xf32>
    %c1 = arith.constant 1 : index
    %c0_7 = arith.constant 0 : index
    %c0_8 = arith.constant 0 : index
    %13 = vector.load %arg4[%c1, %c0_7, %c0_8] : memref<5x32x16xf32, #tpu.memory_space<vmem>>, vector<1x32x16xf32>
    %14 = vector.shape_cast %13 : vector<1x32x16xf32> to vector<32x16xf32>
    %cst_9 = arith.constant dense<0.000000e+00> : vector<252x16xf32>
    %15 = tpu.matmul %12, %14, %cst_9 {dimension_numbers = #tpu.dot_dimension_numbers<[1], [0], [0], [1], [0, 0, 1, 1], [], []>} : vector<252x32xf32>, vector<32x16xf32>, vector<252x16xf32> -> vector<252x16xf32>
    %16 = arith.addf %11, %15 : vector<252x16xf32>
    %17 = vector.extract_strided_slice %7 {offsets = [2, 0], sizes = [252, 32], strides = [1, 1]} : vector<256x32xf32> to vector<252x32xf32>
    %c2 = arith.constant 2 : index
    %c0_10 = arith.constant 0 : index
    %c0_11 = arith.constant 0 : index
    %18 = vector.load %arg4[%c2, %c0_10, %c0_11] : memref<5x32x16xf32, #tpu.memory_space<vmem>>, vector<1x32x16xf32>
    %19 = vector.shape_cast %18 : vector<1x32x16xf32> to vector<32x16xf32>
    %cst_12 = arith.constant dense<0.000000e+00> : vector<252x16xf32>
    %20 = tpu.matmul %17, %19, %cst_12 {dimension_numbers = #tpu.dot_dimension_numbers<[1], [0], [0], [1], [0, 0, 1, 1], [], []>} : vector<252x32xf32>, vector<32x16xf32>, vector<252x16xf32> -> vector<252x16xf32>
    %21 = arith.addf %16, %20 : vector<252x16xf32>
    %22 = vector.extract_strided_slice %7 {offsets = [3, 0], sizes = [252, 32], strides = [1, 1]} : vector<256x32xf32> to vector<252x32xf32>
    %c3 = arith.constant 3 : index
    %c0_13 = arith.constant 0 : index
    %c0_14 = arith.constant 0 : index
    %23 = vector.load %arg4[%c3, %c0_13, %c0_14] : memref<5x32x16xf32, #tpu.memory_space<vmem>>, vector<1x32x16xf32>
    %24 = vector.shape_cast %23 : vector<1x32x16xf32> to vector<32x16xf32>
    %cst_15 = arith.constant dense<0.000000e+00> : vector<252x16xf32>
    %25 = tpu.matmul %22, %24, %cst_15 {dimension_numbers = #tpu.dot_dimension_numbers<[1], [0], [0], [1], [0, 0, 1, 1], [], []>} : vector<252x32xf32>, vector<32x16xf32>, vector<252x16xf32> -> vector<252x16xf32>
    %26 = arith.addf %21, %25 : vector<252x16xf32>
    %27 = vector.extract_strided_slice %7 {offsets = [4, 0], sizes = [252, 32], strides = [1, 1]} : vector<256x32xf32> to vector<252x32xf32>
    %c4 = arith.constant 4 : index
    %c0_16 = arith.constant 0 : index
    %c0_17 = arith.constant 0 : index
    %28 = vector.load %arg4[%c4, %c0_16, %c0_17] : memref<5x32x16xf32, #tpu.memory_space<vmem>>, vector<1x32x16xf32>
    %29 = vector.shape_cast %28 : vector<1x32x16xf32> to vector<32x16xf32>
    %cst_18 = arith.constant dense<0.000000e+00> : vector<252x16xf32>
    %30 = tpu.matmul %27, %29, %cst_18 {dimension_numbers = #tpu.dot_dimension_numbers<[1], [0], [0], [1], [0, 0, 1, 1], [], []>} : vector<252x32xf32>, vector<32x16xf32>, vector<252x16xf32> -> vector<252x16xf32>
    %31 = arith.addf %26, %30 : vector<252x16xf32>
    %c0_19 = arith.constant 0 : index
    %c0_20 = arith.constant 0 : index
    %32 = vector.load %arg5[%c0_19, %c0_20] : memref<1x16xf32, #tpu.memory_space<vmem>>, vector<1x16xf32>
    %33 = vector.broadcast %32 : vector<1x16xf32> to vector<252x16xf32>
    %34 = arith.addf %31, %33 : vector<252x16xf32>
    %c0_21 = arith.constant 0 : index
    %c0_22 = arith.constant 0 : index
    %35 = vector.load %arg6[%c0_21, %c0_22] : memref<80x252xf32, #tpu.memory_space<vmem>>, vector<80x252xf32>
    %cst_23 = arith.constant dense<0.000000e+00> : vector<80x16xf32>
    %36 = tpu.matmul %35, %34, %cst_23 {dimension_numbers = #tpu.dot_dimension_numbers<[1], [0], [0], [1], [0, 0, 1, 1], [], []>} : vector<80x252xf32>, vector<252x16xf32>, vector<80x16xf32> -> vector<80x16xf32>
    %cst_24 = arith.constant 0.000000e+00 : f32
    %37 = vector.broadcast %cst_24 : f32 to vector<80x16xf32>
    %38 = arith.maximumf %36, %37 : vector<80x16xf32>
    %39 = vector.extract_strided_slice %38 {offsets = [0, 0], sizes = [78, 16], strides = [1, 1]} : vector<80x16xf32> to vector<78x16xf32>
    %c0_25 = arith.constant 0 : index
    %c0_26 = arith.constant 0 : index
    %c0_27 = arith.constant 0 : index
    %40 = vector.load %arg7[%c0_25, %c0_26, %c0_27] : memref<3x16x8xf32, #tpu.memory_space<vmem>>, vector<1x16x8xf32>
    %41 = vector.shape_cast %40 : vector<1x16x8xf32> to vector<16x8xf32>
    %cst_28 = arith.constant dense<0.000000e+00> : vector<78x8xf32>
    %42 = tpu.matmul %39, %41, %cst_28 {dimension_numbers = #tpu.dot_dimension_numbers<[1], [0], [0], [1], [0, 0, 1, 1], [], []>} : vector<78x16xf32>, vector<16x8xf32>, vector<78x8xf32> -> vector<78x8xf32>
    %43 = vector.extract_strided_slice %38 {offsets = [1, 0], sizes = [78, 16], strides = [1, 1]} : vector<80x16xf32> to vector<78x16xf32>
    %c1_29 = arith.constant 1 : index
    %c0_30 = arith.constant 0 : index
    %c0_31 = arith.constant 0 : index
    %44 = vector.load %arg7[%c1_29, %c0_30, %c0_31] : memref<3x16x8xf32, #tpu.memory_space<vmem>>, vector<1x16x8xf32>
    %45 = vector.shape_cast %44 : vector<1x16x8xf32> to vector<16x8xf32>
    %cst_32 = arith.constant dense<0.000000e+00> : vector<78x8xf32>
    %46 = tpu.matmul %43, %45, %cst_32 {dimension_numbers = #tpu.dot_dimension_numbers<[1], [0], [0], [1], [0, 0, 1, 1], [], []>} : vector<78x16xf32>, vector<16x8xf32>, vector<78x8xf32> -> vector<78x8xf32>
    %47 = arith.addf %42, %46 : vector<78x8xf32>
    %48 = vector.extract_strided_slice %38 {offsets = [2, 0], sizes = [78, 16], strides = [1, 1]} : vector<80x16xf32> to vector<78x16xf32>
    %c2_33 = arith.constant 2 : index
    %c0_34 = arith.constant 0 : index
    %c0_35 = arith.constant 0 : index
    %49 = vector.load %arg7[%c2_33, %c0_34, %c0_35] : memref<3x16x8xf32, #tpu.memory_space<vmem>>, vector<1x16x8xf32>
    %50 = vector.shape_cast %49 : vector<1x16x8xf32> to vector<16x8xf32>
    %cst_36 = arith.constant dense<0.000000e+00> : vector<78x8xf32>
    %51 = tpu.matmul %48, %50, %cst_36 {dimension_numbers = #tpu.dot_dimension_numbers<[1], [0], [0], [1], [0, 0, 1, 1], [], []>} : vector<78x16xf32>, vector<16x8xf32>, vector<78x8xf32> -> vector<78x8xf32>
    %52 = arith.addf %47, %51 : vector<78x8xf32>
    %c0_37 = arith.constant 0 : index
    %c0_38 = arith.constant 0 : index
    %53 = vector.load %arg8[%c0_37, %c0_38] : memref<1x8xf32, #tpu.memory_space<vmem>>, vector<1x8xf32>
    %54 = vector.broadcast %53 : vector<1x8xf32> to vector<78x8xf32>
    %55 = arith.addf %52, %54 : vector<78x8xf32>
    %c0_39 = arith.constant 0 : index
    %c0_40 = arith.constant 0 : index
    %56 = vector.load %arg9[%c0_39, %c0_40] : memref<24x78xf32, #tpu.memory_space<vmem>>, vector<24x78xf32>
    %cst_41 = arith.constant dense<0.000000e+00> : vector<24x8xf32>
    %57 = tpu.matmul %56, %55, %cst_41 {dimension_numbers = #tpu.dot_dimension_numbers<[1], [0], [0], [1], [0, 0, 1, 1], [], []>} : vector<24x78xf32>, vector<78x8xf32>, vector<24x8xf32> -> vector<24x8xf32>
    %cst_42 = arith.constant 0.000000e+00 : f32
    %58 = vector.broadcast %cst_42 : f32 to vector<24x8xf32>
    %59 = arith.maximumf %57, %58 : vector<24x8xf32>
    %60 = tpu.iota {dimensions = array<i32: 1>} : vector<4x19xi32>
    %61 = tpu.iota {dimensions = array<i32: 0>} : vector<4x19xi32>
    %c6_i32 = arith.constant 6 : i32
    %62 = vector.broadcast %c6_i32 : i32 to vector<4x19xi32>
    %63 = arith.muli %62, %61 : vector<4x19xi32>
    %64 = arith.cmpi eq, %60, %63 : vector<4x19xi32>
    %65 = arith.extui %64 : vector<4x19xi1> to vector<4x19xi32>
    %66 = arith.sitofp %65 : vector<4x19xi32> to vector<4x19xf32>
    %67 = vector.extract_strided_slice %59 {offsets = [0, 0], sizes = [23, 8], strides = [1, 1]} : vector<24x8xf32> to vector<23x8xf32>
    %c0_43 = arith.constant 0 : index
    %c0_44 = arith.constant 0 : index
    %c0_45 = arith.constant 0 : index
    %68 = vector.load %arg10[%c0_43, %c0_44, %c0_45] : memref<2x8x32xf32, #tpu.memory_space<vmem>>, vector<1x8x32xf32>
    %69 = vector.shape_cast %68 : vector<1x8x32xf32> to vector<8x32xf32>
    %cst_46 = arith.constant dense<0.000000e+00> : vector<23x32xf32>
    %70 = tpu.matmul %67, %69, %cst_46 {dimension_numbers = #tpu.dot_dimension_numbers<[1], [0], [0], [1], [0, 0, 1, 1], [], []>} : vector<23x8xf32>, vector<8x32xf32>, vector<23x32xf32> -> vector<23x32xf32>
    %71 = vector.extract_strided_slice %59 {offsets = [1, 0], sizes = [23, 8], strides = [1, 1]} : vector<24x8xf32> to vector<23x8xf32>
    %c1_47 = arith.constant 1 : index
    %c0_48 = arith.constant 0 : index
    %c0_49 = arith.constant 0 : index
    %72 = vector.load %arg10[%c1_47, %c0_48, %c0_49] : memref<2x8x32xf32, #tpu.memory_space<vmem>>, vector<1x8x32xf32>
    %73 = vector.shape_cast %72 : vector<1x8x32xf32> to vector<8x32xf32>
    %cst_50 = arith.constant dense<0.000000e+00> : vector<23x32xf32>
    %74 = tpu.matmul %71, %73, %cst_50 {dimension_numbers = #tpu.dot_dimension_numbers<[1], [0], [0], [1], [0, 0, 1, 1], [], []>} : vector<23x8xf32>, vector<8x32xf32>, vector<23x32xf32> -> vector<23x32xf32>
    %75 = arith.addf %70, %74 : vector<23x32xf32>
    %c0_51 = arith.constant 0 : index
    %c0_52 = arith.constant 0 : index
    %76 = vector.load %arg11[%c0_51, %c0_52] : memref<1x32xf32, #tpu.memory_space<vmem>>, vector<1x32xf32>
    %77 = vector.broadcast %76 : vector<1x32xf32> to vector<23x32xf32>
    %78 = arith.addf %75, %77 : vector<23x32xf32>
    %79 = vector.extract_strided_slice %78 {offsets = [0, 0], sizes = [19, 32], strides = [1, 1]} : vector<23x32xf32> to vector<19x32xf32>
    %80 = vector.extract_strided_slice %78 {offsets = [1, 0], sizes = [19, 32], strides = [1, 1]} : vector<23x32xf32> to vector<19x32xf32>
    %81 = arith.maximumf %79, %80 : vector<19x32xf32>
    %82 = vector.extract_strided_slice %78 {offsets = [2, 0], sizes = [19, 32], strides = [1, 1]} : vector<23x32xf32> to vector<19x32xf32>
    %83 = arith.maximumf %81, %82 : vector<19x32xf32>
    %84 = vector.extract_strided_slice %78 {offsets = [3, 0], sizes = [19, 32], strides = [1, 1]} : vector<23x32xf32> to vector<19x32xf32>
    %85 = arith.maximumf %83, %84 : vector<19x32xf32>
    %86 = vector.extract_strided_slice %78 {offsets = [4, 0], sizes = [19, 32], strides = [1, 1]} : vector<23x32xf32> to vector<19x32xf32>
    %87 = arith.maximumf %85, %86 : vector<19x32xf32>
    %cst_53 = arith.constant dense<0.000000e+00> : vector<4x32xf32>
    %88 = tpu.matmul %66, %87, %cst_53 {dimension_numbers = #tpu.dot_dimension_numbers<[1], [0], [0], [1], [0, 0, 1, 1], [], []>} : vector<4x19xf32>, vector<19x32xf32>, vector<4x32xf32> -> vector<4x32xf32>
    %89 = vector.extract_strided_slice %59 {offsets = [0, 0], sizes = [22, 8], strides = [1, 1]} : vector<24x8xf32> to vector<22x8xf32>
    %c0_54 = arith.constant 0 : index
    %c0_55 = arith.constant 0 : index
    %c0_56 = arith.constant 0 : index
    %90 = vector.load %arg12[%c0_54, %c0_55, %c0_56] : memref<3x8x32xf32, #tpu.memory_space<vmem>>, vector<1x8x32xf32>
    %91 = vector.shape_cast %90 : vector<1x8x32xf32> to vector<8x32xf32>
    %cst_57 = arith.constant dense<0.000000e+00> : vector<22x32xf32>
    %92 = tpu.matmul %89, %91, %cst_57 {dimension_numbers = #tpu.dot_dimension_numbers<[1], [0], [0], [1], [0, 0, 1, 1], [], []>} : vector<22x8xf32>, vector<8x32xf32>, vector<22x32xf32> -> vector<22x32xf32>
    %93 = vector.extract_strided_slice %59 {offsets = [1, 0], sizes = [22, 8], strides = [1, 1]} : vector<24x8xf32> to vector<22x8xf32>
    %c1_58 = arith.constant 1 : index
    %c0_59 = arith.constant 0 : index
    %c0_60 = arith.constant 0 : index
    %94 = vector.load %arg12[%c1_58, %c0_59, %c0_60] : memref<3x8x32xf32, #tpu.memory_space<vmem>>, vector<1x8x32xf32>
    %95 = vector.shape_cast %94 : vector<1x8x32xf32> to vector<8x32xf32>
    %cst_61 = arith.constant dense<0.000000e+00> : vector<22x32xf32>
    %96 = tpu.matmul %93, %95, %cst_61 {dimension_numbers = #tpu.dot_dimension_numbers<[1], [0], [0], [1], [0, 0, 1, 1], [], []>} : vector<22x8xf32>, vector<8x32xf32>, vector<22x32xf32> -> vector<22x32xf32>
    %97 = arith.addf %92, %96 : vector<22x32xf32>
    %98 = vector.extract_strided_slice %59 {offsets = [2, 0], sizes = [22, 8], strides = [1, 1]} : vector<24x8xf32> to vector<22x8xf32>
    %c2_62 = arith.constant 2 : index
    %c0_63 = arith.constant 0 : index
    %c0_64 = arith.constant 0 : index
    %99 = vector.load %arg12[%c2_62, %c0_63, %c0_64] : memref<3x8x32xf32, #tpu.memory_space<vmem>>, vector<1x8x32xf32>
    %100 = vector.shape_cast %99 : vector<1x8x32xf32> to vector<8x32xf32>
    %cst_65 = arith.constant dense<0.000000e+00> : vector<22x32xf32>
    %101 = tpu.matmul %98, %100, %cst_65 {dimension_numbers = #tpu.dot_dimension_numbers<[1], [0], [0], [1], [0, 0, 1, 1], [], []>} : vector<22x8xf32>, vector<8x32xf32>, vector<22x32xf32> -> vector<22x32xf32>
    %102 = arith.addf %97, %101 : vector<22x32xf32>
    %c0_66 = arith.constant 0 : index
    %c0_67 = arith.constant 0 : index
    %103 = vector.load %arg13[%c0_66, %c0_67] : memref<1x32xf32, #tpu.memory_space<vmem>>, vector<1x32xf32>
    %104 = vector.broadcast %103 : vector<1x32xf32> to vector<22x32xf32>
    %105 = arith.addf %102, %104 : vector<22x32xf32>
    %106 = vector.extract_strided_slice %105 {offsets = [0, 0], sizes = [19, 32], strides = [1, 1]} : vector<22x32xf32> to vector<19x32xf32>
    %107 = vector.extract_strided_slice %105 {offsets = [1, 0], sizes = [19, 32], strides = [1, 1]} : vector<22x32xf32> to vector<19x32xf32>
    %108 = arith.maximumf %106, %107 : vector<19x32xf32>
    %109 = vector.extract_strided_slice %105 {offsets = [2, 0], sizes = [19, 32], strides = [1, 1]} : vector<22x32xf32> to vector<19x32xf32>
    %110 = arith.maximumf %108, %109 : vector<19x32xf32>
    %111 = vector.extract_strided_slice %105 {offsets = [3, 0], sizes = [19, 32], strides = [1, 1]} : vector<22x32xf32> to vector<19x32xf32>
    %112 = arith.maximumf %110, %111 : vector<19x32xf32>
    %cst_68 = arith.constant dense<0.000000e+00> : vector<4x32xf32>
    %113 = tpu.matmul %66, %112, %cst_68 {dimension_numbers = #tpu.dot_dimension_numbers<[1], [0], [0], [1], [0, 0, 1, 1], [], []>} : vector<4x19xf32>, vector<19x32xf32>, vector<4x32xf32> -> vector<4x32xf32>
    %c0_69 = arith.constant 0 : index
    %c0_70 = arith.constant 0 : index
    %c0_71 = arith.constant 0 : index
    %114 = vector.load %arg14[%c0_69, %c0_70, %c0_71] : memref<2x32x32xf32, #tpu.memory_space<vmem>>, vector<1x32x32xf32>
    %115 = vector.shape_cast %114 : vector<1x32x32xf32> to vector<32x32xf32>
    %cst_72 = arith.constant dense<0.000000e+00> : vector<4x32xf32>
    %116 = tpu.matmul %88, %115, %cst_72 {dimension_numbers = #tpu.dot_dimension_numbers<[1], [0], [0], [1], [0, 0, 1, 1], [], []>} : vector<4x32xf32>, vector<32x32xf32>, vector<4x32xf32> -> vector<4x32xf32>
    %c1_73 = arith.constant 1 : index
    %c0_74 = arith.constant 0 : index
    %c0_75 = arith.constant 0 : index
    %117 = vector.load %arg14[%c1_73, %c0_74, %c0_75] : memref<2x32x32xf32, #tpu.memory_space<vmem>>, vector<1x32x32xf32>
    %118 = vector.shape_cast %117 : vector<1x32x32xf32> to vector<32x32xf32>
    %cst_76 = arith.constant dense<0.000000e+00> : vector<4x32xf32>
    %119 = tpu.matmul %113, %118, %cst_76 {dimension_numbers = #tpu.dot_dimension_numbers<[1], [0], [0], [1], [0, 0, 1, 1], [], []>} : vector<4x32xf32>, vector<32x32xf32>, vector<4x32xf32> -> vector<4x32xf32>
    %120 = arith.addf %116, %119 : vector<4x32xf32>
    %c0_77 = arith.constant 0 : index
    %c0_78 = arith.constant 0 : index
    %121 = vector.load %arg15[%c0_77, %c0_78] : memref<1x32xf32, #tpu.memory_space<vmem>>, vector<1x32xf32>
    %122 = vector.broadcast %121 : vector<1x32xf32> to vector<4x32xf32>
    %123 = arith.addf %120, %122 : vector<4x32xf32>
    %cst_79 = arith.constant 0.000000e+00 : f32
    %124 = vector.broadcast %cst_79 : f32 to vector<4x32xf32>
    %125 = arith.maximumf %123, %124 : vector<4x32xf32>
    %c0_80 = arith.constant 0 : index
    %c0_81 = arith.constant 0 : index
    %126 = vector.load %arg16[%c0_80, %c0_81] : memref<32x32xf32, #tpu.memory_space<vmem>>, vector<32x32xf32>
    %cst_82 = arith.constant dense<0.000000e+00> : vector<4x32xf32>
    %127 = tpu.matmul %125, %126, %cst_82 {dimension_numbers = #tpu.dot_dimension_numbers<[1], [0], [0], [1], [0, 0, 1, 1], [], []>} : vector<4x32xf32>, vector<32x32xf32>, vector<4x32xf32> -> vector<4x32xf32>
    %c0_83 = arith.constant 0 : index
    %c0_84 = arith.constant 0 : index
    %128 = vector.load %arg17[%c0_83, %c0_84] : memref<1x32xf32, #tpu.memory_space<vmem>>, vector<1x32xf32>
    %129 = vector.broadcast %128 : vector<1x32xf32> to vector<4x32xf32>
    %130 = arith.addf %127, %129 : vector<4x32xf32>
    %c0_85 = arith.constant 0 : index
    %c0_86 = arith.constant 0 : index
    %131 = vector.load %arg18[%c0_85, %c0_86] : memref<384x1xi32, #tpu.memory_space<vmem>>, vector<384x1xi32>
    %132 = tpu.iota {dimensions = array<i32: 1>} : vector<384x26xi32>
    %133 = vector.broadcast %131 : vector<384x1xi32> to vector<384x26xi32>
    %134 = arith.cmpi eq, %132, %133 : vector<384x26xi32>
    %135 = arith.extui %134 : vector<384x26xi1> to vector<384x26xi32>
    %136 = arith.sitofp %135 : vector<384x26xi32> to vector<384x26xf32>
    %c0_87 = arith.constant 0 : index
    %c0_88 = arith.constant 0 : index
    %137 = vector.load %arg19[%c0_87, %c0_88] : memref<26x32xf32, #tpu.memory_space<vmem>>, vector<26x32xf32>
    %cst_89 = arith.constant dense<0.000000e+00> : vector<384x32xf32>
    %138 = tpu.matmul %136, %137, %cst_89 {dimension_numbers = #tpu.dot_dimension_numbers<[1], [0], [0], [1], [0, 0, 1, 1], [], []>} : vector<384x26xf32>, vector<26x32xf32>, vector<384x32xf32> -> vector<384x32xf32>
    %139 = vector.extract_strided_slice %138 {offsets = [0, 0], sizes = [380, 32], strides = [1, 1]} : vector<384x32xf32> to vector<380x32xf32>
    %c0_90 = arith.constant 0 : index
    %c0_91 = arith.constant 0 : index
    %c0_92 = arith.constant 0 : index
    %140 = vector.load %arg20[%c0_90, %c0_91, %c0_92] : memref<5x32x16xf32, #tpu.memory_space<vmem>>, vector<1x32x16xf32>
    %141 = vector.shape_cast %140 : vector<1x32x16xf32> to vector<32x16xf32>
    %cst_93 = arith.constant dense<0.000000e+00> : vector<380x16xf32>
    %142 = tpu.matmul %139, %141, %cst_93 {dimension_numbers = #tpu.dot_dimension_numbers<[1], [0], [0], [1], [0, 0, 1, 1], [], []>} : vector<380x32xf32>, vector<32x16xf32>, vector<380x16xf32> -> vector<380x16xf32>
    %143 = vector.extract_strided_slice %138 {offsets = [1, 0], sizes = [380, 32], strides = [1, 1]} : vector<384x32xf32> to vector<380x32xf32>
    %c1_94 = arith.constant 1 : index
    %c0_95 = arith.constant 0 : index
    %c0_96 = arith.constant 0 : index
    %144 = vector.load %arg20[%c1_94, %c0_95, %c0_96] : memref<5x32x16xf32, #tpu.memory_space<vmem>>, vector<1x32x16xf32>
    %145 = vector.shape_cast %144 : vector<1x32x16xf32> to vector<32x16xf32>
    %cst_97 = arith.constant dense<0.000000e+00> : vector<380x16xf32>
    %146 = tpu.matmul %143, %145, %cst_97 {dimension_numbers = #tpu.dot_dimension_numbers<[1], [0], [0], [1], [0, 0, 1, 1], [], []>} : vector<380x32xf32>, vector<32x16xf32>, vector<380x16xf32> -> vector<380x16xf32>
    %147 = arith.addf %142, %146 : vector<380x16xf32>
    %148 = vector.extract_strided_slice %138 {offsets = [2, 0], sizes = [380, 32], strides = [1, 1]} : vector<384x32xf32> to vector<380x32xf32>
    %c2_98 = arith.constant 2 : index
    %c0_99 = arith.constant 0 : index
    %c0_100 = arith.constant 0 : index
    %149 = vector.load %arg20[%c2_98, %c0_99, %c0_100] : memref<5x32x16xf32, #tpu.memory_space<vmem>>, vector<1x32x16xf32>
    %150 = vector.shape_cast %149 : vector<1x32x16xf32> to vector<32x16xf32>
    %cst_101 = arith.constant dense<0.000000e+00> : vector<380x16xf32>
    %151 = tpu.matmul %148, %150, %cst_101 {dimension_numbers = #tpu.dot_dimension_numbers<[1], [0], [0], [1], [0, 0, 1, 1], [], []>} : vector<380x32xf32>, vector<32x16xf32>, vector<380x16xf32> -> vector<380x16xf32>
    %152 = arith.addf %147, %151 : vector<380x16xf32>
    %153 = vector.extract_strided_slice %138 {offsets = [3, 0], sizes = [380, 32], strides = [1, 1]} : vector<384x32xf32> to vector<380x32xf32>
    %c3_102 = arith.constant 3 : index
    %c0_103 = arith.constant 0 : index
    %c0_104 = arith.constant 0 : index
    %154 = vector.load %arg20[%c3_102, %c0_103, %c0_104] : memref<5x32x16xf32, #tpu.memory_space<vmem>>, vector<1x32x16xf32>
    %155 = vector.shape_cast %154 : vector<1x32x16xf32> to vector<32x16xf32>
    %cst_105 = arith.constant dense<0.000000e+00> : vector<380x16xf32>
    %156 = tpu.matmul %153, %155, %cst_105 {dimension_numbers = #tpu.dot_dimension_numbers<[1], [0], [0], [1], [0, 0, 1, 1], [], []>} : vector<380x32xf32>, vector<32x16xf32>, vector<380x16xf32> -> vector<380x16xf32>
    %157 = arith.addf %152, %156 : vector<380x16xf32>
    %158 = vector.extract_strided_slice %138 {offsets = [4, 0], sizes = [380, 32], strides = [1, 1]} : vector<384x32xf32> to vector<380x32xf32>
    %c4_106 = arith.constant 4 : index
    %c0_107 = arith.constant 0 : index
    %c0_108 = arith.constant 0 : index
    %159 = vector.load %arg20[%c4_106, %c0_107, %c0_108] : memref<5x32x16xf32, #tpu.memory_space<vmem>>, vector<1x32x16xf32>
    %160 = vector.shape_cast %159 : vector<1x32x16xf32> to vector<32x16xf32>
    %cst_109 = arith.constant dense<0.000000e+00> : vector<380x16xf32>
    %161 = tpu.matmul %158, %160, %cst_109 {dimension_numbers = #tpu.dot_dimension_numbers<[1], [0], [0], [1], [0, 0, 1, 1], [], []>} : vector<380x32xf32>, vector<32x16xf32>, vector<380x16xf32> -> vector<380x16xf32>
    %162 = arith.addf %157, %161 : vector<380x16xf32>
    %c0_110 = arith.constant 0 : index
    %c0_111 = arith.constant 0 : index
    %163 = vector.load %arg21[%c0_110, %c0_111] : memref<1x16xf32, #tpu.memory_space<vmem>>, vector<1x16xf32>
    %164 = vector.broadcast %163 : vector<1x16xf32> to vector<380x16xf32>
    %165 = arith.addf %162, %164 : vector<380x16xf32>
    %c0_112 = arith.constant 0 : index
    %c0_113 = arith.constant 0 : index
    %166 = vector.load %arg22[%c0_112, %c0_113] : memref<120x380xf32, #tpu.memory_space<vmem>>, vector<120x380xf32>
    %cst_114 = arith.constant dense<0.000000e+00> : vector<120x16xf32>
    %167 = tpu.matmul %166, %165, %cst_114 {dimension_numbers = #tpu.dot_dimension_numbers<[1], [0], [0], [1], [0, 0, 1, 1], [], []>} : vector<120x380xf32>, vector<380x16xf32>, vector<120x16xf32> -> vector<120x16xf32>
    %cst_115 = arith.constant 0.000000e+00 : f32
    %168 = vector.broadcast %cst_115 : f32 to vector<120x16xf32>
    %169 = arith.maximumf %167, %168 : vector<120x16xf32>
    %170 = vector.extract_strided_slice %169 {offsets = [0, 0], sizes = [118, 16], strides = [1, 1]} : vector<120x16xf32> to vector<118x16xf32>
    %c0_116 = arith.constant 0 : index
    %c0_117 = arith.constant 0 : index
    %c0_118 = arith.constant 0 : index
    %171 = vector.load %arg23[%c0_116, %c0_117, %c0_118] : memref<3x16x8xf32, #tpu.memory_space<vmem>>, vector<1x16x8xf32>
    %172 = vector.shape_cast %171 : vector<1x16x8xf32> to vector<16x8xf32>
    %cst_119 = arith.constant dense<0.000000e+00> : vector<118x8xf32>
    %173 = tpu.matmul %170, %172, %cst_119 {dimension_numbers = #tpu.dot_dimension_numbers<[1], [0], [0], [1], [0, 0, 1, 1], [], []>} : vector<118x16xf32>, vector<16x8xf32>, vector<118x8xf32> -> vector<118x8xf32>
    %174 = vector.extract_strided_slice %169 {offsets = [1, 0], sizes = [118, 16], strides = [1, 1]} : vector<120x16xf32> to vector<118x16xf32>
    %c1_120 = arith.constant 1 : index
    %c0_121 = arith.constant 0 : index
    %c0_122 = arith.constant 0 : index
    %175 = vector.load %arg23[%c1_120, %c0_121, %c0_122] : memref<3x16x8xf32, #tpu.memory_space<vmem>>, vector<1x16x8xf32>
    %176 = vector.shape_cast %175 : vector<1x16x8xf32> to vector<16x8xf32>
    %cst_123 = arith.constant dense<0.000000e+00> : vector<118x8xf32>
    %177 = tpu.matmul %174, %176, %cst_123 {dimension_numbers = #tpu.dot_dimension_numbers<[1], [0], [0], [1], [0, 0, 1, 1], [], []>} : vector<118x16xf32>, vector<16x8xf32>, vector<118x8xf32> -> vector<118x8xf32>
    %178 = arith.addf %173, %177 : vector<118x8xf32>
    %179 = vector.extract_strided_slice %169 {offsets = [2, 0], sizes = [118, 16], strides = [1, 1]} : vector<120x16xf32> to vector<118x16xf32>
    %c2_124 = arith.constant 2 : index
    %c0_125 = arith.constant 0 : index
    %c0_126 = arith.constant 0 : index
    %180 = vector.load %arg23[%c2_124, %c0_125, %c0_126] : memref<3x16x8xf32, #tpu.memory_space<vmem>>, vector<1x16x8xf32>
    %181 = vector.shape_cast %180 : vector<1x16x8xf32> to vector<16x8xf32>
    %cst_127 = arith.constant dense<0.000000e+00> : vector<118x8xf32>
    %182 = tpu.matmul %179, %181, %cst_127 {dimension_numbers = #tpu.dot_dimension_numbers<[1], [0], [0], [1], [0, 0, 1, 1], [], []>} : vector<118x16xf32>, vector<16x8xf32>, vector<118x8xf32> -> vector<118x8xf32>
    %183 = arith.addf %178, %182 : vector<118x8xf32>
    %c0_128 = arith.constant 0 : index
    %c0_129 = arith.constant 0 : index
    %184 = vector.load %arg24[%c0_128, %c0_129] : memref<1x8xf32, #tpu.memory_space<vmem>>, vector<1x8xf32>
    %185 = vector.broadcast %184 : vector<1x8xf32> to vector<118x8xf32>
    %186 = arith.addf %183, %185 : vector<118x8xf32>
    %c0_130 = arith.constant 0 : index
    %c0_131 = arith.constant 0 : index
    %187 = vector.load %arg25[%c0_130, %c0_131] : memref<36x118xf32, #tpu.memory_space<vmem>>, vector<36x118xf32>
    %cst_132 = arith.constant dense<0.000000e+00> : vector<36x8xf32>
    %188 = tpu.matmul %187, %186, %cst_132 {dimension_numbers = #tpu.dot_dimension_numbers<[1], [0], [0], [1], [0, 0, 1, 1], [], []>} : vector<36x118xf32>, vector<118x8xf32>, vector<36x8xf32> -> vector<36x8xf32>
    %cst_133 = arith.constant 0.000000e+00 : f32
    %189 = vector.broadcast %cst_133 : f32 to vector<36x8xf32>
    %190 = arith.maximumf %188, %189 : vector<36x8xf32>
    %191 = tpu.iota {dimensions = array<i32: 1>} : vector<6x31xi32>
    %192 = tpu.iota {dimensions = array<i32: 0>} : vector<6x31xi32>
    %c6_i32_134 = arith.constant 6 : i32
    %193 = vector.broadcast %c6_i32_134 : i32 to vector<6x31xi32>
    %194 = arith.muli %193, %192 : vector<6x31xi32>
    %195 = arith.cmpi eq, %191, %194 : vector<6x31xi32>
    %196 = arith.extui %195 : vector<6x31xi1> to vector<6x31xi32>
    %197 = arith.sitofp %196 : vector<6x31xi32> to vector<6x31xf32>
    %198 = vector.extract_strided_slice %190 {offsets = [0, 0], sizes = [35, 8], strides = [1, 1]} : vector<36x8xf32> to vector<35x8xf32>
    %c0_135 = arith.constant 0 : index
    %c0_136 = arith.constant 0 : index
    %c0_137 = arith.constant 0 : index
    %199 = vector.load %arg26[%c0_135, %c0_136, %c0_137] : memref<2x8x32xf32, #tpu.memory_space<vmem>>, vector<1x8x32xf32>
    %200 = vector.shape_cast %199 : vector<1x8x32xf32> to vector<8x32xf32>
    %cst_138 = arith.constant dense<0.000000e+00> : vector<35x32xf32>
    %201 = tpu.matmul %198, %200, %cst_138 {dimension_numbers = #tpu.dot_dimension_numbers<[1], [0], [0], [1], [0, 0, 1, 1], [], []>} : vector<35x8xf32>, vector<8x32xf32>, vector<35x32xf32> -> vector<35x32xf32>
    %202 = vector.extract_strided_slice %190 {offsets = [1, 0], sizes = [35, 8], strides = [1, 1]} : vector<36x8xf32> to vector<35x8xf32>
    %c1_139 = arith.constant 1 : index
    %c0_140 = arith.constant 0 : index
    %c0_141 = arith.constant 0 : index
    %203 = vector.load %arg26[%c1_139, %c0_140, %c0_141] : memref<2x8x32xf32, #tpu.memory_space<vmem>>, vector<1x8x32xf32>
    %204 = vector.shape_cast %203 : vector<1x8x32xf32> to vector<8x32xf32>
    %cst_142 = arith.constant dense<0.000000e+00> : vector<35x32xf32>
    %205 = tpu.matmul %202, %204, %cst_142 {dimension_numbers = #tpu.dot_dimension_numbers<[1], [0], [0], [1], [0, 0, 1, 1], [], []>} : vector<35x8xf32>, vector<8x32xf32>, vector<35x32xf32> -> vector<35x32xf32>
    %206 = arith.addf %201, %205 : vector<35x32xf32>
    %c0_143 = arith.constant 0 : index
    %c0_144 = arith.constant 0 : index
    %207 = vector.load %arg27[%c0_143, %c0_144] : memref<1x32xf32, #tpu.memory_space<vmem>>, vector<1x32xf32>
    %208 = vector.broadcast %207 : vector<1x32xf32> to vector<35x32xf32>
    %209 = arith.addf %206, %208 : vector<35x32xf32>
    %210 = vector.extract_strided_slice %209 {offsets = [0, 0], sizes = [31, 32], strides = [1, 1]} : vector<35x32xf32> to vector<31x32xf32>
    %211 = vector.extract_strided_slice %209 {offsets = [1, 0], sizes = [31, 32], strides = [1, 1]} : vector<35x32xf32> to vector<31x32xf32>
    %212 = arith.maximumf %210, %211 : vector<31x32xf32>
    %213 = vector.extract_strided_slice %209 {offsets = [2, 0], sizes = [31, 32], strides = [1, 1]} : vector<35x32xf32> to vector<31x32xf32>
    %214 = arith.maximumf %212, %213 : vector<31x32xf32>
    %215 = vector.extract_strided_slice %209 {offsets = [3, 0], sizes = [31, 32], strides = [1, 1]} : vector<35x32xf32> to vector<31x32xf32>
    %216 = arith.maximumf %214, %215 : vector<31x32xf32>
    %217 = vector.extract_strided_slice %209 {offsets = [4, 0], sizes = [31, 32], strides = [1, 1]} : vector<35x32xf32> to vector<31x32xf32>
    %218 = arith.maximumf %216, %217 : vector<31x32xf32>
    %cst_145 = arith.constant dense<0.000000e+00> : vector<6x32xf32>
    %219 = tpu.matmul %197, %218, %cst_145 {dimension_numbers = #tpu.dot_dimension_numbers<[1], [0], [0], [1], [0, 0, 1, 1], [], []>} : vector<6x31xf32>, vector<31x32xf32>, vector<6x32xf32> -> vector<6x32xf32>
    %220 = vector.extract_strided_slice %190 {offsets = [0, 0], sizes = [34, 8], strides = [1, 1]} : vector<36x8xf32> to vector<34x8xf32>
    %c0_146 = arith.constant 0 : index
    %c0_147 = arith.constant 0 : index
    %c0_148 = arith.constant 0 : index
    %221 = vector.load %arg28[%c0_146, %c0_147, %c0_148] : memref<3x8x32xf32, #tpu.memory_space<vmem>>, vector<1x8x32xf32>
    %222 = vector.shape_cast %221 : vector<1x8x32xf32> to vector<8x32xf32>
    %cst_149 = arith.constant dense<0.000000e+00> : vector<34x32xf32>
    %223 = tpu.matmul %220, %222, %cst_149 {dimension_numbers = #tpu.dot_dimension_numbers<[1], [0], [0], [1], [0, 0, 1, 1], [], []>} : vector<34x8xf32>, vector<8x32xf32>, vector<34x32xf32> -> vector<34x32xf32>
    %224 = vector.extract_strided_slice %190 {offsets = [1, 0], sizes = [34, 8], strides = [1, 1]} : vector<36x8xf32> to vector<34x8xf32>
    %c1_150 = arith.constant 1 : index
    %c0_151 = arith.constant 0 : index
    %c0_152 = arith.constant 0 : index
    %225 = vector.load %arg28[%c1_150, %c0_151, %c0_152] : memref<3x8x32xf32, #tpu.memory_space<vmem>>, vector<1x8x32xf32>
    %226 = vector.shape_cast %225 : vector<1x8x32xf32> to vector<8x32xf32>
    %cst_153 = arith.constant dense<0.000000e+00> : vector<34x32xf32>
    %227 = tpu.matmul %224, %226, %cst_153 {dimension_numbers = #tpu.dot_dimension_numbers<[1], [0], [0], [1], [0, 0, 1, 1], [], []>} : vector<34x8xf32>, vector<8x32xf32>, vector<34x32xf32> -> vector<34x32xf32>
    %228 = arith.addf %223, %227 : vector<34x32xf32>
    %229 = vector.extract_strided_slice %190 {offsets = [2, 0], sizes = [34, 8], strides = [1, 1]} : vector<36x8xf32> to vector<34x8xf32>
    %c2_154 = arith.constant 2 : index
    %c0_155 = arith.constant 0 : index
    %c0_156 = arith.constant 0 : index
    %230 = vector.load %arg28[%c2_154, %c0_155, %c0_156] : memref<3x8x32xf32, #tpu.memory_space<vmem>>, vector<1x8x32xf32>
    %231 = vector.shape_cast %230 : vector<1x8x32xf32> to vector<8x32xf32>
    %cst_157 = arith.constant dense<0.000000e+00> : vector<34x32xf32>
    %232 = tpu.matmul %229, %231, %cst_157 {dimension_numbers = #tpu.dot_dimension_numbers<[1], [0], [0], [1], [0, 0, 1, 1], [], []>} : vector<34x8xf32>, vector<8x32xf32>, vector<34x32xf32> -> vector<34x32xf32>
    %233 = arith.addf %228, %232 : vector<34x32xf32>
    %c0_158 = arith.constant 0 : index
    %c0_159 = arith.constant 0 : index
    %234 = vector.load %arg29[%c0_158, %c0_159] : memref<1x32xf32, #tpu.memory_space<vmem>>, vector<1x32xf32>
    %235 = vector.broadcast %234 : vector<1x32xf32> to vector<34x32xf32>
    %236 = arith.addf %233, %235 : vector<34x32xf32>
    %237 = vector.extract_strided_slice %236 {offsets = [0, 0], sizes = [31, 32], strides = [1, 1]} : vector<34x32xf32> to vector<31x32xf32>
    %238 = vector.extract_strided_slice %236 {offsets = [1, 0], sizes = [31, 32], strides = [1, 1]} : vector<34x32xf32> to vector<31x32xf32>
    %239 = arith.maximumf %237, %238 : vector<31x32xf32>
    %240 = vector.extract_strided_slice %236 {offsets = [2, 0], sizes = [31, 32], strides = [1, 1]} : vector<34x32xf32> to vector<31x32xf32>
    %241 = arith.maximumf %239, %240 : vector<31x32xf32>
    %242 = vector.extract_strided_slice %236 {offsets = [3, 0], sizes = [31, 32], strides = [1, 1]} : vector<34x32xf32> to vector<31x32xf32>
    %243 = arith.maximumf %241, %242 : vector<31x32xf32>
    %cst_160 = arith.constant dense<0.000000e+00> : vector<6x32xf32>
    %244 = tpu.matmul %197, %243, %cst_160 {dimension_numbers = #tpu.dot_dimension_numbers<[1], [0], [0], [1], [0, 0, 1, 1], [], []>} : vector<6x31xf32>, vector<31x32xf32>, vector<6x32xf32> -> vector<6x32xf32>
    %c0_161 = arith.constant 0 : index
    %c0_162 = arith.constant 0 : index
    %c0_163 = arith.constant 0 : index
    %245 = vector.load %arg30[%c0_161, %c0_162, %c0_163] : memref<2x32x32xf32, #tpu.memory_space<vmem>>, vector<1x32x32xf32>
    %246 = vector.shape_cast %245 : vector<1x32x32xf32> to vector<32x32xf32>
    %cst_164 = arith.constant dense<0.000000e+00> : vector<6x32xf32>
    %247 = tpu.matmul %219, %246, %cst_164 {dimension_numbers = #tpu.dot_dimension_numbers<[1], [0], [0], [1], [0, 0, 1, 1], [], []>} : vector<6x32xf32>, vector<32x32xf32>, vector<6x32xf32> -> vector<6x32xf32>
    %c1_165 = arith.constant 1 : index
    %c0_166 = arith.constant 0 : index
    %c0_167 = arith.constant 0 : index
    %248 = vector.load %arg30[%c1_165, %c0_166, %c0_167] : memref<2x32x32xf32, #tpu.memory_space<vmem>>, vector<1x32x32xf32>
    %249 = vector.shape_cast %248 : vector<1x32x32xf32> to vector<32x32xf32>
    %cst_168 = arith.constant dense<0.000000e+00> : vector<6x32xf32>
    %250 = tpu.matmul %244, %249, %cst_168 {dimension_numbers = #tpu.dot_dimension_numbers<[1], [0], [0], [1], [0, 0, 1, 1], [], []>} : vector<6x32xf32>, vector<32x32xf32>, vector<6x32xf32> -> vector<6x32xf32>
    %251 = arith.addf %247, %250 : vector<6x32xf32>
    %c0_169 = arith.constant 0 : index
    %c0_170 = arith.constant 0 : index
    %252 = vector.load %arg31[%c0_169, %c0_170] : memref<1x32xf32, #tpu.memory_space<vmem>>, vector<1x32xf32>
    %253 = vector.broadcast %252 : vector<1x32xf32> to vector<6x32xf32>
    %254 = arith.addf %251, %253 : vector<6x32xf32>
    %cst_171 = arith.constant 0.000000e+00 : f32
    %255 = vector.broadcast %cst_171 : f32 to vector<6x32xf32>
    %256 = arith.maximumf %254, %255 : vector<6x32xf32>
    %c0_172 = arith.constant 0 : index
    %c0_173 = arith.constant 0 : index
    %257 = vector.load %arg32[%c0_172, %c0_173] : memref<32x32xf32, #tpu.memory_space<vmem>>, vector<32x32xf32>
    %cst_174 = arith.constant dense<0.000000e+00> : vector<6x32xf32>
    %258 = tpu.matmul %256, %257, %cst_174 {dimension_numbers = #tpu.dot_dimension_numbers<[1], [0], [0], [1], [0, 0, 1, 1], [], []>} : vector<6x32xf32>, vector<32x32xf32>, vector<6x32xf32> -> vector<6x32xf32>
    %c0_175 = arith.constant 0 : index
    %c0_176 = arith.constant 0 : index
    %259 = vector.load %arg33[%c0_175, %c0_176] : memref<1x32xf32, #tpu.memory_space<vmem>>, vector<1x32xf32>
    %260 = vector.broadcast %259 : vector<1x32xf32> to vector<6x32xf32>
    %261 = arith.addf %258, %260 : vector<6x32xf32>
    %262 = tpu.concatenate %130, %261 in 0 : vector<4x32xf32>, vector<6x32xf32> -> vector<10x32xf32>
    %c0_177 = arith.constant 0 : index
    %c0_178 = arith.constant 0 : index
    %263 = vector.load %arg34[%c0_177, %c0_178] : memref<10x10xf32, #tpu.memory_space<vmem>>, vector<10x10xf32>
    %cst_179 = arith.constant 0.000000e+00 : f32
    %264 = vector.broadcast %cst_179 : f32 to vector<10x10xf32>
    %265 = arith.cmpf ogt, %263, %264 : vector<10x10xf32>
    %c0_180 = arith.constant 0 : index
    %c0_181 = arith.constant 0 : index
    %266 = vector.load %arg35[%c0_180, %c0_181] : memref<10x10xf32, #tpu.memory_space<vmem>>, vector<10x10xf32>
    %c0_182 = arith.constant 0 : index
    %c0_183 = arith.constant 0 : index
    %c0_184 = arith.constant 0 : index
    %267 = vector.load %arg36[%c0_182, %c0_183, %c0_184] : memref<2x32x64xf32, #tpu.memory_space<vmem>>, vector<1x32x64xf32>
    %268 = vector.shape_cast %267 : vector<1x32x64xf32> to vector<32x64xf32>
    %cst_185 = arith.constant dense<0.000000e+00> : vector<10x64xf32>
    %269 = tpu.matmul %262, %268, %cst_185 {dimension_numbers = #tpu.dot_dimension_numbers<[1], [0], [0], [1], [0, 0, 1, 1], [], []>} : vector<10x32xf32>, vector<32x64xf32>, vector<10x64xf32> -> vector<10x64xf32>
    %270 = vector.extract_strided_slice %269 {offsets = [0, 0], sizes = [10, 32], strides = [1, 1]} : vector<10x64xf32> to vector<10x32xf32>
    %271 = vector.extract_strided_slice %269 {offsets = [0, 32], sizes = [10, 32], strides = [1, 1]} : vector<10x64xf32> to vector<10x32xf32>
    %c0_186 = arith.constant 0 : index
    %c0_187 = arith.constant 0 : index
    %c0_188 = arith.constant 0 : index
    %272 = vector.load %arg37[%c0_186, %c0_187, %c0_188] : memref<2x1x32xf32, #tpu.memory_space<vmem>>, vector<1x1x32xf32>
    %273 = vector.shape_cast %272 : vector<1x1x32xf32> to vector<1x32xf32>
    %274 = vector.broadcast %273 : vector<1x32xf32> to vector<10x32xf32>
    %275 = arith.mulf %270, %274 : vector<10x32xf32>
    %cst_189 = arith.constant dense<0.000000e+00> : vector<10xf32>
    %276 = vector.multi_reduction <add>, %275, %cst_189 [1] : vector<10x32xf32> to vector<10xf32>
    %277 = vector.shape_cast %276 : vector<10xf32> to vector<10x1xf32>
    %c0_190 = arith.constant 0 : index
    %c0_191 = arith.constant 0 : index
    %c0_192 = arith.constant 0 : index
    %278 = vector.load %arg38[%c0_190, %c0_191, %c0_192] : memref<2x1x32xf32, #tpu.memory_space<vmem>>, vector<1x1x32xf32>
    %279 = vector.shape_cast %278 : vector<1x1x32xf32> to vector<1x32xf32>
    %280 = vector.broadcast %279 : vector<1x32xf32> to vector<10x32xf32>
    %281 = arith.mulf %270, %280 : vector<10x32xf32>
    %cst_193 = arith.constant dense<0.000000e+00> : vector<10xf32>
    %282 = vector.multi_reduction <add>, %281, %cst_193 [1] : vector<10x32xf32> to vector<10xf32>
    %283 = vector.shape_cast %282 : vector<10xf32> to vector<10x1xf32>
    %284 = tpu.transpose %277, [1, 0] : vector<10x1xf32> -> vector<1x10xf32>
    %285 = vector.broadcast %283 : vector<10x1xf32> to vector<10x10xf32>
    %286 = vector.broadcast %284 : vector<1x10xf32> to vector<10x10xf32>
    %287 = arith.addf %285, %286 : vector<10x10xf32>
    %cst_194 = arith.constant 0.000000e+00 : f32
    %288 = vector.broadcast %cst_194 : f32 to vector<10x10xf32>
    %289 = arith.cmpf ogt, %287, %288 : vector<10x10xf32>
    %cst_195 = arith.constant 2.000000e-01 : f32
    %290 = vector.broadcast %cst_195 : f32 to vector<10x10xf32>
    %291 = arith.mulf %290, %287 : vector<10x10xf32>
    %292 = arith.select %289, %287, %291 : vector<10x10xi1>, vector<10x10xf32>
    %cst_196 = arith.constant -1.000000e+30 : f32
    %293 = vector.broadcast %cst_196 : f32 to vector<10x10xf32>
    %294 = arith.select %265, %292, %293 : vector<10x10xi1>, vector<10x10xf32>
    %cst_197 = arith.constant dense<0xFF800000> : vector<10xf32>
    %295 = vector.multi_reduction <maximumf>, %294, %cst_197 [1] : vector<10x10xf32> to vector<10xf32>
    %296 = vector.shape_cast %295 : vector<10xf32> to vector<10x1xf32>
    %297 = vector.broadcast %296 : vector<10x1xf32> to vector<10x10xf32>
    %298 = arith.subf %294, %297 : vector<10x10xf32>
    %299 = math.exp %298 : vector<10x10xf32>
    %cst_198 = arith.constant 0.000000e+00 : f32
    %300 = vector.broadcast %cst_198 : f32 to vector<10x10xf32>
    %301 = arith.select %265, %299, %300 : vector<10x10xi1>, vector<10x10xf32>
    %cst_199 = arith.constant dense<0.000000e+00> : vector<10xf32>
    %302 = vector.multi_reduction <add>, %301, %cst_199 [1] : vector<10x10xf32> to vector<10xf32>
    %303 = vector.shape_cast %302 : vector<10xf32> to vector<10x1xf32>
    %304 = vector.broadcast %303 : vector<10x1xf32> to vector<10x10xf32>
    %305 = arith.divf %301, %304 : vector<10x10xf32>
    %cst_200 = arith.constant dense<0.000000e+00> : vector<10x32xf32>
    %306 = tpu.matmul %305, %270, %cst_200 {dimension_numbers = #tpu.dot_dimension_numbers<[1], [0], [0], [1], [0, 0, 1, 1], [], []>} : vector<10x10xf32>, vector<10x32xf32>, vector<10x32xf32> -> vector<10x32xf32>
    %c0_201 = arith.constant 0 : index
    %c0_202 = arith.constant 0 : index
    %c0_203 = arith.constant 0 : index
    %307 = vector.load %arg39[%c0_201, %c0_202, %c0_203] : memref<2x1x32xf32, #tpu.memory_space<vmem>>, vector<1x1x32xf32>
    %308 = vector.shape_cast %307 : vector<1x1x32xf32> to vector<1x32xf32>
    %309 = vector.broadcast %308 : vector<1x32xf32> to vector<10x32xf32>
    %310 = arith.addf %306, %309 : vector<10x32xf32>
    %cst_204 = arith.constant dense<0.000000e+00> : vector<10x32xf32>
    %311 = tpu.matmul %266, %262, %cst_204 {dimension_numbers = #tpu.dot_dimension_numbers<[1], [0], [0], [1], [0, 0, 1, 1], [], []>} : vector<10x10xf32>, vector<10x32xf32>, vector<10x32xf32> -> vector<10x32xf32>
    %c0_205 = arith.constant 0 : index
    %c0_206 = arith.constant 0 : index
    %c0_207 = arith.constant 0 : index
    %312 = vector.load %arg40[%c0_205, %c0_206, %c0_207] : memref<2x32x32xf32, #tpu.memory_space<vmem>>, vector<1x32x32xf32>
    %313 = vector.shape_cast %312 : vector<1x32x32xf32> to vector<32x32xf32>
    %cst_208 = arith.constant dense<0.000000e+00> : vector<10x32xf32>
    %314 = tpu.matmul %311, %313, %cst_208 {dimension_numbers = #tpu.dot_dimension_numbers<[1], [0], [0], [1], [0, 0, 1, 1], [], []>} : vector<10x32xf32>, vector<32x32xf32>, vector<10x32xf32> -> vector<10x32xf32>
    %315 = arith.addf %314, %271 : vector<10x32xf32>
    %c0_209 = arith.constant 0 : index
    %c0_210 = arith.constant 0 : index
    %c0_211 = arith.constant 0 : index
    %316 = vector.load %arg41[%c0_209, %c0_210, %c0_211] : memref<2x1x32xf32, #tpu.memory_space<vmem>>, vector<1x1x32xf32>
    %317 = vector.shape_cast %316 : vector<1x1x32xf32> to vector<1x32xf32>
    %318 = vector.broadcast %317 : vector<1x32xf32> to vector<10x32xf32>
    %319 = arith.addf %315, %318 : vector<10x32xf32>
    %c0_212 = arith.constant 0 : index
    %c0_213 = arith.constant 0 : index
    %c0_214 = arith.constant 0 : index
    %320 = vector.load %arg42[%c0_212, %c0_213, %c0_214] : memref<2x96x32xf32, #tpu.memory_space<vmem>>, vector<1x96x32xf32>
    %321 = vector.shape_cast %320 : vector<1x96x32xf32> to vector<96x32xf32>
    %322 = vector.extract_strided_slice %321 {offsets = [0, 0], sizes = [32, 32], strides = [1, 1]} : vector<96x32xf32> to vector<32x32xf32>
    %cst_215 = arith.constant dense<0.000000e+00> : vector<10x32xf32>
    %323 = tpu.matmul %262, %322, %cst_215 {dimension_numbers = #tpu.dot_dimension_numbers<[1], [0], [0], [1], [0, 0, 1, 1], [], []>} : vector<10x32xf32>, vector<32x32xf32>, vector<10x32xf32> -> vector<10x32xf32>
    %324 = vector.extract_strided_slice %321 {offsets = [32, 0], sizes = [32, 32], strides = [1, 1]} : vector<96x32xf32> to vector<32x32xf32>
    %cst_216 = arith.constant dense<0.000000e+00> : vector<10x32xf32>
    %325 = tpu.matmul %310, %324, %cst_216 {dimension_numbers = #tpu.dot_dimension_numbers<[1], [0], [0], [1], [0, 0, 1, 1], [], []>} : vector<10x32xf32>, vector<32x32xf32>, vector<10x32xf32> -> vector<10x32xf32>
    %326 = arith.addf %323, %325 : vector<10x32xf32>
    %327 = vector.extract_strided_slice %321 {offsets = [64, 0], sizes = [32, 32], strides = [1, 1]} : vector<96x32xf32> to vector<32x32xf32>
    %cst_217 = arith.constant dense<0.000000e+00> : vector<10x32xf32>
    %328 = tpu.matmul %319, %327, %cst_217 {dimension_numbers = #tpu.dot_dimension_numbers<[1], [0], [0], [1], [0, 0, 1, 1], [], []>} : vector<10x32xf32>, vector<32x32xf32>, vector<10x32xf32> -> vector<10x32xf32>
    %329 = arith.addf %326, %328 : vector<10x32xf32>
    %c0_218 = arith.constant 0 : index
    %c0_219 = arith.constant 0 : index
    %c0_220 = arith.constant 0 : index
    %330 = vector.load %arg43[%c0_218, %c0_219, %c0_220] : memref<2x1x32xf32, #tpu.memory_space<vmem>>, vector<1x1x32xf32>
    %331 = vector.shape_cast %330 : vector<1x1x32xf32> to vector<1x32xf32>
    %332 = vector.broadcast %331 : vector<1x32xf32> to vector<10x32xf32>
    %333 = arith.addf %329, %332 : vector<10x32xf32>
    %334 = math.tanh %333 : vector<10x32xf32>
    %c1_221 = arith.constant 1 : index
    %c0_222 = arith.constant 0 : index
    %c0_223 = arith.constant 0 : index
    %335 = vector.load %arg36[%c1_221, %c0_222, %c0_223] : memref<2x32x64xf32, #tpu.memory_space<vmem>>, vector<1x32x64xf32>
    %336 = vector.shape_cast %335 : vector<1x32x64xf32> to vector<32x64xf32>
    %cst_224 = arith.constant dense<0.000000e+00> : vector<10x64xf32>
    %337 = tpu.matmul %334, %336, %cst_224 {dimension_numbers = #tpu.dot_dimension_numbers<[1], [0], [0], [1], [0, 0, 1, 1], [], []>} : vector<10x32xf32>, vector<32x64xf32>, vector<10x64xf32> -> vector<10x64xf32>
    %338 = vector.extract_strided_slice %337 {offsets = [0, 0], sizes = [10, 32], strides = [1, 1]} : vector<10x64xf32> to vector<10x32xf32>
    %339 = vector.extract_strided_slice %337 {offsets = [0, 32], sizes = [10, 32], strides = [1, 1]} : vector<10x64xf32> to vector<10x32xf32>
    %c1_225 = arith.constant 1 : index
    %c0_226 = arith.constant 0 : index
    %c0_227 = arith.constant 0 : index
    %340 = vector.load %arg37[%c1_225, %c0_226, %c0_227] : memref<2x1x32xf32, #tpu.memory_space<vmem>>, vector<1x1x32xf32>
    %341 = vector.shape_cast %340 : vector<1x1x32xf32> to vector<1x32xf32>
    %342 = vector.broadcast %341 : vector<1x32xf32> to vector<10x32xf32>
    %343 = arith.mulf %338, %342 : vector<10x32xf32>
    %cst_228 = arith.constant dense<0.000000e+00> : vector<10xf32>
    %344 = vector.multi_reduction <add>, %343, %cst_228 [1] : vector<10x32xf32> to vector<10xf32>
    %345 = vector.shape_cast %344 : vector<10xf32> to vector<10x1xf32>
    %c1_229 = arith.constant 1 : index
    %c0_230 = arith.constant 0 : index
    %c0_231 = arith.constant 0 : index
    %346 = vector.load %arg38[%c1_229, %c0_230, %c0_231] : memref<2x1x32xf32, #tpu.memory_space<vmem>>, vector<1x1x32xf32>
    %347 = vector.shape_cast %346 : vector<1x1x32xf32> to vector<1x32xf32>
    %348 = vector.broadcast %347 : vector<1x32xf32> to vector<10x32xf32>
    %349 = arith.mulf %338, %348 : vector<10x32xf32>
    %cst_232 = arith.constant dense<0.000000e+00> : vector<10xf32>
    %350 = vector.multi_reduction <add>, %349, %cst_232 [1] : vector<10x32xf32> to vector<10xf32>
    %351 = vector.shape_cast %350 : vector<10xf32> to vector<10x1xf32>
    %352 = tpu.transpose %345, [1, 0] : vector<10x1xf32> -> vector<1x10xf32>
    %353 = vector.broadcast %351 : vector<10x1xf32> to vector<10x10xf32>
    %354 = vector.broadcast %352 : vector<1x10xf32> to vector<10x10xf32>
    %355 = arith.addf %353, %354 : vector<10x10xf32>
    %cst_233 = arith.constant 0.000000e+00 : f32
    %356 = vector.broadcast %cst_233 : f32 to vector<10x10xf32>
    %357 = arith.cmpf ogt, %355, %356 : vector<10x10xf32>
    %cst_234 = arith.constant 2.000000e-01 : f32
    %358 = vector.broadcast %cst_234 : f32 to vector<10x10xf32>
    %359 = arith.mulf %358, %355 : vector<10x10xf32>
    %360 = arith.select %357, %355, %359 : vector<10x10xi1>, vector<10x10xf32>
    %cst_235 = arith.constant -1.000000e+30 : f32
    %361 = vector.broadcast %cst_235 : f32 to vector<10x10xf32>
    %362 = arith.select %265, %360, %361 : vector<10x10xi1>, vector<10x10xf32>
    %cst_236 = arith.constant dense<0xFF800000> : vector<10xf32>
    %363 = vector.multi_reduction <maximumf>, %362, %cst_236 [1] : vector<10x10xf32> to vector<10xf32>
    %364 = vector.shape_cast %363 : vector<10xf32> to vector<10x1xf32>
    %365 = vector.broadcast %364 : vector<10x1xf32> to vector<10x10xf32>
    %366 = arith.subf %362, %365 : vector<10x10xf32>
    %367 = math.exp %366 : vector<10x10xf32>
    %cst_237 = arith.constant 0.000000e+00 : f32
    %368 = vector.broadcast %cst_237 : f32 to vector<10x10xf32>
    %369 = arith.select %265, %367, %368 : vector<10x10xi1>, vector<10x10xf32>
    %cst_238 = arith.constant dense<0.000000e+00> : vector<10xf32>
    %370 = vector.multi_reduction <add>, %369, %cst_238 [1] : vector<10x10xf32> to vector<10xf32>
    %371 = vector.shape_cast %370 : vector<10xf32> to vector<10x1xf32>
    %372 = vector.broadcast %371 : vector<10x1xf32> to vector<10x10xf32>
    %373 = arith.divf %369, %372 : vector<10x10xf32>
    %cst_239 = arith.constant dense<0.000000e+00> : vector<10x32xf32>
    %374 = tpu.matmul %373, %338, %cst_239 {dimension_numbers = #tpu.dot_dimension_numbers<[1], [0], [0], [1], [0, 0, 1, 1], [], []>} : vector<10x10xf32>, vector<10x32xf32>, vector<10x32xf32> -> vector<10x32xf32>
    %c1_240 = arith.constant 1 : index
    %c0_241 = arith.constant 0 : index
    %c0_242 = arith.constant 0 : index
    %375 = vector.load %arg39[%c1_240, %c0_241, %c0_242] : memref<2x1x32xf32, #tpu.memory_space<vmem>>, vector<1x1x32xf32>
    %376 = vector.shape_cast %375 : vector<1x1x32xf32> to vector<1x32xf32>
    %377 = vector.broadcast %376 : vector<1x32xf32> to vector<10x32xf32>
    %378 = arith.addf %374, %377 : vector<10x32xf32>
    %cst_243 = arith.constant dense<0.000000e+00> : vector<10x32xf32>
    %379 = tpu.matmul %266, %334, %cst_243 {dimension_numbers = #tpu.dot_dimension_numbers<[1], [0], [0], [1], [0, 0, 1, 1], [], []>} : vector<10x10xf32>, vector<10x32xf32>, vector<10x32xf32> -> vector<10x32xf32>
    %c1_244 = arith.constant 1 : index
    %c0_245 = arith.constant 0 : index
    %c0_246 = arith.constant 0 : index
    %380 = vector.load %arg40[%c1_244, %c0_245, %c0_246] : memref<2x32x32xf32, #tpu.memory_space<vmem>>, vector<1x32x32xf32>
    %381 = vector.shape_cast %380 : vector<1x32x32xf32> to vector<32x32xf32>
    %cst_247 = arith.constant dense<0.000000e+00> : vector<10x32xf32>
    %382 = tpu.matmul %379, %381, %cst_247 {dimension_numbers = #tpu.dot_dimension_numbers<[1], [0], [0], [1], [0, 0, 1, 1], [], []>} : vector<10x32xf32>, vector<32x32xf32>, vector<10x32xf32> -> vector<10x32xf32>
    %383 = arith.addf %382, %339 : vector<10x32xf32>
    %c1_248 = arith.constant 1 : index
    %c0_249 = arith.constant 0 : index
    %c0_250 = arith.constant 0 : index
    %384 = vector.load %arg41[%c1_248, %c0_249, %c0_250] : memref<2x1x32xf32, #tpu.memory_space<vmem>>, vector<1x1x32xf32>
    %385 = vector.shape_cast %384 : vector<1x1x32xf32> to vector<1x32xf32>
    %386 = vector.broadcast %385 : vector<1x32xf32> to vector<10x32xf32>
    %387 = arith.addf %383, %386 : vector<10x32xf32>
    %c1_251 = arith.constant 1 : index
    %c0_252 = arith.constant 0 : index
    %c0_253 = arith.constant 0 : index
    %388 = vector.load %arg42[%c1_251, %c0_252, %c0_253] : memref<2x96x32xf32, #tpu.memory_space<vmem>>, vector<1x96x32xf32>
    %389 = vector.shape_cast %388 : vector<1x96x32xf32> to vector<96x32xf32>
    %390 = vector.extract_strided_slice %389 {offsets = [0, 0], sizes = [32, 32], strides = [1, 1]} : vector<96x32xf32> to vector<32x32xf32>
    %cst_254 = arith.constant dense<0.000000e+00> : vector<10x32xf32>
    %391 = tpu.matmul %334, %390, %cst_254 {dimension_numbers = #tpu.dot_dimension_numbers<[1], [0], [0], [1], [0, 0, 1, 1], [], []>} : vector<10x32xf32>, vector<32x32xf32>, vector<10x32xf32> -> vector<10x32xf32>
    %392 = vector.extract_strided_slice %389 {offsets = [32, 0], sizes = [32, 32], strides = [1, 1]} : vector<96x32xf32> to vector<32x32xf32>
    %cst_255 = arith.constant dense<0.000000e+00> : vector<10x32xf32>
    %393 = tpu.matmul %378, %392, %cst_255 {dimension_numbers = #tpu.dot_dimension_numbers<[1], [0], [0], [1], [0, 0, 1, 1], [], []>} : vector<10x32xf32>, vector<32x32xf32>, vector<10x32xf32> -> vector<10x32xf32>
    %394 = arith.addf %391, %393 : vector<10x32xf32>
    %395 = vector.extract_strided_slice %389 {offsets = [64, 0], sizes = [32, 32], strides = [1, 1]} : vector<96x32xf32> to vector<32x32xf32>
    %cst_256 = arith.constant dense<0.000000e+00> : vector<10x32xf32>
    %396 = tpu.matmul %387, %395, %cst_256 {dimension_numbers = #tpu.dot_dimension_numbers<[1], [0], [0], [1], [0, 0, 1, 1], [], []>} : vector<10x32xf32>, vector<32x32xf32>, vector<10x32xf32> -> vector<10x32xf32>
    %397 = arith.addf %394, %396 : vector<10x32xf32>
    %c1_257 = arith.constant 1 : index
    %c0_258 = arith.constant 0 : index
    %c0_259 = arith.constant 0 : index
    %398 = vector.load %arg43[%c1_257, %c0_258, %c0_259] : memref<2x1x32xf32, #tpu.memory_space<vmem>>, vector<1x1x32xf32>
    %399 = vector.shape_cast %398 : vector<1x1x32xf32> to vector<1x32xf32>
    %400 = vector.broadcast %399 : vector<1x32xf32> to vector<10x32xf32>
    %401 = arith.addf %397, %400 : vector<10x32xf32>
    %402 = math.tanh %401 : vector<10x32xf32>
    %c0_260 = arith.constant 0 : index
    %c0_261 = arith.constant 0 : index
    %403 = vector.load %arg45[%c0_260, %c0_261] : memref<10x32xf32, #tpu.memory_space<vmem>>, vector<10x32xf32>
    tpu.vector_store %arg45[%c0_260, %c0_261], %402 {strides = array<i32>} : memref<10x32xf32, #tpu.memory_space<vmem>>, vector<10x32xf32>,
    %c0_262 = arith.constant 0 : index
    %c0_263 = arith.constant 0 : index
    %404 = memref.load %arg1[%c0_262, %c0_263] : memref<2x3xi32, #tpu.memory_space<smem>>
    %c1_264 = arith.constant 1 : index
    %c0_265 = arith.constant 0 : index
    %405 = memref.load %arg1[%c1_264, %c0_265] : memref<2x3xi32, #tpu.memory_space<smem>>
    %406 = arith.index_cast %404 : i32 to index
    %c0_266 = arith.constant 0 : index
    %407 = vector.load %arg45[%406, %c0_266] : memref<10x32xf32, #tpu.memory_space<vmem>>, vector<1x32xf32>
    %408 = arith.index_cast %405 : i32 to index
    %c0_267 = arith.constant 0 : index
    %409 = vector.load %arg45[%408, %c0_267] : memref<10x32xf32, #tpu.memory_space<vmem>>, vector<1x32xf32>
    %410 = arith.mulf %407, %409 : vector<1x32xf32>
    %cst_268 = arith.constant dense<0.000000e+00> : vector<1xf32>
    %411 = vector.multi_reduction <add>, %410, %cst_268 [1] : vector<1x32xf32> to vector<1xf32>
    %412 = vector.shape_cast %411 : vector<1xf32> to vector<1x1xf32>
    %c0_269 = arith.constant 0 : index
    %c1_270 = arith.constant 1 : index
    %413 = memref.load %arg1[%c0_269, %c1_270] : memref<2x3xi32, #tpu.memory_space<smem>>
    %c1_271 = arith.constant 1 : index
    %c1_272 = arith.constant 1 : index
    %414 = memref.load %arg1[%c1_271, %c1_272] : memref<2x3xi32, #tpu.memory_space<smem>>
    %415 = arith.index_cast %413 : i32 to index
    %c0_273 = arith.constant 0 : index
    %416 = vector.load %arg45[%415, %c0_273] : memref<10x32xf32, #tpu.memory_space<vmem>>, vector<1x32xf32>
    %417 = arith.index_cast %414 : i32 to index
    %c0_274 = arith.constant 0 : index
    %418 = vector.load %arg45[%417, %c0_274] : memref<10x32xf32, #tpu.memory_space<vmem>>, vector<1x32xf32>
    %419 = arith.mulf %416, %418 : vector<1x32xf32>
    %cst_275 = arith.constant dense<0.000000e+00> : vector<1xf32>
    %420 = vector.multi_reduction <add>, %419, %cst_275 [1] : vector<1x32xf32> to vector<1xf32>
    %421 = vector.shape_cast %420 : vector<1xf32> to vector<1x1xf32>
    %c0_276 = arith.constant 0 : index
    %c2_277 = arith.constant 2 : index
    %422 = memref.load %arg1[%c0_276, %c2_277] : memref<2x3xi32, #tpu.memory_space<smem>>
    %c1_278 = arith.constant 1 : index
    %c2_279 = arith.constant 2 : index
    %423 = memref.load %arg1[%c1_278, %c2_279] : memref<2x3xi32, #tpu.memory_space<smem>>
    %424 = arith.index_cast %422 : i32 to index
    %c0_280 = arith.constant 0 : index
    %425 = vector.load %arg45[%424, %c0_280] : memref<10x32xf32, #tpu.memory_space<vmem>>, vector<1x32xf32>
    %426 = arith.index_cast %423 : i32 to index
    %c0_281 = arith.constant 0 : index
    %427 = vector.load %arg45[%426, %c0_281] : memref<10x32xf32, #tpu.memory_space<vmem>>, vector<1x32xf32>
    %428 = arith.mulf %425, %427 : vector<1x32xf32>
    %cst_282 = arith.constant dense<0.000000e+00> : vector<1xf32>
    %429 = vector.multi_reduction <add>, %428, %cst_282 [1] : vector<1x32xf32> to vector<1xf32>
    %430 = vector.shape_cast %429 : vector<1xf32> to vector<1x1xf32>
    %431 = tpu.concatenate %412, %421, %430 in 1 : vector<1x1xf32>, vector<1x1xf32>, vector<1x1xf32> -> vector<1x3xf32>
    %432 = arith.negf %431 : vector<1x3xf32>
    %433 = math.exp %432 : vector<1x3xf32>
    %cst_283 = arith.constant 1.000000e+00 : f32
    %434 = vector.broadcast %cst_283 : f32 to vector<1x3xf32>
    %435 = arith.addf %434, %433 : vector<1x3xf32>
    %436 = arith.divf %434, %435 : vector<1x3xf32>
    %c0_284 = arith.constant 0 : index
    %c0_285 = arith.constant 0 : index
    %437 = vector.load %arg44[%c0_284, %c0_285] : memref<1x3xf32, #tpu.memory_space<vmem>>, vector<1x3xf32>
    tpu.vector_store %arg44[%c0_284, %c0_285], %436 {strides = array<i32>} : memref<1x3xf32, #tpu.memory_space<vmem>>, vector<1x3xf32>,
    return
  }
  func.func @transform_0(%arg0: i32, %arg1: memref<2x3xi32, #tpu.memory_space<smem>>) -> (i32, i32) {
    %c0_i32 = arith.constant 0 : i32
    %c0_i32_0 = arith.constant 0 : i32
    %c0_i32_1 = arith.constant 0 : i32
    return %c0_i32, %c0_i32_0 : i32, i32
  }
  func.func @transform_1(%arg0: i32, %arg1: memref<2x3xi32, #tpu.memory_space<smem>>) -> (i32, i32) {
    %c0_i32 = arith.constant 0 : i32
    %c0_i32_0 = arith.constant 0 : i32
    %c0_i32_1 = arith.constant 0 : i32
    return %c0_i32, %c0_i32_0 : i32, i32
  }
  func.func @transform_2(%arg0: i32, %arg1: memref<2x3xi32, #tpu.memory_space<smem>>) -> (i32, i32, i32) {
    %c0_i32 = arith.constant 0 : i32
    %c0_i32_0 = arith.constant 0 : i32
    %c0_i32_1 = arith.constant 0 : i32
    %c0_i32_2 = arith.constant 0 : i32
    return %c0_i32, %c0_i32_0, %c0_i32_1 : i32, i32, i32
  }
  func.func @transform_3(%arg0: i32, %arg1: memref<2x3xi32, #tpu.memory_space<smem>>) -> (i32, i32) {
    %c0_i32 = arith.constant 0 : i32
    %c0_i32_0 = arith.constant 0 : i32
    %c0_i32_1 = arith.constant 0 : i32
    return %c0_i32, %c0_i32_0 : i32, i32
  }
  func.func @transform_4(%arg0: i32, %arg1: memref<2x3xi32, #tpu.memory_space<smem>>) -> (i32, i32) {
    %c0_i32 = arith.constant 0 : i32
    %c0_i32_0 = arith.constant 0 : i32
    %c0_i32_1 = arith.constant 0 : i32
    return %c0_i32, %c0_i32_0 : i32, i32
  }
  func.func @transform_5(%arg0: i32, %arg1: memref<2x3xi32, #tpu.memory_space<smem>>) -> (i32, i32, i32) {
    %c0_i32 = arith.constant 0 : i32
    %c0_i32_0 = arith.constant 0 : i32
    %c0_i32_1 = arith.constant 0 : i32
    %c0_i32_2 = arith.constant 0 : i32
    return %c0_i32, %c0_i32_0, %c0_i32_1 : i32, i32, i32
  }
  func.func @transform_6(%arg0: i32, %arg1: memref<2x3xi32, #tpu.memory_space<smem>>) -> (i32, i32) {
    %c0_i32 = arith.constant 0 : i32
    %c0_i32_0 = arith.constant 0 : i32
    %c0_i32_1 = arith.constant 0 : i32
    return %c0_i32, %c0_i32_0 : i32, i32
  }
  func.func @transform_7(%arg0: i32, %arg1: memref<2x3xi32, #tpu.memory_space<smem>>) -> (i32, i32) {
    %c0_i32 = arith.constant 0 : i32
    %c0_i32_0 = arith.constant 0 : i32
    %c0_i32_1 = arith.constant 0 : i32
    return %c0_i32, %c0_i32_0 : i32, i32
  }
  func.func @transform_8(%arg0: i32, %arg1: memref<2x3xi32, #tpu.memory_space<smem>>) -> (i32, i32, i32) {
    %c0_i32 = arith.constant 0 : i32
    %c0_i32_0 = arith.constant 0 : i32
    %c0_i32_1 = arith.constant 0 : i32
    %c0_i32_2 = arith.constant 0 : i32
    return %c0_i32, %c0_i32_0, %c0_i32_1 : i32, i32, i32
  }
  func.func @transform_9(%arg0: i32, %arg1: memref<2x3xi32, #tpu.memory_space<smem>>) -> (i32, i32) {
    %c0_i32 = arith.constant 0 : i32
    %c0_i32_0 = arith.constant 0 : i32
    %c0_i32_1 = arith.constant 0 : i32
    return %c0_i32, %c0_i32_0 : i32, i32
  }
  func.func @transform_10(%arg0: i32, %arg1: memref<2x3xi32, #tpu.memory_space<smem>>) -> (i32, i32, i32) {
    %c0_i32 = arith.constant 0 : i32
    %c0_i32_0 = arith.constant 0 : i32
    %c0_i32_1 = arith.constant 0 : i32
    %c0_i32_2 = arith.constant 0 : i32
    return %c0_i32, %c0_i32_0, %c0_i32_1 : i32, i32, i32
  }
  func.func @transform_11(%arg0: i32, %arg1: memref<2x3xi32, #tpu.memory_space<smem>>) -> (i32, i32) {
    %c0_i32 = arith.constant 0 : i32
    %c0_i32_0 = arith.constant 0 : i32
    %c0_i32_1 = arith.constant 0 : i32
    return %c0_i32, %c0_i32_0 : i32, i32
  }
  func.func @transform_12(%arg0: i32, %arg1: memref<2x3xi32, #tpu.memory_space<smem>>) -> (i32, i32, i32) {
    %c0_i32 = arith.constant 0 : i32
    %c0_i32_0 = arith.constant 0 : i32
    %c0_i32_1 = arith.constant 0 : i32
    %c0_i32_2 = arith.constant 0 : i32
    return %c0_i32, %c0_i32_0, %c0_i32_1 : i32, i32, i32
  }
  func.func @transform_13(%arg0: i32, %arg1: memref<2x3xi32, #tpu.memory_space<smem>>) -> (i32, i32) {
    %c0_i32 = arith.constant 0 : i32
    %c0_i32_0 = arith.constant 0 : i32
    %c0_i32_1 = arith.constant 0 : i32
    return %c0_i32, %c0_i32_0 : i32, i32
  }
  func.func @transform_14(%arg0: i32, %arg1: memref<2x3xi32, #tpu.memory_space<smem>>) -> (i32, i32) {
    %c0_i32 = arith.constant 0 : i32
    %c0_i32_0 = arith.constant 0 : i32
    %c0_i32_1 = arith.constant 0 : i32
    return %c0_i32, %c0_i32_0 : i32, i32
  }
  func.func @transform_15(%arg0: i32, %arg1: memref<2x3xi32, #tpu.memory_space<smem>>) -> (i32, i32) {
    %c0_i32 = arith.constant 0 : i32
    %c0_i32_0 = arith.constant 0 : i32
    %c0_i32_1 = arith.constant 0 : i32
    return %c0_i32, %c0_i32_0 : i32, i32
  }
  func.func @transform_16(%arg0: i32, %arg1: memref<2x3xi32, #tpu.memory_space<smem>>) -> (i32, i32) {
    %c0_i32 = arith.constant 0 : i32
    %c0_i32_0 = arith.constant 0 : i32
    %c0_i32_1 = arith.constant 0 : i32
    return %c0_i32, %c0_i32_0 : i32, i32
  }
  func.func @transform_17(%arg0: i32, %arg1: memref<2x3xi32, #tpu.memory_space<smem>>) -> (i32, i32) {
    %c0_i32 = arith.constant 0 : i32
    %c0_i32_0 = arith.constant 0 : i32
    %c0_i32_1 = arith.constant 0 : i32
    return %c0_i32, %c0_i32_0 : i32, i32
  }
  func.func @transform_18(%arg0: i32, %arg1: memref<2x3xi32, #tpu.memory_space<smem>>) -> (i32, i32, i32) {
    %c0_i32 = arith.constant 0 : i32
    %c0_i32_0 = arith.constant 0 : i32
    %c0_i32_1 = arith.constant 0 : i32
    %c0_i32_2 = arith.constant 0 : i32
    return %c0_i32, %c0_i32_0, %c0_i32_1 : i32, i32, i32
  }
  func.func @transform_19(%arg0: i32, %arg1: memref<2x3xi32, #tpu.memory_space<smem>>) -> (i32, i32) {
    %c0_i32 = arith.constant 0 : i32
    %c0_i32_0 = arith.constant 0 : i32
    %c0_i32_1 = arith.constant 0 : i32
    return %c0_i32, %c0_i32_0 : i32, i32
  }
  func.func @transform_20(%arg0: i32, %arg1: memref<2x3xi32, #tpu.memory_space<smem>>) -> (i32, i32) {
    %c0_i32 = arith.constant 0 : i32
    %c0_i32_0 = arith.constant 0 : i32
    %c0_i32_1 = arith.constant 0 : i32
    return %c0_i32, %c0_i32_0 : i32, i32
  }
  func.func @transform_21(%arg0: i32, %arg1: memref<2x3xi32, #tpu.memory_space<smem>>) -> (i32, i32, i32) {
    %c0_i32 = arith.constant 0 : i32
    %c0_i32_0 = arith.constant 0 : i32
    %c0_i32_1 = arith.constant 0 : i32
    %c0_i32_2 = arith.constant 0 : i32
    return %c0_i32, %c0_i32_0, %c0_i32_1 : i32, i32, i32
  }
  func.func @transform_22(%arg0: i32, %arg1: memref<2x3xi32, #tpu.memory_space<smem>>) -> (i32, i32) {
    %c0_i32 = arith.constant 0 : i32
    %c0_i32_0 = arith.constant 0 : i32
    %c0_i32_1 = arith.constant 0 : i32
    return %c0_i32, %c0_i32_0 : i32, i32
  }
  func.func @transform_23(%arg0: i32, %arg1: memref<2x3xi32, #tpu.memory_space<smem>>) -> (i32, i32) {
    %c0_i32 = arith.constant 0 : i32
    %c0_i32_0 = arith.constant 0 : i32
    %c0_i32_1 = arith.constant 0 : i32
    return %c0_i32, %c0_i32_0 : i32, i32
  }
  func.func @transform_24(%arg0: i32, %arg1: memref<2x3xi32, #tpu.memory_space<smem>>) -> (i32, i32, i32) {
    %c0_i32 = arith.constant 0 : i32
    %c0_i32_0 = arith.constant 0 : i32
    %c0_i32_1 = arith.constant 0 : i32
    %c0_i32_2 = arith.constant 0 : i32
    return %c0_i32, %c0_i32_0, %c0_i32_1 : i32, i32, i32
  }
  func.func @transform_25(%arg0: i32, %arg1: memref<2x3xi32, #tpu.memory_space<smem>>) -> (i32, i32) {
    %c0_i32 = arith.constant 0 : i32
    %c0_i32_0 = arith.constant 0 : i32
    %c0_i32_1 = arith.constant 0 : i32
    return %c0_i32, %c0_i32_0 : i32, i32
  }
  func.func @transform_26(%arg0: i32, %arg1: memref<2x3xi32, #tpu.memory_space<smem>>) -> (i32, i32, i32) {
    %c0_i32 = arith.constant 0 : i32
    %c0_i32_0 = arith.constant 0 : i32
    %c0_i32_1 = arith.constant 0 : i32
    %c0_i32_2 = arith.constant 0 : i32
    return %c0_i32, %c0_i32_0, %c0_i32_1 : i32, i32, i32
  }
  func.func @transform_27(%arg0: i32, %arg1: memref<2x3xi32, #tpu.memory_space<smem>>) -> (i32, i32) {
    %c0_i32 = arith.constant 0 : i32
    %c0_i32_0 = arith.constant 0 : i32
    %c0_i32_1 = arith.constant 0 : i32
    return %c0_i32, %c0_i32_0 : i32, i32
  }
  func.func @transform_28(%arg0: i32, %arg1: memref<2x3xi32, #tpu.memory_space<smem>>) -> (i32, i32, i32) {
    %c0_i32 = arith.constant 0 : i32
    %c0_i32_0 = arith.constant 0 : i32
    %c0_i32_1 = arith.constant 0 : i32
    %c0_i32_2 = arith.constant 0 : i32
    return %c0_i32, %c0_i32_0, %c0_i32_1 : i32, i32, i32
  }
  func.func @transform_29(%arg0: i32, %arg1: memref<2x3xi32, #tpu.memory_space<smem>>) -> (i32, i32) {
    %c0_i32 = arith.constant 0 : i32
    %c0_i32_0 = arith.constant 0 : i32
    %c0_i32_1 = arith.constant 0 : i32
    return %c0_i32, %c0_i32_0 : i32, i32
  }
  func.func @transform_30(%arg0: i32, %arg1: memref<2x3xi32, #tpu.memory_space<smem>>) -> (i32, i32) {
    %c0_i32 = arith.constant 0 : i32
    %c0_i32_0 = arith.constant 0 : i32
    %c0_i32_1 = arith.constant 0 : i32
    return %c0_i32, %c0_i32_0 : i32, i32
  }
  func.func @transform_31(%arg0: i32, %arg1: memref<2x3xi32, #tpu.memory_space<smem>>) -> (i32, i32) {
    %c0_i32 = arith.constant 0 : i32
    %c0_i32_0 = arith.constant 0 : i32
    %c0_i32_1 = arith.constant 0 : i32
    return %c0_i32, %c0_i32_0 : i32, i32
  }
  func.func @transform_32(%arg0: i32, %arg1: memref<2x3xi32, #tpu.memory_space<smem>>) -> (i32, i32) {
    %c0_i32 = arith.constant 0 : i32
    %c0_i32_0 = arith.constant 0 : i32
    %c0_i32_1 = arith.constant 0 : i32
    return %c0_i32, %c0_i32_0 : i32, i32
  }
  func.func @transform_33(%arg0: i32, %arg1: memref<2x3xi32, #tpu.memory_space<smem>>) -> (i32, i32) {
    %c0_i32 = arith.constant 0 : i32
    %c0_i32_0 = arith.constant 0 : i32
    %c0_i32_1 = arith.constant 0 : i32
    return %c0_i32, %c0_i32_0 : i32, i32
  }
  func.func @transform_34(%arg0: i32, %arg1: memref<2x3xi32, #tpu.memory_space<smem>>) -> (i32, i32, i32) {
    %c0_i32 = arith.constant 0 : i32
    %c0_i32_0 = arith.constant 0 : i32
    %c0_i32_1 = arith.constant 0 : i32
    %c0_i32_2 = arith.constant 0 : i32
    return %c0_i32, %c0_i32_0, %c0_i32_1 : i32, i32, i32
  }
  func.func @transform_35(%arg0: i32, %arg1: memref<2x3xi32, #tpu.memory_space<smem>>) -> (i32, i32, i32) {
    %c0_i32 = arith.constant 0 : i32
    %c0_i32_0 = arith.constant 0 : i32
    %c0_i32_1 = arith.constant 0 : i32
    %c0_i32_2 = arith.constant 0 : i32
    return %c0_i32, %c0_i32_0, %c0_i32_1 : i32, i32, i32
  }
  func.func @transform_36(%arg0: i32, %arg1: memref<2x3xi32, #tpu.memory_space<smem>>) -> (i32, i32, i32) {
    %c0_i32 = arith.constant 0 : i32
    %c0_i32_0 = arith.constant 0 : i32
    %c0_i32_1 = arith.constant 0 : i32
    %c0_i32_2 = arith.constant 0 : i32
    return %c0_i32, %c0_i32_0, %c0_i32_1 : i32, i32, i32
  }
  func.func @transform_37(%arg0: i32, %arg1: memref<2x3xi32, #tpu.memory_space<smem>>) -> (i32, i32, i32) {
    %c0_i32 = arith.constant 0 : i32
    %c0_i32_0 = arith.constant 0 : i32
    %c0_i32_1 = arith.constant 0 : i32
    %c0_i32_2 = arith.constant 0 : i32
    return %c0_i32, %c0_i32_0, %c0_i32_1 : i32, i32, i32
  }
  func.func @transform_38(%arg0: i32, %arg1: memref<2x3xi32, #tpu.memory_space<smem>>) -> (i32, i32, i32) {
    %c0_i32 = arith.constant 0 : i32
    %c0_i32_0 = arith.constant 0 : i32
    %c0_i32_1 = arith.constant 0 : i32
    %c0_i32_2 = arith.constant 0 : i32
    return %c0_i32, %c0_i32_0, %c0_i32_1 : i32, i32, i32
  }
  func.func @transform_39(%arg0: i32, %arg1: memref<2x3xi32, #tpu.memory_space<smem>>) -> (i32, i32, i32) {
    %c0_i32 = arith.constant 0 : i32
    %c0_i32_0 = arith.constant 0 : i32
    %c0_i32_1 = arith.constant 0 : i32
    %c0_i32_2 = arith.constant 0 : i32
    return %c0_i32, %c0_i32_0, %c0_i32_1 : i32, i32, i32
  }
  func.func @transform_40(%arg0: i32, %arg1: memref<2x3xi32, #tpu.memory_space<smem>>) -> (i32, i32, i32) {
    %c0_i32 = arith.constant 0 : i32
    %c0_i32_0 = arith.constant 0 : i32
    %c0_i32_1 = arith.constant 0 : i32
    %c0_i32_2 = arith.constant 0 : i32
    return %c0_i32, %c0_i32_0, %c0_i32_1 : i32, i32, i32
  }
  func.func @transform_41(%arg0: i32, %arg1: memref<2x3xi32, #tpu.memory_space<smem>>) -> (i32, i32, i32) {
    %c0_i32 = arith.constant 0 : i32
    %c0_i32_0 = arith.constant 0 : i32
    %c0_i32_1 = arith.constant 0 : i32
    %c0_i32_2 = arith.constant 0 : i32
    return %c0_i32, %c0_i32_0, %c0_i32_1 : i32, i32, i32
  }
  func.func @transform_42(%arg0: i32, %arg1: memref<2x3xi32, #tpu.memory_space<smem>>) -> (i32, i32) {
    %c0_i32 = arith.constant 0 : i32
    %c0_i32_0 = arith.constant 0 : i32
    %c0_i32_1 = arith.constant 0 : i32
    return %c0_i32, %c0_i32_0 : i32, i32
  }
}

</mosaic_0001>

<bundles_post_ra>
// kernel: all_model_forward.1
= control target key start
LH: loop header
LB: loop body
LE: loop exit
PB: predicated region body
PF: predicated region fallthrough
CT: control target
= control target key end

     0   :  { %s16494_s6 = smov 1   ;;  %s16495_s10 = smov 2   ;;  %s20550_s0 = inlined_call_operand.smem [shape: u32[44], index: -1, kind: input, shape index: {}] }
   0x1   :  { %s16575_s5 = sld [smem:[%s20550_s0]]   ;;  %s16496_s14 = smov 3  }
   0x2   :  { %s16580_s9 = sld [smem:[%s20550_s0 + %s16494_s6]]   ;;  %s16497_s18 = smov 4  }
   0x3   :  { %s16585_s13 = sld [smem:[%s20550_s0 + %s16495_s10]]   ;;  %s16498_s22 = smov 5  }
   0x4   :  { %s16590_s17 = sld [smem:[%s20550_s0 + %s16496_s14]]   ;;  %s16499_s26 = smov 6  }
   0x5   :  { %s16595_s21 = sld [smem:[%s20550_s0 + %s16497_s18]]   ;;  %s16500_s30 = smov 7  }
   0x6   :  { %s16600_s25 = sld [smem:[%s20550_s0 + %s16498_s22]]   ;;  %s16501_s4 = smov 8  }
   0x7   :  { %s16605_s29 = sld [smem:[%s20550_s0 + %s16499_s26]]   ;;  %s16502_s10 = smov 9  }
   0x8   :  { %20587 = sst [smem:[#allocation47_spill]] %s16580_s9  ;;  %s16503_s15 = smov 10  }
   0x9   :  { %s16610_s3 = sld [smem:[%s20550_s0 + %s16500_s30]]   ;;  %s16504_s20 = smov 11  }
   0xa   :  { %s16615_s8 = sld [smem:[%s20550_s0 + %s16501_s4]]   ;;  %s16505_s26 = smov 12  }
   0xb   :  { %20588 = sst [smem:[#allocation48_spill]] %s16595_s21  ;;  %s16506_s1 = smov 13  }
   0xc   :  { %s16620_s14 = sld [smem:[%s20550_s0 + %s16502_s10]]   ;;  %s16507_s7 = smov 14  }
   0xd   :  { %s16625_s19 = sld [smem:[%s20550_s0 + %s16503_s15]]   ;;  %s16508_s15 = smov 15  }
   0xe   :  { %s16630_s24 = sld [smem:[%s20550_s0 + %s16504_s20]]   ;;  %s16509_s22 = smov 16  }
   0xf   :  { %20589 = sst [smem:[#allocation49_spill]] %s16610_s3  ;;  %s16510_s28 = smov 17  }
  0x10   :  { %s16635_s30 = sld [smem:[%s20550_s0 + %s16505_s26]]   ;;  %s16531_s10 = smov 38  }
  0x11   :  { %s16640_s6 = sld [smem:[%s20550_s0 + %s16506_s1]]   ;;  %s16532_s18 = smov 39  }
  0x12   :  { %s16645_s12 = sld [smem:[%s20550_s0 + %s16507_s7]]   ;;  %s16511_s7 = smov 18  }
  0x13   :  { %20590 = sst [smem:[#allocation50_spill]] %s16625_s19  ;;  %s16533_s26 = smov 40  }
  0x14   :  { %s16650_s20 = sld [smem:[%s20550_s0 + %s16508_s15]]   ;;  %s16512_s15 = smov 19  }
  0x15   :  { %s16655_s27 = sld [smem:[%s20550_s0 + %s16509_s22]]   ;;  %s16513_s22 = smov 20  }
  0x16   :  { %20591 = sst [smem:[#allocation51_spill]] %s16635_s30 }
  0x17   :  { %s16660_s4 = sld [smem:[%s20550_s0 + %s16510_s28]]   ;;  %s16514_s28 = smov 21  }
  0x18   :  { %20592 = sst [smem:[#allocation52_spill]] %s16645_s12 }
  0x19   :  { %s16665_s12 = sld [smem:[%s20550_s0 + %s16511_s7]]   ;;  %s16515_s7 = smov 22  }
  0x1a   :  { %s16670_s30 = sld [smem:[%s20550_s0 + %s16512_s15]]   ;;  %s16516_s15 = smov 23  }
  0x1b   :  { %20593 = sst [smem:[#allocation53_spill]] %s16655_s27 }
  0x1c   :  { %s16675_s27 = sld [smem:[%s20550_s0 + %s16513_s22]]   ;;  %s16517_s22 = smov 24  }
  0x1d   :  { %20594 = sst [smem:[#allocation54_spill]] %s16660_s4 }
  0x1e   :  { %s16680_s19 = sld [smem:[%s20550_s0 + %s16514_s28]]   ;;  %s16518_s28 = smov 25  }
  0x1f   :  { %s16685_s3 = sld [smem:[%s20550_s0 + %s16515_s7]]   ;;  %s16519_s7 = smov 26  }
  0x20   :  { %20595 = sst [smem:[#allocation55_spill]] %s16670_s30 }
  0x21   :  { %s16690_s30 = sld [smem:[%s20550_s0 + %s16516_s15]]   ;;  %s16520_s15 = smov 27  }
  0x22   :  { %20596 = sst [smem:[#allocation56_spill]] %s16675_s27 }
  0x23   :  { %s16695_s27 = sld [smem:[%s20550_s0 + %s16517_s22]]   ;;  %s16521_s22 = smov 28  }
  0x24   :  { %20597 = sst [smem:[#allocation57_spill]] %s16680_s19 }
  0x25   :  { %20598 = sst [smem:[#allocation58_spill]] %s16685_s3 }
  0x26   :  { %s16700_s19 = sld [smem:[%s20550_s0 + %s16518_s28]]   ;;  %s16522_s28 = smov 29  }
  0x27   :  { %20599 = sst [smem:[#allocation59_spill]] %s16690_s30 }
  0x28   :  { %s16705_s21 = sld [smem:[%s20550_s0 + %s16519_s7]]   ;;  %s16523_s7 = smov 30  }
  0x29   :  { %s16710_s30 = sld [smem:[%s20550_s0 + %s16520_s15]]   ;;  %s16524_s15 = smov 31  }
  0x2a   :  { %s16715_s4 = sld [smem:[%s20550_s0 + %s16521_s22]]   ;;  %s16525_s22 = smov 32  }
  0x2b   :  { %s16720_s9 = sld [smem:[%s20550_s0 + %s16522_s28]]   ;;  %s16526_s28 = smov 33  }
  0x2c   :  { %20600 = sst [smem:[#allocation60_spill]] %s16700_s19 }
  0x2d   :  { %s16730_s19 = sld [smem:[%s20550_s0 + %s16524_s15]]   ;;  %s16528_s15 = smov 35  }
  0x2e   :  { %20601 = sst [smem:[#allocation61_spill]] %s16705_s21 }
  0x2f   :  { %s16725_s21 = sld [smem:[%s20550_s0 + %s16523_s7]]   ;;  %s16527_s7 = smov 34  }
  0x30   :  { %20602 = sst [smem:[#allocation62_spill]] %s16715_s4 }
  0x31   :  { %20603 = sst [smem:[#allocation63_spill]] %s16720_s9 }
  0x32   :  { %s16735_s4 = sld [smem:[%s20550_s0 + %s16525_s22]]   ;;  %s16529_s22 = smov 36  }
  0x33   :  { %s16740_s9 = sld [smem:[%s20550_s0 + %s16526_s28]]   ;;  %s16530_s28 = smov 37  }
  0x34   :  { %s16750_s3 = sld [smem:[%s20550_s0 + %s16528_s15]]  }
  0x35   :  { %20604 = sst [smem:[#allocation64_spill]] %s16725_s21 }
  0x36   :  { %s16745_s21 = sld [smem:[%s20550_s0 + %s16527_s7]]  }
  0x37   :  { %s16755_s1 = sld [smem:[%s20550_s0 + %s16529_s22]]  }
  0x38   :  { %20605 = sst [smem:[#allocation65_spill]] %s16735_s4  ;;  %s16042_s4 = scalar_lea.hbm %s16575_s5, 32 }
  0x39   :  { %20606 = sst [smem:[#allocation66_spill]] %s16740_s9  ;;  %p16043_p0 = scmp.ne.s32.totalorder %s16575_s5, %s16042_s4 }
  0x3a   :  { %20608 = sst [smem:[#allocation68_spill]] %s16750_s3  ;;  %p16046_p1 = scmp.lt.u32.totalorder %s16042_s4, %s16575_s5 }
  0x3b   :  { %s16760_s7 = sld [smem:[%s20550_s0 + %s16530_s28]]   ;;  %s16534_s28 = smov 41  }
  0x3c   :  { %20607 = sst [smem:[#allocation67_spill]] %s16745_s21  ;;  %s16536_s21 = smov 43  }
  0x3d   :  { %20609 = sst [smem:[#allocation69_spill]] %s16755_s1  ;;  %p16048_p2 = pnand %p16046_p1, %p16043_p0 }
  0x3e   :  { %s16765_s15 = sld [smem:[%s20550_s0 + %s16531_s10]]   ;;  %s16535_s10 = smov 42  }
  0x3f   :  { %s16770_s22 = sld [smem:[%s20550_s0 + %s16532_s18]]  }
  0x40   :  { %s16775_s9 = sld [smem:[%s20550_s0 + %s16533_s26]]  }
  0x41   :  { %20610 = sst [smem:[#allocation70_spill]] %s16760_s7 }
  0x42   :  { %s16780_s3 = sld [smem:[%s20550_s0 + %s16534_s28]]  }
  0x44   :  { %20611 = sst [smem:[#allocation71_spill]] %s16765_s15 }
  0x45   :  { %20612 = sst [smem:[#allocation72_spill]] %s16770_s22 }
  0x46   :  { %s16785_s15 = sld [smem:[%s20550_s0 + %s16535_s10]]  }
  0x47   :  { %s16790_s22 = sld [smem:[%s20550_s0 + %s16536_s21]]  }
  0x48   :  { %16051 = shalt.err (!%p16048_p2)  }
  0x49   :  { %s16537_s1 = smov [#allocation4]  }
  0x4a   :  { %93 = dma.hbm_to_smem %s16575_s5, 32, %s16537_s1, [#allocation3] }
  0x4b   :  { %16470 = dma.done.wait [#allocation3], 32 }
  0x4c   :  { %16471 = vsyncadd [#allocation3], 4294967264 }
  0x4d   :  { %95 = sfence }
  0x4e   :  { %96 = vsyncpa [#allocation6], 0 }
  0x4f   :  { %97 = vsyncpa [#allocation9], 0 }
  0x50   :  { %98 = vsyncpa [#allocation12], 0 }
  0x51   :  { %99 = vsyncpa [#allocation15], 0 }
  0x52   :  { %100 = vsyncpa [#allocation18], 0 }
  0x53   :  { %101 = vsyncpa [#allocation21], 0 }
  0x54   :  { %102 = vsyncpa [#allocation24], 0 }
  0x55   :  { %103 = vsyncpa [#allocation27], 0 }
  0x56   :  { %104 = vsyncpa [#allocation30], 0 }
  0x57   :  { %105 = vsyncpa [#allocation33], 0 }
  0x58   :  { %106 = vsyncpa [#allocation7], 0  ;;  %s16538_s0 = smov [#allocation8]   ;;  %s16539_s5 = smov [#allocation11]  }
  0x59   :  { %s126_s7 = sshll.u32 %s16538_s0, 4  ;;  %s152_s26 = sshll.u32 %s16539_s5, 4  ;;  %s127_s7 = int_to_ptr.vmem [resolvable:$true] %s126_s7  ;;  %s16796_s26 = int_to_ptr.vmem [resolvable:$true] %s152_s26 }
  0x5a   :  { %s16052_s28 = scalar_lea.hbm %s16590_s17, 2560 }
  0x5b   :  { %p16053_p3 = scmp.ne.s32.totalorder %s16590_s17, %s16052_s28  ;;  %p16056_p4 = scmp.lt.u32.totalorder %s16052_s28, %s16590_s17 }
  0x5d   :  { %p16058_p5 = pnand %p16056_p4, %p16053_p3 }
  0x5f   :  { %16061 = shalt.err (!%p16058_p5)
}
  0x60   :  { %s16062_s2 = scalar_lea.vmem %s127_s7, 2560  ;;  %p16067_p7 = scmp.lt.s32.totalorder %s127_s7, %s127_s7 }
  0x61   :  { %p16063_p6 = scmp.ne.s32.totalorder %s127_s7, %s16062_s2  ;;  %p16068_p8 = scmp.lt.s32.totalorder %s16062_s2, %s16062_s2 }
  0x63   :  { %p16069_p9 = por %p16068_p8, %p16067_p7 }
  0x65   :  { %p16070_p10 = pnand %p16069_p9, %p16063_p6 }
  0x67   :  { %16073 = shalt.err (!%p16070_p10)
}
  0x68   :  { %s16540_s10 = smov 128   ;;  %s16541_s11 = smov 8  }
  0x69   :  { %132 = dma.hbm_to_vmem [thread:$0]  %s16590_s17, 2560, %s127_s7, [#allocation9], %s16540_s10, %s16540_s10, %s16541_s11  }
  0x6a   :  { %s16074_s16 = scalar_lea.hbm %s16605_s29, 768 }
  0x6b   :  { %p16075_p11 = scmp.ne.s32.totalorder %s16605_s29, %s16074_s16  ;;  %p16078_p12 = scmp.lt.u32.totalorder %s16074_s16, %s16605_s29 }
  0x6d   :  { %p16080_p13 = pnand %p16078_p12, %p16075_p11 }
  0x6f   :  { %16083 = shalt.err (!%p16080_p13)
}
  0x70   :  { %s16084_s21 = scalar_lea.vmem %s16796_s26, 768  ;;  %p16089_p1 = scmp.lt.s32.totalorder %s16796_s26, %s16796_s26 }
  0x71   :  { %p16085_p0 = scmp.ne.s32.totalorder %s16796_s26, %s16084_s21  ;;  %p16090_p2 = scmp.lt.s32.totalorder %s16084_s21, %s16084_s21 }
  0x73   :  { %p16091_p3 = por %p16090_p2, %p16089_p1 }
  0x75   :  { %p16092_p4 = pnand %p16091_p3, %p16085_p0 }
  0x77   :  { %16095 = shalt.err (!%p16092_p4)
}
  0x78   :  { %158 = dma.hbm_to_vmem [thread:$0]  %s16605_s29, 768, %s16796_s26, [#allocation12], %s16540_s10, %s16540_s10, %s16541_s11  }
  0x79   :  { %s16542_s17 = smov [#allocation14]   ;;  %s16543_s23 = smov [#allocation17]  }
  0x7a   :  { %s178_s18 = sshll.u32 %s16542_s17, 4  ;;  %s206_s4 = sshll.u32 %s16543_s23, 4  ;;  %s179_s18 = int_to_ptr.vmem [resolvable:$true] %s178_s18  ;;  %s16817_s4 = int_to_ptr.vmem [resolvable:$true] %s206_s4 }
  0x7b   :  { %s16096_s1 = scalar_lea.hbm %s16620_s14, 256 }
  0x7c   :  { %p16097_p5 = scmp.ne.s32.totalorder %s16620_s14, %s16096_s1  ;;  %p16100_p6 = scmp.lt.u32.totalorder %s16096_s1, %s16620_s14 }
  0x7e   :  { %p16102_p7 = pnand %p16100_p6, %p16097_p5 }
  0x80   :  { %16105 = shalt.err (!%p16102_p7)
}
  0x81   :  { %s16106_s0 = scalar_lea.vmem %s179_s18, 256  ;;  %p16111_p9 = scmp.lt.s32.totalorder %s179_s18, %s179_s18 }
  0x82   :  { %p16107_p8 = scmp.ne.s32.totalorder %s179_s18, %s16106_s0  ;;  %p16112_p10 = scmp.lt.s32.totalorder %s16106_s0, %s16106_s0 }
  0x84   :  { %p16113_p11 = por %p16112_p10, %p16111_p9 }
  0x86   :  { %p16114_p12 = pnand %p16113_p11, %p16107_p8 }
  0x88   :  { %16117 = shalt.err (!%p16114_p12)
}
  0x89   :  { %184 = dma.hbm_to_vmem [thread:$0]  %s16620_s14, 256, %s179_s18, [#allocation15], %s16540_s10, %s16540_s10, %s16541_s11  }
  0x8a   :  { %s16118_s29 = scalar_lea.hbm %s16640_s6, 1024 }
  0x8b   :  { %p16119_p13 = scmp.ne.s32.totalorder %s16640_s6, %s16118_s29  ;;  %p16122_p0 = scmp.lt.u32.totalorder %s16118_s29, %s16640_s6 }
  0x8d   :  { %p16124_p1 = pnand %p16122_p0, %p16119_p13 }
  0x8f   :  { %16127 = shalt.err (!%p16124_p1)
}
  0x90   :  { %s16128_s7 = scalar_lea.vmem %s16817_s4, 1024  ;;  %p16133_p3 = scmp.lt.s32.totalorder %s16817_s4, %s16817_s4 }
  0x91   :  { %p16129_p2 = scmp.ne.s32.totalorder %s16817_s4, %s16128_s7  ;;  %p16134_p4 = scmp.lt.s32.totalorder %s16128_s7, %s16128_s7 }
  0x93   :  { %p16135_p5 = por %p16134_p4, %p16133_p3 }
  0x95   :  { %p16136_p6 = pnand %p16135_p5, %p16129_p2 }
  0x97   :  { %16139 = shalt.err (!%p16136_p6)
}
  0x98   :  { %212 = dma.hbm_to_vmem [thread:$0]  %s16640_s6, 1024, %s16817_s4, [#allocation18], %s16540_s10, %s16540_s10, %s16541_s11  }
  0x99   :  { %s16544_s14 = smov [#allocation20]   ;;  %s16545_s26 = smov [#allocation23]  }
  0x9a   :  { %s236_s5 = sshll.u32 %s16544_s14, 4  ;;  %s268_s28 = sshll.u32 %s16545_s26, 4  ;;  %s237_s5 = int_to_ptr.vmem [resolvable:$true] %s236_s5  ;;  %s16838_s28 = int_to_ptr.vmem [resolvable:$true] %s268_s28 }
  0x9b   :  { %s16140_s2 = scalar_lea.hbm %s16665_s12, 512 }
  0x9c   :  { %p16141_p7 = scmp.ne.s32.totalorder %s16665_s12, %s16140_s2  ;;  %p16144_p8 = scmp.lt.u32.totalorder %s16140_s2, %s16665_s12 }
  0x9e   :  { %p16146_p9 = pnand %p16144_p8, %p16141_p7 }
  0xa0   :  { %16149 = shalt.err (!%p16146_p9)
}
  0xa1   :  { %s16150_s16 = scalar_lea.vmem %s237_s5, 512  ;;  %p16155_p11 = scmp.lt.s32.totalorder %s237_s5, %s237_s5 }
  0xa2   :  { %p16151_p10 = scmp.ne.s32.totalorder %s237_s5, %s16150_s16  ;;  %p16156_p12 = scmp.lt.s32.totalorder %s16150_s16, %s16150_s16 }
  0xa4   :  { %p16157_p13 = por %p16156_p12, %p16155_p11 }
  0xa6   :  { %p16158_p0 = pnand %p16157_p13, %p16151_p10 }
  0xa8   :  { %16161 = shalt.err (!%p16158_p0)
}
  0xa9   :  { %242 = dma.hbm_to_vmem [thread:$0]  %s16665_s12, 512, %s237_s5, [#allocation21], %s16540_s10, %s16540_s10, %s16541_s11  }
  0xaa   :  { %s16162_s6 = scalar_lea.hbm %s16695_s27, 640 }
  0xab   :  { %p16163_p1 = scmp.ne.s32.totalorder %s16695_s27, %s16162_s6  ;;  %p16166_p2 = scmp.lt.u32.totalorder %s16162_s6, %s16695_s27 }
  0xad   :  { %p16168_p3 = pnand %p16166_p2, %p16163_p1 }
  0xaf   :  { %16171 = shalt.err (!%p16168_p3)
}
  0xb0   :  { %s16172_s21 = scalar_lea.vmem %s16838_s28, 640  ;;  %p16177_p5 = scmp.lt.s32.totalorder %s16838_s28, %s16838_s28 }
  0xb1   :  { %p16173_p4 = scmp.ne.s32.totalorder %s16838_s28, %s16172_s21  ;;  %p16178_p6 = scmp.lt.s32.totalorder %s16172_s21, %s16172_s21 }
  0xb3   :  { %p16179_p7 = por %p16178_p6, %p16177_p5 }
  0xb5   :  { %p16180_p8 = pnand %p16179_p7, %p16173_p4 }
  0xb7   :  { %16183 = shalt.err (!%p16180_p8)
}
  0xb8   :  { %274 = dma.hbm_to_vmem [thread:$0]  %s16695_s27, 640, %s16838_s28, [#allocation24], %s16540_s10, %s16540_s10, %s16541_s11  }
  0xb9   :  { %s16546_s12 = smov [#allocation26]   ;;  %s16547_s18 = smov [#allocation29]  }
  0xba   :  { %s294_s17 = sshll.u32 %s16546_s12, 4  ;;  %s322_s23 = sshll.u32 %s16547_s18, 4  ;;  %s295_s17 = int_to_ptr.vmem [resolvable:$true] %s294_s17  ;;  %s16859_s23 = int_to_ptr.vmem [resolvable:$true] %s322_s23 }
  0xbb   :  { %s16184_s4 = scalar_lea.hbm %s16710_s30, 384 }
  0xbc   :  { %p16185_p9 = scmp.ne.s32.totalorder %s16710_s30, %s16184_s4  ;;  %p16188_p10 = scmp.lt.u32.totalorder %s16184_s4, %s16710_s30 }
  0xbe   :  { %p16190_p11 = pnand %p16188_p10, %p16185_p9 }
  0xc0   :  { %16193 = shalt.err (!%p16190_p11)
}
  0xc1   :  { %s16194_s1 = scalar_lea.vmem %s295_s17, 384  ;;  %p16199_p13 = scmp.lt.s32.totalorder %s295_s17, %s295_s17 }
  0xc2   :  { %p16195_p12 = scmp.ne.s32.totalorder %s295_s17, %s16194_s1  ;;  %p16200_p0 = scmp.lt.s32.totalorder %s16194_s1, %s16194_s1 }
  0xc4   :  { %p16201_p1 = por %p16200_p0, %p16199_p13 }
  0xc6   :  { %p16202_p2 = pnand %p16201_p1, %p16195_p12 }
  0xc8   :  { %16205 = shalt.err (!%p16202_p2)
}
  0xc9   :  { %300 = dma.hbm_to_vmem [thread:$0]  %s16710_s30, 384, %s295_s17, [#allocation27], %s16540_s10, %s16540_s10, %s16541_s11  }
  0xca   :  { %s16206_s27 = scalar_lea.hbm %s16730_s19, 512 }
  0xcb   :  { %p16207_p3 = scmp.ne.s32.totalorder %s16730_s19, %s16206_s27  ;;  %p16210_p4 = scmp.lt.u32.totalorder %s16206_s27, %s16730_s19 }
  0xcd   :  { %p16212_p5 = pnand %p16210_p4, %p16207_p3 }
  0xcf   :  { %16215 = shalt.err (!%p16212_p5)
}
  0xd0   :  { %s16216_s0 = scalar_lea.vmem %s16859_s23, 512  ;;  %p16221_p7 = scmp.lt.s32.totalorder %s16859_s23, %s16859_s23 }
  0xd1   :  { %p16217_p6 = scmp.ne.s32.totalorder %s16859_s23, %s16216_s0  ;;  %p16222_p8 = scmp.lt.s32.totalorder %s16216_s0, %s16216_s0 }
  0xd3   :  { %p16223_p9 = por %p16222_p8, %p16221_p7 }
  0xd5   :  { %p16224_p10 = pnand %p16223_p9, %p16217_p6 }
  0xd7   :  { %16227 = shalt.err (!%p16224_p10)
}
  0xd8   :  { %328 = dma.hbm_to_vmem [thread:$0]  %s16730_s19, 512, %s16859_s23, [#allocation30], %s16540_s10, %s16540_s10, %s16541_s11  }
  0xd9   :  { %s16548_s30 = smov [#allocation5]   ;;  %s16549_s7 = smov [#allocation10]  }
  0xda   :  { %s114_s29 = sshll.u32 %s16548_s30, 4  ;;  %s140_s14 = sshll.u32 %s16549_s7, 4  ;;  %s115_s29 = int_to_ptr.vmem [resolvable:$true] %s114_s29  ;;  %s16880_s14 = int_to_ptr.vmem [resolvable:$true] %s140_s14 }
  0xdb   :  { %s16228_s5 = scalar_lea.hbm %s16585_s13, 512 }
  0xdc   :  { %p16229_p11 = scmp.ne.s32.totalorder %s16585_s13, %s16228_s5  ;;  %p16232_p12 = scmp.lt.u32.totalorder %s16228_s5, %s16585_s13 }
  0xde   :  { %p16234_p13 = pnand %p16232_p12, %p16229_p11 }
  0xe0   :  { %16237 = shalt.err (!%p16234_p13)
}
  0xe1   :  { %s16238_s26 = scalar_lea.vmem %s115_s29, 512  ;;  %p16243_p1 = scmp.lt.s32.totalorder %s115_s29, %s115_s29 }
  0xe2   :  { %p16239_p0 = scmp.ne.s32.totalorder %s115_s29, %s16238_s26  ;;  %p16244_p2 = scmp.lt.s32.totalorder %s16238_s26, %s16238_s26 }
  0xe4   :  { %p16245_p3 = por %p16244_p2, %p16243_p1 }
  0xe6   :  { %p16246_p4 = pnand %p16245_p3, %p16239_p0 }
  0xe8   :  { %16249 = shalt.err (!%p16246_p4)
}
  0xe9   :  { %120 = dma.hbm_to_vmem [thread:$0]  %s16585_s13, 512, %s115_s29, [#allocation6], %s16540_s10, %s16540_s10, %s16541_s11  }
  0xea   :  { %s16250_s19 = scalar_lea.hbm %s16600_s25, 2560 }
  0xeb   :  { %p16251_p5 = scmp.ne.s32.totalorder %s16600_s25, %s16250_s19  ;;  %p16254_p6 = scmp.lt.u32.totalorder %s16250_s19, %s16600_s25 }
  0xed   :  { %p16256_p7 = pnand %p16254_p6, %p16251_p5 }
  0xef   :  { %16259 = shalt.err (!%p16256_p7)
}
  0xf0   :  { %s16260_s28 = scalar_lea.vmem %s16880_s14, 2560  ;;  %p16265_p9 = scmp.lt.s32.totalorder %s16880_s14, %s16880_s14 }
  0xf1   :  { %p16261_p8 = scmp.ne.s32.totalorder %s16880_s14, %s16260_s28  ;;  %p16266_p10 = scmp.lt.s32.totalorder %s16260_s28, %s16260_s28 }
  0xf3   :  { %p16267_p11 = por %p16266_p10, %p16265_p9 }
  0xf5   :  { %p16268_p12 = pnand %p16267_p11, %p16261_p8 }
  0xf7   :  { %16271 = shalt.err (!%p16268_p12)
}
  0xf8   :  { %s16550_s2 = smov 256   ;;  %s16551_s13 = smov 16  }
  0xf9   :  { %146 = dma.hbm_to_vmem [thread:$0]  %s16600_s25, 2560, %s16880_s14, [#allocation9], %s16550_s2, %s16550_s2, %s16551_s13  }
  0xfa   :  { %s16552_s16 = smov [#allocation13]   ;;  %s16553_s21 = smov [#allocation16]  }
  0xfb   :  { %s166_s6 = sshll.u32 %s16552_s16, 4  ;;  %s192_s12 = sshll.u32 %s16553_s21, 4  ;;  %s167_s6 = int_to_ptr.vmem [resolvable:$true] %s166_s6  ;;  %s16898_s12 = int_to_ptr.vmem [resolvable:$true] %s192_s12 }
  0xfc   :  { %s16272_s17 = scalar_lea.hbm %s16615_s8, 384 }
  0xfd   :  { %p16273_p13 = scmp.ne.s32.totalorder %s16615_s8, %s16272_s17  ;;  %p16276_p0 = scmp.lt.u32.totalorder %s16272_s17, %s16615_s8 }
  0xff   :  { %p16278_p1 = pnand %p16276_p0, %p16273_p13 }
 0x101   :  { %16281 = shalt.err (!%p16278_p1)
}
 0x102   :  { %s16282_s18 = scalar_lea.vmem %s167_s6, 384  ;;  %p16287_p3 = scmp.lt.s32.totalorder %s167_s6, %s167_s6 }
 0x103   :  { %p16283_p2 = scmp.ne.s32.totalorder %s167_s6, %s16282_s18  ;;  %p16288_p4 = scmp.lt.s32.totalorder %s16282_s18, %s16282_s18 }
 0x105   :  { %p16289_p5 = por %p16288_p4, %p16287_p3 }
 0x107   :  { %p16290_p6 = pnand %p16289_p5, %p16283_p2 }
 0x109   :  { %16293 = shalt.err (!%p16290_p6)
}
 0x10a   :  { %172 = dma.hbm_to_vmem [thread:$0]  %s16615_s8, 384, %s167_s6, [#allocation12], %s16540_s10, %s16540_s10, %s16541_s11  }
 0x10b   :  { %s16294_s25 = scalar_lea.hbm %s16630_s24, 384 }
 0x10c   :  { %p16295_p7 = scmp.ne.s32.totalorder %s16630_s24, %s16294_s25  ;;  %p16298_p8 = scmp.lt.u32.totalorder %s16294_s25, %s16630_s24 }
 0x10e   :  { %p16300_p9 = pnand %p16298_p8, %p16295_p7 }
 0x110   :  { %16303 = shalt.err (!%p16300_p9)
}
 0x111   :  { %s16304_s23 = scalar_lea.vmem %s16898_s12, 384  ;;  %p16309_p11 = scmp.lt.s32.totalorder %s16898_s12, %s16898_s12 }
 0x112   :  { %p16305_p10 = scmp.ne.s32.totalorder %s16898_s12, %s16304_s23  ;;  %p16310_p12 = scmp.lt.s32.totalorder %s16304_s23, %s16304_s23 }
 0x114   :  { %p16311_p13 = por %p16310_p12, %p16309_p11 }
 0x116   :  { %p16312_p0 = pnand %p16311_p13, %p16305_p10 }
 0x118   :  { %16315 = shalt.err (!%p16312_p0)
}
 0x119   :  { %198 = dma.hbm_to_vmem [thread:$0]  %s16630_s24, 384, %s16898_s12, [#allocation15], %s16540_s10, %s16540_s10, %s16541_s11  }
 0x11a   :  { %s16554_s8 = smov [#allocation19]   ;;  %s16555_s1 = smov [#allocation22]  }
 0x11b   :  { %s220_s4 = sshll.u32 %s16554_s8, 4  ;;  %s254_s27 = sshll.u32 %s16555_s1, 4  ;;  %s221_s4 = int_to_ptr.vmem [resolvable:$true] %s220_s4  ;;  %s16919_s27 = int_to_ptr.vmem [resolvable:$true] %s254_s27 }
 0x11c   :  { %s16316_s0 = scalar_lea.hbm %s16650_s20, 512 }
 0x11d   :  { %p16317_p1 = scmp.ne.s32.totalorder %s16650_s20, %s16316_s0  ;;  %p16320_p2 = scmp.lt.u32.totalorder %s16316_s0, %s16650_s20 }
 0x11f   :  { %p16322_p3 = pnand %p16320_p2, %p16317_p1 }
 0x121   :  { %16325 = shalt.err (!%p16322_p3)
}
 0x122   :  { %s16326_s30 = scalar_lea.vmem %s221_s4, 512  ;;  %p16331_p5 = scmp.lt.s32.totalorder %s221_s4, %s221_s4 }
 0x123   :  { %p16327_p4 = scmp.ne.s32.totalorder %s221_s4, %s16326_s30  ;;  %p16332_p6 = scmp.lt.s32.totalorder %s16326_s30, %s16326_s30 }
 0x125   :  { %p16333_p7 = por %p16332_p6, %p16331_p5 }
 0x127   :  { %p16334_p8 = pnand %p16333_p7, %p16327_p4 }
 0x129   :  { %16337 = shalt.err (!%p16334_p8)
}
 0x12a   :  { %s20613_s24 = sld [smem:[#allocation58_spill]] }
 0x12b   :  { %226 = dma.hbm_to_vmem [thread:$0]  %s16650_s20, 512, %s221_s4, [#allocation18], %s16540_s10, %s16540_s10, %s16541_s11  }
 0x130   :  { %s16338_s29 = scalar_lea.hbm %s20613_s24, 768 }
 0x131   :  { %p16339_p9 = scmp.ne.s32.totalorder %s20613_s24, %s16338_s29  ;;  %p16342_p10 = scmp.lt.u32.totalorder %s16338_s29, %s20613_s24 }
 0x133   :  { %p16344_p11 = pnand %p16342_p10, %p16339_p9 }
 0x135   :  { %16347 = shalt.err (!%p16344_p11)
}
 0x136   :  { %s16348_s7 = scalar_lea.vmem %s16919_s27, 768  ;;  %p16353_p13 = scmp.lt.s32.totalorder %s16919_s27, %s16919_s27 }
 0x137   :  { %p16349_p12 = scmp.ne.s32.totalorder %s16919_s27, %s16348_s7  ;;  %p16354_p0 = scmp.lt.s32.totalorder %s16348_s7, %s16348_s7 }
 0x139   :  { %p16355_p1 = por %p16354_p0, %p16353_p13 }
 0x13b   :  { %p16356_p2 = pnand %p16355_p1, %p16349_p12 }
 0x13d   :  { %16359 = shalt.err (!%p16356_p2)
}
 0x13e   :  { %s20614_s20 = sld [smem:[#allocation60_spill]]  ;;  %s16556_s14 = smov [#allocation25]  }
 0x13f   :  { %260 = dma.hbm_to_vmem [thread:$0]  %s20613_s24, 768, %s16919_s27, [#allocation21], %s16540_s10, %s16540_s10, %s16541_s11  }
 0x140   :  { %s280_s5 = sshll.u32 %s16556_s14, 4  ;;  %s16557_s26 = smov [#allocation28]   ;;  %s281_s5 = int_to_ptr.vmem [resolvable:$true] %s280_s5 }
 0x141   :  { %s308_s19 = sshll.u32 %s16557_s26, 4  ;;  %s16940_s19 = int_to_ptr.vmem [resolvable:$true] %s308_s19 }
 0x144   :  { %s16360_s28 = scalar_lea.hbm %s20614_s20, 256 }
 0x145   :  { %p16361_p3 = scmp.ne.s32.totalorder %s20614_s20, %s16360_s28  ;;  %p16364_p4 = scmp.lt.u32.totalorder %s16360_s28, %s20614_s20 }
 0x147   :  { %p16366_p5 = pnand %p16364_p4, %p16361_p3 }
 0x149   :  { %16369 = shalt.err (!%p16366_p5)
}
 0x14a   :  { %s16370_s2 = scalar_lea.vmem %s281_s5, 256  ;;  %p16375_p7 = scmp.lt.s32.totalorder %s281_s5, %s281_s5 }
 0x14b   :  { %p16371_p6 = scmp.ne.s32.totalorder %s281_s5, %s16370_s2  ;;  %p16376_p8 = scmp.lt.s32.totalorder %s16370_s2, %s16370_s2 }
 0x14d   :  { %p16377_p9 = por %p16376_p8, %p16375_p7 }
 0x14f   :  { %p16378_p10 = pnand %p16377_p9, %p16371_p6 }
 0x151   :  { %16381 = shalt.err (!%p16378_p10)
}
 0x152   :  { %s20615_s13 = sld [smem:[#allocation63_spill]] }
 0x153   :  { %286 = dma.hbm_to_vmem [thread:$0]  %s20614_s20, 256, %s281_s5, [#allocation24], %s16540_s10, %s16540_s10, %s16541_s11  }
 0x158   :  { %s16382_s16 = scalar_lea.hbm %s20615_s13, 1024 }
 0x159   :  { %p16383_p11 = scmp.ne.s32.totalorder %s20615_s13, %s16382_s16  ;;  %p16386_p12 = scmp.lt.u32.totalorder %s16382_s16, %s20615_s13 }
 0x15b   :  { %p16388_p13 = pnand %p16386_p12, %p16383_p11 }
 0x15d   :  { %16391 = shalt.err (!%p16388_p13)
}
 0x15e   :  { %s16392_s6 = scalar_lea.vmem %s16940_s19, 1024  ;;  %p16397_p1 = scmp.lt.s32.totalorder %s16940_s19, %s16940_s19 }
 0x15f   :  { %p16393_p0 = scmp.ne.s32.totalorder %s16940_s19, %s16392_s6  ;;  %p16398_p2 = scmp.lt.s32.totalorder %s16392_s6, %s16392_s6 }
 0x161   :  { %p16399_p3 = por %p16398_p2, %p16397_p1 }
 0x163   :  { %p16400_p4 = pnand %p16399_p3, %p16393_p0 }
 0x165   :  { %16403 = shalt.err (!%p16400_p4)
}
 0x166   :  { %s20616_s21 = sld [smem:[#allocation68_spill]]  ;;  %s16558_s12 = smov [#allocation31]  }
 0x167   :  { %314 = dma.hbm_to_vmem [thread:$0]  %s20615_s13, 1024, %s16940_s19, [#allocation27], %s16540_s10, %s16540_s10, %s16541_s11  }
 0x168   :  { %s340_s17 = sshll.u32 %s16558_s12, 4  ;;  %s16559_s18 = smov [#allocation32]   ;;  %s341_s17 = int_to_ptr.vmem [resolvable:$true] %s340_s17 }
 0x169   :  { %s358_s25 = sshll.u32 %s16559_s18, 4  ;;  %s16961_s25 = int_to_ptr.vmem [resolvable:$true] %s358_s25 }
 0x16c   :  { %s16404_s23 = scalar_lea.hbm %s20616_s21, 1024 }
 0x16d   :  { %p16405_p5 = scmp.ne.s32.totalorder %s20616_s21, %s16404_s23  ;;  %p16408_p6 = scmp.lt.u32.totalorder %s16404_s23, %s20616_s21 }
 0x16f   :  { %p16410_p7 = pnand %p16408_p6, %p16405_p5 }
 0x171   :  { %16413 = shalt.err (!%p16410_p7)
}
 0x172   :  { %s16414_s8 = scalar_lea.vmem %s341_s17, 1024  ;;  %p16419_p9 = scmp.lt.s32.totalorder %s341_s17, %s341_s17 }
 0x173   :  { %p16415_p8 = scmp.ne.s32.totalorder %s341_s17, %s16414_s8  ;;  %p16420_p10 = scmp.lt.s32.totalorder %s16414_s8, %s16414_s8 }
 0x175   :  { %p16421_p11 = por %p16420_p10, %p16419_p9 }
 0x177   :  { %p16422_p12 = pnand %p16421_p11, %p16415_p8 }
 0x179   :  { %16425 = shalt.err (!%p16422_p12)
}
 0x17a   :  { %s20617_s4 = sld [smem:[#allocation72_spill]] }
 0x17b   :  { %346 = dma.hbm_to_vmem [thread:$0]  %s20616_s21, 1024, %s341_s17, [#allocation30], %s16540_s10, %s16540_s10, %s16541_s11  }
 0x180   :  { %s16426_s1 = scalar_lea.hbm %s20617_s4, 1024 }
 0x181   :  { %p16427_p13 = scmp.ne.s32.totalorder %s20617_s4, %s16426_s1  ;;  %p16430_p0 = scmp.lt.u32.totalorder %s16426_s1, %s20617_s4 }
 0x183   :  { %p16432_p1 = pnand %p16430_p0, %p16427_p13 }
 0x185   :  { %16435 = shalt.err (!%p16432_p1)
}
 0x186   :  { %s16436_s27 = scalar_lea.vmem %s16961_s25, 1024  ;;  %p16441_p3 = scmp.lt.s32.totalorder %s16961_s25, %s16961_s25 }
 0x187   :  { %p16437_p2 = scmp.ne.s32.totalorder %s16961_s25, %s16436_s27  ;;  %p16442_p4 = scmp.lt.s32.totalorder %s16436_s27, %s16436_s27 }
 0x189   :  { %p16443_p5 = por %p16442_p4, %p16441_p3 }
 0x18b   :  { %p16444_p6 = pnand %p16443_p5, %p16437_p2 }
 0x18d   :  { %16447 = shalt.err (!%p16444_p6)
}
 0x18e   :  { %364 = dma.hbm_to_vmem [thread:$0]  %s20617_s4, 1024, %s16961_s25, [#allocation33], %s16540_s10, %s16540_s10, %s16541_s11  }
 0x18f   :  { %16472 = dma.done.wait [#allocation6], 512  }
 0x190   :  { %16473 = vsyncadd [#allocation6], 4294966784 }
 0x191   :  { %16474 = dma.done.wait [#allocation9], 5120  }
 0x192   :  { %16475 = vsyncadd [#allocation9], 4294962176 }
 0x193   :  { %16476 = dma.done.wait [#allocation12], 1152  }
 0x194   :  { %16477 = vsyncadd [#allocation12], 4294966144 }
 0x195   :  { %16478 = dma.done.wait [#allocation15], 640  }
 0x196   :  { %16479 = vsyncadd [#allocation15], 4294966656 }
 0x197   :  { %16480 = dma.done.wait [#allocation18], 1536  }
 0x198   :  { %16481 = vsyncadd [#allocation18], 4294965760 }
 0x199   :  { %16482 = dma.done.wait [#allocation21], 1280  }
 0x19a   :  { %16483 = vsyncadd [#allocation21], 4294966016 }
 0x19b   :  { %16484 = dma.done.wait [#allocation24], 896  }
 0x19c   :  { %16485 = vsyncadd [#allocation24], 4294966400 }
 0x19d   :  { %16486 = dma.done.wait [#allocation27], 1408  }
 0x19e   :  { %16487 = vsyncadd [#allocation27], 4294965888 }
 0x19f   :  { %16488 = dma.done.wait [#allocation30], 1536  }
 0x1a0   :  { %16489 = vsyncadd [#allocation30], 4294965760 }
 0x1a1   :  { %16490 = dma.done.wait [#allocation33], 1024  }
 0x1a2   :  { %16491 = vsyncadd [#allocation33], 4294966272  ;;  %s20618_s10 = sld [smem:[#allocation47_spill]]  ;;  %v16560_v0 = vmov 0   ;;  %v651_v13 = vld [vmem:[#allocation5] sm:$0xff]  ;;  %v652_v14 = vld [vmem:[#allocation5 + $0x8] sm:$0xff] }
 0x1a3   :  { %16013 = vset.pattern.permute.xlu1 %v16560_v0  ;;  %16012 = vset.pattern.permute.xlu0 %v16560_v0  ;;  %vm752_vm0 = vcmask 1045504   ;;  %v15183_v17 = vpack.c.bf16 %v652_v14, %v651_v13  ;;  %v653_v18 = vld [vmem:[#allocation5 + $0x10] sm:$0xff]  ;;  %v654_v19 = vld [vmem:[#allocation5 + $0x18] sm:$0x3f]  ;;  %vm20571_vm1 = vmmov 1   ;;  %v20619_v21 = vmov 0 }
 0x1a4   :  { %v15187_v20 = vpack.c.bf16 %v654_v19, %v653_v18  ;;  %vm16998_vm2 = vmpackc.low %vm752_vm0, %vm20571_vm1  ;;  %s20622_s11 = sld [smem:[#allocation54_spill]]  ;;  %vm655_vm3 = vcmask 244736   ;;  %v20566_v14 = vmov 0.0   ;;  %s20766_s0 = sld [smem:[#allocation48_spill]] }
 0x1a5   :  { %15184 = vmatprep.subr.bf16.mxu0 %v15183_v17  ;;  %v20620_v21 = vsel %vm16998_vm2, 4294967295, %v20619_v21  ;;  %s20776_s30 = sld [smem:[#allocation49_spill]]  ;;  %s20779_s24 = sld [smem:[#allocation50_spill]] }
 0x1a6   :  { %20621 = vst [vmem:[#allocation73_spill] sm:$0xff] %v20620_v21  ;;  %15186 = vmatpush3.bf16.msra.mxu0 %v15183_v17  ;;  %s20784_s29 = sld [smem:[#allocation51_spill]]  ;;  %s20785_s7 = sld [smem:[#allocation52_spill]] }
 0x1a7   :  { %15189 = vmatprep.subr.msk.bf16.mxu0 %vm16998_vm2, %v15187_v20  ;;  %s20789_s20 = sld [smem:[#allocation55_spill]]  ;;  %s21059_s14 = sld [smem:[#allocation57_spill]] }
 0x1a8   :  { %v427_v1 = vld [vmem:[%s20618_s10 + $0x10] sm:$0xff]  ;;  %v425_v2 = vld [vmem:[%s20618_s10] sm:$0xff]  ;;  %v428_v3 = vld [vmem:[%s20618_s10 + $0x18] sm:$0xff]  ;;  %s21062_s5 = sld [smem:[#allocation56_spill]]  ;;  %s21074_s26 = sld [smem:[#allocation59_spill]] }
 0x1a9   :  { %466 = vperm.xlu1 %16013, %v427_v1   ;;  %460 = vperm.xlu0 %16012, %v425_v2   ;;  %v426_v4 = vld [vmem:[%s20618_s10 + $0x8] sm:$0xff]  ;;  %v429_v6 = vld [vmem:[%s20618_s10 + $0x20] sm:$0xff]  ;;  %v432_v7 = vld [vmem:[%s20618_s10 + $0x38] sm:$0xff]  ;;  %s21084_s19 = sld [smem:[#allocation61_spill]]  ;;  %s21102_s28 = sld [smem:[#allocation62_spill]] }
 0x1aa   :  { %v430_v5 = vld [vmem:[%s20618_s10 + $0x28] sm:$0xff]  ;;  %v431_v8 = vld [vmem:[%s20618_s10 + $0x30] sm:$0xff]  ;;  %v433_v10 = vld [vmem:[%s20618_s10 + $0x40] sm:$0xff]  ;;  %15192 = vmatpush3.bf16.msk.msra.mxu0 %vm16998_vm2, %v15187_v20  ;;  %s21103_s2 = sld [smem:[#allocation64_spill]]  ;;  %s21104_s13 = sld [smem:[#allocation65_spill]] }
 0x1ab   :  { %v434_v9 = vld [vmem:[%s20618_s10 + $0x48] sm:$0xff]  ;;  %v436_v11 = vld [vmem:[%s20618_s10 + $0x58] sm:$0xff]  ;;  %v435_v12 = vld [vmem:[%s20618_s10 + $0x50] sm:$0xff]  ;;  %s21105_s16 = sld [smem:[#allocation53_spill]]  ;;  %s21107_s21 = sld [smem:[#allocation70_spill]] }
 0x1ac   :  { %v438_v15 = vld [vmem:[%s20618_s10 + $0x68] sm:$0xff]  ;;  %v437_v16 = vld [vmem:[%s20618_s10 + $0x60] sm:$0xff]  ;;  %v440_v22 = vld [vmem:[%s20618_s10 + $0x78] sm:$0xff]  ;;  %s21106_s6 = sld [smem:[#allocation69_spill]]  ;;  %s21110_s12 = sld [smem:[#allocation67_spill]] }
 0x1ad   :  { %469 = vperm.xlu1 %16013, %v428_v3   ;;  %463 = vperm.xlu0 %16012, %v426_v4   ;;  %v439_v23 = vld [vmem:[%s20618_s10 + $0x70] sm:$0xff]  ;;  %v442_v24 = vld [vmem:[%s20618_s10 + $0x88] sm:$0xff]  ;;  %v441_v25 = vld [vmem:[%s20618_s10 + $0x80] sm:$0xff]  ;;  %s21111_s17 = sld [smem:[#allocation66_spill]]  ;;  %s16565_s18 = smov 96  }
 0x1ae   :  { %v444_v26 = vld [vmem:[%s20618_s10 + $0x98] sm:$0xff]  ;;  %v443_v27 = vld [vmem:[%s20618_s10 + $0x90] sm:$0xff]  ;;  %v446_v28 = vld [vmem:[%s20618_s10 + $0xa8] sm:$0xff]  ;;  %s21113_s25 = sld [smem:[#allocation71_spill]]  ;;  %s12632_s23 = sld [smem:[#allocation4 + $0x81]] }
 0x1af   :  { %v445_v29 = vld [vmem:[%s20618_s10 + $0xa0] sm:$0xff]  ;;  %v448_v30 = vld [vmem:[%s20618_s10 + $0xb8] sm:$0xff]  ;;  %v447_v31 = vld [vmem:[%s20618_s10 + $0xb0] sm:$0xff]  ;;  %s11698_s8 = sld [smem:[#allocation4]]  ;;  %s12634_s1 = sld [smem:[#allocation4 + $0x82]] }
 0x1b0   :  { %v450_v32 = vld [vmem:[%s20618_s10 + $0xc8] sm:$0xff]  ;;  %v449_v33 = vld [vmem:[%s20618_s10 + $0xc0] sm:$0xff]  ;;  %v452_v34 = vld [vmem:[%s20618_s10 + $0xd8] sm:$0xff]  ;;  %s12630_s4 = sld [smem:[#allocation4 + $0x80]] }
 0x1b1   :  { %475 = vperm.xlu1 %16013, %v430_v5   ;;  %472 = vperm.xlu0 %16012, %v429_v6   ;;  %v451_v35 = vld [vmem:[%s20618_s10 + $0xd0] sm:$0xff]  ;;  %v454_v36 = vld [vmem:[%s20618_s10 + $0xe8] sm:$0xff]  ;;  %v453_v37 = vld [vmem:[%s20618_s10 + $0xe0] sm:$0xff]  ;;  %v20565_v6 = vlaneseq }
 0x1b2   :  { %v456_v38 = vld [vmem:[%s20618_s10 + $0xf8] sm:$0xff]  ;;  %v455_v39 = vld [vmem:[%s20618_s10 + $0xf0] sm:$0xff]  ;;  %v4592_v40 = vld [vmem:[%s20622_s11 + $0x8] sm:$0xff] }
 0x1b3   :  { %v4591_v41 = vld [vmem:[%s20622_s11] sm:$0xff]  ;;  %v4594_v42 = vld [vmem:[%s20622_s11 + $0x18] sm:$0xff]  ;;  %v4593_v43 = vld [vmem:[%s20622_s11 + $0x10] sm:$0xff] }
 0x1b4   :  { %v4596_v44 = vld [vmem:[%s20622_s11 + $0x28] sm:$0xff]  ;;  %v4595_v45 = vld [vmem:[%s20622_s11 + $0x20] sm:$0xff]  ;;  %v4598_v46 = vld [vmem:[%s20622_s11 + $0x38] sm:$0xff]  ;;  %s11713_s27 = scalar_lea.vmem [#allocation2], %s12632_s23 }
 0x1b5   :  { %481 = vperm.xlu1 %16013, %v432_v7   ;;  %478 = vperm.xlu0 %16012, %v431_v8   ;;  %v4597_v47 = vld [vmem:[%s20622_s11 + $0x30] sm:$0xff]  ;;  %v4600_v48 = vld [vmem:[%s20622_s11 + $0x48] sm:$0xff]  ;;  %v4599_v49 = vld [vmem:[%s20622_s11 + $0x40] sm:$0xff]  ;;  %s11700_s10 = scalar_lea.vmem [#allocation2], %s11698_s8 }
 0x1b6   :  { %v4602_v50 = vld [vmem:[%s20622_s11 + $0x58] sm:$0xff]  ;;  %v4601_v51 = vld [vmem:[%s20622_s11 + $0x50] sm:$0xff]  ;;  %v4604_v52 = vld [vmem:[%s20622_s11 + $0x68] sm:$0xff] }
 0x1b7   :  { %v4603_v53 = vld [vmem:[%s20622_s11 + $0x60] sm:$0xff]  ;;  %v4606_v54 = vld [vmem:[%s20622_s11 + $0x78] sm:$0xff]  ;;  %v4605_v55 = vld [vmem:[%s20622_s11 + $0x70] sm:$0xff] }
 0x1b8   :  { %v4608_v56 = vld [vmem:[%s20622_s11 + $0x88] sm:$0xff]  ;;  %v4607_v57 = vld [vmem:[%s20622_s11 + $0x80] sm:$0xff]  ;;  %v4610_v58 = vld [vmem:[%s20622_s11 + $0x98] sm:$0xff] }
 0x1b9   :  { %487 = vperm.xlu1 %16013, %v434_v9   ;;  %484 = vperm.xlu0 %16012, %v433_v10   ;;  %v4609_v59 = vld [vmem:[%s20622_s11 + $0x90] sm:$0xff]  ;;  %v4612_v60 = vld [vmem:[%s20622_s11 + $0xa8] sm:$0xff]  ;;  %v4611_v61 = vld [vmem:[%s20622_s11 + $0xa0] sm:$0xff]  ;;  %v17057_v9 = vand.u32 127, %v20565_v6 }
 0x1ba   :  { %v4614_v62 = vld [vmem:[%s20622_s11 + $0xb8] sm:$0xff]  ;;  %v4613_v63 = vld [vmem:[%s20622_s11 + $0xb0] sm:$0xff]  ;;  %v4616_v0 = vld [vmem:[%s20622_s11 + $0xc8] sm:$0xff] }
 0x1bb   :  { %v4615_v1 = vld [vmem:[%s20622_s11 + $0xc0] sm:$0xff]  ;;  %v4618_v2 = vld [vmem:[%s20622_s11 + $0xd8] sm:$0xff]  ;;  %v4617_v3 = vld [vmem:[%s20622_s11 + $0xd0] sm:$0xff]  ;;  %20623 = vst [vmem:[#allocation74_spill] sm:$0xff] %v17057_v9 }
 0x1bc   :  { %v4620_v4 = vld [vmem:[%s20622_s11 + $0xe8] sm:$0xff]  ;;  %v4619_v5 = vld [vmem:[%s20622_s11 + $0xe0] sm:$0xff]  ;;  %v4622_v7 = vld [vmem:[%s20622_s11 + $0xf8] sm:$0xff] }
 0x1bd   :  { %493 = vperm.xlu1 %16013, %v436_v11   ;;  %490 = vperm.xlu0 %16012, %v435_v12   ;;  %v4621_v8 = vld [vmem:[%s20622_s11 + $0xf0] sm:$0xff]  ;;  %v4624_v10 = vld [vmem:[%s20622_s11 + $0x108] sm:$0xff]  ;;  %v4623_v11 = vld [vmem:[%s20622_s11 + $0x100] sm:$0xff] }
 0x1be   :  { %v4625_v17 = vld [vmem:[%s20622_s11 + $0x110] sm:$0xff] }
 0x1c1   :  { %499 = vperm.xlu1 %16013, %v438_v15   ;;  %496 = vperm.xlu0 %16012, %v437_v16   ;;  %v4626_v16 = vld [vmem:[%s20622_s11 + $0x118] sm:$0xff] }
 0x1c5   :  { %505 = vperm.xlu1 %16013, %v440_v22   ;;  %502 = vperm.xlu0 %16012, %v439_v23   ;;  %v4628_v23 = vld [vmem:[%s20622_s11 + $0x128] sm:$0xff] }
 0x1c9   :  { %511 = vperm.xlu1 %16013, %v442_v24   ;;  %508 = vperm.xlu0 %16012, %v441_v25   ;;  %v4627_v24 = vld [vmem:[%s20622_s11 + $0x120] sm:$0xff] }
 0x1cd   :  { %517 = vperm.xlu1 %16013, %v444_v26   ;;  %514 = vperm.xlu0 %16012, %v443_v27  }
 0x1d1   :  { %523 = vperm.xlu1 %16013, %v446_v28   ;;  %520 = vperm.xlu0 %16012, %v445_v29   ;;  %v4630_v29 = vld [vmem:[%s20622_s11 + $0x138] sm:$0xff] }
 0x1d5   :  { %529 = vperm.xlu1 %16013, %v448_v30   ;;  %526 = vperm.xlu0 %16012, %v447_v31   ;;  %v4629_v30 = vld [vmem:[%s20622_s11 + $0x130] sm:$0xff] }
 0x1d9   :  { %535 = vperm.xlu1 %16013, %v450_v32   ;;  %532 = vperm.xlu0 %16012, %v449_v33  }
 0x1dd   :  { %541 = vperm.xlu1 %16013, %v452_v34   ;;  %538 = vperm.xlu0 %16012, %v451_v35   ;;  %v4632_v35 = vld [vmem:[%s20622_s11 + $0x148] sm:$0xff] }
 0x1e1   :  { %547 = vperm.xlu1 %16013, %v454_v36   ;;  %544 = vperm.xlu0 %16012, %v453_v37   ;;  %v4631_v36 = vld [vmem:[%s20622_s11 + $0x140] sm:$0xff] }
 0x1e5   :  { %553 = vperm.xlu1 %16013, %v456_v38   ;;  %550 = vperm.xlu0 %16012, %v455_v39  }
 0x1e9   :  { %4643 = vperm.xlu1 %16013, %v4592_v40   ;;  %4640 = vperm.xlu0 %16012, %v4591_v41   ;;  %v4634_v41 = vld [vmem:[%s20622_s11 + $0x158] sm:$0xff] }
 0x1ed   :  { %4649 = vperm.xlu1 %16013, %v4594_v42   ;;  %4646 = vperm.xlu0 %16012, %v4593_v43   ;;  %v4633_v42 = vld [vmem:[%s20622_s11 + $0x150] sm:$0xff] }
 0x1f1   :  { %4655 = vperm.xlu1 %16013, %v4596_v44   ;;  %4652 = vperm.xlu0 %16012, %v4595_v45  }
 0x1f5   :  { %4661 = vperm.xlu1 %16013, %v4598_v46   ;;  %4658 = vperm.xlu0 %16012, %v4597_v47   ;;  %v4636_v47 = vld [vmem:[%s20622_s11 + $0x168] sm:$0xff] }
 0x1f9   :  { %4667 = vperm.xlu1 %16013, %v4600_v48   ;;  %4664 = vperm.xlu0 %16012, %v4599_v49   ;;  %v4635_v48 = vld [vmem:[%s20622_s11 + $0x160] sm:$0xff] }
 0x1fd   :  { %4673 = vperm.xlu1 %16013, %v4602_v50   ;;  %4670 = vperm.xlu0 %16012, %v4601_v51  }
 0x201   :  { %4679 = vperm.xlu1 %16013, %v4604_v52   ;;  %4676 = vperm.xlu0 %16012, %v4603_v53   ;;  %v4638_v53 = vld [vmem:[%s20622_s11 + $0x178] sm:$0xff] }
 0x205   :  { %4685 = vperm.xlu1 %16013, %v4606_v54   ;;  %4682 = vperm.xlu0 %16012, %v4605_v55   ;;  %v4637_v54 = vld [vmem:[%s20622_s11 + $0x170] sm:$0xff]  ;;  %s11702_s11 = scalar_lea.vmem [#allocation2], %s12630_s4 }
 0x209   :  { %4691 = vperm.xlu1 %16013, %v4608_v56   ;;  %4688 = vperm.xlu0 %16012, %v4607_v57  }
 0x20d   :  { %4697 = vperm.xlu1 %16013, %v4610_v58   ;;  %4694 = vperm.xlu0 %16012, %v4609_v59  }
 0x211   :  { %4703 = vperm.xlu1 %16013, %v4612_v60   ;;  %4700 = vperm.xlu0 %16012, %v4611_v61  }
 0x215   :  { %4709 = vperm.xlu1 %16013, %v4614_v62   ;;  %4706 = vperm.xlu0 %16012, %v4613_v63  }
 0x219   :  { %4715 = vperm.xlu1 %16013, %v4616_v0   ;;  %4712 = vperm.xlu0 %16012, %v4615_v1  }
 0x21d   :  { %4721 = vperm.xlu1 %16013, %v4618_v2   ;;  %4718 = vperm.xlu0 %16012, %v4617_v3  }
 0x221   :  { %4727 = vperm.xlu1 %16013, %v4620_v4   ;;  %4724 = vperm.xlu0 %16012, %v4619_v5  }
 0x225   :  { %4733 = vperm.xlu1 %16013, %v4622_v7   ;;  %4730 = vperm.xlu0 %16012, %v4621_v8  }
 0x228   :  { %v467_v12 = vpop.permute.xlu1 %466  ;;  %v461_v13 = vpop.permute.xlu0 %460 }
 0x229   :  { %4739 = vperm.xlu1 %16013, %v4624_v10   ;;  %4736 = vperm.xlu0 %16012, %v4623_v11   ;;  %vm555_vm4 = vcmp.eq.s32.totalorder %v17057_v9, %v461_v13  ;;  %vm557_vm5 = vcmp.eq.s32.totalorder %v17057_v9, %v467_v12 }
 0x22a   :  { %v11814_v15 = vsel %vm555_vm4, 1.0, %v20566_v14  ;;  %v11816_v20 = vsel %vm557_vm5, 1.0, %v20566_v14 }
 0x22b   :  { %13636 = vmatprep.mubr.msk.f32.mxu0 %vm655_vm3, %v11814_v15 }
 0x22c   :  { %v470_v18 = vpop.permute.xlu1 %469  ;;  %v464_v19 = vpop.permute.xlu0 %463 }
 0x22d   :  { %vm556_vm6 = vcmp.eq.s32.totalorder %v17057_v9, %v464_v19  ;;  %4745 = vperm.xlu1 %16013, %v4626_v16   ;;  %4742 = vperm.xlu0 %16012, %v4625_v17   ;;  %vm558_vm7 = vcmp.eq.s32.totalorder %v17057_v9, %v470_v18 }
 0x22e   :  { %v11815_v22 = vsel %vm556_vm6, 1.0, %v20566_v14  ;;  %v11817_v27 = vsel %vm558_vm7, 1.0, %v20566_v14 }
 0x22f   :  { %13637 = vmatmul.mubr.msk.f32.vlgmr.msra.gmra.mrb[0].mxu0 %vm655_vm3, %v11815_v22 }
 0x230   :  { %v476_v25 = vpop.permute.xlu1 %475  ;;  %13639 = vmatprep.mubr.msk.f32.mxu0 %vm655_vm3, %v11816_v20  ;;  %v473_v26 = vpop.permute.xlu0 %472 }
 0x231   :  { %vm559_vm8 = vcmp.eq.s32.totalorder %v17057_v9, %v473_v26  ;;  %4751 = vperm.xlu1 %16013, %v4628_v23   ;;  %4748 = vperm.xlu0 %16012, %v4627_v24   ;;  %vm560_vm9 = vcmp.eq.s32.totalorder %v17057_v9, %v476_v25 }
 0x232   :  { %v11818_v28 = vsel %vm559_vm8, 1.0, %v20566_v14  ;;  %v11819_v33 = vsel %vm560_vm9, 1.0, %v20566_v14 }
 0x233   :  { %13640 = vmatmul.mubr.msk.f32.gmra.mrb[2].mxu0 %vm655_vm3, %v11817_v27 }
 0x234   :  { %v482_v31 = vpop.permute.xlu1 %481  ;;  %13642 = vmatprep.mubr.msk.f32.mxu0 %vm655_vm3, %v11818_v28  ;;  %v479_v32 = vpop.permute.xlu0 %478 }
 0x235   :  { %vm561_vm10 = vcmp.eq.s32.totalorder %v17057_v9, %v479_v32  ;;  %4757 = vperm.xlu1 %16013, %v4630_v29   ;;  %4754 = vperm.xlu0 %16012, %v4629_v30   ;;  %vm562_vm11 = vcmp.eq.s32.totalorder %v17057_v9, %v482_v31  ;;  %v986_v32 = vld [vmem:[#allocation8 + $0x20] sm:$0xff] }
 0x236   :  { %v11820_v34 = vsel %vm561_vm10, 1.0, %v20566_v14  ;;  %v11821_v39 = vsel %vm562_vm11, 1.0, %v20566_v14 }
 0x237   :  { %13643 = vmatmul.mubr.msk.f32.gmra.mrb[4].mxu0 %vm655_vm3, %v11819_v33  ;;  %v987_v33 = vld [vmem:[#allocation8 + $0x28] sm:$0xff] }
 0x238   :  { %v488_v37 = vpop.permute.xlu1 %487  ;;  %13645 = vmatprep.mubr.msk.f32.mxu0 %vm655_vm3, %v11820_v34  ;;  %v485_v38 = vpop.permute.xlu0 %484  ;;  %v15193_v34 = vpack.c.bf16 %v987_v33, %v986_v32 }
 0x239   :  { %vm563_vm12 = vcmp.eq.s32.totalorder %v17057_v9, %v485_v38  ;;  %4763 = vperm.xlu1 %16013, %v4632_v35   ;;  %4760 = vperm.xlu0 %16012, %v4631_v36   ;;  %vm564_vm13 = vcmp.eq.s32.totalorder %v17057_v9, %v488_v37  ;;  %v988_v35 = vld [vmem:[#allocation8 + $0x30] sm:$0xff]  ;;  %v989_v36 = vld [vmem:[#allocation8 + $0x38] sm:$0xff]  ;;  %v981_v38 = vld [vmem:[#allocation8] sm:$0xff] }
 0x23a   :  { %v11822_v40 = vsel %vm563_vm12, 1.0, %v20566_v14  ;;  %v11823_v45 = vsel %vm564_vm13, 1.0, %v20566_v14  ;;  %15194 = vmatprep.subr.bf16.mxu1 %v15193_v34  ;;  %v15197_v37 = vpack.c.bf16 %v989_v36, %v988_v35 }
 0x23b   :  { %13646 = vmatmul.mubr.msk.f32.gmra.mrb[6].mxu0 %vm655_vm3, %v11821_v39  ;;  %15196 = vmatpush3.bf16.msra.mxu1 %v15193_v34  ;;  %v982_v39 = vld [vmem:[#allocation8 + $0x8] sm:$0xff] }
 0x23c   :  { %v494_v43 = vpop.permute.xlu1 %493  ;;  %13648 = vmatprep.mubr.msk.f32.mxu0 %vm655_vm3, %v11822_v40  ;;  %v491_v44 = vpop.permute.xlu0 %490  ;;  %15198 = vmatprep.subr.bf16.mxu1 %v15197_v37  ;;  %v15201_v40 = vpack.c.bf16 %v982_v39, %v981_v38 }
 0x23d   :  { %vm565_vm14 = vcmp.eq.s32.totalorder %v17057_v9, %v491_v44  ;;  %4769 = vperm.xlu1 %16013, %v4634_v41   ;;  %4766 = vperm.xlu0 %16012, %v4633_v42   ;;  %vm566_vm15 = vcmp.eq.s32.totalorder %v17057_v9, %v494_v43 }
 0x23e   :  { %v11824_v46 = vsel %vm565_vm14, 1.0, %v20566_v14  ;;  %v11825_v51 = vsel %vm566_vm15, 1.0, %v20566_v14 }
 0x23f   :  { %13649 = vmatmul.mubr.msk.f32.gmra.mrb[8].mxu0 %vm655_vm3, %v11823_v45  ;;  %15200 = vmatpush3.bf16.msra.mxu1 %v15197_v37 }
 0x240   :  { %v500_v49 = vpop.permute.xlu1 %499  ;;  %13651 = vmatprep.mubr.msk.f32.mxu0 %vm655_vm3, %v11824_v46  ;;  %v497_v50 = vpop.permute.xlu0 %496  ;;  %15202 = vmatprep.subr.bf16.mxu1 %v15201_v40 }
 0x241   :  { %vm567_vm4 = vcmp.eq.s32.totalorder %v17057_v9, %v497_v50  ;;  %4775 = vperm.xlu1 %16013, %v4636_v47   ;;  %4772 = vperm.xlu0 %16012, %v4635_v48   ;;  %vm568_vm5 = vcmp.eq.s32.totalorder %v17057_v9, %v500_v49 }
 0x242   :  { %v11826_v52 = vsel %vm567_vm4, 1.0, %v20566_v14  ;;  %v11827_v57 = vsel %vm568_vm5, 1.0, %v20566_v14 }
 0x243   :  { %13652 = vmatmul.mubr.msk.f32.gmra.mrb[10].mxu0 %vm655_vm3, %v11825_v51  ;;  %v983_v51 = vld [vmem:[#allocation8 + $0x10] sm:$0xff] }
 0x244   :  { %v506_v55 = vpop.permute.xlu1 %505  ;;  %13654 = vmatprep.mubr.msk.f32.mxu0 %vm655_vm3, %v11826_v52  ;;  %v503_v56 = vpop.permute.xlu0 %502 }
 0x245   :  { %vm569_vm6 = vcmp.eq.s32.totalorder %v17057_v9, %v503_v56  ;;  %4781 = vperm.xlu1 %16013, %v4638_v53   ;;  %4778 = vperm.xlu0 %16012, %v4637_v54   ;;  %vm570_vm7 = vcmp.eq.s32.totalorder %v17057_v9, %v506_v55  ;;  %v984_v54 = vld [vmem:[#allocation8 + $0x18] sm:$0xff]  ;;  %v1666_v55 = vld [vmem:[#allocation8 + $0x40] sm:$0xff]  ;;  %v1667_v56 = vld [vmem:[#allocation8 + $0x48] sm:$0xff] }
 0x246   :  { %v11828_v58 = vsel %vm569_vm6, 1.0, %v20566_v14  ;;  %v11829_v61 = vsel %vm570_vm7, 1.0, %v20566_v14 }
 0x247   :  { %13655 = vmatmul.mubr.msk.f32.gmra.mrb[12].mxu0 %vm655_vm3, %v11827_v57 }
 0x248   :  { %v512_v59 = vpop.permute.xlu1 %511  ;;  %13657 = vmatprep.mubr.msk.f32.mxu0 %vm655_vm3, %v11828_v58  ;;  %v509_v60 = vpop.permute.xlu0 %508 }
 0x249   :  { %vm571_vm8 = vcmp.eq.s32.totalorder %v17057_v9, %v509_v60  ;;  %vm572_vm9 = vcmp.eq.s32.totalorder %v17057_v9, %v512_v59 }
 0x24a   :  { %v11830_v62 = vsel %vm571_vm8, 1.0, %v20566_v14  ;;  %v11831_v1 = vsel %vm572_vm9, 1.0, %v20566_v14 }
 0x24b   :  { %13658 = vmatmul.mubr.msk.f32.gmra.mrb[14].mxu0 %vm655_vm3, %v11829_v61 }
 0x24c   :  { %v518_v63 = vpop.permute.xlu1 %517  ;;  %13660 = vmatprep.mubr.msk.f32.mxu0 %vm655_vm3, %v11830_v62  ;;  %v515_v0 = vpop.permute.xlu0 %514 }
 0x24d   :  { %vm573_vm10 = vcmp.eq.s32.totalorder %v17057_v9, %v515_v0  ;;  %vm574_vm11 = vcmp.eq.s32.totalorder %v17057_v9, %v518_v63 }
 0x24e   :  { %v11832_v2 = vsel %vm573_vm10, 1.0, %v20566_v14  ;;  %v11833_v5 = vsel %vm574_vm11, 1.0, %v20566_v14 }
 0x24f   :  { %13661 = vmatmul.mubr.msk.f32.gmra.mrb[16].mxu0 %vm655_vm3, %v11831_v1 }
 0x250   :  { %v524_v3 = vpop.permute.xlu1 %523  ;;  %13663 = vmatprep.mubr.msk.f32.mxu0 %vm655_vm3, %v11832_v2  ;;  %v521_v4 = vpop.permute.xlu0 %520 }
 0x251   :  { %vm575_vm12 = vcmp.eq.s32.totalorder %v17057_v9, %v521_v4  ;;  %vm576_vm13 = vcmp.eq.s32.totalorder %v17057_v9, %v524_v3  ;;  %v15205_v3 = vpack.c.bf16 %v984_v54, %v983_v51  ;;  %v17204_v4 = vpack.c.bf16 %v1667_v56, %v1666_v55 }
 0x252   :  { %v11834_v7 = vsel %vm575_vm12, 1.0, %v20566_v14  ;;  %v11835_v11 = vsel %vm576_vm13, 1.0, %v20566_v14  ;;  %vm1022_vm12 = vcmask 1046528   ;;  %vm1086_vm13 = vcmask 261120  }
 0x253   :  { %13664 = vmatmul.mubr.msk.f32.gmra.mrb[18].mxu0 %vm655_vm3, %v11833_v5 }
 0x254   :  { %v530_v8 = vpop.permute.xlu1 %529  ;;  %13666 = vmatprep.mubr.msk.f32.mxu0 %vm655_vm3, %v11834_v7  ;;  %v527_v10 = vpop.permute.xlu0 %526 }
 0x255   :  { %vm577_vm14 = vcmp.eq.s32.totalorder %v17057_v9, %v527_v10  ;;  %vm578_vm15 = vcmp.eq.s32.totalorder %v17057_v9, %v530_v8 }
 0x256   :  { %v11836_v12 = vsel %vm577_vm14, 1.0, %v20566_v14  ;;  %v11837_v16 = vsel %vm578_vm15, 1.0, %v20566_v14  ;;  %vm2059_vm14 = vcmask 1044480   ;;  %vm2893_vm15 = vcmask 1014784  }
 0x257   :  { %13667 = vmatmul.mubr.msk.f32.gmra.mrb[20].mxu0 %vm655_vm3, %v11835_v11 }
 0x258   :  { %v536_v13 = vpop.permute.xlu1 %535  ;;  %13669 = vmatprep.mubr.msk.f32.mxu0 %vm655_vm3, %v11836_v12  ;;  %v533_v15 = vpop.permute.xlu0 %532 }
 0x259   :  { %vm579_vm4 = vcmp.eq.s32.totalorder %v17057_v9, %v533_v15  ;;  %vm580_vm5 = vcmp.eq.s32.totalorder %v17057_v9, %v536_v13 }
 0x25a   :  { %v11838_v17 = vsel %vm579_vm4, 1.0, %v20566_v14  ;;  %v11839_v20 = vsel %vm580_vm5, 1.0, %v20566_v14  ;;  %vm3086_vm5 = vcmask 130048  }
 0x25b   :  { %13670 = vmatmul.mubr.msk.f32.gmra.mrb[22].mxu0 %vm655_vm3, %v11837_v16 }
 0x25c   :  { %v542_v18 = vpop.permute.xlu1 %541  ;;  %13672 = vmatprep.mubr.msk.f32.mxu0 %vm655_vm3, %v11838_v17  ;;  %v539_v19 = vpop.permute.xlu0 %538 }
 0x25d   :  { %vm581_vm6 = vcmp.eq.s32.totalorder %v17057_v9, %v539_v19  ;;  %vm582_vm7 = vcmp.eq.s32.totalorder %v17057_v9, %v542_v18 }
 0x25e   :  { %v11840_v22 = vsel %vm581_vm6, 1.0, %v20566_v14  ;;  %v11841_v25 = vsel %vm582_vm7, 1.0, %v20566_v14  ;;  %vm16564_vm6 = vmmov 0   ;;  %vm3544_vm7 = vcmask 637952  }
 0x25f   :  { %13673 = vmatmul.mubr.msk.f32.gmra.mrb[24].mxu0 %vm655_vm3, %v11839_v20 }
 0x260   :  { %v548_v23 = vpop.permute.xlu1 %547  ;;  %13675 = vmatprep.mubr.msk.f32.mxu0 %vm655_vm3, %v11840_v22  ;;  %v545_v24 = vpop.permute.xlu0 %544 }
 0x261   :  { %vm583_vm8 = vcmp.eq.s32.totalorder %v17057_v9, %v545_v24  ;;  %vm584_vm9 = vcmp.eq.s32.totalorder %v17057_v9, %v548_v23 }
 0x262   :  { %v11842_v26 = vsel %vm583_vm8, 1.0, %v20566_v14  ;;  %v11843_v29 = vsel %vm584_vm9, 1.0, %v20566_v14  ;;  %vm3891_vm9 = vcmask 1042432  }
 0x263   :  { %13676 = vmatmul.mubr.msk.f32.gmra.mrb[26].mxu0 %vm655_vm3, %v11841_v25 }
 0x264   :  { %v554_v27 = vpop.permute.xlu1 %553  ;;  %13678 = vmatprep.mubr.msk.f32.mxu0 %vm655_vm3, %v11842_v26  ;;  %v551_v28 = vpop.permute.xlu0 %550 }
 0x265   :  { %vm585_vm10 = vcmp.eq.s32.totalorder %v17057_v9, %v551_v28  ;;  %vm586_vm11 = vcmp.eq.s32.totalorder %v17057_v9, %v554_v27 }
 0x266   :  { %v11844_v30 = vsel %vm585_vm10, 1.0, %v20566_v14  ;;  %v11845_v31 = vsel %vm586_vm11, 1.0, %v20566_v14  ;;  %vm3887_vm10 = vcmask 154624   ;;  %vm5076_vm11 = vcmask 1041408  }
 0x267   :  { %13679 = vmatmul.mubr.msk.f32.gmra.mrb[28].mxu0 %vm655_vm3, %v11843_v29 }
 0x268   :  { %13681 = vmatprep.mubr.msk.f32.mxu0 %vm655_vm3, %v11844_v30 }
 0x26b   :  { %13682 = vmatmul.mubr.msk.f32.gmra.mrb[30].mxu0 %vm655_vm3, %v11845_v31  ;;  %vm2449_vm3 = vcmask 1043456  }
 0x26c   :  { %vm18012_vm4 = vmpackc.low %vm2449_vm3, %vm20571_vm1 }
 0x302   :  { %v17171_v41 = vpop.f32.mrb[0].mxu0 }
 0x303   :  { %v17173_v42 = vpop.f32.mrb[1].mxu0  ;;  %v1024_v43 = vrot.slane %v17171_v41, 1  ;;  %v1671_v44 = vrot.slane %v17171_v41, 2  ;;  %v2061_v45 = vrot.slane %v17171_v41, 3  ;;  %v2451_v46 = vrot.slane %v17171_v41, 4 }
 0x304   :  { %v1023_v47 = vrot.slane %v17173_v42, 1  ;;  %v1670_v48 = vrot.slane %v17173_v42, 2  ;;  %v2060_v49 = vrot.slane %v17173_v42, 3  ;;  %v2450_v50 = vrot.slane %v17173_v42, 4 }
 0x306   :  { %v17183_v52 = vpop.f32.mrb[2].mxu0  ;;  %v1025_v53 = vsel %vm1022_vm12, %v1023_v47, %v1024_v43  ;;  %v17187_v57 = vsel %vm752_vm0, %v1670_v48, %v1671_v44  ;;  %v17190_v58 = vsel %vm2059_vm14, %v2060_v49, %v2061_v45  ;;  %v17193_v59 = vsel %vm2449_vm3, %v2450_v50, %v2451_v46 }
 0x307   :  { %20624 = vst [vmem:[#allocation75_spill] sm:$0xff] %v17190_v58  ;;  %20625 = vst [vmem:[#allocation76_spill] sm:$0xff] %v17193_v59  ;;  %v17195_v60 = vpop.f32.mrb[3].mxu0  ;;  %13692 = vmatprep.mubr.msk.f32.mxu1 %vm1086_vm13, %v1025_v53  ;;  %v1028_v61 = vrot.slane %v17183_v52, 1  ;;  %v1675_v62 = vrot.slane %v17183_v52, 2  ;;  %v2065_v63 = vrot.slane %v17183_v52, 3 }
 0x308   :  { %v1026_v0 = vrot.slane %v17195_v60, 1  ;;  %v1673_v1 = vrot.slane %v17195_v60, 2  ;;  %v2063_v2 = vrot.slane %v17195_v60, 3  ;;  %v2453_v5 = vrot.slane %v17195_v60, 4 }
 0x309   :  { %v2455_v7 = vrot.slane %v17183_v52, 4 }
 0x30a   :  { %v17208_v8 = vpop.f32.mrb[4].mxu0  ;;  %v1027_v10 = vsel %vm1022_vm12, %v1024_v43, %v1026_v0  ;;  %v1029_v11 = vsel %vm1022_vm12, %v1026_v0, %v1028_v61  ;;  %v17213_v12 = vsel %vm752_vm0, %v1671_v44, %v1673_v1  ;;  %v17216_v13 = vsel %vm752_vm0, %v1673_v1, %v1675_v62 }
 0x30b   :  { %v17218_v15 = vpop.f32.mrb[5].mxu0  ;;  %13693 = vmatmul.mubr.msk.f32.vlgmr.msra.gmra.mrb[0].mxu1 %vm1086_vm13, %v1027_v10  ;;  %v1032_v16 = vrot.slane %v17208_v8, 1  ;;  %v1679_v17 = vrot.slane %v17208_v8, 2  ;;  %v17224_v18 = vsel %vm2059_vm14, %v2061_v45, %v2063_v2  ;;  %v17227_v19 = vsel %vm2059_vm14, %v2063_v2, %v2065_v63 }
 0x30c   :  { %20626 = vst [vmem:[#allocation77_spill] sm:$0xff] %v17224_v18  ;;  %20627 = vst [vmem:[#allocation78_spill] sm:$0xff] %v17227_v19  ;;  %13695 = vmatprep.mubr.msk.f32.mxu1 %vm1086_vm13, %v1029_v11  ;;  %v1030_v20 = vrot.slane %v17218_v15, 1  ;;  %15204 = vmatpush3.bf16.msra.mxu1 %v15201_v40  ;;  %v1677_v22 = vrot.slane %v17218_v15, 2  ;;  %v2067_v23 = vrot.slane %v17218_v15, 3  ;;  %v2069_v24 = vrot.slane %v17208_v8, 3 }
 0x30d   :  { %15206 = vmatprep.subr.bf16.mxu1 %v15205_v3  ;;  %v17235_v25 = vsel %vm2449_vm3, %v2451_v46, %v2453_v5  ;;  %v17238_v26 = vsel %vm2449_vm3, %v2453_v5, %v2455_v7  ;;  %v2457_v27 = vrot.slane %v17218_v15, 4  ;;  %v2459_v28 = vrot.slane %v17208_v8, 4 }
 0x30e   :  { %20628 = vst [vmem:[#allocation79_spill] sm:$0xff] %v17235_v25  ;;  %20629 = vst [vmem:[#allocation80_spill] sm:$0xff] %v17238_v26  ;;  %v17242_v29 = vpop.f32.mrb[6].mxu0  ;;  %v1031_v30 = vsel %vm1022_vm12, %v1028_v61, %v1030_v20  ;;  %v1033_v31 = vsel %vm1022_vm12, %v1030_v20, %v1032_v16  ;;  %v17247_v32 = vsel %vm752_vm0, %v1675_v62, %v1677_v22 }
 0x30f   :  { %v17250_v33 = vsel %vm752_vm0, %v1677_v22, %v1679_v17  ;;  %v17252_v34 = vpop.f32.mrb[7].mxu0  ;;  %13696 = vmatmul.mubr.msk.f32.gmra.mrb[2].mxu1 %vm1086_vm13, %v1031_v30  ;;  %v1036_v35 = vrot.slane %v17242_v29, 1  ;;  %v1683_v36 = vrot.slane %v17242_v29, 2  ;;  %v17258_v37 = vsel %vm2059_vm14, %v2065_v63, %v2067_v23 }
 0x310   :  { %20630 = vst [vmem:[#allocation81_spill] sm:$0xff] %v17258_v37  ;;  %v17261_v38 = vsel %vm2059_vm14, %v2067_v23, %v2069_v24  ;;  %13698 = vmatprep.mubr.msk.f32.mxu1 %vm1086_vm13, %v1033_v31  ;;  %v1034_v39 = vrot.slane %v17252_v34, 1  ;;  %15208 = vmatpush3.bf16.msra.mxu1 %v15205_v3  ;;  %v1681_v40 = vrot.slane %v17252_v34, 2  ;;  %v2071_v43 = vrot.slane %v17252_v34, 3 }
 0x311   :  { %20631 = vst [vmem:[#allocation82_spill] sm:$0xff] %v17261_v38  ;;  %v2073_v44 = vrot.slane %v17242_v29, 3  ;;  %15210 = vmatprep.subr.bf16.mxu1 %v17204_v4  ;;  %v17270_v45 = vsel %vm2449_vm3, %v2455_v7, %v2457_v27  ;;  %v17273_v46 = vsel %vm2449_vm3, %v2457_v27, %v2459_v28  ;;  %v2461_v47 = vrot.slane %v17252_v34, 4 }
 0x312   :  { %20632 = vst [vmem:[#allocation83_spill] sm:$0xff] %v17270_v45  ;;  %20633 = vst [vmem:[#allocation84_spill] sm:$0xff] %v17273_v46  ;;  %v2463_v48 = vrot.slane %v17242_v29, 4  ;;  %v17277_v49 = vpop.f32.mrb[8].mxu0  ;;  %v1035_v50 = vsel %vm1022_vm12, %v1032_v16, %v1034_v39  ;;  %v1037_v51 = vsel %vm1022_vm12, %v1034_v39, %v1036_v35  ;;  %v17282_v53 = vsel %vm752_vm0, %v1679_v17, %v1681_v40 }
 0x313   :  { %v17285_v54 = vsel %vm752_vm0, %v1681_v40, %v1683_v36  ;;  %v17287_v55 = vpop.f32.mrb[9].mxu0  ;;  %13699 = vmatmul.mubr.msk.f32.gmra.mrb[4].mxu1 %vm1086_vm13, %v1035_v50  ;;  %v1040_v56 = vrot.slane %v17277_v49, 1  ;;  %v1687_v61 = vrot.slane %v17277_v49, 2  ;;  %v17293_v62 = vsel %vm2059_vm14, %v2069_v24, %v2071_v43 }
 0x314   :  { %20634 = vst [vmem:[#allocation85_spill] sm:$0xff] %v17293_v62  ;;  %v17296_v63 = vsel %vm2059_vm14, %v2071_v43, %v2073_v44  ;;  %13701 = vmatprep.mubr.msk.f32.mxu1 %vm1086_vm13, %v1037_v51  ;;  %v1038_v0 = vrot.slane %v17287_v55, 1  ;;  %v1685_v1 = vrot.slane %v17287_v55, 2  ;;  %v2075_v2 = vrot.slane %v17287_v55, 3 }
 0x315   :  { %20635 = vst [vmem:[#allocation86_spill] sm:$0xff] %v17296_v63  ;;  %v2077_v3 = vrot.slane %v17277_v49, 3  ;;  %v17304_v5 = vsel %vm2449_vm3, %v2459_v28, %v2461_v47  ;;  %v17307_v7 = vsel %vm2449_vm3, %v2461_v47, %v2463_v48  ;;  %v2465_v10 = vrot.slane %v17287_v55, 4 }
 0x316   :  { %20636 = vst [vmem:[#allocation87_spill] sm:$0xff] %v17304_v5  ;;  %20637 = vst [vmem:[#allocation88_spill] sm:$0xff] %v17307_v7  ;;  %v2467_v11 = vrot.slane %v17277_v49, 4  ;;  %v17311_v16 = vpop.f32.mrb[10].mxu0  ;;  %v1039_v17 = vsel %vm1022_vm12, %v1036_v35, %v1038_v0  ;;  %v1041_v20 = vsel %vm1022_vm12, %v1038_v0, %v1040_v56  ;;  %v17316_v22 = vsel %vm752_vm0, %v1683_v36, %v1685_v1 }
 0x317   :  { %v17319_v23 = vsel %vm752_vm0, %v1685_v1, %v1687_v61  ;;  %v17321_v24 = vpop.f32.mrb[11].mxu0  ;;  %13702 = vmatmul.mubr.msk.f32.gmra.mrb[6].mxu1 %vm1086_vm13, %v1039_v17  ;;  %v1044_v27 = vrot.slane %v17311_v16, 1  ;;  %v1691_v28 = vrot.slane %v17311_v16, 2  ;;  %v17327_v30 = vsel %vm2059_vm14, %v2073_v44, %v2075_v2 }
 0x318   :  { %20638 = vst [vmem:[#allocation89_spill] sm:$0xff] %v17327_v30  ;;  %v17330_v31 = vsel %vm2059_vm14, %v2075_v2, %v2077_v3  ;;  %13704 = vmatprep.mubr.msk.f32.mxu1 %vm1086_vm13, %v1041_v20  ;;  %v1042_v35 = vrot.slane %v17321_v24, 1  ;;  %v1689_v36 = vrot.slane %v17321_v24, 2  ;;  %v2079_v39 = vrot.slane %v17321_v24, 3 }
 0x319   :  { %20639 = vst [vmem:[#allocation90_spill] sm:$0xff] %v17330_v31  ;;  %v2081_v40 = vrot.slane %v17311_v16, 3  ;;  %v17338_v43 = vsel %vm2449_vm3, %v2463_v48, %v2465_v10  ;;  %v17341_v47 = vsel %vm2449_vm3, %v2465_v10, %v2467_v11  ;;  %v2469_v44 = vrot.slane %v17321_v24, 4 }
 0x31a   :  { %20640 = vst [vmem:[#allocation91_spill] sm:$0xff] %v17338_v43  ;;  %20641 = vst [vmem:[#allocation92_spill] sm:$0xff] %v17341_v47  ;;  %v2471_v50 = vrot.slane %v17311_v16, 4  ;;  %v17345_v51 = vpop.f32.mrb[12].mxu0  ;;  %v1043_v0 = vsel %vm1022_vm12, %v1040_v56, %v1042_v35  ;;  %v1045_v1 = vsel %vm1022_vm12, %v1042_v35, %v1044_v27  ;;  %v17350_v2 = vsel %vm752_vm0, %v1687_v61, %v1689_v36 }
 0x31b   :  { %v17353_v17 = vsel %vm752_vm0, %v1689_v36, %v1691_v28  ;;  %v17355_v48 = vpop.f32.mrb[13].mxu0  ;;  %13705 = vmatmul.mubr.msk.f32.gmra.mrb[8].mxu1 %vm1086_vm13, %v1043_v0  ;;  %v1048_v10 = vrot.slane %v17345_v51, 1  ;;  %v1695_v20 = vrot.slane %v17345_v51, 2  ;;  %v17361_v6 = vsel %vm2059_vm14, %v2077_v3, %v2079_v39 }
 0x31c   :  { %20642 = vst [vmem:[#allocation93_spill] sm:$0xff] %v17361_v6  ;;  %v17364_v56 = vsel %vm2059_vm14, %v2079_v39, %v2081_v40  ;;  %13707 = vmatprep.mubr.msk.f32.mxu1 %vm1086_vm13, %v1045_v1  ;;  %v1046_v61 = vrot.slane %v17355_v48, 1  ;;  %v1693_v35 = vrot.slane %v17355_v48, 2  ;;  %v2083_v36 = vrot.slane %v17355_v48, 3 }
 0x31d   :  { %20643 = vst [vmem:[#allocation94_spill] sm:$0xff] %v17364_v56  ;;  %v2085_v0 = vrot.slane %v17345_v51, 3  ;;  %v17372_v14 = vsel %vm2449_vm3, %v2467_v11, %v2469_v44  ;;  %v17375_v9 = vsel %vm2449_vm3, %v2469_v44, %v2471_v50  ;;  %v2473_v3 = vrot.slane %v17355_v48, 4 }
 0x31e   :  { %20644 = vst [vmem:[#allocation95_spill] sm:$0xff] %v17372_v14  ;;  %20645 = vst [vmem:[#allocation96_spill] sm:$0xff] %v17375_v9  ;;  %v2475_v39 = vrot.slane %v17345_v51, 4  ;;  %v17379_v21 = vpop.f32.mrb[14].mxu0  ;;  %v1047_v1 = vsel %vm1022_vm12, %v1044_v27, %v1046_v61  ;;  %v1049_v47 = vsel %vm1022_vm12, %v1046_v61, %v1048_v10  ;;  %v17384_v43 = vsel %vm752_vm0, %v1691_v28, %v1693_v35 }
 0x31f   :  { %v17387_v7 = vsel %vm752_vm0, %v1693_v35, %v1695_v20  ;;  %v17389_v11 = vpop.f32.mrb[15].mxu0  ;;  %13708 = vmatmul.mubr.msk.f32.gmra.mrb[10].mxu1 %vm1086_vm13, %v1047_v1  ;;  %v1052_v44 = vrot.slane %v17379_v21, 1  ;;  %v1699_v9 = vrot.slane %v17379_v21, 2  ;;  %v17395_v14 = vsel %vm2059_vm14, %v2081_v40, %v2083_v36 }
 0x320   :  { %20646 = vst [vmem:[#allocation97_spill] sm:$0xff] %v17387_v7  ;;  %20647 = vst [vmem:[#allocation98_spill] sm:$0xff] %v17395_v14  ;;  %v17398_v27 = vsel %vm2059_vm14, %v2083_v36, %v2085_v0  ;;  %13710 = vmatprep.mubr.msk.f32.mxu1 %vm1086_vm13, %v1049_v47  ;;  %v1050_v28 = vrot.slane %v17389_v11, 1  ;;  %v1697_v61 = vrot.slane %v17389_v11, 2  ;;  %v2087_v35 = vrot.slane %v17389_v11, 3 }
 0x321   :  { %20648 = vst [vmem:[#allocation99_spill] sm:$0xff] %v17398_v27  ;;  %v2089_v1 = vrot.slane %v17379_v21, 3  ;;  %v17406_v5 = vsel %vm2449_vm3, %v2471_v50, %v2473_v3  ;;  %v17409_v46 = vsel %vm2449_vm3, %v2473_v3, %v2475_v39  ;;  %v2477_v40 = vrot.slane %v17389_v11, 4 }
 0x322   :  { %20649 = vst [vmem:[#allocation100_spill] sm:$0xff] %v17406_v5  ;;  %20650 = vst [vmem:[#allocation101_spill] sm:$0xff] %v17409_v46  ;;  %v2479_v36 = vrot.slane %v17379_v21, 4  ;;  %v17413_v45 = vpop.f32.mrb[16].mxu0  ;;  %v1051_v47 = vsel %vm1022_vm12, %v1048_v10, %v1050_v28  ;;  %v1053_v26 = vsel %vm1022_vm12, %v1050_v28, %v1052_v44  ;;  %v17418_v25 = vsel %vm752_vm0, %v1695_v20, %v1697_v61 }
 0x323   :  { %20651 = vst [vmem:[#allocation102_spill] sm:$0xff] %v17418_v25  ;;  %v17421_v59 = vsel %vm752_vm0, %v1697_v61, %v1699_v9  ;;  %v17423_v50 = vpop.f32.mrb[17].mxu0  ;;  %13711 = vmatmul.mubr.msk.f32.gmra.mrb[12].mxu1 %vm1086_vm13, %v1051_v47  ;;  %v1056_v3 = vrot.slane %v17413_v45, 1  ;;  %v1703_v46 = vrot.slane %v17413_v45, 2  ;;  %v17429_v5 = vsel %vm2059_vm14, %v2085_v0, %v2087_v35 }
 0x324   :  { %20652 = vst [vmem:[#allocation103_spill] sm:$0xff] %v17421_v59  ;;  %20653 = vst [vmem:[#allocation104_spill] sm:$0xff] %v17429_v5  ;;  %v17432_v10 = vsel %vm2059_vm14, %v2087_v35, %v2089_v1  ;;  %13713 = vmatprep.mubr.msk.f32.mxu1 %vm1086_vm13, %v1053_v26  ;;  %v1054_v20 = vrot.slane %v17423_v50, 1  ;;  %v1701_v28 = vrot.slane %v17423_v50, 2  ;;  %v2091_v61 = vrot.slane %v17423_v50, 3 }
 0x325   :  { %20654 = vst [vmem:[#allocation105_spill] sm:$0xff] %v17432_v10  ;;  %v2093_v47 = vrot.slane %v17413_v45, 3  ;;  %v17440_v27 = vsel %vm2449_vm3, %v2475_v39, %v2477_v40  ;;  %v17443_v14 = vsel %vm2449_vm3, %v2477_v40, %v2479_v36  ;;  %v2481_v0 = vrot.slane %v17423_v50, 4 }
 0x326   :  { %20655 = vst [vmem:[#allocation106_spill] sm:$0xff] %v17440_v27  ;;  %20656 = vst [vmem:[#allocation107_spill] sm:$0xff] %v17443_v14  ;;  %v2483_v35 = vrot.slane %v17413_v45, 4  ;;  %v17447_v10 = vpop.f32.mrb[18].mxu0  ;;  %v1055_v26 = vsel %vm1022_vm12, %v1052_v44, %v1054_v20  ;;  %v1057_v5 = vsel %vm1022_vm12, %v1054_v20, %v1056_v3  ;;  %v17452_v56 = vsel %vm752_vm0, %v1699_v9, %v1701_v28 }
 0x327   :  { %20657 = vst [vmem:[#allocation108_spill] sm:$0xff] %v17452_v56  ;;  %v17455_v6 = vsel %vm752_vm0, %v1701_v28, %v1703_v46  ;;  %v17457_v39 = vpop.f32.mrb[19].mxu0  ;;  %13714 = vmatmul.mubr.msk.f32.gmra.mrb[14].mxu1 %vm1086_vm13, %v1055_v26  ;;  %v1060_v40 = vrot.slane %v17447_v10, 1  ;;  %v1707_v14 = vrot.slane %v17447_v10, 2  ;;  %v17463_v27 = vsel %vm2059_vm14, %v2089_v1, %v2091_v61 }
 0x328   :  { %20658 = vst [vmem:[#allocation109_spill] sm:$0xff] %v17455_v6  ;;  %20659 = vst [vmem:[#allocation110_spill] sm:$0xff] %v17463_v27  ;;  %v17466_v44 = vsel %vm2059_vm14, %v2091_v61, %v2093_v47  ;;  %13716 = vmatprep.mubr.msk.f32.mxu1 %vm1086_vm13, %v1057_v5  ;;  %v1058_v9 = vrot.slane %v17457_v39, 1  ;;  %v1705_v20 = vrot.slane %v17457_v39, 2  ;;  %v2095_v28 = vrot.slane %v17457_v39, 3 }
 0x329   :  { %20660 = vst [vmem:[#allocation111_spill] sm:$0xff] %v17466_v44  ;;  %v2097_v26 = vrot.slane %v17447_v10, 3  ;;  %v17474_v31 = vsel %vm2449_vm3, %v2479_v36, %v2481_v0  ;;  %v17477_v30 = vsel %vm2449_vm3, %v2481_v0, %v2483_v35  ;;  %v2485_v1 = vrot.slane %v17457_v39, 4 }
 0x32a   :  { %20661 = vst [vmem:[#allocation112_spill] sm:$0xff] %v17474_v31  ;;  %20662 = vst [vmem:[#allocation113_spill] sm:$0xff] %v17477_v30  ;;  %v2487_v61 = vrot.slane %v17447_v10, 4  ;;  %v17481_v44 = vpop.f32.mrb[20].mxu0  ;;  %v1059_v5 = vsel %vm1022_vm12, %v1056_v3, %v1058_v9  ;;  %v1061_v27 = vsel %vm1022_vm12, %v1058_v9, %v1060_v40  ;;  %v17486_v63 = vsel %vm752_vm0, %v1703_v46, %v1705_v20 }
 0x32b   :  { %20663 = vst [vmem:[#allocation114_spill] sm:$0xff] %v17486_v63  ;;  %v17489_v62 = vsel %vm752_vm0, %v1705_v20, %v1707_v14  ;;  %v17491_v36 = vpop.f32.mrb[21].mxu0  ;;  %13717 = vmatmul.mubr.msk.f32.gmra.mrb[16].mxu1 %vm1086_vm13, %v1059_v5  ;;  %v1064_v0 = vrot.slane %v17481_v44, 1  ;;  %v1711_v30 = vrot.slane %v17481_v44, 2  ;;  %v17497_v31 = vsel %vm2059_vm14, %v2093_v47, %v2095_v28 }
 0x32c   :  { %20664 = vst [vmem:[#allocation115_spill] sm:$0xff] %v17489_v62  ;;  %20665 = vst [vmem:[#allocation116_spill] sm:$0xff] %v17497_v31  ;;  %v17500_v3 = vsel %vm2059_vm14, %v2095_v28, %v2097_v26  ;;  %13719 = vmatprep.mubr.msk.f32.mxu1 %vm1086_vm13, %v1061_v27  ;;  %v1062_v46 = vrot.slane %v17491_v36, 1  ;;  %v1709_v9 = vrot.slane %v17491_v36, 2  ;;  %v2099_v20 = vrot.slane %v17491_v36, 3 }
 0x32d   :  { %20666 = vst [vmem:[#allocation117_spill] sm:$0xff] %v17500_v3  ;;  %v2101_v5 = vrot.slane %v17481_v44, 3  ;;  %v17508_v38 = vsel %vm2449_vm3, %v2483_v35, %v2485_v1  ;;  %v17511_v37 = vsel %vm2449_vm3, %v2485_v1, %v2487_v61  ;;  %v2489_v47 = vrot.slane %v17491_v36, 4 }
 0x32e   :  { %20667 = vst [vmem:[#allocation118_spill] sm:$0xff] %v17508_v38  ;;  %20668 = vst [vmem:[#allocation119_spill] sm:$0xff] %v17511_v37  ;;  %v2491_v28 = vrot.slane %v17481_v44, 4  ;;  %v17515_v3 = vpop.f32.mrb[22].mxu0  ;;  %v1063_v27 = vsel %vm1022_vm12, %v1060_v40, %v1062_v46  ;;  %v1065_v31 = vsel %vm1022_vm12, %v1062_v46, %v1064_v0  ;;  %v17520_v19 = vsel %vm752_vm0, %v1707_v14, %v1709_v9 }
 0x32f   :  { %20669 = vst [vmem:[#allocation120_spill] sm:$0xff] %v17520_v19  ;;  %v17523_v18 = vsel %vm752_vm0, %v1709_v9, %v1711_v30  ;;  %v17525_v35 = vpop.f32.mrb[23].mxu0  ;;  %13720 = vmatmul.mubr.msk.f32.gmra.mrb[18].mxu1 %vm1086_vm13, %v1063_v27  ;;  %v1068_v1 = vrot.slane %v17515_v3, 1  ;;  %v1715_v37 = vrot.slane %v17515_v3, 2  ;;  %v17531_v38 = vsel %vm2059_vm14, %v2097_v26, %v2099_v20 }
 0x330   :  { %20670 = vst [vmem:[#allocation121_spill] sm:$0xff] %v17523_v18  ;;  %20671 = vst [vmem:[#allocation122_spill] sm:$0xff] %v17531_v38  ;;  %v17534_v40 = vsel %vm2059_vm14, %v2099_v20, %v2101_v5  ;;  %13722 = vmatprep.mubr.msk.f32.mxu1 %vm1086_vm13, %v1065_v31  ;;  %v1066_v14 = vrot.slane %v17525_v35, 1  ;;  %v1713_v46 = vrot.slane %v17525_v35, 2  ;;  %v2103_v9 = vrot.slane %v17525_v35, 3 }
 0x331   :  { %20672 = vst [vmem:[#allocation123_spill] sm:$0xff] %v17534_v40  ;;  %v2105_v27 = vrot.slane %v17515_v3, 3  ;;  %v17542_v58 = vsel %vm2449_vm3, %v2487_v61, %v2489_v47  ;;  %v17545_v18 = vsel %vm2449_vm3, %v2489_v47, %v2491_v28  ;;  %v2493_v26 = vrot.slane %v17525_v35, 4 }
 0x332   :  { %20673 = vst [vmem:[#allocation124_spill] sm:$0xff] %v17542_v58  ;;  %20674 = vst [vmem:[#allocation125_spill] sm:$0xff] %v17545_v18  ;;  %v2495_v20 = vrot.slane %v17515_v3, 4  ;;  %v17549_v40 = vpop.f32.mrb[24].mxu0  ;;  %v1067_v31 = vsel %vm1022_vm12, %v1064_v0, %v1066_v14  ;;  %v1069_v38 = vsel %vm1022_vm12, %v1066_v14, %v1068_v1  ;;  %v17554_v19 = vsel %vm752_vm0, %v1711_v30, %v1713_v46 }
 0x333   :  { %20675 = vst [vmem:[#allocation126_spill] sm:$0xff] %v17554_v19  ;;  %v17557_v62 = vsel %vm752_vm0, %v1713_v46, %v1715_v37  ;;  %v17559_v61 = vpop.f32.mrb[25].mxu0  ;;  %13723 = vmatmul.mubr.msk.f32.gmra.mrb[20].mxu1 %vm1086_vm13, %v1067_v31  ;;  %v1072_v47 = vrot.slane %v17549_v40, 1  ;;  %v1719_v18 = vrot.slane %v17549_v40, 2  ;;  %v17565_v58 = vsel %vm2059_vm14, %v2101_v5, %v2103_v9 }
 0x334   :  { %20676 = vst [vmem:[#allocation127_spill] sm:$0xff] %v17557_v62  ;;  %20677 = vst [vmem:[#allocation128_spill] sm:$0xff] %v17565_v58  ;;  %v17568_v0 = vsel %vm2059_vm14, %v2103_v9, %v2105_v27  ;;  %13725 = vmatprep.mubr.msk.f32.mxu1 %vm1086_vm13, %v1069_v38  ;;  %v1070_v30 = vrot.slane %v17559_v61, 1  ;;  %v1717_v14 = vrot.slane %v17559_v61, 2  ;;  %v2107_v46 = vrot.slane %v17559_v61, 3 }
 0x335   :  { %20678 = vst [vmem:[#allocation129_spill] sm:$0xff] %v17568_v0  ;;  %v2109_v31 = vrot.slane %v17549_v40, 3  ;;  %v17576_v62 = vsel %vm2449_vm3, %v2491_v28, %v2493_v26  ;;  %v17579_v19 = vsel %vm2449_vm3, %v2493_v26, %v2495_v20  ;;  %v2497_v5 = vrot.slane %v17559_v61, 4 }
 0x336   :  { %20679 = vst [vmem:[#allocation130_spill] sm:$0xff] %v17576_v62  ;;  %20680 = vst [vmem:[#allocation131_spill] sm:$0xff] %v17579_v19  ;;  %v2499_v9 = vrot.slane %v17549_v40, 4  ;;  %v17583_v0 = vpop.f32.mrb[26].mxu0  ;;  %v1071_v38 = vsel %vm1022_vm12, %v1068_v1, %v1070_v30  ;;  %v1073_v58 = vsel %vm1022_vm12, %v1070_v30, %v1072_v47  ;;  %v17588_v63 = vsel %vm752_vm0, %v1715_v37, %v1717_v14 }
 0x337   :  { %20681 = vst [vmem:[#allocation132_spill] sm:$0xff] %v17588_v63  ;;  %v17591_v6 = vsel %vm752_vm0, %v1717_v14, %v1719_v18  ;;  %v17593_v28 = vpop.f32.mrb[27].mxu0  ;;  %13726 = vmatmul.mubr.msk.f32.gmra.mrb[22].mxu1 %vm1086_vm13, %v1071_v38  ;;  %v1076_v26 = vrot.slane %v17583_v0, 1  ;;  %v1723_v19 = vrot.slane %v17583_v0, 2  ;;  %v17599_v62 = vsel %vm2059_vm14, %v2105_v27, %v2107_v46 }
 0x338   :  { %20682 = vst [vmem:[#allocation133_spill] sm:$0xff] %v17591_v6  ;;  %20683 = vst [vmem:[#allocation134_spill] sm:$0xff] %v17599_v62  ;;  %v17602_v1 = vsel %vm2059_vm14, %v2107_v46, %v2109_v31  ;;  %13728 = vmatprep.mubr.msk.f32.mxu1 %vm1086_vm13, %v1073_v58  ;;  %v1074_v37 = vrot.slane %v17593_v28, 1  ;;  %v1721_v30 = vrot.slane %v17593_v28, 2  ;;  %v2111_v14 = vrot.slane %v17593_v28, 3 }
 0x339   :  { %20684 = vst [vmem:[#allocation135_spill] sm:$0xff] %v17602_v1  ;;  %v2113_v38 = vrot.slane %v17583_v0, 3  ;;  %v17610_v6 = vsel %vm2449_vm3, %v2495_v20, %v2497_v5  ;;  %v17613_v63 = vsel %vm2449_vm3, %v2497_v5, %v2499_v9  ;;  %v2501_v27 = vrot.slane %v17593_v28, 4 }
 0x33a   :  { %20685 = vst [vmem:[#allocation136_spill] sm:$0xff] %v17610_v6  ;;  %20686 = vst [vmem:[#allocation137_spill] sm:$0xff] %v17613_v63  ;;  %v2503_v46 = vrot.slane %v17583_v0, 4  ;;  %v17617_v1 = vpop.f32.mrb[28].mxu0  ;;  %v1075_v58 = vsel %vm1022_vm12, %v1072_v47, %v1074_v37  ;;  %v1077_v62 = vsel %vm1022_vm12, %v1074_v37, %v1076_v26  ;;  %v17622_v56 = vsel %vm752_vm0, %v1719_v18, %v1721_v30 }
 0x33b   :  { %20687 = vst [vmem:[#allocation138_spill] sm:$0xff] %v17622_v56  ;;  %v17625_v59 = vsel %vm752_vm0, %v1721_v30, %v1723_v19  ;;  %v17627_v20 = vpop.f32.mrb[29].mxu0  ;;  %13729 = vmatmul.mubr.msk.f32.gmra.mrb[24].mxu1 %vm1086_vm13, %v1075_v58  ;;  %v1080_v5 = vrot.slane %v17617_v1, 1  ;;  %v1727_v63 = vrot.slane %v17617_v1, 2  ;;  %v17633_v6 = vsel %vm2059_vm14, %v2109_v31, %v2111_v14 }
 0x33c   :  { %20688 = vst [vmem:[#allocation139_spill] sm:$0xff] %v17625_v59  ;;  %20689 = vst [vmem:[#allocation140_spill] sm:$0xff] %v17633_v6  ;;  %v17636_v47 = vsel %vm2059_vm14, %v2111_v14, %v2113_v38  ;;  %13731 = vmatprep.mubr.msk.f32.mxu1 %vm1086_vm13, %v1077_v62  ;;  %v1078_v18 = vrot.slane %v17627_v20, 1  ;;  %v1725_v37 = vrot.slane %v17627_v20, 2  ;;  %v2115_v30 = vrot.slane %v17627_v20, 3 }
 0x33d   :  { %20690 = vst [vmem:[#allocation141_spill] sm:$0xff] %v17636_v47  ;;  %v2117_v58 = vrot.slane %v17617_v1, 3  ;;  %v17644_v59 = vsel %vm2449_vm3, %v2499_v9, %v2501_v27  ;;  %v17647_v56 = vsel %vm2449_vm3, %v2501_v27, %v2503_v46  ;;  %v2505_v31 = vrot.slane %v17627_v20, 4 }
 0x33e   :  { %20691 = vst [vmem:[#allocation142_spill] sm:$0xff] %v17644_v59  ;;  %20692 = vst [vmem:[#allocation143_spill] sm:$0xff] %v17647_v56  ;;  %v2507_v14 = vrot.slane %v17617_v1, 4  ;;  %v17651_v47 = vpop.f32.mrb[30].mxu0  ;;  %v1079_v62 = vsel %vm1022_vm12, %v1076_v26, %v1078_v18  ;;  %v1081_v6 = vsel %vm1022_vm12, %v1078_v18, %v1080_v5  ;;  %v17656_v25 = vsel %vm752_vm0, %v1723_v19, %v1725_v37 }
 0x33f   :  { %20693 = vst [vmem:[#allocation144_spill] sm:$0xff] %v17656_v25  ;;  %v17659_v7 = vsel %vm752_vm0, %v1725_v37, %v1727_v63  ;;  %v17661_v9 = vpop.f32.mrb[31].mxu0  ;;  %13732 = vmatmul.mubr.msk.f32.gmra.mrb[26].mxu1 %vm1086_vm13, %v1079_v62  ;;  %v1084_v27 = vrot.slane %v17651_v47, 1  ;;  %v17667_v59 = vsel %vm2059_vm14, %v2113_v38, %v2115_v30  ;;  %v17670_v26 = vsel %vm2059_vm14, %v2115_v30, %v2117_v58 }
 0x340   :  { %20694 = vst [vmem:[#allocation145_spill] sm:$0xff] %v17659_v7  ;;  %20695 = vst [vmem:[#allocation146_spill] sm:$0xff] %v17667_v59  ;;  %13734 = vmatprep.mubr.msk.f32.mxu1 %vm1086_vm13, %v1081_v6  ;;  %v1082_v19 = vrot.slane %v17661_v9, 1  ;;  %v1729_v18 = vrot.slane %v17661_v9, 2  ;;  %v2119_v37 = vrot.slane %v17661_v9, 3  ;;  %v2121_v62 = vrot.slane %v17651_v47, 3 }
 0x341   :  { %20696 = vst [vmem:[#allocation147_spill] sm:$0xff] %v17670_v26  ;;  %v17678_v7 = vsel %vm2449_vm3, %v2503_v46, %v2505_v31  ;;  %v17681_v56 = vsel %vm2449_vm3, %v2505_v31, %v2507_v14  ;;  %v2509_v38 = vrot.slane %v17661_v9, 4  ;;  %v20697_v59 = vrot.slane %v17651_v47, 2 }
 0x342   :  { %v1083_v30 = vsel %vm1022_vm12, %v1080_v5, %v1082_v19  ;;  %v1085_v6 = vsel %vm1022_vm12, %v1082_v19, %v1084_v27  ;;  %v17687_v26 = vsel %vm752_vm0, %v1727_v63, %v1729_v18  ;;  %v17696_v46 = vsel %vm2059_vm14, %v2117_v58, %v2119_v37  ;;  %v1668_v19 = vld [vmem:[#allocation8 + $0x50] sm:$0xff]  ;;  %v1669_v58 = vld [vmem:[#allocation8 + $0x58] sm:$0xff] }
 0x343   :  { %v17692_v25 = vsel %vm752_vm0, %v1729_v18, %v20697_v59  ;;  %13735 = vmatmul.mubr.msk.f32.gmra.mrb[28].mxu1 %vm1086_vm13, %v1083_v30  ;;  %v17701_v31 = vsel %vm2059_vm14, %v2119_v37, %v2121_v62  ;;  %v17704_v5 = vsel %vm2449_vm3, %v2507_v14, %v2509_v38  ;;  %v2511_v63 = vrot.slane %v17651_v47, 4  ;;  %v2055_v37 = vld [vmem:[#allocation8 + $0x60] sm:$0xff]  ;;  %v2056_v14 = vld [vmem:[#allocation8 + $0x68] sm:$0xff] }
 0x344   :  { %13737 = vmatprep.mubr.msk.f32.mxu1 %vm1086_vm13, %v1085_v6  ;;  %v15213_v18 = vpack.c.bf16 %v1669_v58, %v1668_v19  ;;  %v20736_v30 = vld [vmem:[#allocation123_spill] sm:$0xff]  ;;  %v20737_v6 = vld [vmem:[#allocation128_spill] sm:$0xff]  ;;  %v20738_v19 = vld [vmem:[#allocation129_spill] sm:$0xff] }
 0x345   :  { %v17711_v59 = vsel %vm2449_vm3, %v2509_v38, %v2511_v63  ;;  %v15217_v38 = vpack.c.bf16 %v2056_v14, %v2055_v37  ;;  %v20739_v58 = vld [vmem:[#allocation134_spill] sm:$0xff]  ;;  %v20741_v37 = vld [vmem:[#allocation140_spill] sm:$0xff]  ;;  %v20742_v14 = vld [vmem:[#allocation141_spill] sm:$0xff] }
 0x347   :  { %13738 = vmatmul.mubr.msk.f32.gmra.mrb[30].mxu1 %vm1086_vm13, %v1084_v27  ;;  %v20734_v27 = vld [vmem:[#allocation117_spill] sm:$0xff] }
 0x348   :  { %13748 = vmatprep.mubr.msk.f32.mxu1 %vm1086_vm13, %v17173_v42 }
 0x34b   :  { %13749 = vmatmul.mubr.msk.f32.vlgmr.msra.gmra.mrb[0].mxu1 %vm1086_vm13, %v17171_v41  ;;  %v2058_v41 = vld [vmem:[#allocation8 + $0x78] sm:$0xff] }
 0x34c   :  { %13751 = vmatprep.mubr.msk.f32.mxu1 %vm1086_vm13, %v17195_v60  ;;  %15212 = vmatpush3.bf16.msra.mxu1 %v17204_v4  ;;  %v2446_v60 = vld [vmem:[#allocation8 + $0x88] sm:$0xff] }
 0x34d   :  { %15214 = vmatprep.subr.bf16.mxu1 %v15213_v18 }
 0x34f   :  { %13752 = vmatmul.mubr.msk.f32.gmra.mrb[2].mxu1 %vm1086_vm13, %v17183_v52  ;;  %v2445_v52 = vld [vmem:[#allocation8 + $0x80] sm:$0xff] }
 0x350   :  { %13754 = vmatprep.mubr.msk.f32.mxu1 %vm1086_vm13, %v17218_v15  ;;  %15216 = vmatpush3.bf16.msra.mxu1 %v15213_v18  ;;  %v15225_v4 = vpack.c.bf16 %v2446_v60, %v2445_v52  ;;  %v20702_v15 = vld [vmem:[#allocation109_spill] sm:$0xff]  ;;  %v20740_v18 = vld [vmem:[#allocation135_spill] sm:$0xff]  ;;  %v20747_v52 = vld [vmem:[#allocation80_spill] sm:$0xff] }
 0x351   :  { %15218 = vmatprep.subr.bf16.mxu1 %v15217_v38  ;;  %v20748_v60 = vld [vmem:[#allocation83_spill] sm:$0xff] }
 0x353   :  { %13755 = vmatmul.mubr.msk.f32.gmra.mrb[4].mxu1 %vm1086_vm13, %v17208_v8  ;;  %v20699_v8 = vld [vmem:[#allocation102_spill] sm:$0xff] }
 0x354   :  { %13757 = vmatprep.mubr.msk.f32.mxu1 %vm1086_vm13, %v17252_v34  ;;  %v20706_v34 = vld [vmem:[#allocation121_spill] sm:$0xff] }
 0x357   :  { %13758 = vmatmul.mubr.msk.f32.gmra.mrb[6].mxu1 %vm1086_vm13, %v17242_v29  ;;  %v20703_v29 = vld [vmem:[#allocation114_spill] sm:$0xff] }
 0x358   :  { %13760 = vmatprep.mubr.msk.f32.mxu1 %vm1086_vm13, %v17287_v55  ;;  %v20711_v55 = vld [vmem:[#allocation138_spill] sm:$0xff] }
 0x35b   :  { %13761 = vmatmul.mubr.msk.f32.gmra.mrb[8].mxu1 %vm1086_vm13, %v17277_v49  ;;  %v20708_v49 = vld [vmem:[#allocation127_spill] sm:$0xff] }
 0x35c   :  { %13763 = vmatprep.mubr.msk.f32.mxu1 %vm1086_vm13, %v17321_v24  ;;  %v2447_v24 = vld [vmem:[#allocation8 + $0x90] sm:$0xff] }
 0x35f   :  { %13764 = vmatmul.mubr.msk.f32.gmra.mrb[10].mxu1 %vm1086_vm13, %v17311_v16  ;;  %v20712_v16 = vld [vmem:[#allocation139_spill] sm:$0xff] }
 0x360   :  { %13766 = vmatprep.mubr.msk.f32.mxu1 %vm1086_vm13, %v17355_v48  ;;  %v20717_v48 = vld [vmem:[#allocation77_spill] sm:$0xff] }
 0x363   :  { %13767 = vmatmul.mubr.msk.f32.gmra.mrb[12].mxu1 %vm1086_vm13, %v17345_v51  ;;  %v20715_v51 = vrot.slane %v17651_v47, 2 }
 0x364   :  { %13769 = vmatprep.mubr.msk.f32.mxu1 %vm1086_vm13, %v17389_v11  ;;  %v20718_v11 = vld [vmem:[#allocation78_spill] sm:$0xff] }
 0x367   :  { %13770 = vmatmul.mubr.msk.f32.gmra.mrb[14].mxu1 %vm1086_vm13, %v17379_v21  ;;  %v2057_v21 = vld [vmem:[#allocation8 + $0x70] sm:$0xff] }
 0x368   :  { %13772 = vmatprep.mubr.msk.f32.mxu1 %vm1086_vm13, %v17423_v50  ;;  %v15221_v42 = vpack.c.bf16 %v2058_v41, %v2057_v21  ;;  %v20719_v50 = vld [vmem:[#allocation81_spill] sm:$0xff]  ;;  %v20744_v21 = vld [vmem:[#allocation147_spill] sm:$0xff]  ;;  %v20745_v41 = vld [vmem:[#allocation76_spill] sm:$0xff] }
 0x36b   :  { %13773 = vmatmul.mubr.msk.f32.gmra.mrb[16].mxu1 %vm1086_vm13, %v17413_v45  ;;  %v20707_v45 = vld [vmem:[#allocation126_spill] sm:$0xff] }
 0x36c   :  { %13775 = vmatprep.mubr.msk.f32.mxu1 %vm1086_vm13, %v17457_v39  ;;  %v20722_v39 = vld [vmem:[#allocation86_spill] sm:$0xff] }
 0x36f   :  { %13776 = vmatmul.mubr.msk.f32.gmra.mrb[18].mxu1 %vm1086_vm13, %v17447_v10  ;;  %v20721_v10 = vld [vmem:[#allocation85_spill] sm:$0xff] }
 0x370   :  { %13778 = vmatprep.mubr.msk.f32.mxu1 %vm1086_vm13, %v17491_v36  ;;  %v20724_v36 = vld [vmem:[#allocation90_spill] sm:$0xff] }
 0x373   :  { %13779 = vmatmul.mubr.msk.f32.gmra.mrb[20].mxu1 %vm1086_vm13, %v17481_v44  ;;  %v20723_v44 = vld [vmem:[#allocation89_spill] sm:$0xff] }
 0x374   :  { %13781 = vmatprep.mubr.msk.f32.mxu1 %vm1086_vm13, %v17525_v35  ;;  %v20726_v35 = vld [vmem:[#allocation94_spill] sm:$0xff] }
 0x377   :  { %13782 = vmatmul.mubr.msk.f32.gmra.mrb[22].mxu1 %vm1086_vm13, %v17515_v3  ;;  %v20725_v3 = vld [vmem:[#allocation93_spill] sm:$0xff] }
 0x378   :  { %13784 = vmatprep.mubr.msk.f32.mxu1 %vm1086_vm13, %v17559_v61  ;;  %v20728_v61 = vld [vmem:[#allocation99_spill] sm:$0xff] }
 0x37b   :  { %13785 = vmatmul.mubr.msk.f32.gmra.mrb[24].mxu1 %vm1086_vm13, %v17549_v40  ;;  %v20727_v40 = vld [vmem:[#allocation98_spill] sm:$0xff] }
 0x37c   :  { %13787 = vmatprep.mubr.msk.f32.mxu1 %vm1086_vm13, %v17593_v28  ;;  %v20730_v28 = vld [vmem:[#allocation105_spill] sm:$0xff] }
 0x37f   :  { %13788 = vmatmul.mubr.msk.f32.gmra.mrb[26].mxu1 %vm1086_vm13, %v17583_v0  ;;  %v20729_v0 = vld [vmem:[#allocation104_spill] sm:$0xff] }
 0x380   :  { %13790 = vmatprep.mubr.msk.f32.mxu1 %vm1086_vm13, %v17627_v20  ;;  %v20732_v20 = vld [vmem:[#allocation111_spill] sm:$0xff] }
 0x383   :  { %13791 = vmatmul.mubr.msk.f32.gmra.mrb[28].mxu1 %vm1086_vm13, %v17617_v1  ;;  %v20731_v1 = vld [vmem:[#allocation110_spill] sm:$0xff] }
 0x384   :  { %13793 = vmatprep.mubr.msk.f32.mxu1 %vm1086_vm13, %v17661_v9  ;;  %v20733_v9 = vld [vmem:[#allocation116_spill] sm:$0xff] }
 0x387   :  { %13794 = vmatmul.mubr.msk.f32.gmra.mrb[30].mxu1 %vm1086_vm13, %v17651_v47 }
 0x388   :  { %13804 = vmatprep.mubr.msk.f32.mxu1 %vm1086_vm13, %v17187_v57  ;;  %v20698_v57 = vld [vmem:[#allocation97_spill] sm:$0xff] }
 0x38b   :  { %13805 = vmatmul.mubr.msk.f32.vlgmr.msra.gmra.mrb[0].mxu1 %vm1086_vm13, %v17213_v12  ;;  %v20700_v12 = vld [vmem:[#allocation103_spill] sm:$0xff] }
 0x38c   :  { %13807 = vmatprep.mubr.msk.f32.mxu1 %vm1086_vm13, %v17216_v13  ;;  %15220 = vmatpush3.bf16.msra.mxu1 %v15217_v38  ;;  %v20701_v13 = vld [vmem:[#allocation108_spill] sm:$0xff]  ;;  %v20743_v38 = vld [vmem:[#allocation146_spill] sm:$0xff] }
 0x38d   :  { %15222 = vmatprep.subr.bf16.mxu1 %v15221_v42 }
 0x38f   :  { %13808 = vmatmul.mubr.msk.f32.gmra.mrb[2].mxu1 %vm1086_vm13, %v17247_v32  ;;  %v20704_v32 = vld [vmem:[#allocation115_spill] sm:$0xff] }
 0x390   :  { %13810 = vmatprep.mubr.msk.f32.mxu1 %vm1086_vm13, %v17250_v33  ;;  %15224 = vmatpush3.bf16.msra.mxu1 %v15221_v42  ;;  %v20705_v33 = vld [vmem:[#allocation120_spill] sm:$0xff]  ;;  %v20746_v42 = vld [vmem:[#allocation79_spill] sm:$0xff] }
 0x391   :  { %15226 = vmatprep.subr.bf16.mxu1 %v15225_v4 }
 0x393   :  { %13811 = vmatmul.mubr.msk.f32.gmra.mrb[4].mxu1 %vm1086_vm13, %v17282_v53  ;;  %v20709_v53 = vld [vmem:[#allocation132_spill] sm:$0xff] }
 0x394   :  { %13813 = vmatprep.mubr.msk.f32.mxu1 %vm1086_vm13, %v17285_v54  ;;  %v20710_v54 = vld [vmem:[#allocation133_spill] sm:$0xff] }
 0x397   :  { %13814 = vmatmul.mubr.msk.f32.gmra.mrb[6].mxu1 %vm1086_vm13, %v17316_v22  ;;  %v20713_v22 = vld [vmem:[#allocation144_spill] sm:$0xff] }
 0x398   :  { %13816 = vmatprep.mubr.msk.f32.mxu1 %vm1086_vm13, %v17319_v23  ;;  %v20714_v23 = vld [vmem:[#allocation145_spill] sm:$0xff] }
 0x39b   :  { %13817 = vmatmul.mubr.msk.f32.gmra.mrb[8].mxu1 %vm1086_vm13, %v17350_v2  ;;  %v20716_v2 = vld [vmem:[#allocation75_spill] sm:$0xff] }
 0x39c   :  { %13819 = vmatprep.mubr.msk.f32.mxu1 %vm1086_vm13, %v17353_v17 }
 0x39f   :  { %13820 = vmatmul.mubr.msk.f32.gmra.mrb[10].mxu1 %vm1086_vm13, %v17384_v43  ;;  %v2448_v43 = vld [vmem:[#allocation8 + $0x98] sm:$0xff] }
 0x3a0   :  { %13822 = vmatprep.mubr.msk.f32.mxu1 %vm1086_vm13, %v20698_v57  ;;  %v15229_v17 = vpack.c.bf16 %v2448_v43, %v2447_v24  ;;  %v20753_v57 = vld [vmem:[#allocation92_spill] sm:$0xff]  ;;  %v20771_v24 = vld [vmem:[#allocation142_spill] sm:$0xff]  ;;  %v20772_v43 = vld [vmem:[#allocation143_spill] sm:$0xff] }
 0x3a3   :  { %13823 = vmatmul.mubr.msk.f32.gmra.mrb[12].mxu1 %vm1086_vm13, %v20699_v8  ;;  %v20754_v8 = vld [vmem:[#allocation95_spill] sm:$0xff] }
 0x3a4   :  { %13825 = vmatprep.mubr.msk.f32.mxu1 %vm1086_vm13, %v20700_v12  ;;  %v20755_v12 = vld [vmem:[#allocation96_spill] sm:$0xff] }
 0x3a7   :  { %13826 = vmatmul.mubr.msk.f32.gmra.mrb[14].mxu1 %vm1086_vm13, %v20701_v13  ;;  %v20756_v13 = vld [vmem:[#allocation100_spill] sm:$0xff] }
 0x3a8   :  { %13828 = vmatprep.mubr.msk.f32.mxu1 %vm1086_vm13, %v20702_v15  ;;  %v20757_v15 = vld [vmem:[#allocation101_spill] sm:$0xff] }
 0x3ab   :  { %13829 = vmatmul.mubr.msk.f32.gmra.mrb[16].mxu1 %vm1086_vm13, %v20703_v29  ;;  %v20758_v29 = vld [vmem:[#allocation106_spill] sm:$0xff] }
 0x3ac   :  { %13831 = vmatprep.mubr.msk.f32.mxu1 %vm1086_vm13, %v20704_v32  ;;  %v20759_v32 = vld [vmem:[#allocation107_spill] sm:$0xff] }
 0x3af   :  { %13832 = vmatmul.mubr.msk.f32.gmra.mrb[18].mxu1 %vm1086_vm13, %v20705_v33  ;;  %v20760_v33 = vld [vmem:[#allocation112_spill] sm:$0xff] }
 0x3b0   :  { %13834 = vmatprep.mubr.msk.f32.mxu1 %vm1086_vm13, %v20706_v34  ;;  %v20761_v34 = vld [vmem:[#allocation113_spill] sm:$0xff] }
 0x3b3   :  { %13835 = vmatmul.mubr.msk.f32.gmra.mrb[20].mxu1 %vm1086_vm13, %v20707_v45  ;;  %v20762_v45 = vld [vmem:[#allocation118_spill] sm:$0xff] }
 0x3b4   :  { %13837 = vmatprep.mubr.msk.f32.mxu1 %vm1086_vm13, %v20708_v49  ;;  %v20763_v49 = vld [vmem:[#allocation119_spill] sm:$0xff] }
 0x3b7   :  { %13838 = vmatmul.mubr.msk.f32.gmra.mrb[22].mxu1 %vm1086_vm13, %v20709_v53  ;;  %v20764_v53 = vld [vmem:[#allocation124_spill] sm:$0xff] }
 0x3b8   :  { %13840 = vmatprep.mubr.msk.f32.mxu1 %vm1086_vm13, %v20710_v54  ;;  %v20765_v54 = vld [vmem:[#allocation125_spill] sm:$0xff] }
 0x3bb   :  { %13841 = vmatmul.mubr.msk.f32.gmra.mrb[24].mxu1 %vm1086_vm13, %v20711_v55  ;;  %v20767_v55 = vld [vmem:[#allocation130_spill] sm:$0xff] }
 0x3bc   :  { %13843 = vmatprep.mubr.msk.f32.mxu1 %vm1086_vm13, %v20712_v16  ;;  %v20768_v16 = vld [vmem:[#allocation131_spill] sm:$0xff] }
 0x3bf   :  { %13844 = vmatmul.mubr.msk.f32.gmra.mrb[26].mxu1 %vm1086_vm13, %v20713_v22  ;;  %v20769_v22 = vld [vmem:[#allocation136_spill] sm:$0xff] }
 0x3c0   :  { %13846 = vmatprep.mubr.msk.f32.mxu1 %vm1086_vm13, %v20714_v23  ;;  %v20770_v23 = vld [vmem:[#allocation137_spill] sm:$0xff] }
 0x3c3   :  { %13847 = vmatmul.mubr.msk.f32.gmra.mrb[28].mxu1 %vm1086_vm13, %v17687_v26  ;;  %v20735_v26 = vld [vmem:[#allocation122_spill] sm:$0xff] }
 0x3c4   :  { %13849 = vmatprep.mubr.msk.f32.mxu1 %vm1086_vm13, %v17692_v25  ;;  %v20720_v25 = vld [vmem:[#allocation82_spill] sm:$0xff] }
 0x3c7   :  { %13850 = vmatmul.mubr.msk.f32.gmra.mrb[30].mxu1 %vm1086_vm13, %v20715_v51  ;;  %v2874_v51 = vld [vmem:[#allocation10 + $0x8] sm:$0xff] }
 0x3c8   :  { %13860 = vmatprep.mubr.msk.f32.mxu1 %vm1086_vm13, %v20716_v2  ;;  %12041 = vmatprep.mubr.msk.f32.mxu0 %vm2893_vm15, %v2874_v51  ;;  %v17976_v2 = vld [vmem:[%s20766_s0] ss:$0 sm:$0xff] }
 0x3cb   :  { %13861 = vmatmul.mubr.msk.f32.vlgmr.msra.gmra.mrb[0].mxu1 %vm1086_vm13, %v20717_v48 }
 0x3cc   :  { %13863 = vmatprep.mubr.msk.f32.mxu1 %vm1086_vm13, %v20718_v11  ;;  %15228 = vmatpush3.bf16.msra.mxu1 %v15225_v4  ;;  %v20751_v4 = vld [vmem:[#allocation88_spill] sm:$0xff] }
 0x3cd   :  { %15230 = vmatprep.subr.bf16.mxu1 %v15229_v17 }
 0x3cf   :  { %13864 = vmatmul.mubr.msk.f32.gmra.mrb[2].mxu1 %vm1086_vm13, %v20719_v50 }
 0x3d0   :  { %13866 = vmatprep.mubr.msk.f32.mxu1 %vm1086_vm13, %v20720_v25  ;;  %15232 = vmatpush3.bf16.msra.mxu1 %v15229_v17 }
 0x3d3   :  { %13867 = vmatmul.mubr.msk.f32.gmra.mrb[4].mxu1 %vm1086_vm13, %v20721_v10 }
 0x3d4   :  { %13869 = vmatprep.mubr.msk.f32.mxu1 %vm1086_vm13, %v20722_v39 }
 0x3d7   :  { %13870 = vmatmul.mubr.msk.f32.gmra.mrb[6].mxu1 %vm1086_vm13, %v20723_v44 }
 0x3d8   :  { %13872 = vmatprep.mubr.msk.f32.mxu1 %vm1086_vm13, %v20724_v36 }
 0x3db   :  { %13873 = vmatmul.mubr.msk.f32.gmra.mrb[8].mxu1 %vm1086_vm13, %v20725_v3 }
 0x3dc   :  { %13875 = vmatprep.mubr.msk.f32.mxu1 %vm1086_vm13, %v20726_v35 }
 0x3df   :  { %13876 = vmatmul.mubr.msk.f32.gmra.mrb[10].mxu1 %vm1086_vm13, %v20727_v40 }
 0x3e0   :  { %13878 = vmatprep.mubr.msk.f32.mxu1 %vm1086_vm13, %v20728_v61 }
 0x3e3   :  { %13879 = vmatmul.mubr.msk.f32.gmra.mrb[12].mxu1 %vm1086_vm13, %v20729_v0 }
 0x3e4   :  { %13881 = vmatprep.mubr.msk.f32.mxu1 %vm1086_vm13, %v20730_v28 }
 0x3e7   :  { %13882 = vmatmul.mubr.msk.f32.gmra.mrb[14].mxu1 %vm1086_vm13, %v20731_v1 }
 0x3e8   :  { %13884 = vmatprep.mubr.msk.f32.mxu1 %vm1086_vm13, %v20732_v20 }
 0x3eb   :  { %13885 = vmatmul.mubr.msk.f32.gmra.mrb[16].mxu1 %vm1086_vm13, %v20733_v9 }
 0x3ec   :  { %13887 = vmatprep.mubr.msk.f32.mxu1 %vm1086_vm13, %v20734_v27 }
 0x3ef   :  { %13888 = vmatmul.mubr.msk.f32.gmra.mrb[18].mxu1 %vm1086_vm13, %v20735_v26 }
 0x3f0   :  { %13890 = vmatprep.mubr.msk.f32.mxu1 %vm1086_vm13, %v20736_v30 }
 0x3f3   :  { %13891 = vmatmul.mubr.msk.f32.gmra.mrb[20].mxu1 %vm1086_vm13, %v20737_v6 }
 0x3f4   :  { %13893 = vmatprep.mubr.msk.f32.mxu1 %vm1086_vm13, %v20738_v19 }
 0x3f7   :  { %13894 = vmatmul.mubr.msk.f32.gmra.mrb[22].mxu1 %vm1086_vm13, %v20739_v58 }
 0x3f8   :  { %13896 = vmatprep.mubr.msk.f32.mxu1 %vm1086_vm13, %v20740_v18 }
 0x3fb   :  { %13897 = vmatmul.mubr.msk.f32.gmra.mrb[24].mxu1 %vm1086_vm13, %v20741_v37 }
 0x3fc   :  { %13899 = vmatprep.mubr.msk.f32.mxu1 %vm1086_vm13, %v20742_v14 }
 0x3ff   :  { %13900 = vmatmul.mubr.msk.f32.gmra.mrb[26].mxu1 %vm1086_vm13, %v20743_v38 }
 0x400   :  { %13902 = vmatprep.mubr.msk.f32.mxu1 %vm1086_vm13, %v20744_v21 }
 0x403   :  { %13903 = vmatmul.mubr.msk.f32.gmra.mrb[28].mxu1 %vm1086_vm13, %v17696_v46  ;;  %v20749_v46 = vld [vmem:[#allocation84_spill] sm:$0xff] }
 0x404   :  { %13905 = vmatprep.mubr.msk.f32.mxu1 %vm1086_vm13, %v17701_v31  ;;  %v20750_v31 = vld [vmem:[#allocation87_spill] sm:$0xff] }
 0x407   :  { %13906 = vmatmul.mubr.msk.f32.gmra.mrb[30].mxu1 %vm1086_vm13, %v2121_v62  ;;  %v20752_v62 = vld [vmem:[#allocation91_spill] sm:$0xff] }
 0x408   :  { %13916 = vmatprep.mubr.msk.f32.mxu1 %vm1086_vm13, %v20745_v41 }
 0x40b   :  { %13917 = vmatmul.mubr.msk.f32.vlgmr.msra.gmra.mrb[0].mxu1 %vm1086_vm13, %v20746_v42 }
 0x40c   :  { %13919 = vmatprep.mubr.msk.f32.mxu1 %vm1086_vm13, %v20747_v52 }
 0x40f   :  { %13920 = vmatmul.mubr.msk.f32.gmra.mrb[2].mxu1 %vm1086_vm13, %v20748_v60 }
 0x410   :  { %13922 = vmatprep.mubr.msk.f32.mxu1 %vm1086_vm13, %v20749_v46 }
 0x413   :  { %13923 = vmatmul.mubr.msk.f32.gmra.mrb[4].mxu1 %vm1086_vm13, %v20750_v31 }
 0x414   :  { %13925 = vmatprep.mubr.msk.f32.mxu1 %vm1086_vm13, %v20751_v4 }
 0x417   :  { %13926 = vmatmul.mubr.msk.f32.gmra.mrb[6].mxu1 %vm1086_vm13, %v20752_v62 }
 0x418   :  { %13928 = vmatprep.mubr.msk.f32.mxu1 %vm1086_vm13, %v20753_v57 }
 0x41b   :  { %13929 = vmatmul.mubr.msk.f32.gmra.mrb[8].mxu1 %vm1086_vm13, %v20754_v8 }
 0x41c   :  { %13931 = vmatprep.mubr.msk.f32.mxu1 %vm1086_vm13, %v20755_v12 }
 0x41f   :  { %13932 = vmatmul.mubr.msk.f32.gmra.mrb[10].mxu1 %vm1086_vm13, %v20756_v13 }
 0x420   :  { %13934 = vmatprep.mubr.msk.f32.mxu1 %vm1086_vm13, %v20757_v15 }
 0x423   :  { %13935 = vmatmul.mubr.msk.f32.gmra.mrb[12].mxu1 %vm1086_vm13, %v20758_v29 }
 0x424   :  { %13937 = vmatprep.mubr.msk.f32.mxu1 %vm1086_vm13, %v20759_v32 }
 0x427   :  { %13938 = vmatmul.mubr.msk.f32.gmra.mrb[14].mxu1 %vm1086_vm13, %v20760_v33 }
 0x428   :  { %13940 = vmatprep.mubr.msk.f32.mxu1 %vm1086_vm13, %v20761_v34 }
 0x42b   :  { %13941 = vmatmul.mubr.msk.f32.gmra.mrb[16].mxu1 %vm1086_vm13, %v20762_v45 }
 0x42c   :  { %13943 = vmatprep.mubr.msk.f32.mxu1 %vm1086_vm13, %v20763_v49 }
 0x42f   :  { %13944 = vmatmul.mubr.msk.f32.gmra.mrb[18].mxu1 %vm1086_vm13, %v20764_v53 }
 0x430   :  { %13946 = vmatprep.mubr.msk.f32.mxu1 %vm1086_vm13, %v20765_v54 }
 0x433   :  { %13947 = vmatmul.mubr.msk.f32.gmra.mrb[20].mxu1 %vm1086_vm13, %v20767_v55 }
 0x434   :  { %13949 = vmatprep.mubr.msk.f32.mxu1 %vm1086_vm13, %v20768_v16 }
 0x437   :  { %13950 = vmatmul.mubr.msk.f32.gmra.mrb[22].mxu1 %vm1086_vm13, %v20769_v22 }
 0x438   :  { %13952 = vmatprep.mubr.msk.f32.mxu1 %vm1086_vm13, %v20770_v23 }
 0x43b   :  { %13953 = vmatmul.mubr.msk.f32.gmra.mrb[24].mxu1 %vm1086_vm13, %v20771_v24 }
 0x43c   :  { %13955 = vmatprep.mubr.msk.f32.mxu1 %vm1086_vm13, %v20772_v43 }
 0x43f   :  { %13956 = vmatmul.mubr.msk.f32.gmra.mrb[26].mxu1 %vm1086_vm13, %v17678_v7 }
 0x440   :  { %13958 = vmatprep.mubr.msk.f32.mxu1 %vm1086_vm13, %v17681_v56 }
 0x443   :  { %13959 = vmatmul.mubr.msk.f32.gmra.mrb[28].mxu1 %vm1086_vm13, %v17704_v5 }
 0x444   :  { %13961 = vmatprep.mubr.msk.f32.mxu1 %vm1086_vm13, %v17711_v59 }
 0x447   :  { %13962 = vmatmul.mubr.msk.f32.gmra.mrb[30].mxu1 %vm1086_vm13, %v2511_v63 }
 0x4de   :  { %v13918_v7 = vpop.f32.mrb[0].mxu1 }
 0x4df   :  { %v2842_v17 = vadd.f32 %v13918_v7, %v17976_v2  ;;  %v2643_v56 = vpop.f32.mrb[1].mxu1 }
 0x4e0   :  { %v2841_v48 = vadd.f32 %v17976_v2, %v2643_v56 }
 0x4e2   :  { %v15235_v5 = vpack.c.bf16 %v2842_v17, %v2841_v48  ;;  %v13921_v11 = vpop.f32.mrb[2].mxu1 }
 0x4e3   :  { %v2844_v59 = vadd.f32 %v13921_v11, %v17976_v2  ;;  %v2653_v50 = vpop.f32.mrb[3].mxu1 }
 0x4e4   :  { %v2843_v47 = vadd.f32 %v17976_v2, %v2653_v50 }
 0x4e6   :  { %v15239_v63 = vpack.c.bf16 %v2844_v59, %v2843_v47  ;;  %v13924_v25 = vpop.f32.mrb[4].mxu1 }
 0x4e7   :  { %v2846_v10 = vadd.f32 %v13924_v25, %v17976_v2  ;;  %v2663_v39 = vpop.f32.mrb[5].mxu1 }
 0x4e8   :  { %v2845_v44 = vadd.f32 %v17976_v2, %v2663_v39 }
 0x4ea   :  { %v15243_v36 = vpack.c.bf16 %v2846_v10, %v2845_v44  ;;  %v13927_v3 = vpop.f32.mrb[6].mxu1 }
 0x4eb   :  { %v2848_v35 = vadd.f32 %v13927_v3, %v17976_v2  ;;  %v2673_v40 = vpop.f32.mrb[7].mxu1 }
 0x4ec   :  { %v2847_v61 = vadd.f32 %v17976_v2, %v2673_v40 }
 0x4ee   :  { %v15247_v0 = vpack.c.bf16 %v2848_v35, %v2847_v61  ;;  %v13930_v28 = vpop.f32.mrb[8].mxu1  ;;  %v20773_v35 = vmov 0  ;;  %v2873_v61 = vld [vmem:[#allocation10] sm:$0xff] }
 0x4ef   :  { %v2850_v1 = vadd.f32 %v13930_v28, %v17976_v2  ;;  %v2683_v20 = vpop.f32.mrb[9].mxu1  ;;  %v20774_v35 = vsel %vm18012_vm4, 4294967295, %v20773_v35  ;;  %v2875_v28 = vld [vmem:[#allocation10 + $0x10] sm:$0xff] }
 0x4f0   :  { %v2849_v9 = vadd.f32 %v17976_v2, %v2683_v20  ;;  %20775 = vst [vmem:[#allocation97_spill] sm:$0xff] %v20774_v35  ;;  %v2880_v20 = vld [vmem:[#allocation10 + $0x38] sm:$0xff] }
 0x4f2   :  { %v15251_v27 = vpack.c.bf16 %v2850_v1, %v2849_v9  ;;  %v13933_v26 = vpop.f32.mrb[10].mxu1  ;;  %v2877_v1 = vld [vmem:[#allocation10 + $0x20] sm:$0xff]  ;;  %v2879_v9 = vld [vmem:[#allocation10 + $0x30] sm:$0xff] }
 0x4f3   :  { %v2852_v30 = vadd.f32 %v13933_v26, %v17976_v2  ;;  %v2693_v6 = vpop.f32.mrb[11].mxu1  ;;  %v2881_v26 = vld [vmem:[#allocation10 + $0x40] sm:$0xff] }
 0x4f4   :  { %v2851_v19 = vadd.f32 %v17976_v2, %v2693_v6  ;;  %v2883_v6 = vld [vmem:[#allocation10 + $0x50] sm:$0xff] }
 0x4f6   :  { %v15255_v58 = vpack.c.bf16 %v2852_v30, %v2851_v19  ;;  %v13936_v18 = vpop.f32.mrb[12].mxu1  ;;  %v2884_v30 = vld [vmem:[#allocation10 + $0x58] sm:$0xff]  ;;  %v2886_v19 = vld [vmem:[#allocation10 + $0x68] sm:$0xff] }
 0x4f7   :  { %v2854_v37 = vadd.f32 %v13936_v18, %v17976_v2  ;;  %v2703_v14 = vpop.f32.mrb[13].mxu1  ;;  %v2888_v18 = vld [vmem:[#allocation10 + $0x78] sm:$0xff] }
 0x4f8   :  { %v2853_v38 = vadd.f32 %v17976_v2, %v2703_v14  ;;  %v2890_v14 = vld [vmem:[#allocation10 + $0x88] sm:$0xff] }
 0x4fa   :  { %v15259_v21 = vpack.c.bf16 %v2854_v37, %v2853_v38  ;;  %v13939_v41 = vpop.f32.mrb[14].mxu1  ;;  %v2887_v37 = vld [vmem:[#allocation10 + $0x70] sm:$0xff]  ;;  %v2889_v38 = vld [vmem:[#allocation10 + $0x80] sm:$0xff] }
 0x4fb   :  { %v2856_v42 = vadd.f32 %v13939_v41, %v17976_v2  ;;  %v2713_v52 = vpop.f32.mrb[15].mxu1  ;;  %v2891_v41 = vld [vmem:[#allocation10 + $0x90] sm:$0xff] }
 0x4fc   :  { %v2855_v60 = vadd.f32 %v17976_v2, %v2713_v52  ;;  %v3056_v52 = vld [vmem:[#allocation11 + $0x18] sm:$0xff] }
 0x4fe   :  { %v15264_v46 = vpack.c.bf16 %v2856_v42, %v2855_v60  ;;  %v13942_v31 = vpop.f32.mrb[16].mxu1  ;;  %v3055_v42 = vld [vmem:[#allocation11 + $0x10] sm:$0xff] }
 0x4ff   :  { %v2858_v4 = vadd.f32 %v13942_v31, %v17976_v2  ;;  %v2723_v62 = vpop.f32.mrb[17].mxu1  ;;  %v15266_v60 = vpack.c.bf16 %v3056_v52, %v3055_v42  ;;  %v3053_v31 = vld [vmem:[#allocation11 + $0x8] sm:$0xff] }
 0x500   :  { %v2857_v57 = vadd.f32 %v17976_v2, %v2723_v62 }
 0x502   :  { %v15233_v8 = vpack.c.bf16 %v2858_v4, %v2857_v57  ;;  %v13945_v12 = vpop.f32.mrb[18].mxu1 }
 0x503   :  { %v2860_v13 = vadd.f32 %v13945_v12, %v17976_v2  ;;  %v2733_v15 = vpop.f32.mrb[19].mxu1 }
 0x504   :  { %v2859_v29 = vadd.f32 %v17976_v2, %v2733_v15  ;;  %15234 = vmatprep.subr.bf16.mxu0 %v15233_v8 }
 0x505   :  { %15236 = vmatpush3.bf16.msra.mxu0 %v15235_v5 }
 0x506   :  { %v15237_v32 = vpack.c.bf16 %v2860_v13, %v2859_v29  ;;  %v13948_v33 = vpop.f32.mrb[20].mxu1 }
 0x507   :  { %v2862_v34 = vadd.f32 %v13948_v33, %v17976_v2  ;;  %v2743_v45 = vpop.f32.mrb[21].mxu1 }
 0x508   :  { %v2861_v49 = vadd.f32 %v17976_v2, %v2743_v45  ;;  %15238 = vmatprep.subr.bf16.mxu0 %v15237_v32 }
 0x509   :  { %15240 = vmatpush3.bf16.msra.mxu0 %v15239_v63 }
 0x50a   :  { %v15241_v53 = vpack.c.bf16 %v2862_v34, %v2861_v49  ;;  %v13951_v54 = vpop.f32.mrb[22].mxu1 }
 0x50b   :  { %v2864_v55 = vadd.f32 %v13951_v54, %v17976_v2  ;;  %v2753_v16 = vpop.f32.mrb[23].mxu1 }
 0x50c   :  { %v2863_v22 = vadd.f32 %v17976_v2, %v2753_v16  ;;  %15242 = vmatprep.subr.bf16.mxu0 %v15241_v53 }
 0x50d   :  { %15244 = vmatpush3.bf16.msra.mxu0 %v15243_v36 }
 0x50e   :  { %v15245_v23 = vpack.c.bf16 %v2864_v55, %v2863_v22  ;;  %v13954_v24 = vpop.f32.mrb[24].mxu1 }
 0x50f   :  { %v2866_v43 = vadd.f32 %v13954_v24, %v17976_v2  ;;  %v2763_v51 = vpop.f32.mrb[25].mxu1  ;;  %v3358_v24 = vld [vmem:[#allocation11 + $0x20] sm:$0xff] }
 0x510   :  { %v2865_v7 = vadd.f32 %v17976_v2, %v2763_v51  ;;  %15246 = vmatprep.subr.bf16.mxu0 %v15245_v23 }
 0x511   :  { %15248 = vmatpush3.bf16.msra.mxu0 %v15247_v0  ;;  %v2876_v0 = vld [vmem:[#allocation10 + $0x18] sm:$0xff] }
 0x512   :  { %v15249_v17 = vpack.c.bf16 %v2866_v43, %v2865_v7  ;;  %v13957_v56 = vpop.f32.mrb[26].mxu1  ;;  %v3359_v43 = vld [vmem:[#allocation11 + $0x28] sm:$0xff] }
 0x513   :  { %v2868_v48 = vadd.f32 %v13957_v56, %v17976_v2  ;;  %v2773_v5 = vpop.f32.mrb[27].mxu1 }
 0x514   :  { %v2867_v11 = vadd.f32 %v17976_v2, %v2773_v5  ;;  %15250 = vmatprep.subr.bf16.mxu0 %v15249_v17  ;;  %v18044_v5 = vpack.c.bf16 %v3359_v43, %v3358_v24 }
 0x515   :  { %15252 = vmatpush3.bf16.msra.mxu0 %v15251_v27  ;;  %v2882_v27 = vld [vmem:[#allocation10 + $0x48] sm:$0xff] }
 0x516   :  { %v15253_v59 = vpack.c.bf16 %v2868_v48, %v2867_v11  ;;  %v13960_v50 = vpop.f32.mrb[28].mxu1 }
 0x517   :  { %v2870_v47 = vadd.f32 %v13960_v50, %v17976_v2  ;;  %v2783_v63 = vpop.f32.mrb[29].mxu1 }
 0x518   :  { %v2869_v25 = vadd.f32 %v17976_v2, %v2783_v63  ;;  %15254 = vmatprep.subr.bf16.mxu0 %v15253_v59 }
 0x519   :  { %15256 = vmatpush3.bf16.msra.mxu0 %v15255_v58  ;;  %v2885_v58 = vld [vmem:[#allocation10 + $0x60] sm:$0xff] }
 0x51a   :  { %v15257_v10 = vpack.c.bf16 %v2870_v47, %v2869_v25  ;;  %v13963_v39 = vpop.f32.mrb[30].mxu1 }
 0x51b   :  { %v2872_v44 = vadd.f32 %v13963_v39, %v17976_v2  ;;  %v2793_v36 = vpop.f32.mrb[31].mxu1 }
 0x51c   :  { %v2871_v3 = vadd.f32 %v17976_v2, %v2793_v36  ;;  %15258 = vmatprep.subr.bf16.mxu0 %v15257_v10  ;;  %v2878_v2 = vld [vmem:[#allocation10 + $0x28] sm:$0xff] }
 0x51d   :  { %15260 = vmatpush3.bf16.msra.mxu0 %v15259_v21  ;;  %v2892_v21 = vld [vmem:[#allocation10 + $0x98] sm:$0xff] }
 0x51e   :  { %v15261_v40 = vpack.c.bf16 %v2872_v44, %v2871_v3 }
 0x520   :  { %15263 = vmatprep.subr.msk.bf16.mxu0 %vm18012_vm4, %v15261_v40 }
 0x521   :  { %15265 = vmatpush3.bf16.msra.mxu0 %v15264_v46  ;;  %v3052_v46 = vld [vmem:[#allocation11] sm:$0xff] }
 0x522   :  { %15267 = vmatprep.subr.bf16.mxu0 %v15266_v60  ;;  %v15270_v4 = vpack.c.bf16 %v3053_v31, %v3052_v46 }
 0x524   :  { %2992 = vmatmul.mubr.f32.vlgmr.msra.gmra.mrb[32].mxu0 %v2873_v61 }
 0x525   :  { %12042 = vmatprep.mubr.msk.f32.mxu0 %vm2893_vm15, %v2876_v0  ;;  %15269 = vmatpush3.bf16.msra.mxu0 %v15266_v60 }
 0x526   :  { %15271 = vmatprep.subr.bf16.mxu0 %v15270_v4 }
 0x528   :  { %2997 = vmatmul.mubr.f32.gmra.mrb[34].mxu0 %v2875_v28 }
 0x529   :  { %12043 = vmatprep.mubr.msk.f32.mxu0 %vm2893_vm15, %v2878_v2 }
 0x52c   :  { %3002 = vmatmul.mubr.f32.gmra.mrb[36].mxu0 %v2877_v1 }
 0x52d   :  { %12044 = vmatprep.mubr.msk.f32.mxu0 %vm2893_vm15, %v2880_v20 }
 0x530   :  { %3007 = vmatmul.mubr.f32.gmra.mrb[38].mxu0 %v2879_v9 }
 0x531   :  { %12045 = vmatprep.mubr.msk.f32.mxu0 %vm2893_vm15, %v2882_v27 }
 0x534   :  { %3012 = vmatmul.mubr.f32.gmra.mrb[40].mxu0 %v2881_v26 }
 0x535   :  { %12046 = vmatprep.mubr.msk.f32.mxu0 %vm2893_vm15, %v2884_v30 }
 0x538   :  { %3017 = vmatmul.mubr.f32.gmra.mrb[42].mxu0 %v2883_v6 }
 0x539   :  { %12047 = vmatprep.mubr.msk.f32.mxu0 %vm2893_vm15, %v2886_v19 }
 0x53c   :  { %3022 = vmatmul.mubr.f32.gmra.mrb[44].mxu0 %v2885_v58 }
 0x53d   :  { %12048 = vmatprep.mubr.msk.f32.mxu0 %vm2893_vm15, %v2888_v18 }
 0x540   :  { %3027 = vmatmul.mubr.f32.gmra.mrb[46].mxu0 %v2887_v37 }
 0x541   :  { %12049 = vmatprep.mubr.msk.f32.mxu0 %vm2893_vm15, %v2890_v14 }
 0x544   :  { %3032 = vmatmul.mubr.f32.gmra.mrb[48].mxu0 %v2889_v38 }
 0x545   :  { %12050 = vmatprep.mubr.msk.f32.mxu0 %vm2893_vm15, %v2892_v21 }
 0x548   :  { %3037 = vmatmul.mubr.f32.gmra.mrb[50].mxu0 %v2891_v41 }
 0x5f7   :  { %v12884_v62 = vpop.f32.mrb[32].mxu0 }
 0x5f8   :  { %v12885_v57 = vpop.f32.mrb[33].mxu0 }
 0x5f9   :  { %v12886_v8 = vadd.f32 %v12885_v57, %v12884_v62 }
 0x5fb   :  { %v12887_v12 = vpop.f32.mrb[34].mxu0  ;;  %v18027_v13 = vmax.f32 %v12886_v8, 0.0 }
 0x5fc   :  { %v12888_v15 = vpop.f32.mrb[35].mxu0 }
 0x5fd   :  { %v12889_v29 = vadd.f32 %v12888_v15, %v12887_v12  ;;  %v3067_v45 = vrot.slane %v18027_v13, 1  ;;  %v3360_v54 = vrot.slane %v18027_v13, 2 }
 0x5ff   :  { %v18029_v32 = vmax.f32 %v12889_v29, 0.0  ;;  %v12890_v33 = vpop.f32.mrb[36].mxu0 }
 0x600   :  { %v12891_v34 = vpop.f32.mrb[37].mxu0 }
 0x601   :  { %v12892_v49 = vadd.f32 %v12891_v34, %v12890_v33  ;;  %v3068_v53 = vrot.slane %v18029_v32, 1  ;;  %v3361_v55 = vrot.slane %v18029_v32, 2 }
 0x603   :  { %v18035_v16 = vmax.f32 %v12892_v49, 0.0  ;;  %v12893_v22 = vpop.f32.mrb[38].mxu0  ;;  %v3069_v23 = vsel %vm1022_vm12, %v3067_v45, %v3068_v53  ;;  %v18039_v51 = vsel %vm752_vm0, %v3360_v54, %v3361_v55 }
 0x604   :  { %v12894_v7 = vpop.f32.mrb[39].mxu0  ;;  %13968 = vmatprep.mubr.msk.f32.mxu0 %vm3086_vm5, %v3069_v23 }
 0x605   :  { %v3070_v17 = vrot.slane %v18035_v16, 1  ;;  %v3363_v56 = vrot.slane %v18035_v16, 2  ;;  %v12895_v48 = vadd.f32 %v12894_v7, %v12893_v22 }
 0x607   :  { %v18046_v11 = vmax.f32 %v12895_v48, 0.0  ;;  %v12896_v59 = vpop.f32.mrb[40].mxu0  ;;  %v3071_v50 = vsel %vm1022_vm12, %v3068_v53, %v3070_v17  ;;  %v18050_v47 = vsel %vm752_vm0, %v3361_v55, %v3363_v56 }
 0x608   :  { %v12897_v63 = vpop.f32.mrb[41].mxu0  ;;  %13969 = vmatmul.mubr.msk.f32.vlgmr.msra.gmra.mrb[52].mxu0 %vm3086_vm5, %v3071_v50 }
 0x609   :  { %v12898_v25 = vadd.f32 %v12897_v63, %v12896_v59  ;;  %v3072_v10 = vrot.slane %v18046_v11, 1  ;;  %15273 = vmatpush3.bf16.msra.mxu0 %v15270_v4  ;;  %v3365_v39 = vrot.slane %v18046_v11, 2 }
 0x60a   :  { %15275 = vmatprep.subr.bf16.mxu0 %v18044_v5 }
 0x60b   :  { %v3046_v44 = vmax.f32 %v12898_v25, 0.0  ;;  %v12899_v36 = vpop.f32.mrb[42].mxu0  ;;  %v3073_v3 = vsel %vm1022_vm12, %v3070_v17, %v3072_v10  ;;  %v18058_v40 = vsel %vm752_vm0, %v3363_v56, %v3365_v39 }
 0x60c   :  { %v12900_v61 = vpop.f32.mrb[43].mxu0  ;;  %13971 = vmatprep.mubr.msk.f32.mxu0 %vm3086_vm5, %v3073_v3 }
 0x60d   :  { %v12901_v0 = vadd.f32 %v12900_v61, %v12899_v36  ;;  %v3074_v28 = vrot.slane %v3046_v44, 1  ;;  %v3367_v2 = vrot.slane %v3046_v44, 2 }
 0x60f   :  { %v3047_v1 = vmax.f32 %v12901_v0, 0.0  ;;  %v12902_v20 = vpop.f32.mrb[44].mxu0  ;;  %v3075_v9 = vsel %vm1022_vm12, %v3072_v10, %v3074_v28  ;;  %v3368_v27 = vsel %vm752_vm0, %v3365_v39, %v3367_v2 }
 0x610   :  { %v12903_v26 = vpop.f32.mrb[45].mxu0  ;;  %13972 = vmatmul.mubr.msk.f32.gmra.mrb[54].mxu0 %vm3086_vm5, %v3075_v9 }
 0x611   :  { %v12904_v30 = vadd.f32 %v12903_v26, %v12902_v20  ;;  %v3076_v6 = vrot.slane %v3047_v1, 1  ;;  %v3369_v19 = vrot.slane %v3047_v1, 2 }
 0x613   :  { %v3048_v58 = vmax.f32 %v12904_v30, 0.0  ;;  %v12905_v18 = vpop.f32.mrb[46].mxu0  ;;  %v3077_v37 = vsel %vm1022_vm12, %v3074_v28, %v3076_v6  ;;  %v3370_v14 = vsel %vm752_vm0, %v3367_v2, %v3369_v19  ;;  %v3541_v30 = vld [vmem:[#allocation13] sm:$0xff] }
 0x614   :  { %v12906_v38 = vpop.f32.mrb[47].mxu0  ;;  %13974 = vmatprep.mubr.msk.f32.mxu0 %vm3086_vm5, %v3077_v37 }
 0x615   :  { %v12907_v21 = vadd.f32 %v12906_v38, %v12905_v18  ;;  %v3078_v41 = vrot.slane %v3048_v58, 1  ;;  %v3371_v42 = vrot.slane %v3048_v58, 2 }
 0x617   :  { %v3049_v52 = vmax.f32 %v12907_v21, 0.0  ;;  %v12908_v60 = vpop.f32.mrb[48].mxu0  ;;  %v3079_v46 = vsel %vm1022_vm12, %v3076_v6, %v3078_v41  ;;  %v3372_v31 = vsel %vm752_vm0, %v3369_v19, %v3371_v42  ;;  %v3542_v6 = vld [vmem:[#allocation13 + $0x8] sm:$0xff]  ;;  %v3543_v19 = vld [vmem:[#allocation13 + $0x10] sm:$0xff] }
 0x618   :  { %v12909_v4 = vpop.f32.mrb[49].mxu0  ;;  %13975 = vmatmul.mubr.msk.f32.gmra.mrb[56].mxu0 %vm3086_vm5, %v3079_v46  ;;  %v3646_v46 = vld [vmem:[#allocation14] sm:$0xff] }
 0x619   :  { %v12910_v62 = vadd.f32 %v12909_v4, %v12908_v60  ;;  %v3080_v57 = vrot.slane %v3049_v52, 1  ;;  %v3373_v8 = vrot.slane %v3049_v52, 2 }
 0x61b   :  { %v3050_v12 = vmax.f32 %v12910_v62, 0.0  ;;  %v12911_v15 = vpop.f32.mrb[50].mxu0  ;;  %v3081_v29 = vsel %vm1022_vm12, %v3078_v41, %v3080_v57  ;;  %v3374_v33 = vsel %vm752_vm0, %v3371_v42, %v3373_v8 }
 0x61c   :  { %v12912_v34 = vpop.f32.mrb[51].mxu0  ;;  %13977 = vmatprep.mubr.msk.f32.mxu0 %vm3086_vm5, %v3081_v29 }
 0x61d   :  { %v12913_v45 = vadd.f32 %v12912_v34, %v12911_v15  ;;  %v3082_v49 = vrot.slane %v3050_v12, 1  ;;  %v3375_v53 = vrot.slane %v3050_v12, 2 }
 0x61f   :  { %v3051_v54 = vmax.f32 %v12913_v45, 0.0  ;;  %v3083_v55 = vsel %vm1022_vm12, %v3080_v57, %v3082_v49  ;;  %v3376_v22 = vsel %vm752_vm0, %v3373_v8, %v3375_v53 }
 0x620   :  { %13978 = vmatmul.mubr.msk.f32.gmra.mrb[58].mxu0 %vm3086_vm5, %v3083_v55 }
 0x621   :  { %v3084_v23 = vrot.slane %v3051_v54, 1  ;;  %v3377_v24 = vrot.slane %v3051_v54, 2 }
 0x623   :  { %v3085_v43 = vsel %vm1022_vm12, %v3082_v49, %v3084_v23  ;;  %v3378_v7 = vsel %vm752_vm0, %v3375_v53, %v3377_v24 }
 0x624   :  { %13980 = vmatprep.mubr.msk.f32.mxu0 %vm3086_vm5, %v3085_v43 }
 0x625   :  { %13981 = vmatmul.mubr.msk.f32.gmra.mrb[60].mxu0 %vm3086_vm5, %v3084_v23 }
 0x626   :  { %13987 = vmatprep.mubr.msk.f32.mxu0 %vm3086_vm5, %v18027_v13  ;;  %v20573_v13 = vmov 0.0|0.0  }
 0x629   :  { %13988 = vmatmul.mubr.msk.f32.vlgmr.msra.gmra.mrb[52].mxu0 %vm3086_vm5, %v18029_v32  ;;  %v20777_v32 = vmov 0.0  }
 0x62a   :  { %13990 = vmatprep.mubr.msk.f32.mxu0 %vm3086_vm5, %v18035_v16  ;;  %15277 = vmatpush3.bf16.msra.mxu0 %v18044_v5  ;;  %v12081_v16 = vld [vmem:[%s20776_s30] ss:$0 sm:$0xff]  ;;  %s11723_s30 = scalar_lea.vmem [#allocation2], %s12634_s1 }
 0x62b   :  { %15278 = vmatprep.subr.bf16.mxu0 %v20573_v13 }
 0x62d   :  { %13991 = vmatmul.mubr.msk.f32.gmra.mrb[54].mxu0 %vm3086_vm5, %v18046_v11 }
 0x62e   :  { %13993 = vmatprep.mubr.msk.f32.mxu0 %vm3086_vm5, %v3046_v44 }
 0x631   :  { %13994 = vmatmul.mubr.msk.f32.gmra.mrb[56].mxu0 %vm3086_vm5, %v3047_v1 }
 0x632   :  { %13996 = vmatprep.mubr.msk.f32.mxu0 %vm3086_vm5, %v3048_v58  ;;  %v3648_v58 = vld [vmem:[#allocation14 + $0x8] sm:$0xff] }
 0x635   :  { %13997 = vmatmul.mubr.msk.f32.gmra.mrb[58].mxu0 %vm3086_vm5, %v3049_v52 }
 0x636   :  { %13999 = vmatprep.mubr.msk.f32.mxu0 %vm3086_vm5, %v3050_v12 }
 0x639   :  { %14000 = vmatmul.mubr.msk.f32.gmra.mrb[60].mxu0 %vm3086_vm5, %v3051_v54  ;;  %v12093_v54 = vld [vmem:[%s20779_s24] ss:$0 sm:$0xff]  ;;  %s16566_s24 = smov [#allocation34]  }
 0x63a   :  { %14006 = vmatprep.mubr.msk.f32.mxu0 %vm3086_vm5, %v18039_v51 }
 0x63d   :  { %14007 = vmatmul.mubr.msk.f32.vlgmr.msra.gmra.mrb[52].mxu0 %vm3086_vm5, %v18050_v47 }
 0x63e   :  { %14009 = vmatprep.mubr.msk.f32.mxu0 %vm3086_vm5, %v18058_v40 }
 0x641   :  { %14010 = vmatmul.mubr.msk.f32.gmra.mrb[54].mxu0 %vm3086_vm5, %v3368_v27 }
 0x642   :  { %14012 = vmatprep.mubr.msk.f32.mxu0 %vm3086_vm5, %v3370_v14 }
 0x645   :  { %14013 = vmatmul.mubr.msk.f32.gmra.mrb[56].mxu0 %vm3086_vm5, %v3372_v31 }
 0x646   :  { %14015 = vmatprep.mubr.msk.f32.mxu0 %vm3086_vm5, %v3374_v33 }
 0x649   :  { %14016 = vmatmul.mubr.msk.f32.gmra.mrb[58].mxu0 %vm3086_vm5, %v3376_v22 }
 0x64a   :  { %14018 = vmatprep.mubr.msk.f32.mxu0 %vm3086_vm5, %v3378_v7 }
 0x64d   :  { %14019 = vmatmul.mubr.msk.f32.gmra.mrb[60].mxu0 %vm3086_vm5, %v3377_v24 }
 0x64e   :  { %14041 = vmatprep.mubr.msk.f32.mxu0 %vm16564_vm6, %v20777_v32 }
 0x710   :  { %v14008_v51 = vpop.f32.mrb[52].mxu0 }
 0x711   :  { %v3532_v17 = vadd.f32 %v14008_v51, %v12081_v16  ;;  %v3465_v56 = vpop.f32.mrb[53].mxu0 }
 0x712   :  { %v3531_v48 = vadd.f32 %v12081_v16, %v3465_v56 }
 0x714   :  { %v15279_v5 = vpack.c.bf16 %v3532_v17, %v3531_v48  ;;  %v14011_v11 = vpop.f32.mrb[54].mxu0 }
 0x715   :  { %v3534_v59 = vadd.f32 %v14011_v11, %v12081_v16  ;;  %v3475_v50 = vpop.f32.mrb[55].mxu0 }
 0x716   :  { %v3533_v47 = vadd.f32 %v12081_v16, %v3475_v50  ;;  %15280 = vmatpush3.bf16.msra.mxu0 %v15279_v5 }
 0x717   :  { %15281 = vmatprep.subr.bf16.mxu0 %v20573_v13 }
 0x718   :  { %v15282_v63 = vpack.c.bf16 %v3534_v59, %v3533_v47  ;;  %v14014_v25 = vpop.f32.mrb[56].mxu0 }
 0x719   :  { %v3536_v10 = vadd.f32 %v14014_v25, %v12081_v16  ;;  %v3485_v39 = vpop.f32.mrb[57].mxu0 }
 0x71a   :  { %v3535_v44 = vadd.f32 %v12081_v16, %v3485_v39  ;;  %15283 = vmatpush3.bf16.msra.mxu0 %v15282_v63 }
 0x71b   :  { %15284 = vmatprep.subr.bf16.mxu0 %v20573_v13 }
 0x71c   :  { %v15285_v36 = vpack.c.bf16 %v3536_v10, %v3535_v44  ;;  %v14017_v3 = vpop.f32.mrb[58].mxu0 }
 0x71d   :  { %v3538_v40 = vadd.f32 %v14017_v3, %v12081_v16  ;;  %v3495_v61 = vpop.f32.mrb[59].mxu0 }
 0x71e   :  { %v3537_v0 = vadd.f32 %v12081_v16, %v3495_v61  ;;  %15286 = vmatpush3.bf16.msra.mxu0 %v15285_v36 }
 0x71f   :  { %15287 = vmatprep.subr.bf16.mxu0 %v20573_v13 }
 0x720   :  { %v15288_v28 = vpack.c.bf16 %v3538_v40, %v3537_v0  ;;  %v14020_v2 = vpop.f32.mrb[60].mxu0 }
 0x721   :  { %v3540_v1 = vadd.f32 %v14020_v2, %v12081_v16  ;;  %v3505_v20 = vpop.f32.mrb[61].mxu0 }
 0x722   :  { %v3539_v9 = vadd.f32 %v12081_v16, %v3505_v20  ;;  %15289 = vmatpush3.bf16.msra.mxu0 %v15288_v28 }
 0x723   :  { %15290 = vmatprep.subr.bf16.mxu0 %v20573_v13 }
 0x724   :  { %v15291_v27 = vpack.c.bf16 %v3540_v1, %v3539_v9 }
 0x726   :  { %15293 = vmatpush3.bf16.msk.msra.mxu0 %vm16998_vm2, %v15291_v27  ;;  %vm20572_vm2 = vcmask 64512  }
 0x727   :  { %14050 = vmatprep.subr.mxu0 %v20777_v32 }
 0x729   :  { %14042 = vmatmul.mubr.msk.f32.vlgmr.msra.gmra.mrb[62].mxu0 %vm3544_vm7, %v3541_v30 }
 0x72a   :  { %14044 = vmatprep.mubr.msk.f32.mxu0 %vm16564_vm6, %v20777_v32  ;;  %14051 = vmatpush3.msra.mxu0 %v3648_v58 }
 0x72b   :  { %14061 = vmatprep.subr.mxu0 %v20777_v32 }
 0x72d   :  { %14045 = vmatmul.mubr.msk.f32.gmra.mrb[64].mxu0 %vm3544_vm7, %v3542_v6 }
 0x72e   :  { %14047 = vmatprep.mubr.msk.f32.mxu0 %vm16564_vm6, %v20777_v32 }
 0x731   :  { %14048 = vmatmul.mubr.msk.f32.gmra.mrb[66].mxu0 %vm3544_vm7, %v3543_v19  ;;  %v20780_v19 = vlaneseq }
 0x732   :  { %14052 = vmatprep.mubr.msk.f32.mxu0 %vm16564_vm6, %v20777_v32 }
 0x733   :  { %v18179_v58 = vshrl.u32 %v20780_v19, 7 }
 0x735   :  { %20781 = vst [vmem:[#allocation102_spill] sm:$0xff] %v18179_v58 }
 0x7fc   :  { %v3623_v18 = vpop.f32.mrb[62].mxu0 }
 0x7fd   :  { %v14043_v37 = vpop.f32.mrb[63].mxu0  ;;  %v18126_v14 = vmax.f32 %v3623_v18, 0.0 }
 0x7ff   :  { %v3652_v42 = vrot.slane %v18126_v14, 1 }
 0x800   :  { %v3628_v38 = vpop.f32.mrb[64].mxu0 }
 0x801   :  { %v18128_v21 = vmax.f32 %v3628_v38, 0.0  ;;  %v14046_v41 = vpop.f32.mrb[65].mxu0 }
 0x803   :  { %v3653_v52 = vrot.slane %v18128_v21, 1 }
 0x804   :  { %v3633_v60 = vpop.f32.mrb[66].mxu0 }
 0x805   :  { %v18132_v31 = vmax.f32 %v3633_v60, 0.0  ;;  %v14049_v4 = vpop.f32.mrb[67].mxu0  ;;  %v18135_v62 = vsel %vm1022_vm12, %v3652_v42, %v3653_v52  ;;  %v3642_v42 = vmul.u32 6, %v18179_v58 }
 0x806   :  { %14053 = vmatmul.mubr.msk.f32.vlgmr.msra.gmra.mrb[68].mxu0 %vm20572_vm2, %v18135_v62  ;;  %v20782_v4 = vld [vmem:[#allocation74_spill] sm:$0xff] }
 0x807   :  { %14055 = vmatprep.mubr.msk.f32.mxu0 %vm16564_vm6, %v20777_v32  ;;  %v18142_v57 = vrot.slane %v18132_v31, 1  ;;  %14062 = vmatpush3.msra.mxu0 %v3646_v46  ;;  %vm3643_vm8 = vcmp.eq.s32.totalorder %v20782_v4, %v3642_v42 }
 0x808   :  { %15294 = vmatprep.subr.bf16.mxu0 %v20573_v13 }
 0x809   :  { %v18147_v8 = vsel %vm1022_vm12, %v3653_v52, %v18142_v57 }
 0x80a   :  { %14056 = vmatmul.mubr.msk.f32.gmra.mrb[70].mxu0 %vm20572_vm2, %v18147_v8 }
 0x80b   :  { %14058 = vmatprep.mubr.msk.f32.mxu0 %vm16564_vm6, %v20777_v32 }
 0x80e   :  { %14059 = vmatmul.mubr.msk.f32.gmra.mrb[72].mxu0 %vm20572_vm2, %v18142_v57 }
 0x80f   :  { %14063 = vmatprep.mubr.msk.f32.mxu0 %vm16564_vm6, %v20777_v32 }
 0x812   :  { %14064 = vmatmul.mubr.msk.f32.vlgmr.msra.gmra.mrb[74].mxu0 %vm20572_vm2, %v18126_v14 }
 0x813   :  { %14066 = vmatprep.mubr.msk.f32.mxu0 %vm16564_vm6, %v20777_v32 }
 0x816   :  { %14067 = vmatmul.mubr.msk.f32.gmra.mrb[76].mxu0 %vm20572_vm2, %v18128_v21 }
 0x817   :  { %14069 = vmatprep.mubr.msk.f32.mxu0 %vm16564_vm6, %v20777_v32 }
 0x81a   :  { %14070 = vmatmul.mubr.msk.f32.gmra.mrb[78].mxu0 %vm20572_vm2, %v18132_v31 }
 0x81b   :  { %14078 = vmatprep.mubr.msk.f32.mxu0 %vm16564_vm6, %v20777_v32 }
 0x8d9   :  { %v3730_v12 = vpop.f32.mrb[68].mxu0 }
 0x8da   :  { %v14054_v15 = vpop.f32.mrb[69].mxu0 }
 0x8db   :  { %v18185_v15 = vsel %vm3643_vm8, 1.0, %v20777_v32  ;;  %vm4931_vm8 = vcmask 211968  }
 0x8dc   :  { %20783 = vst [vmem:[#allocation103_spill] sm:$0xff] %v18185_v15 }
 0x8dd   :  { %v3735_v29 = vpop.f32.mrb[70].mxu0 }
 0x8de   :  { %v14057_v33 = vpop.f32.mrb[71].mxu0 }
 0x8df   :  { %v3965_v33 = vld [vmem:[#allocation16] sm:$0xff] }
 0x8e1   :  { %v3740_v34 = vpop.f32.mrb[72].mxu0 }
 0x8e2   :  { %v14060_v45 = vpop.f32.mrb[73].mxu0 }
 0x8e3   :  { %v4133_v45 = vrot.slane %v18132_v31, 2 }
 0x8e5   :  { %v3816_v49 = vpop.f32.mrb[74].mxu0 }
 0x8e6   :  { %v3817_v53 = vadd.f32 %v3816_v49, %v3730_v12  ;;  %v14065_v55 = vpop.f32.mrb[75].mxu0 }
 0x8e8   :  { %v3837_v22 = vadd.f32 %v12093_v54, %v3817_v53 }
 0x8e9   :  { %v3821_v23 = vpop.f32.mrb[76].mxu0 }
 0x8ea   :  { %v3822_v24 = vadd.f32 %v3821_v23, %v3735_v29  ;;  %v14068_v43 = vpop.f32.mrb[77].mxu0  ;;  %v3843_v16 = vrot.slane %v3837_v22, 1  ;;  %v3854_v51 = vrot.slane %v3837_v22, 2  ;;  %v3865_v56 = vrot.slane %v3837_v22, 3  ;;  %v3967_v29 = vld [vmem:[#allocation16 + $0x8] sm:$0xff] }
 0x8eb   :  { %v3876_v47 = vrot.slane %v3837_v22, 4 }
 0x8ec   :  { %v3838_v7 = vadd.f32 %v12093_v54, %v3822_v24 }
 0x8ed   :  { %v3826_v17 = vpop.f32.mrb[78].mxu0 }
 0x8ee   :  { %v3844_v48 = vrot.slane %v3838_v7, 1  ;;  %v3855_v5 = vrot.slane %v3838_v7, 2  ;;  %v3827_v11 = vadd.f32 %v3826_v17, %v3740_v34  ;;  %v14071_v59 = vpop.f32.mrb[79].mxu0  ;;  %v3866_v50 = vrot.slane %v3838_v7, 3  ;;  %v4129_v34 = vld [vmem:[#allocation16 + $0x10] sm:$0xff] }
 0x8ef   :  { %v3877_v63 = vrot.slane %v3838_v7, 4 }
 0x8f0   :  { %v3839_v25 = vadd.f32 %v12093_v54, %v3827_v11  ;;  %v3845_v10 = vsel %vm1022_vm12, %v3843_v16, %v3844_v48  ;;  %v3856_v39 = vsel %vm752_vm0, %v3854_v51, %v3855_v5  ;;  %v3867_v44 = vsel %vm2059_vm14, %v3865_v56, %v3866_v50 }
 0x8f1   :  { %v3851_v36 = vmax.f32 %v3837_v22, %v3845_v10  ;;  %v3878_v3 = vsel %vm2449_vm3, %v3876_v47, %v3877_v63 }
 0x8f2   :  { %v3846_v40 = vrot.slane %v3839_v25, 1  ;;  %v3857_v61 = vrot.slane %v3839_v25, 2  ;;  %v3868_v0 = vrot.slane %v3839_v25, 3  ;;  %v3879_v28 = vrot.slane %v3839_v25, 4 }
 0x8f3   :  { %v3862_v2 = vmax.f32 %v3851_v36, %v3856_v39 }
 0x8f4   :  { %v3847_v1 = vsel %vm1022_vm12, %v3844_v48, %v3846_v40  ;;  %v3858_v20 = vsel %vm752_vm0, %v3855_v5, %v3857_v61  ;;  %v3869_v9 = vsel %vm2059_vm14, %v3866_v50, %v3868_v0  ;;  %v3880_v27 = vsel %vm2449_vm3, %v3877_v63, %v3879_v28  ;;  %v12105_v50 = vld [vmem:[%s20784_s29] ss:$0 sm:$0xff]  ;;  %s11747_s29 = sshll.u32 %s16566_s24, 4  ;;  %s11748_s29 = int_to_ptr.vmem [resolvable:$true] %s11747_s29 }
 0x8f5   :  { %v3852_v26 = vmax.f32 %v3838_v7, %v3847_v1  ;;  %v3873_v30 = vmax.f32 %v3862_v2, %v3867_v44  ;;  %v3853_v6 = vmax.f32 %v3839_v25, %v3846_v40  ;;  %p16453_p8 = scmp.lt.s32.totalorder %s11748_s29, %s11748_s29 }
 0x8f7   :  { %v3863_v18 = vmax.f32 %v3852_v26, %v3858_v20  ;;  %v3884_v37 = vmax.f32 %v3873_v30, %v3878_v3  ;;  %v3864_v41 = vmax.f32 %v3853_v6, %v3857_v61 }
 0x8f9   :  { %v3874_v38 = vmax.f32 %v3863_v18, %v3869_v9  ;;  %v3875_v46 = vmax.f32 %v3864_v41, %v3868_v0 }
 0x8fb   :  { %v3885_v52 = vmax.f32 %v3874_v38, %v3880_v27  ;;  %v3886_v12 = vmax.f32 %v3875_v46, %v3879_v28 }
 0x8fd   :  { %v15295_v60 = vpack.c.bf16 %v3885_v52, %v3884_v37 }
 0x8ff   :  { %15296 = vmatpush3.bf16.msra.mxu0 %v15295_v60 }
 0x900   :  { %14076 = vmatprep.subr.mxu0 %v20777_v32 }
 0x903   :  { %14077 = vmatpush3.msk.msra.mxu0 %vm3891_vm9, %v3886_v12 }
 0x904   :  { %14079 = vmatmul.mubr.msk.f32.vlgmr.msra.gmra.mrb[80].mxu0 %vm3887_vm10, %v18185_v15  ;;  %14081 = vmatprep.subr.mxu0 %v20777_v32 }
 0x905   :  { %14082 = vmatpush3.msra.mxu0 %v3967_v29  ;;  %14083 = vmatprep.mubr.msk.f32.mxu0 %vm16564_vm6, %v20777_v32 }
 0x906   :  { %14092 = vmatprep.subr.mxu0 %v20777_v32 }
 0x908   :  { %14084 = vmatmul.mubr.msk.f32.vlgmr.msra.gmra.mrb[82].mxu0 %vm20572_vm2, %v18135_v62  ;;  %v4131_v62 = vrot.slane %v18128_v21, 2 }
 0x909   :  { %14086 = vmatprep.mubr.msk.f32.mxu0 %vm16564_vm6, %v20777_v32  ;;  %14093 = vmatpush3.msra.mxu0 %v3965_v33 }
 0x90a   :  { %14103 = vmatprep.subr.mxu0 %v20777_v32  ;;  %v4134_v49 = vsel %vm752_vm0, %v4131_v62, %v4133_v45 }
 0x90c   :  { %14087 = vmatmul.mubr.msk.f32.gmra.mrb[84].mxu0 %vm20572_vm2, %v18147_v8 }
 0x90d   :  { %14089 = vmatprep.mubr.msk.f32.mxu0 %vm16564_vm6, %v20777_v32 }
 0x910   :  { %14090 = vmatmul.mubr.msk.f32.gmra.mrb[86].mxu0 %vm20572_vm2, %v18142_v57  ;;  %v4130_v57 = vrot.slane %v18126_v14, 2 }
 0x911   :  { %14094 = vmatprep.mubr.msk.f32.mxu0 %vm16564_vm6, %v20777_v32 }
 0x912   :  { %v4132_v8 = vsel %vm752_vm0, %v4130_v57, %v4131_v62  ;;  %v4348_v57 = vld [vmem:[#allocation17 + $0x20] sm:$0xff] }
 0x914   :  { %14095 = vmatmul.mubr.msk.f32.vlgmr.msra.gmra.mrb[88].mxu0 %vm20572_vm2, %v18126_v14 }
 0x915   :  { %14097 = vmatprep.mubr.msk.f32.mxu0 %vm16564_vm6, %v20777_v32  ;;  %14104 = vmatpush3.msra.mxu0 %v4129_v34 }
 0x916   :  { %15297 = vmatprep.subr.bf16.mxu0 %v20573_v13 }
 0x918   :  { %14098 = vmatmul.mubr.msk.f32.gmra.mrb[90].mxu0 %vm20572_vm2, %v18128_v21 }
 0x919   :  { %14100 = vmatprep.mubr.msk.f32.mxu0 %vm16564_vm6, %v20777_v32 }
 0x91c   :  { %14101 = vmatmul.mubr.msk.f32.gmra.mrb[92].mxu0 %vm20572_vm2, %v18132_v31 }
 0x91d   :  { %14105 = vmatprep.mubr.msk.f32.mxu0 %vm16564_vm6, %v20777_v32 }
 0x920   :  { %14106 = vmatmul.mubr.msk.f32.vlgmr.msra.gmra.mrb[94].mxu0 %vm20572_vm2, %v4132_v8  ;;  %v4349_v8 = vld [vmem:[#allocation17 + $0x28] sm:$0xff] }
 0x921   :  { %14108 = vmatprep.mubr.msk.f32.mxu0 %vm16564_vm6, %v20777_v32 }
 0x924   :  { %14109 = vmatmul.mubr.msk.f32.gmra.mrb[96].mxu0 %vm20572_vm2, %v4134_v49  ;;  %v15301_v49 = vpack.c.bf16 %v4349_v8, %v4348_v57 }
 0x925   :  { %14111 = vmatprep.mubr.msk.f32.mxu0 %vm16564_vm6, %v20777_v32 }
 0x928   :  { %14112 = vmatmul.mubr.msk.f32.gmra.mrb[98].mxu0 %vm20572_vm2, %v4133_v45 }
 0x929   :  { %14120 = vmatprep.mubr.msk.f32.mxu0 %vm16564_vm6, %v20777_v32 }
 0x9d7   :  { %v18234_v14 = vpop.f32.mrb[80].mxu0 }
 0x9d8   :  { %v14080_v21 = vpop.f32.mrb[81].mxu0 }
 0x9d9   :  { %v4350_v21 = vld [vmem:[#allocation17 + $0x30] sm:$0xff] }
 0x9db   :  { %v4034_v31 = vpop.f32.mrb[82].mxu0 }
 0x9dc   :  { %v14085_v53 = vpop.f32.mrb[83].mxu0 }
 0x9df   :  { %v4039_v54 = vpop.f32.mrb[84].mxu0 }
 0x9e0   :  { %v14088_v55 = vpop.f32.mrb[85].mxu0 }
 0x9e1   :  { %v4344_v55 = vld [vmem:[#allocation17 + $0x8] sm:$0xff] }
 0x9e3   :  { %v4044_v22 = vpop.f32.mrb[86].mxu0 }
 0x9e4   :  { %v14091_v23 = vpop.f32.mrb[87].mxu0 }
 0x9e5   :  { %v4345_v23 = vld [vmem:[#allocation17 + $0x10] sm:$0xff] }
 0x9e7   :  { %v4114_v24 = vpop.f32.mrb[88].mxu0 }
 0x9e8   :  { %v4115_v43 = vadd.f32 %v4114_v24, %v4034_v31  ;;  %v14096_v7 = vpop.f32.mrb[89].mxu0  ;;  %v4351_v31 = vld [vmem:[#allocation17 + $0x38] sm:$0xff] }
 0x9e9   :  { %v15304_v53 = vpack.c.bf16 %v4351_v31, %v4350_v21  ;;  %v4346_v24 = vld [vmem:[#allocation17 + $0x18] sm:$0xff] }
 0x9eb   :  { %v4119_v16 = vpop.f32.mrb[90].mxu0 }
 0x9ec   :  { %v4120_v51 = vadd.f32 %v4119_v16, %v4039_v54  ;;  %v14099_v17 = vpop.f32.mrb[91].mxu0  ;;  %v4343_v54 = vld [vmem:[#allocation17] sm:$0xff]  ;;  %v15310_v16 = vpack.c.bf16 %v4346_v24, %v4345_v23 }
 0x9ed   :  { %v4508_v17 = vld [vmem:[#allocation19 + $0x8] sm:$0xff] }
 0x9ef   :  { %v4124_v56 = vpop.f32.mrb[92].mxu0 }
 0x9f0   :  { %v4125_v48 = vadd.f32 %v4124_v56, %v4044_v22  ;;  %v14102_v5 = vpop.f32.mrb[93].mxu0  ;;  %v15307_v22 = vpack.c.bf16 %v4344_v55, %v4343_v54 }
 0x9f1   :  { %v4510_v5 = vld [vmem:[#allocation19 + $0x18] sm:$0xff] }
 0x9f3   :  { %v4207_v11 = vpop.f32.mrb[94].mxu0 }
 0x9f4   :  { %v4221_v59 = vadd.f32 %v4207_v11, %v4115_v43  ;;  %v14107_v47 = vpop.f32.mrb[95].mxu0 }
 0x9f6   :  { %v4231_v63 = vadd.f32 %v12105_v50, %v4221_v59  ;;  %v4927_v59 = vld [vmem:[#allocation20] sm:$0xff] }
 0x9f7   :  { %v4212_v25 = vpop.f32.mrb[96].mxu0 }
 0x9f8   :  { %v4222_v10 = vadd.f32 %v4212_v25, %v4120_v51  ;;  %v14110_v39 = vpop.f32.mrb[97].mxu0  ;;  %v4237_v36 = vrot.slane %v4231_v63, 1  ;;  %v4248_v3 = vrot.slane %v4231_v63, 2  ;;  %v4259_v40 = vrot.slane %v4231_v63, 3  ;;  %v4507_v51 = vld [vmem:[#allocation19] sm:$0xff]  ;;  %v4644_v25 = vpop.permute.xlu1 %4643 }
 0x9f9   :  { %v15313_v56 = vpack.c.bf16 %v4508_v17, %v4507_v51 }
 0x9fa   :  { %v4232_v44 = vadd.f32 %v12105_v50, %v4222_v10 }
 0x9fb   :  { %v4217_v61 = vpop.f32.mrb[98].mxu0 }
 0x9fc   :  { %v4238_v0 = vrot.slane %v4232_v44, 1  ;;  %v4249_v28 = vrot.slane %v4232_v44, 2  ;;  %v4260_v2 = vrot.slane %v4232_v44, 3  ;;  %v4223_v1 = vadd.f32 %v4217_v61, %v4125_v48  ;;  %v14113_v20 = vpop.f32.mrb[99].mxu0  ;;  %v4509_v48 = vld [vmem:[#allocation19 + $0x10] sm:$0xff]  ;;  %v4650_v10 = vpop.permute.xlu1 %4649 }
 0x9fd   :  { %v15316_v11 = vpack.c.bf16 %v4510_v5, %v4509_v48 }
 0x9fe   :  { %v4233_v9 = vadd.f32 %v12105_v50, %v4223_v1  ;;  %v4239_v27 = vsel %vm1022_vm12, %v4237_v36, %v4238_v0  ;;  %v4250_v26 = vsel %vm752_vm0, %v4248_v3, %v4249_v28  ;;  %v4261_v30 = vsel %vm2059_vm14, %v4259_v40, %v4260_v2  ;;  %v4928_v50 = vld [vmem:[#allocation20 + $0x8] sm:$0xff] }
 0x9ff   :  { %v4245_v6 = vmax.f32 %v4231_v63, %v4239_v27  ;;  %v15318_v47 = vpack.c.bf16 %v4928_v50, %v4927_v59  ;;  %v4641_v63 = vpop.permute.xlu0 %4640 }
 0xa00   :  { %v4240_v19 = vrot.slane %v4233_v9, 1  ;;  %v4251_v18 = vrot.slane %v4233_v9, 2  ;;  %v4262_v37 = vrot.slane %v4233_v9, 3  ;;  %vm4783_vm7 = vcmp.eq.s32.totalorder %v20782_v4, %v4641_v63 }
 0xa01   :  { %v4256_v38 = vmax.f32 %v4245_v6, %v4250_v26  ;;  %v12110_v26 = vld [vmem:[%s20785_s7] ss:$0 sm:$0xff]  ;;  %s16448_s7 = scalar_lea.vmem %s11748_s29, 16 }
 0xa02   :  { %v4241_v41 = vsel %vm1022_vm12, %v4238_v0, %v4240_v19  ;;  %v4252_v42 = vsel %vm752_vm0, %v4249_v28, %v4251_v18  ;;  %v4263_v52 = vsel %vm2059_vm14, %v4260_v2, %v4262_v37  ;;  %v4247_v12 = vmax.f32 %v4233_v9, %v4240_v19  ;;  %p16449_p7 = scmp.ne.s32.totalorder %s11748_s29, %s16448_s7 }
 0xa03   :  { %v4246_v60 = vmax.f32 %v4232_v44, %v4241_v41  ;;  %v4267_v46 = vmax.f32 %v4256_v38, %v4261_v30  ;;  %v4656_v44 = vpop.permute.xlu1 %4655 }
 0xa04   :  { %v4258_v62 = vmax.f32 %v4247_v12, %v4251_v18  ;;  %v4929_v18 = vld [vmem:[#allocation20 + $0x10] sm:$0xff]  ;;  %vm4788_vm2 = vcmp.eq.s32.totalorder %v20782_v4, %v4656_v44 }
 0xa05   :  { %v4257_v29 = vmax.f32 %v4246_v60, %v4252_v42  ;;  %v20786_v60 = vmov 0  ;;  %v12118_v21 = vsel %vm4788_vm2, 1.0, %v20777_v32 }
 0xa06   :  { %v4269_v45 = vmax.f32 %v4258_v62, %v4262_v37  ;;  %v4930_v37 = vld [vmem:[#allocation20 + $0x18] sm:$0x3] }
 0xa07   :  { %v4268_v33 = vmax.f32 %v4257_v29, %v4263_v52  ;;  %v4662_v3 = vpop.permute.xlu1 %4661  ;;  %v15322_v52 = vpack.c.bf16 %v4930_v37, %v4929_v18 }
 0xa09   :  { %v15298_v34 = vpack.c.bf16 %v4268_v33, %v4267_v46  ;;  %v12113_v46 = vsel %vm4783_vm7, 1.0, %v20777_v32  ;;  %vm4786_vm7 = vcmp.eq.s32.totalorder %v20782_v4, %v4650_v10 }
 0xa0a   :  { %v12116_v8 = vsel %vm4786_vm7, 1.0, %v20777_v32 }
 0xa0b   :  { %15299 = vmatpush3.bf16.msra.mxu0 %v15298_v34  ;;  %v18262_v61 = vpop.permute.xlu1 %4667 }
 0xa0c   :  { %14118 = vmatprep.subr.mxu0 %v20777_v32 }
 0xa0f   :  { %14119 = vmatpush3.msk.msra.mxu0 %vm3891_vm9, %v4269_v45  ;;  %v18266_v28 = vpop.permute.xlu1 %4673  ;;  %vm18279_vm9 = vmpackc.low %vm5076_vm11, %vm20571_vm1 }
 0xa10   :  { %14121 = vmatmul.mubr.msk.f32.vlgmr.msra.gmra.mrb[100].mxu0 %vm3887_vm10, %v18185_v15  ;;  %15300 = vmatprep.subr.bf16.mxu0 %v20573_v13  ;;  %v20787_v60 = vsel %vm18279_vm9, 4294967295, %v20786_v60  ;;  %vm4784_vm10 = vcmp.eq.s32.totalorder %v20782_v4, %v4644_v25 }
 0xa11   :  { %15302 = vmatpush3.bf16.msra.mxu0 %v15301_v49  ;;  %14131 = vmatprep.mubr.msk.f32.mxu0 %vm16564_vm6, %v20777_v32  ;;  %20788 = vst [vmem:[#allocation108_spill] sm:$0xff] %v20787_v60  ;;  %v12114_v34 = vsel %vm4784_vm10, 1.0, %v20777_v32 }
 0xa12   :  { %15303 = vmatprep.subr.bf16.mxu0 %v20573_v13 }
 0xa13   :  { %v18270_v9 = vpop.permute.xlu1 %4679 }
 0xa15   :  { %15305 = vmatpush3.bf16.msra.mxu0 %v15304_v53 }
 0xa16   :  { %15306 = vmatprep.subr.bf16.mxu0 %v20573_v13 }
 0xa17   :  { %v18276_v41 = vpop.permute.xlu1 %4685 }
 0xa1b   :  { %v18290_v29 = vpop.permute.xlu1 %4691 }
 0xa1f   :  { %v4698_v57 = vpop.permute.xlu1 %4697 }
 0xa23   :  { %v4704_v31 = vpop.permute.xlu1 %4703 }
 0xa27   :  { %v4710_v23 = vpop.permute.xlu1 %4709 }
 0xa2b   :  { %v4716_v51 = vpop.permute.xlu1 %4715 }
 0xae3   :  { %v4339_v43 = vpop.f32.mrb[100].mxu0 }
 0xae4   :  { %v14122_v7 = vpop.f32.mrb[101].mxu0  ;;  %14132 = vmatmul.mubr.msk.f32.vlgmr.msra.gmra.mrb[102].mxu0 %vm1086_vm13, %v4339_v43 }
 0xae5   :  { %15308 = vmatpush3.bf16.msra.mxu0 %v15307_v22  ;;  %14142 = vmatprep.mubr.msk.f32.mxu0 %vm16564_vm6, %v20777_v32 }
 0xae6   :  { %15309 = vmatprep.subr.bf16.mxu0 %v20573_v13 }
 0xae9   :  { %15311 = vmatpush3.bf16.msra.mxu0 %v15310_v16 }
 0xaea   :  { %15312 = vmatprep.subr.bf16.mxu0 %v20573_v13 }
 0xaec   :  { %14143 = vmatmul.mubr.msk.f32.vlgmr.msra.gmra.mrb[104].mxu0 %vm1086_vm13, %v18234_v14  ;;  %v4647_v14 = vpop.permute.xlu0 %4646 }
 0xaed   :  { %14153 = vmatprep.mubr.msk.f32.mxu0 %vm16564_vm6, %v20777_v32  ;;  %15314 = vmatpush3.bf16.msra.mxu0 %v15313_v56  ;;  %vm4785_vm11 = vcmp.eq.s32.totalorder %v20782_v4, %v4647_v14 }
 0xaee   :  { %15315 = vmatprep.subr.bf16.mxu0 %v20573_v13  ;;  %v12115_v62 = vsel %vm4785_vm11, 1.0, %v20777_v32  ;;  %vm4790_vm11 = vcmp.eq.s32.totalorder %v20782_v4, %v4662_v3 }
 0xaef   :  { %v12120_v55 = vsel %vm4790_vm11, 1.0, %v20777_v32 }
 0xaf0   :  { %v4653_v39 = vpop.permute.xlu0 %4652 }
 0xaf1   :  { %15317 = vmatpush3.bf16.msra.mxu0 %v15316_v11  ;;  %vm4787_vm1 = vcmp.eq.s32.totalorder %v20782_v4, %v4653_v39  ;;  %v4722_v11 = vpop.permute.xlu1 %4721 }
 0xaf2   :  { %15319 = vmatprep.subr.bf16.mxu0 %v15318_v47  ;;  %v12117_v45 = vsel %vm4787_vm1, 1.0, %v20777_v32  ;;  %vm4792_vm1 = vcmp.eq.s32.totalorder %v20782_v4, %v18262_v61 }
 0xaf3   :  { %v12122_v24 = vsel %vm4792_vm1, 1.0, %v20777_v32 }
 0xaf4   :  { %v4659_v36 = vpop.permute.xlu0 %4658 }
 0xaf5   :  { %vm4789_vm10 = vcmp.eq.s32.totalorder %v20782_v4, %v4659_v36  ;;  %v4728_v25 = vpop.permute.xlu1 %4727 }
 0xaf6   :  { %v12119_v53 = vsel %vm4789_vm10, 1.0, %v20777_v32  ;;  %vm4794_vm10 = vcmp.eq.s32.totalorder %v20782_v4, %v18266_v28 }
 0xaf7   :  { %v12124_v16 = vsel %vm4794_vm10, 1.0, %v20777_v32 }
 0xaf8   :  { %v4665_v40 = vpop.permute.xlu0 %4664 }
 0xaf9   :  { %vm4791_vm7 = vcmp.eq.s32.totalorder %v20782_v4, %v4665_v40  ;;  %v4734_v36 = vpop.permute.xlu1 %4733 }
 0xafa   :  { %v12121_v22 = vsel %vm4791_vm7, 1.0, %v20777_v32  ;;  %vm4796_vm7 = vcmp.eq.s32.totalorder %v20782_v4, %v18270_v9 }
 0xafb   :  { %v12126_v48 = vsel %vm4796_vm7, 1.0, %v20777_v32 }
 0xafc   :  { %v18264_v0 = vpop.permute.xlu0 %4670 }
 0xafd   :  { %vm4793_vm2 = vcmp.eq.s32.totalorder %v20782_v4, %v18264_v0  ;;  %v4740_v28 = vpop.permute.xlu1 %4739 }
 0xafe   :  { %v12123_v43 = vsel %vm4793_vm2, 1.0, %v20777_v32  ;;  %vm4798_vm2 = vcmp.eq.s32.totalorder %v20782_v4, %v18276_v41 }
 0xaff   :  { %v12128_v59 = vsel %vm4798_vm2, 1.0, %v20777_v32 }
 0xb00   :  { %v18268_v20 = vpop.permute.xlu0 %4676 }
 0xb01   :  { %vm4795_vm11 = vcmp.eq.s32.totalorder %v20782_v4, %v18268_v20 }
 0xb02   :  { %v12125_v17 = vsel %vm4795_vm11, 1.0, %v20777_v32  ;;  %vm4800_vm11 = vcmp.eq.s32.totalorder %v20782_v4, %v18290_v29 }
 0xb03   :  { %v12130_v63 = vsel %vm4800_vm11, 1.0, %v20777_v32 }
 0xb04   :  { %v18273_v30 = vpop.permute.xlu0 %4682 }
 0xb05   :  { %vm4797_vm1 = vcmp.eq.s32.totalorder %v20782_v4, %v18273_v30 }
 0xb06   :  { %v12127_v5 = vsel %vm4797_vm1, 1.0, %v20777_v32  ;;  %vm4802_vm1 = vcmp.eq.s32.totalorder %v20782_v4, %v4698_v57 }
 0xb07   :  { %v12132_v39 = vsel %vm4802_vm1, 1.0, %v20777_v32 }
 0xb08   :  { %v18284_v12 = vpop.permute.xlu0 %4688 }
 0xb09   :  { %vm4799_vm10 = vcmp.eq.s32.totalorder %v20782_v4, %v18284_v12 }
 0xb0a   :  { %v12129_v50 = vsel %vm4799_vm10, 1.0, %v20777_v32  ;;  %vm4804_vm10 = vcmp.eq.s32.totalorder %v20782_v4, %v4704_v31 }
 0xb0b   :  { %v12134_v3 = vsel %vm4804_vm10, 1.0, %v20777_v32 }
 0xb0c   :  { %v18296_v33 = vpop.permute.xlu0 %4694 }
 0xb0d   :  { %vm4801_vm7 = vcmp.eq.s32.totalorder %v20782_v4, %v18296_v33 }
 0xb0e   :  { %v12131_v14 = vsel %vm4801_vm7, 1.0, %v20777_v32  ;;  %vm4806_vm7 = vcmp.eq.s32.totalorder %v20782_v4, %v4710_v23 }
 0xb0f   :  { %v12136_v0 = vsel %vm4806_vm7, 1.0, %v20777_v32 }
 0xb10   :  { %v4701_v49 = vpop.permute.xlu0 %4700 }
 0xb11   :  { %vm4803_vm2 = vcmp.eq.s32.totalorder %v20782_v4, %v4701_v49 }
 0xb12   :  { %v12133_v44 = vsel %vm4803_vm2, 1.0, %v20777_v32  ;;  %vm4808_vm2 = vcmp.eq.s32.totalorder %v20782_v4, %v4716_v51 }
 0xb13   :  { %v12138_v20 = vsel %vm4808_vm2, 1.0, %v20777_v32 }
 0xb14   :  { %v4707_v54 = vpop.permute.xlu0 %4706 }
 0xb15   :  { %vm4805_vm11 = vcmp.eq.s32.totalorder %v20782_v4, %v4707_v54 }
 0xb16   :  { %v12135_v40 = vsel %vm4805_vm11, 1.0, %v20777_v32  ;;  %vm4810_vm11 = vcmp.eq.s32.totalorder %v20782_v4, %v4722_v11 }
 0xb18   :  { %v4713_v7 = vpop.permute.xlu0 %4712 }
 0xb19   :  { %vm4807_vm1 = vcmp.eq.s32.totalorder %v20782_v4, %v4713_v7  ;;  %v12211_v7 = vld [vmem:[%s20789_s20 + $0x28] sm:$0xff] }
 0xb1c   :  { %v4719_v56 = vpop.permute.xlu0 %4718 }
 0xb1d   :  { %vm4809_vm10 = vcmp.eq.s32.totalorder %v20782_v4, %v4719_v56 }
 0xb1e   :  { %v12139_v9 = vsel %vm4809_vm10, 1.0, %v20777_v32  ;;  %vm4814_vm10 = vcmp.eq.s32.totalorder %v20782_v4, %v4734_v36 }
 0xb1f   :  { %v12144_v41 = vsel %vm4814_vm10, 1.0, %v20777_v32 }
 0xbb7   :  { %v4421_v2 = vpop.f32.mrb[102].mxu0 }
 0xbb8   :  { %v14133_v1 = vpop.f32.mrb[103].mxu0 }
 0xbbf   :  { %v4494_v27 = vpop.f32.mrb[104].mxu0 }
 0xbc0   :  { %v4495_v6 = vadd.f32 %v4494_v27, %v4421_v2  ;;  %v14144_v19 = vpop.f32.mrb[105].mxu0  ;;  %v12137_v2 = vsel %vm4807_vm1, 1.0, %v20777_v32  ;;  %v4746_v27 = vpop.permute.xlu1 %4745  ;;  %vm4812_vm1 = vcmp.eq.s32.totalorder %v20782_v4, %v4728_v25 }
 0xbc1   :  { %v12142_v19 = vsel %vm4812_vm1, 1.0, %v20777_v32 }
 0xbc2   :  { %v4505_v38 = vadd.f32 %v12110_v26, %v4495_v6  ;;  %v12140_v26 = vsel %vm4810_vm11, 1.0, %v20777_v32 }
 0xbc4   :  { %v4506_v42 = vmax.f32 %v4505_v38, 0.0  ;;  %v4752_v18 = vpop.permute.xlu1 %4751 }
 0xbc6   :  { %14154 = vmatmul.mubr.msk.f32.vlgmr.msra.gmra.mrb[106].mxu0 %vm1086_vm13, %v4506_v42 }
 0xbc7   :  { %15321 = vmatpush3.bf16.msra.mxu0 %v15318_v47  ;;  %14164 = vmatprep.mubr.msk.f32.mxu0 %vm4931_vm8, %v12113_v46  ;;  %v4725_v47 = vpop.permute.xlu0 %4724 }
 0xbc8   :  { %15324 = vmatprep.subr.msk.bf16.mxu0 %vm18279_vm9, %v15322_v52  ;;  %vm4811_vm7 = vcmp.eq.s32.totalorder %v20782_v4, %v4725_v47  ;;  %v5385_v47 = vld [vmem:[%s20789_s20] sm:$0xff] }
 0xbc9   :  { %v12141_v30 = vsel %vm4811_vm7, 1.0, %v20777_v32  ;;  %vm4816_vm7 = vcmp.eq.s32.totalorder %v20782_v4, %v4740_v28 }
 0xbca   :  { %v12146_v46 = vsel %vm4816_vm7, 1.0, %v20777_v32 }
 0xbcb   :  { %15327 = vmatpush3.bf16.msk.msra.mxu0 %vm18279_vm9, %v15322_v52  ;;  %v4731_v10 = vpop.permute.xlu0 %4730  ;;  %v4758_v52 = vpop.permute.xlu1 %4757 }
 0xbcc   :  { %vm4813_vm2 = vcmp.eq.s32.totalorder %v20782_v4, %v4731_v10 }
 0xbcd   :  { %v12143_v37 = vsel %vm4813_vm2, 1.0, %v20777_v32  ;;  %vm4818_vm2 = vcmp.eq.s32.totalorder %v20782_v4, %v4746_v27  ;;  %v5388_v27 = vld [vmem:[%s20789_s20 + $0x18] sm:$0xff] }
 0xbce   :  { %14165 = vmatmul.mubr.msk.f32.vlgmr.msra.gmra.mrb[108].mxu0 %vm4931_vm8, %v12114_v34  ;;  %v12148_v33 = vsel %vm4818_vm2, 1.0, %v20777_v32 }
 0xbcf   :  { %14167 = vmatprep.mubr.msk.f32.mxu0 %vm4931_vm8, %v12115_v62  ;;  %v4737_v61 = vpop.permute.xlu0 %4736  ;;  %v4764_v34 = vpop.permute.xlu1 %4763 }
 0xbd0   :  { %vm4815_vm11 = vcmp.eq.s32.totalorder %v20782_v4, %v4737_v61 }
 0xbd1   :  { %v12145_v42 = vsel %vm4815_vm11, 1.0, %v20777_v32  ;;  %vm4820_vm11 = vcmp.eq.s32.totalorder %v20782_v4, %v4752_v18 }
 0xbd2   :  { %14168 = vmatmul.mubr.msk.f32.gmra.mrb[110].mxu0 %vm4931_vm8, %v12116_v8  ;;  %v12150_v8 = vsel %vm4820_vm11, 1.0, %v20777_v32 }
 0xbd3   :  { %14170 = vmatprep.mubr.msk.f32.mxu0 %vm4931_vm8, %v12117_v45  ;;  %v4743_v1 = vpop.permute.xlu0 %4742  ;;  %v4770_v49 = vpop.permute.xlu1 %4769 }
 0xbd4   :  { %vm4817_vm1 = vcmp.eq.s32.totalorder %v20782_v4, %v4743_v1 }
 0xbd5   :  { %v12147_v12 = vsel %vm4817_vm1, 1.0, %v20777_v32  ;;  %vm4822_vm1 = vcmp.eq.s32.totalorder %v20782_v4, %v4758_v52 }
 0xbd6   :  { %14171 = vmatmul.mubr.msk.f32.gmra.mrb[112].mxu0 %vm4931_vm8, %v12118_v21  ;;  %v12152_v21 = vsel %vm4822_vm1, 1.0, %v20777_v32 }
 0xbd7   :  { %14173 = vmatprep.mubr.msk.f32.mxu0 %vm4931_vm8, %v12119_v53  ;;  %v4749_v6 = vpop.permute.xlu0 %4748 }
 0xbd8   :  { %vm4819_vm10 = vcmp.eq.s32.totalorder %v20782_v4, %v4749_v6 }
 0xbd9   :  { %v12149_v62 = vsel %vm4819_vm10, 1.0, %v20777_v32  ;;  %vm4824_vm10 = vcmp.eq.s32.totalorder %v20782_v4, %v4764_v34 }
 0xbda   :  { %14174 = vmatmul.mubr.msk.f32.gmra.mrb[114].mxu0 %vm4931_vm8, %v12120_v55  ;;  %v12154_v54 = vsel %vm4824_vm10, 1.0, %v20777_v32  ;;  %v4776_v55 = vpop.permute.xlu1 %4775 }
 0xbdb   :  { %14176 = vmatprep.mubr.msk.f32.mxu0 %vm4931_vm8, %v12121_v22  ;;  %v4755_v38 = vpop.permute.xlu0 %4754 }
 0xbdc   :  { %vm4821_vm7 = vcmp.eq.s32.totalorder %v20782_v4, %v4755_v38 }
 0xbdd   :  { %v12151_v45 = vsel %vm4821_vm7, 1.0, %v20777_v32  ;;  %vm4826_vm7 = vcmp.eq.s32.totalorder %v20782_v4, %v4770_v49 }
 0xbde   :  { %14177 = vmatmul.mubr.msk.f32.gmra.mrb[116].mxu0 %vm4931_vm8, %v12122_v24  ;;  %v12156_v24 = vsel %vm4826_vm7, 1.0, %v20777_v32 }
 0xbdf   :  { %14179 = vmatprep.mubr.msk.f32.mxu0 %vm4931_vm8, %v12123_v43  ;;  %v4761_v29 = vpop.permute.xlu0 %4760  ;;  %v12210_v43 = vld [vmem:[%s20789_s20 + $0x20] sm:$0xff] }
 0xbe0   :  { %vm4823_vm2 = vcmp.eq.s32.totalorder %v20782_v4, %v4761_v29  ;;  %v15328_v51 = vpack.c.bf16 %v12211_v7, %v12210_v43 }
 0xbe1   :  { %v12153_v31 = vsel %vm4823_vm2, 1.0, %v20777_v32  ;;  %vm4828_vm2 = vcmp.eq.s32.totalorder %v20782_v4, %v4776_v55 }
 0xbe2   :  { %14180 = vmatmul.mubr.msk.f32.gmra.mrb[118].mxu0 %vm4931_vm8, %v12124_v16  ;;  %15329 = vmatprep.subr.bf16.mxu1 %v15328_v51  ;;  %v12158_v56 = vsel %vm4828_vm2, 1.0, %v20777_v32 }
 0xbe3   :  { %14182 = vmatprep.mubr.msk.f32.mxu0 %vm4931_vm8, %v12125_v17  ;;  %v4767_v57 = vpop.permute.xlu0 %4766  ;;  %v4782_v17 = vpop.permute.xlu1 %4781  ;;  %15331 = vmatpush3.bf16.msra.mxu1 %v15328_v51 }
 0xbe4   :  { %vm4825_vm11 = vcmp.eq.s32.totalorder %v20782_v4, %v4767_v57 }
 0xbe5   :  { %v12155_v22 = vsel %vm4825_vm11, 1.0, %v20777_v32  ;;  %vm4830_vm11 = vcmp.eq.s32.totalorder %v20782_v4, %v4782_v17 }
 0xbe6   :  { %14183 = vmatmul.mubr.msk.f32.gmra.mrb[120].mxu0 %vm4931_vm8, %v12126_v48  ;;  %v12212_v48 = vld [vmem:[%s20789_s20 + $0x30] sm:$0xff] }
 0xbe7   :  { %14185 = vmatprep.mubr.msk.f32.mxu0 %vm4931_vm8, %v12127_v5  ;;  %v4773_v53 = vpop.permute.xlu0 %4772  ;;  %v12213_v5 = vld [vmem:[%s20789_s20 + $0x38] sm:$0xff] }
 0xbe8   :  { %vm4827_vm1 = vcmp.eq.s32.totalorder %v20782_v4, %v4773_v53 }
 0xbe9   :  { %v12157_v16 = vsel %vm4827_vm1, 1.0, %v20777_v32 }
 0xbea   :  { %14186 = vmatmul.mubr.msk.f32.gmra.mrb[122].mxu0 %vm4931_vm8, %v12128_v59  ;;  %v15332_v59 = vpack.c.bf16 %v12213_v5, %v12212_v48 }
 0xbeb   :  { %14188 = vmatprep.mubr.msk.f32.mxu0 %vm4931_vm8, %v12129_v50  ;;  %v4779_v23 = vpop.permute.xlu0 %4778  ;;  %v12160_v50 = vsel %vm4830_vm11, 1.0, %v20777_v32 }
 0xbec   :  { %vm4829_vm10 = vcmp.eq.s32.totalorder %v20782_v4, %v4779_v23  ;;  %15333 = vmatprep.subr.bf16.mxu1 %v15332_v59 }
 0xbed   :  { %v12159_v11 = vsel %vm4829_vm10, 1.0, %v20777_v32  ;;  %15335 = vmatpush3.bf16.msra.mxu1 %v15332_v59 }
 0xbee   :  { %14189 = vmatmul.mubr.msk.f32.gmra.mrb[124].mxu0 %vm4931_vm8, %v12130_v63  ;;  %v5386_v63 = vld [vmem:[%s20789_s20 + $0x8] sm:$0xff] }
 0xbef   :  { %14191 = vmatprep.mubr.msk.f32.mxu0 %vm4931_vm8, %v12131_v14  ;;  %v15336_v25 = vpack.c.bf16 %v5386_v63, %v5385_v47 }
 0xbf1   :  { %15337 = vmatprep.subr.bf16.mxu1 %v15336_v25 }
 0xbf2   :  { %14192 = vmatmul.mubr.msk.f32.gmra.mrb[126].mxu0 %vm4931_vm8, %v12132_v39 }
 0xbf3   :  { %14194 = vmatprep.mubr.msk.f32.mxu0 %vm4931_vm8, %v12133_v44 }
 0xbf6   :  { %14195 = vmatmul.mubr.msk.f32.gmra.mrb[128].mxu0 %vm4931_vm8, %v12134_v3 }
 0xbf7   :  { %14197 = vmatprep.mubr.msk.f32.mxu0 %vm4931_vm8, %v12135_v40 }
 0xbfa   :  { %14198 = vmatmul.mubr.msk.f32.gmra.mrb[130].mxu0 %vm4931_vm8, %v12136_v0 }
 0xbfb   :  { %14200 = vmatprep.mubr.msk.f32.mxu0 %vm4931_vm8, %v12137_v2 }
 0xbfe   :  { %14201 = vmatmul.mubr.msk.f32.gmra.mrb[132].mxu0 %vm4931_vm8, %v12138_v20 }
 0xbff   :  { %14203 = vmatprep.mubr.msk.f32.mxu0 %vm4931_vm8, %v12139_v9  ;;  %v5387_v9 = vld [vmem:[%s20789_s20 + $0x10] sm:$0xff] }
 0xc02   :  { %14204 = vmatmul.mubr.msk.f32.gmra.mrb[134].mxu0 %vm4931_vm8, %v12140_v26 }
 0xc03   :  { %14206 = vmatprep.mubr.msk.f32.mxu0 %vm4931_vm8, %v12141_v30 }
 0xc06   :  { %14207 = vmatmul.mubr.msk.f32.gmra.mrb[136].mxu0 %vm4931_vm8, %v12142_v19 }
 0xc07   :  { %14209 = vmatprep.mubr.msk.f32.mxu0 %vm4931_vm8, %v12143_v37 }
 0xc0a   :  { %14210 = vmatmul.mubr.msk.f32.gmra.mrb[138].mxu0 %vm4931_vm8, %v12144_v41 }
 0xc0b   :  { %14212 = vmatprep.mubr.msk.f32.mxu0 %vm4931_vm8, %v12145_v42 }
 0xc0e   :  { %14213 = vmatmul.mubr.msk.f32.gmra.mrb[140].mxu0 %vm4931_vm8, %v12146_v46  ;;  %v15340_v46 = vpack.c.bf16 %v5388_v27, %v5387_v9 }
 0xc0f   :  { %14215 = vmatprep.mubr.msk.f32.mxu0 %vm4931_vm8, %v12147_v12 }
 0xc12   :  { %14216 = vmatmul.mubr.msk.f32.gmra.mrb[142].mxu0 %vm4931_vm8, %v12148_v33 }
 0xc13   :  { %14218 = vmatprep.mubr.msk.f32.mxu0 %vm4931_vm8, %v12149_v62 }
 0xc16   :  { %14219 = vmatmul.mubr.msk.f32.gmra.mrb[144].mxu0 %vm4931_vm8, %v12150_v8 }
 0xc17   :  { %14221 = vmatprep.mubr.msk.f32.mxu0 %vm4931_vm8, %v12151_v45 }
 0xc1a   :  { %14222 = vmatmul.mubr.msk.f32.gmra.mrb[146].mxu0 %vm4931_vm8, %v12152_v21 }
 0xc1b   :  { %14224 = vmatprep.mubr.msk.f32.mxu0 %vm4931_vm8, %v12153_v31 }
 0xc1e   :  { %14225 = vmatmul.mubr.msk.f32.gmra.mrb[148].mxu0 %vm4931_vm8, %v12154_v54 }
 0xc1f   :  { %14227 = vmatprep.mubr.msk.f32.mxu0 %vm4931_vm8, %v12155_v22 }
 0xc22   :  { %14228 = vmatmul.mubr.msk.f32.gmra.mrb[150].mxu0 %vm4931_vm8, %v12156_v24 }
 0xc23   :  { %14230 = vmatprep.mubr.msk.f32.mxu0 %vm4931_vm8, %v12157_v16 }
 0xc26   :  { %14231 = vmatmul.mubr.msk.f32.gmra.mrb[152].mxu0 %vm4931_vm8, %v12158_v56 }
 0xc27   :  { %14233 = vmatprep.mubr.msk.f32.mxu0 %vm4931_vm8, %v12159_v11 }
 0xc2a   :  { %14234 = vmatmul.mubr.msk.f32.gmra.mrb[154].mxu0 %vm4931_vm8, %v12160_v50 }
 0xc99   :  { %v18453_v4 = vpop.f32.mrb[106].mxu0 }
 0xc9a   :  { %20790 = vst [vmem:[#allocation109_spill] sm:$0xff] %v18453_v4  ;;  %v14155_v14 = vpop.f32.mrb[107].mxu0 }
 0xca1   :  { %v18455_v10 = vpop.f32.mrb[108].mxu0 }
 0xca2   :  { %v18457_v39 = vpop.f32.mrb[109].mxu0  ;;  %v5443_v44 = vrot.slane %v18455_v10, 1  ;;  %v6345_v36 = vrot.slane %v18455_v10, 2  ;;  %v6894_v3 = vrot.slane %v18455_v10, 3  ;;  %v7443_v40 = vrot.slane %v18455_v10, 4 }
 0xca3   :  { %v5442_v61 = vrot.slane %v18457_v39, 1  ;;  %v6344_v0 = vrot.slane %v18457_v39, 2  ;;  %v6893_v28 = vrot.slane %v18457_v39, 3  ;;  %v7442_v2 = vrot.slane %v18457_v39, 4 }
 0xca5   :  { %v18467_v1 = vpop.f32.mrb[110].mxu0  ;;  %v5444_v20 = vsel %vm1022_vm12, %v5442_v61, %v5443_v44  ;;  %v18473_v26 = vsel %vm752_vm0, %v6344_v0, %v6345_v36  ;;  %v18476_v30 = vsel %vm2059_vm14, %v6893_v28, %v6894_v3  ;;  %v18479_v6 = vsel %vm2449_vm3, %v7442_v2, %v7443_v40 }
 0xca6   :  { %20791 = vst [vmem:[#allocation114_spill] sm:$0xff] %v18473_v26  ;;  %20792 = vst [vmem:[#allocation115_spill] sm:$0xff] %v18476_v30  ;;  %v18481_v19 = vpop.f32.mrb[111].mxu0  ;;  %14244 = vmatprep.mubr.msk.f32.mxu1 %vm1086_vm13, %v5444_v20  ;;  %v5447_v18 = vrot.slane %v18467_v1, 1  ;;  %v6349_v37 = vrot.slane %v18467_v1, 2  ;;  %v6898_v38 = vrot.slane %v18467_v1, 3 }
 0xca7   :  { %20793 = vst [vmem:[#allocation120_spill] sm:$0xff] %v18479_v6  ;;  %v5445_v41 = vrot.slane %v18481_v19, 1  ;;  %v6347_v42 = vrot.slane %v18481_v19, 2  ;;  %v6896_v52 = vrot.slane %v18481_v19, 3  ;;  %v7445_v12 = vrot.slane %v18481_v19, 4 }
 0xca8   :  { %v7447_v29 = vrot.slane %v18467_v1, 4 }
 0xca9   :  { %v18492_v33 = vpop.f32.mrb[112].mxu0  ;;  %v5446_v34 = vsel %vm1022_vm12, %v5443_v44, %v5445_v41  ;;  %v5448_v62 = vsel %vm1022_vm12, %v5445_v41, %v5447_v18  ;;  %v18497_v57 = vsel %vm752_vm0, %v6345_v36, %v6347_v42  ;;  %v18500_v8 = vsel %vm752_vm0, %v6347_v42, %v6349_v37 }
 0xcaa   :  { %20794 = vst [vmem:[#allocation121_spill] sm:$0xff] %v18497_v57  ;;  %20795 = vst [vmem:[#allocation126_spill] sm:$0xff] %v18500_v8  ;;  %v18502_v45 = vpop.f32.mrb[113].mxu0  ;;  %14245 = vmatmul.mubr.msk.f32.vlgmr.msra.gmra.mrb[32].mxu1 %vm1086_vm13, %v5446_v34  ;;  %v5451_v49 = vrot.slane %v18492_v33, 1  ;;  %v6353_v21 = vrot.slane %v18492_v33, 2  ;;  %v18508_v31 = vsel %vm2059_vm14, %v6894_v3, %v6896_v52  ;;  %v18511_v53 = vsel %vm2059_vm14, %v6896_v52, %v6898_v38 }
 0xcab   :  { %20796 = vst [vmem:[#allocation127_spill] sm:$0xff] %v18508_v31  ;;  %20797 = vst [vmem:[#allocation132_spill] sm:$0xff] %v18511_v53  ;;  %14247 = vmatprep.mubr.msk.f32.mxu1 %vm1086_vm13, %v5448_v62  ;;  %v5449_v54 = vrot.slane %v18502_v45, 1  ;;  %15339 = vmatpush3.bf16.msra.mxu1 %v15336_v25  ;;  %v6351_v55 = vrot.slane %v18502_v45, 2  ;;  %v6900_v22 = vrot.slane %v18502_v45, 3  ;;  %v6902_v23 = vrot.slane %v18492_v33, 3 }
 0xcac   :  { %15341 = vmatprep.subr.bf16.mxu1 %v15340_v46  ;;  %v18519_v24 = vsel %vm2449_vm3, %v7443_v40, %v7445_v12  ;;  %v18522_v43 = vsel %vm2449_vm3, %v7445_v12, %v7447_v29  ;;  %v7449_v7 = vrot.slane %v18502_v45, 4  ;;  %v7451_v16 = vrot.slane %v18492_v33, 4 }
 0xcad   :  { %20798 = vst [vmem:[#allocation133_spill] sm:$0xff] %v18519_v24  ;;  %20799 = vst [vmem:[#allocation138_spill] sm:$0xff] %v18522_v43  ;;  %v18526_v51 = vpop.f32.mrb[114].mxu0  ;;  %v5450_v17 = vsel %vm1022_vm12, %v5447_v18, %v5449_v54  ;;  %v5452_v56 = vsel %vm1022_vm12, %v5449_v54, %v5451_v49  ;;  %v18531_v48 = vsel %vm752_vm0, %v6349_v37, %v6351_v55 }
 0xcae   :  { %20800 = vst [vmem:[#allocation139_spill] sm:$0xff] %v18531_v48  ;;  %v18534_v5 = vsel %vm752_vm0, %v6351_v55, %v6353_v21  ;;  %v18536_v11 = vpop.f32.mrb[115].mxu0  ;;  %14248 = vmatmul.mubr.msk.f32.gmra.mrb[34].mxu1 %vm1086_vm13, %v5450_v17  ;;  %v5455_v59 = vrot.slane %v18526_v51, 1  ;;  %v6357_v50 = vrot.slane %v18526_v51, 2  ;;  %v18542_v47 = vsel %vm2059_vm14, %v6898_v38, %v6900_v22 }
 0xcaf   :  { %20801 = vst [vmem:[#allocation144_spill] sm:$0xff] %v18534_v5  ;;  %20802 = vst [vmem:[#allocation145_spill] sm:$0xff] %v18542_v47  ;;  %v18545_v63 = vsel %vm2059_vm14, %v6900_v22, %v6902_v23  ;;  %14250 = vmatprep.mubr.msk.f32.mxu1 %vm1086_vm13, %v5452_v56  ;;  %v5453_v25 = vrot.slane %v18536_v11, 1  ;;  %15343 = vmatpush3.bf16.msra.mxu1 %v15340_v46  ;;  %v6355_v14 = vrot.slane %v18536_v11, 2  ;;  %v6904_v44 = vrot.slane %v18536_v11, 3 }
 0xcb0   :  { %20803 = vst [vmem:[#allocation75_spill] sm:$0xff] %v18545_v63  ;;  %v6906_v36 = vrot.slane %v18526_v51, 3  ;;  %v18553_v3 = vsel %vm2449_vm3, %v7447_v29, %v7449_v7  ;;  %v18556_v40 = vsel %vm2449_vm3, %v7449_v7, %v7451_v16  ;;  %v7453_v61 = vrot.slane %v18536_v11, 4 }
 0xcb1   :  { %20804 = vst [vmem:[#allocation77_spill] sm:$0xff] %v18553_v3  ;;  %20805 = vst [vmem:[#allocation78_spill] sm:$0xff] %v18556_v40  ;;  %v7455_v0 = vrot.slane %v18526_v51, 4  ;;  %v18560_v28 = vpop.f32.mrb[116].mxu0  ;;  %v5454_v2 = vsel %vm1022_vm12, %v5451_v49, %v5453_v25  ;;  %v5456_v20 = vsel %vm1022_vm12, %v5453_v25, %v5455_v59  ;;  %v18565_v9 = vsel %vm752_vm0, %v6353_v21, %v6355_v14 }
 0xcb2   :  { %20806 = vst [vmem:[#allocation81_spill] sm:$0xff] %v18565_v9  ;;  %v18568_v27 = vsel %vm752_vm0, %v6355_v14, %v6357_v50  ;;  %v18570_v18 = vpop.f32.mrb[117].mxu0  ;;  %14251 = vmatmul.mubr.msk.f32.gmra.mrb[36].mxu1 %vm1086_vm13, %v5454_v2  ;;  %v5459_v37 = vrot.slane %v18560_v28, 1  ;;  %v6361_v38 = vrot.slane %v18560_v28, 2  ;;  %v18576_v41 = vsel %vm2059_vm14, %v6902_v23, %v6904_v44 }
 0xcb3   :  { %20807 = vst [vmem:[#allocation82_spill] sm:$0xff] %v18568_v27  ;;  %20808 = vst [vmem:[#allocation85_spill] sm:$0xff] %v18576_v41  ;;  %v18579_v42 = vsel %vm2059_vm14, %v6904_v44, %v6906_v36  ;;  %14253 = vmatprep.mubr.msk.f32.mxu1 %vm1086_vm13, %v5456_v20  ;;  %v5457_v52 = vrot.slane %v18570_v18, 1  ;;  %v6359_v46 = vrot.slane %v18570_v18, 2  ;;  %v6908_v12 = vrot.slane %v18570_v18, 3 }
 0xcb4   :  { %20809 = vst [vmem:[#allocation86_spill] sm:$0xff] %v18579_v42  ;;  %v6910_v29 = vrot.slane %v18560_v28, 3  ;;  %v18587_v34 = vsel %vm2449_vm3, %v7451_v16, %v7453_v61  ;;  %v18590_v62 = vsel %vm2449_vm3, %v7453_v61, %v7455_v0  ;;  %v7457_v49 = vrot.slane %v18570_v18, 4 }
 0xcb5   :  { %20810 = vst [vmem:[#allocation89_spill] sm:$0xff] %v18587_v34  ;;  %20811 = vst [vmem:[#allocation90_spill] sm:$0xff] %v18590_v62  ;;  %v7459_v21 = vrot.slane %v18560_v28, 4  ;;  %v18594_v54 = vpop.f32.mrb[118].mxu0  ;;  %v5458_v55 = vsel %vm1022_vm12, %v5455_v59, %v5457_v52  ;;  %v5460_v22 = vsel %vm1022_vm12, %v5457_v52, %v5459_v37  ;;  %v18599_v23 = vsel %vm752_vm0, %v6357_v50, %v6359_v46 }
 0xcb6   :  { %20812 = vst [vmem:[#allocation93_spill] sm:$0xff] %v18599_v23  ;;  %v18602_v7 = vsel %vm752_vm0, %v6359_v46, %v6361_v38  ;;  %v18604_v16 = vpop.f32.mrb[119].mxu0  ;;  %14254 = vmatmul.mubr.msk.f32.gmra.mrb[38].mxu1 %vm1086_vm13, %v5458_v55  ;;  %v5463_v17 = vrot.slane %v18594_v54, 1  ;;  %v6365_v56 = vrot.slane %v18594_v54, 2  ;;  %v18610_v25 = vsel %vm2059_vm14, %v6906_v36, %v6908_v12 }
 0xcb7   :  { %20813 = vst [vmem:[#allocation94_spill] sm:$0xff] %v18602_v7  ;;  %20814 = vst [vmem:[#allocation98_spill] sm:$0xff] %v18610_v25  ;;  %v18613_v59 = vsel %vm2059_vm14, %v6908_v12, %v6910_v29  ;;  %14256 = vmatprep.mubr.msk.f32.mxu1 %vm1086_vm13, %v5460_v22  ;;  %v5461_v50 = vrot.slane %v18604_v16, 1  ;;  %v6363_v14 = vrot.slane %v18604_v16, 2  ;;  %v6912_v44 = vrot.slane %v18604_v16, 3 }
 0xcb8   :  { %20815 = vst [vmem:[#allocation99_spill] sm:$0xff] %v18613_v59  ;;  %v6914_v61 = vrot.slane %v18594_v54, 3  ;;  %v18621_v2 = vsel %vm2449_vm3, %v7455_v0, %v7457_v49  ;;  %v18624_v20 = vsel %vm2449_vm3, %v7457_v49, %v7459_v21  ;;  %v7461_v36 = vrot.slane %v18604_v16, 4 }
 0xcb9   :  { %20816 = vst [vmem:[#allocation104_spill] sm:$0xff] %v18621_v2  ;;  %20817 = vst [vmem:[#allocation105_spill] sm:$0xff] %v18624_v20  ;;  %v7463_v52 = vrot.slane %v18594_v54, 4  ;;  %v18628_v46 = vpop.f32.mrb[120].mxu0  ;;  %v5462_v12 = vsel %vm1022_vm12, %v5459_v37, %v5461_v50  ;;  %v5464_v55 = vsel %vm1022_vm12, %v5461_v50, %v5463_v17  ;;  %v18633_v22 = vsel %vm752_vm0, %v6361_v38, %v6363_v14 }
 0xcba   :  { %20818 = vst [vmem:[#allocation110_spill] sm:$0xff] %v18633_v22  ;;  %v18636_v13 = vsel %vm752_vm0, %v6363_v14, %v6365_v56  ;;  %v18638_v0 = vpop.f32.mrb[121].mxu0  ;;  %14257 = vmatmul.mubr.msk.f32.gmra.mrb[40].mxu1 %vm1086_vm13, %v5462_v12  ;;  %v5467_v49 = vrot.slane %v18628_v46, 1  ;;  %v6369_v58 = vrot.slane %v18628_v46, 2  ;;  %v18644_v60 = vsel %vm2059_vm14, %v6910_v29, %v6912_v44 }
 0xcbb   :  { %20819 = vst [vmem:[#allocation111_spill] sm:$0xff] %v18636_v13  ;;  %20820 = vst [vmem:[#allocation116_spill] sm:$0xff] %v18644_v60  ;;  %v18647_v37 = vsel %vm2059_vm14, %v6912_v44, %v6914_v61  ;;  %14259 = vmatprep.mubr.msk.f32.mxu1 %vm1086_vm13, %v5464_v55  ;;  %v5465_v38 = vrot.slane %v18638_v0, 1  ;;  %v6367_v50 = vrot.slane %v18638_v0, 2  ;;  %v6916_v14 = vrot.slane %v18638_v0, 3 }
 0xcbc   :  { %20821 = vst [vmem:[#allocation117_spill] sm:$0xff] %v18647_v37  ;;  %v6918_v12 = vrot.slane %v18628_v46, 3  ;;  %v18655_v4 = vsel %vm2449_vm3, %v7459_v21, %v7461_v36  ;;  %v18658_v15 = vsel %vm2449_vm3, %v7461_v36, %v7463_v52  ;;  %v7465_v29 = vrot.slane %v18638_v0, 4 }
 0xcbd   :  { %20822 = vst [vmem:[#allocation122_spill] sm:$0xff] %v18655_v4  ;;  %20823 = vst [vmem:[#allocation123_spill] sm:$0xff] %v18658_v15  ;;  %v7467_v44 = vrot.slane %v18628_v46, 4  ;;  %v18662_v32 = vpop.f32.mrb[122].mxu0  ;;  %v5466_v55 = vsel %vm1022_vm12, %v5463_v17, %v5465_v38  ;;  %v5468_v35 = vsel %vm1022_vm12, %v5465_v38, %v5467_v49  ;;  %v18667_v20 = vsel %vm752_vm0, %v6365_v56, %v6367_v50 }
 0xcbe   :  { %20824 = vst [vmem:[#allocation128_spill] sm:$0xff] %v18667_v20  ;;  %v18670_v2 = vsel %vm752_vm0, %v6367_v50, %v6369_v58  ;;  %v18672_v21 = vpop.f32.mrb[123].mxu0  ;;  %14260 = vmatmul.mubr.msk.f32.gmra.mrb[42].mxu1 %vm1086_vm13, %v5466_v55  ;;  %v5471_v36 = vrot.slane %v18662_v32, 1  ;;  %v6373_v15 = vrot.slane %v18662_v32, 2  ;;  %v18678_v4 = vsel %vm2059_vm14, %v6914_v61, %v6916_v14 }
 0xcbf   :  { %20825 = vst [vmem:[#allocation129_spill] sm:$0xff] %v18670_v2  ;;  %20826 = vst [vmem:[#allocation134_spill] sm:$0xff] %v18678_v4  ;;  %v18681_v17 = vsel %vm2059_vm14, %v6916_v14, %v6918_v12  ;;  %14262 = vmatprep.mubr.msk.f32.mxu1 %vm1086_vm13, %v5468_v35  ;;  %v5469_v56 = vrot.slane %v18672_v21, 1  ;;  %v6371_v38 = vrot.slane %v18672_v21, 2  ;;  %v6920_v50 = vrot.slane %v18672_v21, 3 }
 0xcc0   :  { %20827 = vst [vmem:[#allocation135_spill] sm:$0xff] %v18681_v17  ;;  %v6922_v55 = vrot.slane %v18662_v32, 3  ;;  %v18689_v62 = vsel %vm2449_vm3, %v7463_v52, %v7465_v29  ;;  %v18692_v34 = vsel %vm2449_vm3, %v7465_v29, %v7467_v44  ;;  %v7469_v61 = vrot.slane %v18672_v21, 4 }
 0xcc1   :  { %20828 = vst [vmem:[#allocation140_spill] sm:$0xff] %v18689_v62  ;;  %20829 = vst [vmem:[#allocation141_spill] sm:$0xff] %v18692_v34  ;;  %v7471_v14 = vrot.slane %v18662_v32, 4  ;;  %v18696_v40 = vpop.f32.mrb[124].mxu0  ;;  %v5470_v35 = vsel %vm1022_vm12, %v5467_v49, %v5469_v56  ;;  %v5472_v3 = vsel %vm1022_vm12, %v5469_v56, %v5471_v36  ;;  %v18701_v43 = vsel %vm752_vm0, %v6369_v58, %v6371_v38 }
 0xcc2   :  { %20830 = vst [vmem:[#allocation146_spill] sm:$0xff] %v18701_v43  ;;  %v18704_v24 = vsel %vm752_vm0, %v6371_v38, %v6373_v15  ;;  %v18706_v52 = vpop.f32.mrb[125].mxu0  ;;  %14263 = vmatmul.mubr.msk.f32.gmra.mrb[44].mxu1 %vm1086_vm13, %v5470_v35  ;;  %v5475_v29 = vrot.slane %v18696_v40, 1  ;;  %v6377_v34 = vrot.slane %v18696_v40, 2  ;;  %v18712_v62 = vsel %vm2059_vm14, %v6918_v12, %v6920_v50 }
 0xcc3   :  { %20831 = vst [vmem:[#allocation147_spill] sm:$0xff] %v18704_v24  ;;  %20832 = vst [vmem:[#allocation76_spill] sm:$0xff] %v18712_v62  ;;  %v18715_v49 = vsel %vm2059_vm14, %v6920_v50, %v6922_v55  ;;  %14265 = vmatprep.mubr.msk.f32.mxu1 %vm1086_vm13, %v5472_v3  ;;  %v5473_v58 = vrot.slane %v18706_v52, 1  ;;  %v6375_v56 = vrot.slane %v18706_v52, 2  ;;  %v6924_v38 = vrot.slane %v18706_v52, 3 }
 0xcc4   :  { %20833 = vst [vmem:[#allocation79_spill] sm:$0xff] %v18715_v49  ;;  %v6926_v35 = vrot.slane %v18696_v40, 3  ;;  %v18723_v6 = vsel %vm2449_vm3, %v7467_v44, %v7469_v61  ;;  %v18726_v17 = vsel %vm2449_vm3, %v7469_v61, %v7471_v14  ;;  %v7473_v12 = vrot.slane %v18706_v52, 4 }
 0xcc5   :  { %20834 = vst [vmem:[#allocation80_spill] sm:$0xff] %v18723_v6  ;;  %20835 = vst [vmem:[#allocation83_spill] sm:$0xff] %v18726_v17  ;;  %v7475_v50 = vrot.slane %v18696_v40, 4  ;;  %v18730_v49 = vpop.f32.mrb[126].mxu0  ;;  %v5474_v3 = vsel %vm1022_vm12, %v5471_v36, %v5473_v58  ;;  %v5476_v62 = vsel %vm1022_vm12, %v5473_v58, %v5475_v29  ;;  %v18735_v4 = vsel %vm752_vm0, %v6373_v15, %v6375_v56 }
 0xcc6   :  { %20836 = vst [vmem:[#allocation84_spill] sm:$0xff] %v18735_v4  ;;  %v18738_v37 = vsel %vm752_vm0, %v6375_v56, %v6377_v34  ;;  %v18740_v44 = vpop.f32.mrb[127].mxu0  ;;  %14266 = vmatmul.mubr.msk.f32.gmra.mrb[46].mxu1 %vm1086_vm13, %v5474_v3  ;;  %v5479_v61 = vrot.slane %v18730_v49, 1  ;;  %v6381_v17 = vrot.slane %v18730_v49, 2  ;;  %v18746_v6 = vsel %vm2059_vm14, %v6922_v55, %v6924_v38 }
 0xcc7   :  { %20837 = vst [vmem:[#allocation87_spill] sm:$0xff] %v18738_v37  ;;  %20838 = vst [vmem:[#allocation88_spill] sm:$0xff] %v18746_v6  ;;  %v18749_v36 = vsel %vm2059_vm14, %v6924_v38, %v6926_v35  ;;  %14268 = vmatprep.mubr.msk.f32.mxu1 %vm1086_vm13, %v5476_v62  ;;  %v5477_v15 = vrot.slane %v18740_v44, 1  ;;  %v6379_v58 = vrot.slane %v18740_v44, 2  ;;  %v6928_v56 = vrot.slane %v18740_v44, 3 }
 0xcc8   :  { %20839 = vst [vmem:[#allocation91_spill] sm:$0xff] %v18749_v36  ;;  %v6930_v3 = vrot.slane %v18730_v49, 3  ;;  %v18757_v60 = vsel %vm2449_vm3, %v7471_v14, %v7473_v12  ;;  %v18760_v55 = vsel %vm2449_vm3, %v7473_v12, %v7475_v50  ;;  %v7477_v38 = vrot.slane %v18740_v44, 4 }
 0xcc9   :  { %20840 = vst [vmem:[#allocation92_spill] sm:$0xff] %v18757_v60  ;;  %20841 = vst [vmem:[#allocation95_spill] sm:$0xff] %v18760_v55  ;;  %v7479_v62 = vrot.slane %v18730_v49, 4  ;;  %v18764_v36 = vpop.f32.mrb[128].mxu0  ;;  %v5478_v6 = vsel %vm1022_vm12, %v5475_v29, %v5477_v15  ;;  %v5480_v59 = vsel %vm1022_vm12, %v5477_v15, %v5479_v61  ;;  %v18769_v25 = vsel %vm752_vm0, %v6377_v34, %v6379_v58  ;;  %v12310_v55 = vld [vmem:[%s20789_s20 + $0x40] sm:$0xff]  ;;  %v12311_v60 = vld [vmem:[%s20789_s20 + $0x48] sm:$0xff] }
 0xcca   :  { %20842 = vst [vmem:[#allocation96_spill] sm:$0xff] %v18769_v25  ;;  %v18772_v42 = vsel %vm752_vm0, %v6379_v58, %v6381_v17  ;;  %v18774_v14 = vpop.f32.mrb[129].mxu0  ;;  %14269 = vmatmul.mubr.msk.f32.gmra.mrb[48].mxu1 %vm1086_vm13, %v5478_v6  ;;  %v5483_v12 = vrot.slane %v18764_v36, 1  ;;  %v6385_v41 = vrot.slane %v18764_v36, 2  ;;  %v18782_v29 = vsel %vm2059_vm14, %v6926_v35, %v6928_v56 }
 0xccb   :  { %20843 = vst [vmem:[#allocation100_spill] sm:$0xff] %v18772_v42  ;;  %20844 = vst [vmem:[#allocation101_spill] sm:$0xff] %v18782_v29  ;;  %v18785_v15 = vsel %vm2059_vm14, %v6928_v56, %v6930_v3  ;;  %14271 = vmatprep.mubr.msk.f32.mxu1 %vm1086_vm13, %v5480_v59  ;;  %v5481_v34 = vrot.slane %v18774_v14, 1  ;;  %v18789_v58 = vpack.c.bf16 %v12311_v60, %v12310_v55  ;;  %v6383_v6 = vrot.slane %v18774_v14, 2 }
 0xccc   :  { %20845 = vst [vmem:[#allocation106_spill] sm:$0xff] %v18785_v15  ;;  %v6932_v63 = vrot.slane %v18774_v14, 3  ;;  %v6934_v47 = vrot.slane %v18764_v36, 3  ;;  %v18795_v53 = vsel %vm2449_vm3, %v7475_v50, %v7477_v38  ;;  %v18798_v35 = vsel %vm2449_vm3, %v7477_v38, %v7479_v62 }
 0xccd   :  { %20846 = vst [vmem:[#allocation107_spill] sm:$0xff] %v18795_v53  ;;  %20847 = vst [vmem:[#allocation112_spill] sm:$0xff] %v18798_v35  ;;  %v7481_v56 = vrot.slane %v18774_v14, 4  ;;  %v18801_v15 = vpop.f32.mrb[130].mxu0  ;;  %v5482_v59 = vsel %vm1022_vm12, %v5479_v61, %v5481_v34  ;;  %v5484_v60 = vsel %vm1022_vm12, %v5481_v34, %v5483_v12  ;;  %15345 = vmatprep.subr.bf16.mxu1 %v18789_v58  ;;  %v7483_v30 = vrot.slane %v18764_v36, 4 }
 0xcce   :  { %v18807_v55 = vsel %vm752_vm0, %v6381_v17, %v6383_v6  ;;  %v18810_v29 = vsel %vm752_vm0, %v6383_v6, %v6385_v41  ;;  %v18812_v50 = vpop.f32.mrb[131].mxu0  ;;  %14272 = vmatmul.mubr.msk.f32.gmra.mrb[50].mxu1 %vm1086_vm13, %v5482_v59  ;;  %v5487_v38 = vrot.slane %v18801_v15, 1  ;;  %v6389_v35 = vrot.slane %v18801_v15, 2 }
 0xccf   :  { %20848 = vst [vmem:[#allocation113_spill] sm:$0xff] %v18807_v55  ;;  %20849 = vst [vmem:[#allocation118_spill] sm:$0xff] %v18810_v29  ;;  %v18818_v61 = vsel %vm2059_vm14, %v6930_v3, %v6932_v63  ;;  %v18821_v34 = vsel %vm2059_vm14, %v6932_v63, %v6934_v47  ;;  %14274 = vmatprep.mubr.msk.f32.mxu1 %vm1086_vm13, %v5484_v60  ;;  %v5485_v17 = vrot.slane %v18812_v50, 1  ;;  %v6387_v6 = vrot.slane %v18812_v50, 2 }
 0xcd0   :  { %20850 = vst [vmem:[#allocation119_spill] sm:$0xff] %v18818_v61  ;;  %20851 = vst [vmem:[#allocation124_spill] sm:$0xff] %v18821_v34  ;;  %v6936_v53 = vrot.slane %v18812_v50, 3  ;;  %v6938_v59 = vrot.slane %v18801_v15, 3  ;;  %v18829_v31 = vsel %vm2449_vm3, %v7479_v62, %v7481_v56  ;;  %v7485_v3 = vrot.slane %v18812_v50, 4 }
 0xcd1   :  { %20852 = vst [vmem:[#allocation125_spill] sm:$0xff] %v18829_v31  ;;  %v7487_v63 = vrot.slane %v18801_v15, 4  ;;  %v18834_v34 = vpop.f32.mrb[132].mxu0  ;;  %v5486_v60 = vsel %vm1022_vm12, %v5483_v12, %v5485_v17  ;;  %v5488_v61 = vsel %vm1022_vm12, %v5485_v17, %v5487_v38  ;;  %v18839_v29 = vsel %vm752_vm0, %v6385_v41, %v6387_v6 }
 0xcd2   :  { %20853 = vst [vmem:[#allocation130_spill] sm:$0xff] %v18839_v29  ;;  %v18842_v55 = vsel %vm752_vm0, %v6387_v6, %v6389_v35  ;;  %v18844_v62 = vpop.f32.mrb[133].mxu0  ;;  %14275 = vmatmul.mubr.msk.f32.gmra.mrb[52].mxu1 %vm1086_vm13, %v5486_v60  ;;  %v5491_v31 = vrot.slane %v18834_v34, 1  ;;  %v6393_v42 = vrot.slane %v18834_v34, 2  ;;  %v18850_v25 = vsel %vm2059_vm14, %v6934_v47, %v6936_v53 }
 0xcd3   :  { %20854 = vst [vmem:[#allocation131_spill] sm:$0xff] %v18842_v55  ;;  %20855 = vst [vmem:[#allocation136_spill] sm:$0xff] %v18850_v25  ;;  %v18853_v12 = vsel %vm2059_vm14, %v6936_v53, %v6938_v59  ;;  %14277 = vmatprep.mubr.msk.f32.mxu1 %vm1086_vm13, %v5488_v61  ;;  %v5489_v41 = vrot.slane %v18844_v62, 1  ;;  %v6391_v17 = vrot.slane %v18844_v62, 2  ;;  %v6940_v6 = vrot.slane %v18844_v62, 3 }
 0xcd4   :  { %20856 = vst [vmem:[#allocation137_spill] sm:$0xff] %v18853_v12  ;;  %v6942_v60 = vrot.slane %v18834_v34, 3  ;;  %v18861_v55 = vsel %vm2449_vm3, %v7481_v56, %v7483_v30  ;;  %v18864_v29 = vsel %vm2449_vm3, %v7483_v30, %v7485_v3  ;;  %v18867_v47 = vsel %vm2449_vm3, %v7485_v3, %v7487_v63 }
 0xcd5   :  { %20857 = vst [vmem:[#allocation142_spill] sm:$0xff] %v18861_v55  ;;  %20858 = vst [vmem:[#allocation143_spill] sm:$0xff] %v18864_v29  ;;  %v7489_v53 = vrot.slane %v18844_v62, 4  ;;  %v18870_v61 = vpop.f32.mrb[134].mxu0  ;;  %v5490_v12 = vsel %vm1022_vm12, %v5487_v38, %v5489_v41  ;;  %v5492_v25 = vsel %vm1022_vm12, %v5489_v41, %v5491_v31  ;;  %v18875_v37 = vsel %vm752_vm0, %v6389_v35, %v6391_v17 }
 0xcd6   :  { %20859 = vst [vmem:[#allocation73_spill] sm:$0xff] %v18867_v47  ;;  %20860 = vst [vmem:[#allocation74_spill] sm:$0xff] %v18875_v37  ;;  %v18878_v56 = vsel %vm752_vm0, %v6391_v17, %v6393_v42  ;;  %v18880_v55 = vpop.f32.mrb[135].mxu0  ;;  %14278 = vmatmul.mubr.msk.f32.gmra.mrb[54].mxu1 %vm1086_vm13, %v5490_v12  ;;  %v5495_v30 = vrot.slane %v18870_v61, 1  ;;  %v6397_v3 = vrot.slane %v18870_v61, 2  ;;  %v18886_v47 = vsel %vm2059_vm14, %v6938_v59, %v6940_v6 }
 0xcd7   :  { %20861 = vst [vmem:[#allocation148_spill] sm:$0xff] %v18878_v56  ;;  %20862 = vst [vmem:[#allocation149_spill] sm:$0xff] %v18886_v47  ;;  %v18889_v38 = vsel %vm2059_vm14, %v6940_v6, %v6942_v60  ;;  %14280 = vmatprep.mubr.msk.f32.mxu1 %vm1086_vm13, %v5492_v25  ;;  %v5493_v35 = vrot.slane %v18880_v55, 1  ;;  %v6395_v41 = vrot.slane %v18880_v55, 2  ;;  %v6944_v17 = vrot.slane %v18880_v55, 3 }
 0xcd8   :  { %20863 = vst [vmem:[#allocation150_spill] sm:$0xff] %v18889_v38  ;;  %v6946_v12 = vrot.slane %v18870_v61, 3  ;;  %v18897_v29 = vsel %vm2449_vm3, %v7487_v63, %v7489_v53  ;;  %v7491_v56 = vrot.slane %v18834_v34, 4  ;;  %v7493_v59 = vrot.slane %v18880_v55, 4 }
 0xcd9   :  { %20864 = vst [vmem:[#allocation151_spill] sm:$0xff] %v18897_v29  ;;  %v7495_v6 = vrot.slane %v18870_v61, 4  ;;  %v18902_v38 = vpop.f32.mrb[136].mxu0  ;;  %v5494_v25 = vsel %vm1022_vm12, %v5491_v31, %v5493_v35  ;;  %v5496_v47 = vsel %vm1022_vm12, %v5493_v35, %v5495_v30  ;;  %v18907_v37 = vsel %vm752_vm0, %v6393_v42, %v6395_v41 }
 0xcda   :  { %20865 = vst [vmem:[#allocation152_spill] sm:$0xff] %v18907_v37  ;;  %v18910_v4 = vsel %vm752_vm0, %v6395_v41, %v6397_v3  ;;  %v18912_v63 = vpop.f32.mrb[137].mxu0  ;;  %14281 = vmatmul.mubr.msk.f32.gmra.mrb[56].mxu1 %vm1086_vm13, %v5494_v25  ;;  %v5499_v29 = vrot.slane %v18902_v38, 1  ;;  %v6401_v24 = vrot.slane %v18902_v38, 2  ;;  %v18918_v43 = vsel %vm2059_vm14, %v6942_v60, %v6944_v17 }
 0xcdb   :  { %20866 = vst [vmem:[#allocation153_spill] sm:$0xff] %v18910_v4  ;;  %20867 = vst [vmem:[#allocation154_spill] sm:$0xff] %v18918_v43  ;;  %v18921_v31 = vsel %vm2059_vm14, %v6944_v17, %v6946_v12  ;;  %14283 = vmatprep.mubr.msk.f32.mxu1 %vm1086_vm13, %v5496_v47  ;;  %v5497_v42 = vrot.slane %v18912_v63, 1  ;;  %v6399_v35 = vrot.slane %v18912_v63, 2  ;;  %v6948_v41 = vrot.slane %v18912_v63, 3 }
 0xcdc   :  { %20868 = vst [vmem:[#allocation155_spill] sm:$0xff] %v18921_v31  ;;  %v6950_v25 = vrot.slane %v18902_v38, 3  ;;  %v18929_v4 = vsel %vm2449_vm3, %v7489_v53, %v7491_v56  ;;  %v18932_v37 = vsel %vm2449_vm3, %v7491_v56, %v7493_v59  ;;  %v18935_v60 = vsel %vm2449_vm3, %v7493_v59, %v7495_v6 }
 0xcdd   :  { %20869 = vst [vmem:[#allocation156_spill] sm:$0xff] %v18929_v4  ;;  %20870 = vst [vmem:[#allocation157_spill] sm:$0xff] %v18932_v37  ;;  %v7497_v17 = vrot.slane %v18912_v63, 4  ;;  %v18938_v47 = vpop.f32.mrb[138].mxu0  ;;  %v5498_v31 = vsel %vm1022_vm12, %v5495_v30, %v5497_v42  ;;  %v5500_v43 = vsel %vm1022_vm12, %v5497_v42, %v5499_v29  ;;  %v18943_v2 = vsel %vm752_vm0, %v6397_v3, %v6399_v35 }
 0xcde   :  { %20871 = vst [vmem:[#allocation158_spill] sm:$0xff] %v18935_v60  ;;  %20872 = vst [vmem:[#allocation159_spill] sm:$0xff] %v18943_v2  ;;  %v18946_v53 = vsel %vm752_vm0, %v6399_v35, %v6401_v24  ;;  %v18948_v4 = vpop.f32.mrb[139].mxu0  ;;  %14284 = vmatmul.mubr.msk.f32.gmra.mrb[58].mxu1 %vm1086_vm13, %v5498_v31  ;;  %v5503_v56 = vrot.slane %v18938_v47, 1  ;;  %v6405_v59 = vrot.slane %v18938_v47, 2  ;;  %v18954_v60 = vsel %vm2059_vm14, %v6946_v12, %v6948_v41 }
 0xcdf   :  { %20873 = vst [vmem:[#allocation160_spill] sm:$0xff] %v18946_v53  ;;  %20874 = vst [vmem:[#allocation161_spill] sm:$0xff] %v18954_v60  ;;  %v18957_v30 = vsel %vm2059_vm14, %v6948_v41, %v6950_v25  ;;  %14286 = vmatprep.mubr.msk.f32.mxu1 %vm1086_vm13, %v5500_v43  ;;  %v5501_v3 = vrot.slane %v18948_v4, 1  ;;  %v6403_v42 = vrot.slane %v18948_v4, 2  ;;  %v6952_v35 = vrot.slane %v18948_v4, 3 }
 0xce0   :  { %20875 = vst [vmem:[#allocation162_spill] sm:$0xff] %v18957_v30  ;;  %v6954_v31 = vrot.slane %v18938_v47, 3  ;;  %v18965_v37 = vsel %vm2449_vm3, %v7495_v6, %v7497_v17  ;;  %v7499_v53 = vrot.slane %v18902_v38, 4  ;;  %v7501_v12 = vrot.slane %v18948_v4, 4 }
 0xce1   :  { %20876 = vst [vmem:[#allocation163_spill] sm:$0xff] %v18965_v37  ;;  %v7503_v41 = vrot.slane %v18938_v47, 4  ;;  %v18970_v30 = vpop.f32.mrb[140].mxu0  ;;  %v5502_v43 = vsel %vm1022_vm12, %v5499_v29, %v5501_v3  ;;  %v5504_v60 = vsel %vm1022_vm12, %v5501_v3, %v5503_v56  ;;  %v18975_v2 = vsel %vm752_vm0, %v6401_v24, %v6403_v42 }
 0xce2   :  { %20877 = vst [vmem:[#allocation164_spill] sm:$0xff] %v18975_v2  ;;  %v18978_v20 = vsel %vm752_vm0, %v6403_v42, %v6405_v59  ;;  %v18980_v6 = vpop.f32.mrb[141].mxu0  ;;  %14287 = vmatmul.mubr.msk.f32.gmra.mrb[60].mxu1 %vm1086_vm13, %v5502_v43  ;;  %v5507_v37 = vrot.slane %v18970_v30, 1  ;;  %v6409_v13 = vrot.slane %v18970_v30, 2  ;;  %v18986_v22 = vsel %vm2059_vm14, %v6950_v25, %v6952_v35 }
 0xce3   :  { %20878 = vst [vmem:[#allocation165_spill] sm:$0xff] %v18978_v20  ;;  %20879 = vst [vmem:[#allocation166_spill] sm:$0xff] %v18986_v22  ;;  %v18989_v29 = vsel %vm2059_vm14, %v6952_v35, %v6954_v31  ;;  %14289 = vmatprep.mubr.msk.f32.mxu1 %vm1086_vm13, %v5504_v60  ;;  %v5505_v24 = vrot.slane %v18980_v6, 1  ;;  %v6407_v3 = vrot.slane %v18980_v6, 2  ;;  %v6956_v42 = vrot.slane %v18980_v6, 3 }
 0xce4   :  { %20880 = vst [vmem:[#allocation167_spill] sm:$0xff] %v18989_v29  ;;  %v6958_v43 = vrot.slane %v18970_v30, 3  ;;  %v18997_v20 = vsel %vm2449_vm3, %v7497_v17, %v7499_v53  ;;  %v19000_v2 = vsel %vm2449_vm3, %v7499_v53, %v7501_v12  ;;  %v19003_v25 = vsel %vm2449_vm3, %v7501_v12, %v7503_v41 }
 0xce5   :  { %20881 = vst [vmem:[#allocation168_spill] sm:$0xff] %v18997_v20  ;;  %20882 = vst [vmem:[#allocation169_spill] sm:$0xff] %v19000_v2  ;;  %v7505_v35 = vrot.slane %v18980_v6, 4  ;;  %v19006_v60 = vpop.f32.mrb[142].mxu0  ;;  %v5506_v29 = vsel %vm1022_vm12, %v5503_v56, %v5505_v24  ;;  %v5508_v22 = vsel %vm1022_vm12, %v5505_v24, %v5507_v37  ;;  %v19011_v7 = vsel %vm752_vm0, %v6405_v59, %v6407_v3 }
 0xce6   :  { %20883 = vst [vmem:[#allocation170_spill] sm:$0xff] %v19003_v25  ;;  %20884 = vst [vmem:[#allocation171_spill] sm:$0xff] %v19011_v7  ;;  %v19014_v17 = vsel %vm752_vm0, %v6407_v3, %v6409_v13  ;;  %v19016_v20 = vpop.f32.mrb[143].mxu0  ;;  %14290 = vmatmul.mubr.msk.f32.gmra.mrb[62].mxu1 %vm1086_vm13, %v5506_v29  ;;  %v5511_v53 = vrot.slane %v19006_v60, 1  ;;  %v6413_v12 = vrot.slane %v19006_v60, 2  ;;  %v19022_v25 = vsel %vm2059_vm14, %v6954_v31, %v6956_v42 }
 0xce7   :  { %20885 = vst [vmem:[#allocation172_spill] sm:$0xff] %v19014_v17  ;;  %20886 = vst [vmem:[#allocation173_spill] sm:$0xff] %v19022_v25  ;;  %14292 = vmatprep.mubr.msk.f32.mxu1 %vm1086_vm13, %v5508_v22  ;;  %v5509_v56 = vrot.slane %v19016_v20, 1  ;;  %v6411_v59 = vrot.slane %v19016_v20, 2  ;;  %v19028_v24 = vsel %vm2059_vm14, %v6956_v42, %v6958_v43  ;;  %v6960_v3 = vrot.slane %v19016_v20, 3 }
 0xce8   :  { %20887 = vst [vmem:[#allocation174_spill] sm:$0xff] %v19028_v24  ;;  %v6962_v29 = vrot.slane %v19006_v60, 3  ;;  %v19033_v2 = vsel %vm2449_vm3, %v7503_v41, %v7505_v35  ;;  %v7507_v17 = vrot.slane %v18970_v30, 4  ;;  %v7509_v31 = vrot.slane %v19016_v20, 4 }
 0xce9   :  { %20888 = vst [vmem:[#allocation175_spill] sm:$0xff] %v19033_v2  ;;  %v19037_v25 = vpop.f32.mrb[144].mxu0  ;;  %v5510_v22 = vsel %vm1022_vm12, %v5507_v37, %v5509_v56  ;;  %v5512_v7 = vsel %vm1022_vm12, %v5509_v56, %v5511_v53  ;;  %v19042_v42 = vsel %vm752_vm0, %v6409_v13, %v6411_v59  ;;  %v19045_v24 = vsel %vm752_vm0, %v6411_v59, %v6413_v12 }
 0xcea   :  { %20889 = vst [vmem:[#allocation176_spill] sm:$0xff] %v19042_v42  ;;  %20890 = vst [vmem:[#allocation177_spill] sm:$0xff] %v19045_v24  ;;  %v19047_v23 = vpop.f32.mrb[145].mxu0  ;;  %14293 = vmatmul.mubr.msk.f32.gmra.mrb[64].mxu1 %vm1086_vm13, %v5510_v22  ;;  %v5515_v41 = vrot.slane %v19037_v25, 1  ;;  %v6417_v2 = vrot.slane %v19037_v25, 2  ;;  %v19053_v27 = vsel %vm2059_vm14, %v6958_v43, %v6960_v3  ;;  %v19056_v37 = vsel %vm2059_vm14, %v6960_v3, %v6962_v29 }
 0xceb   :  { %20891 = vst [vmem:[#allocation178_spill] sm:$0xff] %v19053_v27  ;;  %20892 = vst [vmem:[#allocation179_spill] sm:$0xff] %v19056_v37  ;;  %14295 = vmatprep.mubr.msk.f32.mxu1 %vm1086_vm13, %v5512_v7  ;;  %v5513_v13 = vrot.slane %v19047_v23, 1  ;;  %v6415_v56 = vrot.slane %v19047_v23, 2  ;;  %v6964_v59 = vrot.slane %v19047_v23, 3  ;;  %v6966_v22 = vrot.slane %v19037_v25, 3 }
 0xcec   :  { %v19064_v24 = vsel %vm2449_vm3, %v7505_v35, %v7507_v17  ;;  %v19067_v42 = vsel %vm2449_vm3, %v7507_v17, %v7509_v31  ;;  %v7511_v43 = vrot.slane %v19006_v60, 4  ;;  %v7513_v3 = vrot.slane %v19047_v23, 4 }
 0xced   :  { %20893 = vst [vmem:[#allocation180_spill] sm:$0xff] %v19064_v24  ;;  %20894 = vst [vmem:[#allocation181_spill] sm:$0xff] %v19067_v42  ;;  %v19071_v37 = vpop.f32.mrb[146].mxu0  ;;  %v5514_v7 = vsel %vm1022_vm12, %v5511_v53, %v5513_v13  ;;  %v5516_v27 = vsel %vm1022_vm12, %v5513_v13, %v5515_v41  ;;  %v19076_v9 = vsel %vm752_vm0, %v6413_v12, %v6415_v56 }
 0xcee   :  { %20895 = vst [vmem:[#allocation182_spill] sm:$0xff] %v19071_v37  ;;  %20896 = vst [vmem:[#allocation183_spill] sm:$0xff] %v19076_v9  ;;  %v19079_v5 = vsel %vm752_vm0, %v6415_v56, %v6417_v2  ;;  %v19081_v35 = vpop.f32.mrb[147].mxu0  ;;  %14296 = vmatmul.mubr.msk.f32.gmra.mrb[66].mxu1 %vm1086_vm13, %v5514_v7  ;;  %v5519_v17 = vrot.slane %v19071_v37, 1  ;;  %v6421_v42 = vrot.slane %v19071_v37, 2  ;;  %v19087_v24 = vsel %vm2059_vm14, %v6962_v29, %v6964_v59 }
 0xcef   :  { %20897 = vst [vmem:[#allocation184_spill] sm:$0xff] %v19079_v5  ;;  %20898 = vst [vmem:[#allocation185_spill] sm:$0xff] %v19087_v24  ;;  %v19090_v53 = vsel %vm2059_vm14, %v6964_v59, %v6966_v22  ;;  %14298 = vmatprep.mubr.msk.f32.mxu1 %vm1086_vm13, %v5516_v27  ;;  %v5517_v12 = vrot.slane %v19081_v35, 1  ;;  %v6419_v13 = vrot.slane %v19081_v35, 2  ;;  %v6968_v56 = vrot.slane %v19081_v35, 3 }
 0xcf0   :  { %20899 = vst [vmem:[#allocation186_spill] sm:$0xff] %v19090_v53  ;;  %v6970_v7 = vrot.slane %v19071_v37, 3  ;;  %v19098_v5 = vsel %vm2449_vm3, %v7509_v31, %v7511_v43  ;;  %v19101_v9 = vsel %vm2449_vm3, %v7511_v43, %v7513_v3  ;;  %v7515_v29 = vrot.slane %v19037_v25, 4 }
 0xcf1   :  { %20900 = vst [vmem:[#allocation187_spill] sm:$0xff] %v19098_v5  ;;  %20901 = vst [vmem:[#allocation188_spill] sm:$0xff] %v19101_v9  ;;  %v7517_v59 = vrot.slane %v19081_v35, 4  ;;  %v19105_v53 = vpop.f32.mrb[148].mxu0  ;;  %v5518_v27 = vsel %vm1022_vm12, %v5515_v41, %v5517_v12  ;;  %v5520_v24 = vsel %vm1022_vm12, %v5517_v12, %v5519_v17  ;;  %v19110_v48 = vsel %vm752_vm0, %v6417_v2, %v6419_v13 }
 0xcf2   :  { %20902 = vst [vmem:[#allocation189_spill] sm:$0xff] %v19105_v53  ;;  %20903 = vst [vmem:[#allocation190_spill] sm:$0xff] %v19110_v48  ;;  %v19113_v8 = vsel %vm752_vm0, %v6419_v13, %v6421_v42  ;;  %v19115_v31 = vpop.f32.mrb[149].mxu0  ;;  %14299 = vmatmul.mubr.msk.f32.gmra.mrb[68].mxu1 %vm1086_vm13, %v5518_v27  ;;  %v5523_v43 = vrot.slane %v19105_v53, 1  ;;  %v6425_v9 = vrot.slane %v19105_v53, 2  ;;  %v19121_v5 = vsel %vm2059_vm14, %v6966_v22, %v6968_v56 }
 0xcf3   :  { %20904 = vst [vmem:[#allocation191_spill] sm:$0xff] %v19113_v8  ;;  %20905 = vst [vmem:[#allocation192_spill] sm:$0xff] %v19115_v31  ;;  %v19124_v41 = vsel %vm2059_vm14, %v6968_v56, %v6970_v7  ;;  %14301 = vmatprep.mubr.msk.f32.mxu1 %vm1086_vm13, %v5520_v24  ;;  %v5521_v2 = vrot.slane %v19115_v31, 1  ;;  %v6423_v12 = vrot.slane %v19115_v31, 2  ;;  %v6972_v13 = vrot.slane %v19115_v31, 3 }
 0xcf4   :  { %20906 = vst [vmem:[#allocation193_spill] sm:$0xff] %v19121_v5  ;;  %20907 = vst [vmem:[#allocation194_spill] sm:$0xff] %v19124_v41  ;;  %v6974_v27 = vrot.slane %v19105_v53, 3  ;;  %v19132_v8 = vsel %vm2449_vm3, %v7513_v3, %v7515_v29  ;;  %v19135_v48 = vsel %vm2449_vm3, %v7515_v29, %v7517_v59  ;;  %v7519_v22 = vrot.slane %v19071_v37, 4 }
 0xcf5   :  { %20908 = vst [vmem:[#allocation195_spill] sm:$0xff] %v19132_v8  ;;  %20909 = vst [vmem:[#allocation196_spill] sm:$0xff] %v19135_v48  ;;  %v7521_v56 = vrot.slane %v19115_v31, 4  ;;  %v19139_v41 = vpop.f32.mrb[150].mxu0  ;;  %v5522_v24 = vsel %vm1022_vm12, %v5519_v17, %v5521_v2  ;;  %v5524_v5 = vsel %vm1022_vm12, %v5521_v2, %v5523_v43  ;;  %v19144_v57 = vsel %vm752_vm0, %v6421_v42, %v6423_v12 }
 0xcf6   :  { %20910 = vst [vmem:[#allocation197_spill] sm:$0xff] %v19144_v57  ;;  %v19147_v26 = vsel %vm752_vm0, %v6423_v12, %v6425_v9  ;;  %v19149_v3 = vpop.f32.mrb[151].mxu0  ;;  %14302 = vmatmul.mubr.msk.f32.gmra.mrb[70].mxu1 %vm1086_vm13, %v5522_v24  ;;  %v5527_v29 = vrot.slane %v19139_v41, 1  ;;  %v6429_v48 = vrot.slane %v19139_v41, 2  ;;  %v19155_v8 = vsel %vm2059_vm14, %v6970_v7, %v6972_v13 }
 0xcf7   :  { %20911 = vst [vmem:[#allocation198_spill] sm:$0xff] %v19147_v26  ;;  %20912 = vst [vmem:[#allocation199_spill] sm:$0xff] %v19149_v3  ;;  %v19158_v17 = vsel %vm2059_vm14, %v6972_v13, %v6974_v27  ;;  %14304 = vmatprep.mubr.msk.f32.mxu1 %vm1086_vm13, %v5524_v5  ;;  %v5525_v42 = vrot.slane %v19149_v3, 1  ;;  %v6427_v2 = vrot.slane %v19149_v3, 2  ;;  %v6976_v12 = vrot.slane %v19149_v3, 3 }
 0xcf8   :  { %20913 = vst [vmem:[#allocation200_spill] sm:$0xff] %v19155_v8  ;;  %20914 = vst [vmem:[#allocation201_spill] sm:$0xff] %v19158_v17  ;;  %v6978_v24 = vrot.slane %v19139_v41, 3  ;;  %v19166_v26 = vsel %vm2449_vm3, %v7517_v59, %v7519_v22  ;;  %v19169_v57 = vsel %vm2449_vm3, %v7519_v22, %v7521_v56  ;;  %v7523_v7 = vrot.slane %v19105_v53, 4 }
 0xcf9   :  { %20915 = vst [vmem:[#allocation202_spill] sm:$0xff] %v19166_v26  ;;  %20916 = vst [vmem:[#allocation203_spill] sm:$0xff] %v19169_v57  ;;  %v7525_v13 = vrot.slane %v19149_v3, 4  ;;  %v19173_v17 = vpop.f32.mrb[152].mxu0  ;;  %v5526_v5 = vsel %vm1022_vm12, %v5523_v43, %v5525_v42  ;;  %v5528_v8 = vsel %vm1022_vm12, %v5525_v42, %v5527_v29  ;;  %v19178_v31 = vsel %vm752_vm0, %v6425_v9, %v6427_v2 }
 0xcfa   :  { %20917 = vst [vmem:[#allocation204_spill] sm:$0xff] %v19178_v31  ;;  %v19181_v37 = vsel %vm752_vm0, %v6427_v2, %v6429_v48  ;;  %v19183_v59 = vpop.f32.mrb[153].mxu0  ;;  %14305 = vmatmul.mubr.msk.f32.gmra.mrb[72].mxu1 %vm1086_vm13, %v5526_v5  ;;  %v5531_v22 = vrot.slane %v19173_v17, 1  ;;  %v6433_v57 = vrot.slane %v19173_v17, 2  ;;  %v19189_v26 = vsel %vm2059_vm14, %v6974_v27, %v6976_v12 }
 0xcfb   :  { %20918 = vst [vmem:[#allocation205_spill] sm:$0xff] %v19181_v37  ;;  %20919 = vst [vmem:[#allocation206_spill] sm:$0xff] %v19189_v26  ;;  %v19192_v43 = vsel %vm2059_vm14, %v6976_v12, %v6978_v24  ;;  %14307 = vmatprep.mubr.msk.f32.mxu1 %vm1086_vm13, %v5528_v8  ;;  %v5529_v9 = vrot.slane %v19183_v59, 1  ;;  %v6431_v42 = vrot.slane %v19183_v59, 2  ;;  %v6980_v2 = vrot.slane %v19183_v59, 3 }
 0xcfc   :  { %20920 = vst [vmem:[#allocation207_spill] sm:$0xff] %v19192_v43  ;;  %v6982_v5 = vrot.slane %v19173_v17, 3  ;;  %v19200_v37 = vsel %vm2449_vm3, %v7521_v56, %v7523_v7  ;;  %v19203_v31 = vsel %vm2449_vm3, %v7523_v7, %v7525_v13  ;;  %v7527_v27 = vrot.slane %v19139_v41, 4 }
 0xcfd   :  { %20921 = vst [vmem:[#allocation208_spill] sm:$0xff] %v19200_v37  ;;  %20922 = vst [vmem:[#allocation209_spill] sm:$0xff] %v19203_v31  ;;  %v7529_v12 = vrot.slane %v19183_v59, 4  ;;  %v19207_v43 = vpop.f32.mrb[154].mxu0  ;;  %v5530_v8 = vsel %vm1022_vm12, %v5527_v29, %v5529_v9  ;;  %v5532_v26 = vsel %vm1022_vm12, %v5529_v9, %v5531_v22  ;;  %v19212_v3 = vsel %vm752_vm0, %v6429_v48, %v6431_v42 }
 0xcfe   :  { %v19215_v53 = vsel %vm752_vm0, %v6431_v42, %v6433_v57  ;;  %v19217_v56 = vpop.f32.mrb[155].mxu0  ;;  %14308 = vmatmul.mubr.msk.f32.gmra.mrb[74].mxu1 %vm1086_vm13, %v5530_v8  ;;  %v5535_v7 = vrot.slane %v19207_v43, 1  ;;  %v19223_v37 = vsel %vm2059_vm14, %v6978_v24, %v6980_v2  ;;  %v19226_v29 = vsel %vm2059_vm14, %v6980_v2, %v6982_v5 }
 0xcff   :  { %20923 = vst [vmem:[#allocation210_spill] sm:$0xff] %v19215_v53  ;;  %20924 = vst [vmem:[#allocation211_spill] sm:$0xff] %v19223_v37  ;;  %14310 = vmatprep.mubr.msk.f32.mxu1 %vm1086_vm13, %v5532_v26  ;;  %v5533_v48 = vrot.slane %v19217_v56, 1  ;;  %v6435_v9 = vrot.slane %v19217_v56, 2  ;;  %v6984_v42 = vrot.slane %v19217_v56, 3  ;;  %v19234_v53 = vsel %vm2449_vm3, %v7525_v13, %v7527_v27 }
 0xd00   :  { %20925 = vst [vmem:[#allocation212_spill] sm:$0xff] %v19226_v29  ;;  %20926 = vst [vmem:[#allocation213_spill] sm:$0xff] %v19234_v53  ;;  %v19237_v24 = vsel %vm2449_vm3, %v7527_v27, %v7529_v12  ;;  %v7531_v2 = vrot.slane %v19173_v17, 4  ;;  %v7533_v26 = vrot.slane %v19217_v56, 4  ;;  %v20928_v8 = vrot.slane %v19207_v43, 2 }
 0xd01   :  { %20927 = vst [vmem:[#allocation214_spill] sm:$0xff] %v19237_v24  ;;  %v5534_v31 = vsel %vm1022_vm12, %v5531_v22, %v5533_v48  ;;  %v5536_v29 = vsel %vm1022_vm12, %v5533_v48, %v5535_v7  ;;  %v19244_v37 = vsel %vm752_vm0, %v6433_v57, %v6435_v9  ;;  %v19253_v27 = vsel %vm2059_vm14, %v6982_v5, %v6984_v42 }
 0xd02   :  { %v19249_v13 = vsel %vm752_vm0, %v6435_v9, %v20928_v8  ;;  %14311 = vmatmul.mubr.msk.f32.gmra.mrb[76].mxu1 %vm1086_vm13, %v5534_v31  ;;  %v20929_v24 = vrot.slane %v19207_v43, 3  ;;  %v19261_v22 = vsel %vm2449_vm3, %v7529_v12, %v7531_v2  ;;  %v19264_v57 = vsel %vm2449_vm3, %v7531_v2, %v7533_v26  ;;  %v12312_v9 = vld [vmem:[%s20789_s20 + $0x50] sm:$0xff]  ;;  %v12313_v31 = vld [vmem:[%s20789_s20 + $0x58] sm:$0xff] }
 0xd03   :  { %14313 = vmatprep.mubr.msk.f32.mxu1 %vm1086_vm13, %v5536_v29  ;;  %v7535_v48 = vrot.slane %v19207_v43, 4  ;;  %v15348_v12 = vpack.c.bf16 %v12313_v31, %v12312_v9  ;;  %v20966_v29 = vld [vmem:[#allocation172_spill] sm:$0xff]  ;;  %v20968_v8 = vld [vmem:[#allocation177_spill] sm:$0xff]  ;;  %v20972_v9 = vld [vmem:[#allocation191_spill] sm:$0xff] }
 0xd04   :  { %v19258_v53 = vsel %vm2059_vm14, %v6984_v42, %v20929_v24  ;;  %v20967_v42 = vld [vmem:[#allocation176_spill] sm:$0xff]  ;;  %v20969_v24 = vld [vmem:[#allocation183_spill] sm:$0xff]  ;;  %v20973_v31 = vld [vmem:[#allocation197_spill] sm:$0xff] }
 0xd05   :  { %v19273_v5 = vsel %vm2449_vm3, %v7533_v26, %v7535_v48  ;;  %v20970_v2 = vld [vmem:[#allocation184_spill] sm:$0xff]  ;;  %v20971_v26 = vld [vmem:[#allocation190_spill] sm:$0xff] }
 0xd06   :  { %14314 = vmatmul.mubr.msk.f32.gmra.mrb[78].mxu1 %vm1086_vm13, %v5535_v7  ;;  %v20965_v7 = vld [vmem:[#allocation171_spill] sm:$0xff] }
 0xd07   :  { %14324 = vmatprep.mubr.msk.f32.mxu1 %vm1086_vm13, %v18457_v39  ;;  %v12363_v39 = vld [vmem:[%s20789_s20 + $0x68] sm:$0xff] }
 0xd0a   :  { %14325 = vmatmul.mubr.msk.f32.vlgmr.msra.gmra.mrb[32].mxu1 %vm1086_vm13, %v18455_v10  ;;  %v12362_v10 = vld [vmem:[%s20789_s20 + $0x60] sm:$0xff] }
 0xd0b   :  { %14327 = vmatprep.mubr.msk.f32.mxu1 %vm1086_vm13, %v18481_v19  ;;  %15347 = vmatpush3.bf16.msra.mxu1 %v18789_v58  ;;  %v20932_v19 = vld [vmem:[#allocation189_spill] sm:$0xff]  ;;  %v20950_v58 = vld [vmem:[#allocation87_spill] sm:$0xff] }
 0xd0c   :  { %15349 = vmatprep.subr.bf16.mxu1 %v15348_v12 }
 0xd0e   :  { %14328 = vmatmul.mubr.msk.f32.gmra.mrb[34].mxu1 %vm1086_vm13, %v18467_v1  ;;  %v15352_v1 = vpack.c.bf16 %v12363_v39, %v12362_v10  ;;  %v20975_v10 = vld [vmem:[#allocation204_spill] sm:$0xff]  ;;  %v20976_v39 = vld [vmem:[#allocation205_spill] sm:$0xff] }
 0xd0f   :  { %14330 = vmatprep.mubr.msk.f32.mxu1 %vm1086_vm13, %v18502_v45  ;;  %15351 = vmatpush3.bf16.msra.mxu1 %v15348_v12  ;;  %v12364_v45 = vld [vmem:[%s20789_s20 + $0x70] sm:$0xff]  ;;  %v20974_v12 = vld [vmem:[#allocation198_spill] sm:$0xff] }
 0xd10   :  { %15353 = vmatprep.subr.bf16.mxu1 %v15352_v1 }
 0xd12   :  { %14331 = vmatmul.mubr.msk.f32.gmra.mrb[36].mxu1 %vm1086_vm13, %v18492_v33  ;;  %v20933_v33 = vld [vmem:[#allocation199_spill] sm:$0xff] }
 0xd13   :  { %14333 = vmatprep.mubr.msk.f32.mxu1 %vm1086_vm13, %v18536_v11  ;;  %v20934_v11 = vld [vmem:[#allocation114_spill] sm:$0xff] }
 0xd16   :  { %14334 = vmatmul.mubr.msk.f32.gmra.mrb[38].mxu1 %vm1086_vm13, %v18526_v51  ;;  %v12365_v51 = vld [vmem:[%s20789_s20 + $0x78] sm:$0xff] }
 0xd17   :  { %14336 = vmatprep.mubr.msk.f32.mxu1 %vm1086_vm13, %v18570_v18  ;;  %v20936_v18 = vld [vmem:[#allocation126_spill] sm:$0xff] }
 0xd1a   :  { %14337 = vmatmul.mubr.msk.f32.gmra.mrb[40].mxu1 %vm1086_vm13, %v18560_v28  ;;  %v20935_v28 = vld [vmem:[#allocation121_spill] sm:$0xff] }
 0xd1b   :  { %14339 = vmatprep.mubr.msk.f32.mxu1 %vm1086_vm13, %v18604_v16  ;;  %v20939_v16 = vld [vmem:[#allocation81_spill] sm:$0xff] }
 0xd1e   :  { %14340 = vmatmul.mubr.msk.f32.gmra.mrb[42].mxu1 %vm1086_vm13, %v18594_v54  ;;  %v20937_v54 = vld [vmem:[#allocation139_spill] sm:$0xff] }
 0xd1f   :  { %14342 = vmatprep.mubr.msk.f32.mxu1 %vm1086_vm13, %v18638_v0  ;;  %v20942_v0 = vld [vmem:[#allocation94_spill] sm:$0xff] }
 0xd22   :  { %14343 = vmatmul.mubr.msk.f32.gmra.mrb[44].mxu1 %vm1086_vm13, %v18628_v46  ;;  %v20941_v46 = vld [vmem:[#allocation93_spill] sm:$0xff] }
 0xd23   :  { %14345 = vmatprep.mubr.msk.f32.mxu1 %vm1086_vm13, %v18672_v21  ;;  %v20943_v21 = vld [vmem:[#allocation110_spill] sm:$0xff] }
 0xd26   :  { %14346 = vmatmul.mubr.msk.f32.gmra.mrb[46].mxu1 %vm1086_vm13, %v18662_v32  ;;  %v20930_v32 = vld [vmem:[#allocation182_spill] sm:$0xff] }
 0xd27   :  { %14348 = vmatprep.mubr.msk.f32.mxu1 %vm1086_vm13, %v18706_v52  ;;  %v20944_v52 = vld [vmem:[#allocation111_spill] sm:$0xff] }
 0xd2a   :  { %14349 = vmatmul.mubr.msk.f32.gmra.mrb[48].mxu1 %vm1086_vm13, %v18696_v40  ;;  %v15356_v40 = vpack.c.bf16 %v12365_v51, %v12364_v45  ;;  %v20981_v51 = vld [vmem:[#allocation132_spill] sm:$0xff] }
 0xd2b   :  { %14351 = vmatprep.mubr.msk.f32.mxu1 %vm1086_vm13, %v18740_v44  ;;  %v20946_v44 = vld [vmem:[#allocation129_spill] sm:$0xff] }
 0xd2e   :  { %14352 = vmatmul.mubr.msk.f32.gmra.mrb[50].mxu1 %vm1086_vm13, %v18730_v49  ;;  %v20945_v49 = vld [vmem:[#allocation128_spill] sm:$0xff] }
 0xd2f   :  { %14354 = vmatprep.mubr.msk.f32.mxu1 %vm1086_vm13, %v18774_v14  ;;  %v20948_v14 = vld [vmem:[#allocation147_spill] sm:$0xff] }
 0xd32   :  { %14355 = vmatmul.mubr.msk.f32.gmra.mrb[52].mxu1 %vm1086_vm13, %v18764_v36  ;;  %v20947_v36 = vld [vmem:[#allocation146_spill] sm:$0xff] }
 0xd33   :  { %14357 = vmatprep.mubr.msk.f32.mxu1 %vm1086_vm13, %v18812_v50  ;;  %v12414_v50 = vld [vmem:[%s20789_s20 + $0x80] sm:$0xff] }
 0xd36   :  { %14358 = vmatmul.mubr.msk.f32.gmra.mrb[54].mxu1 %vm1086_vm13, %v18801_v15  ;;  %v20949_v15 = vld [vmem:[#allocation84_spill] sm:$0xff] }
 0xd37   :  { %14360 = vmatprep.mubr.msk.f32.mxu1 %vm1086_vm13, %v18844_v62  ;;  %v20952_v62 = vld [vmem:[#allocation100_spill] sm:$0xff] }
 0xd3a   :  { %14361 = vmatmul.mubr.msk.f32.gmra.mrb[56].mxu1 %vm1086_vm13, %v18834_v34  ;;  %v12415_v34 = vld [vmem:[%s20789_s20 + $0x88] sm:$0xff] }
 0xd3b   :  { %14363 = vmatprep.mubr.msk.f32.mxu1 %vm1086_vm13, %v18880_v55  ;;  %v20951_v55 = vld [vmem:[#allocation96_spill] sm:$0xff] }
 0xd3e   :  { %14364 = vmatmul.mubr.msk.f32.gmra.mrb[58].mxu1 %vm1086_vm13, %v18870_v61  ;;  %v15360_v61 = vpack.c.bf16 %v12415_v34, %v12414_v50  ;;  %v21003_v50 = vld [vmem:[#allocation150_spill] sm:$0xff] }
 0xd3f   :  { %14366 = vmatprep.mubr.msk.f32.mxu1 %vm1086_vm13, %v18912_v63  ;;  %v20954_v63 = vld [vmem:[#allocation118_spill] sm:$0xff] }
 0xd40   :  { %v21004_v34 = vld [vmem:[#allocation154_spill] sm:$0xff] }
 0xd42   :  { %14367 = vmatmul.mubr.msk.f32.gmra.mrb[60].mxu1 %vm1086_vm13, %v18902_v38  ;;  %v20953_v38 = vld [vmem:[#allocation113_spill] sm:$0xff] }
 0xd43   :  { %14369 = vmatprep.mubr.msk.f32.mxu1 %vm1086_vm13, %v18948_v4  ;;  %v20931_v4 = vld [vmem:[#allocation192_spill] sm:$0xff] }
 0xd46   :  { %14370 = vmatmul.mubr.msk.f32.gmra.mrb[62].mxu1 %vm1086_vm13, %v18938_v47  ;;  %v20955_v47 = vld [vmem:[#allocation130_spill] sm:$0xff] }
 0xd47   :  { %14372 = vmatprep.mubr.msk.f32.mxu1 %vm1086_vm13, %v18980_v6  ;;  %v20957_v6 = vld [vmem:[#allocation74_spill] sm:$0xff] }
 0xd4a   :  { %14373 = vmatmul.mubr.msk.f32.gmra.mrb[64].mxu1 %vm1086_vm13, %v18970_v30  ;;  %v20956_v30 = vld [vmem:[#allocation131_spill] sm:$0xff] }
 0xd4b   :  { %14375 = vmatprep.mubr.msk.f32.mxu1 %vm1086_vm13, %v19016_v20  ;;  %v20940_v20 = vld [vmem:[#allocation82_spill] sm:$0xff] }
 0xd4e   :  { %14376 = vmatmul.mubr.msk.f32.gmra.mrb[66].mxu1 %vm1086_vm13, %v19006_v60  ;;  %v20959_v60 = vld [vmem:[#allocation152_spill] sm:$0xff] }
 0xd4f   :  { %14378 = vmatprep.mubr.msk.f32.mxu1 %vm1086_vm13, %v19047_v23  ;;  %v20938_v23 = vld [vmem:[#allocation144_spill] sm:$0xff] }
 0xd52   :  { %14379 = vmatmul.mubr.msk.f32.gmra.mrb[68].mxu1 %vm1086_vm13, %v19037_v25  ;;  %v20958_v25 = vld [vmem:[#allocation148_spill] sm:$0xff] }
 0xd53   :  { %14381 = vmatprep.mubr.msk.f32.mxu1 %vm1086_vm13, %v19081_v35  ;;  %v20960_v35 = vld [vmem:[#allocation153_spill] sm:$0xff] }
 0xd56   :  { %14382 = vmatmul.mubr.msk.f32.gmra.mrb[70].mxu1 %vm1086_vm13, %v20930_v32  ;;  %v12416_v32 = vld [vmem:[%s20789_s20 + $0x90] sm:$0xff] }
 0xd57   :  { %14384 = vmatprep.mubr.msk.f32.mxu1 %vm1086_vm13, %v20931_v4  ;;  %v12417_v4 = vld [vmem:[%s20789_s20 + $0x98] sm:$0xff]  ;;  %s16452_s20 = scalar_lea.vmem %s11748_s29, 32 }
 0xd58   :  { %v15364_v45 = vpack.c.bf16 %v12417_v4, %v12416_v32  ;;  %v21034_v32 = vld [vmem:[#allocation122_spill] sm:$0xff]  ;;  %v21035_v4 = vld [vmem:[#allocation123_spill] sm:$0xff]  ;;  %p16454_p9 = scmp.lt.s32.totalorder %s16452_s20, %s16448_s7 }
 0xd5a   :  { %14385 = vmatmul.mubr.msk.f32.gmra.mrb[72].mxu1 %vm1086_vm13, %v20932_v19  ;;  %v20978_v19 = vrot.slane %v19207_v43, 2  ;;  %p16455_p10 = por %p16454_p9, %p16453_p8 }
 0xd5b   :  { %14387 = vmatprep.mubr.msk.f32.mxu1 %vm1086_vm13, %v20933_v33  ;;  %v20979_v33 = vld [vmem:[#allocation115_spill] sm:$0xff] }
 0xd5c   :  { %p16456_p11 = pnand %p16455_p10, %p16449_p7 }
 0xd5e   :  { %14388 = vmatmul.mubr.msk.f32.gmra.mrb[74].mxu1 %vm1086_vm13, %v19139_v41  ;;  %v20961_v41 = vld [vmem:[#allocation159_spill] sm:$0xff] }
 0xd5f   :  { %14390 = vmatprep.mubr.msk.f32.mxu1 %vm1086_vm13, %v19183_v59  ;;  %v20963_v59 = vld [vmem:[#allocation164_spill] sm:$0xff] }
 0xd62   :  { %14391 = vmatmul.mubr.msk.f32.gmra.mrb[76].mxu1 %vm1086_vm13, %v19173_v17  ;;  %v20962_v17 = vld [vmem:[#allocation160_spill] sm:$0xff] }
 0xd63   :  { %14393 = vmatprep.mubr.msk.f32.mxu1 %vm1086_vm13, %v19217_v56  ;;  %v20964_v56 = vld [vmem:[#allocation165_spill] sm:$0xff] }
 0xd66   :  { %14394 = vmatmul.mubr.msk.f32.gmra.mrb[78].mxu1 %vm1086_vm13, %v19207_v43 }
 0xd67   :  { %14404 = vmatprep.mubr.msk.f32.mxu1 %vm1086_vm13, %v20934_v11  ;;  %v20984_v11 = vld [vmem:[#allocation85_spill] sm:$0xff] }
 0xd6a   :  { %14405 = vmatmul.mubr.msk.f32.vlgmr.msra.gmra.mrb[32].mxu1 %vm1086_vm13, %v20935_v28  ;;  %v20986_v28 = vld [vmem:[#allocation98_spill] sm:$0xff] }
 0xd6b   :  { %14407 = vmatprep.mubr.msk.f32.mxu1 %vm1086_vm13, %v20936_v18  ;;  %15355 = vmatpush3.bf16.msra.mxu1 %v15352_v1  ;;  %v20977_v1 = vld [vmem:[#allocation210_spill] sm:$0xff]  ;;  %v20987_v18 = vld [vmem:[#allocation99_spill] sm:$0xff] }
 0xd6c   :  { %15357 = vmatprep.subr.bf16.mxu1 %v15356_v40 }
 0xd6e   :  { %14408 = vmatmul.mubr.msk.f32.gmra.mrb[34].mxu1 %vm1086_vm13, %v20937_v54  ;;  %v20988_v54 = vld [vmem:[#allocation116_spill] sm:$0xff] }
 0xd6f   :  { %14410 = vmatprep.mubr.msk.f32.mxu1 %vm1086_vm13, %v20938_v23  ;;  %15359 = vmatpush3.bf16.msra.mxu1 %v15356_v40  ;;  %v20985_v40 = vld [vmem:[#allocation86_spill] sm:$0xff]  ;;  %v20989_v23 = vld [vmem:[#allocation117_spill] sm:$0xff] }
 0xd70   :  { %15361 = vmatprep.subr.bf16.mxu1 %v15360_v61 }
 0xd72   :  { %14411 = vmatmul.mubr.msk.f32.gmra.mrb[36].mxu1 %vm1086_vm13, %v20939_v16  ;;  %v20990_v16 = vld [vmem:[#allocation134_spill] sm:$0xff] }
 0xd73   :  { %14413 = vmatprep.mubr.msk.f32.mxu1 %vm1086_vm13, %v20940_v20  ;;  %v20991_v20 = vld [vmem:[#allocation135_spill] sm:$0xff] }
 0xd76   :  { %14414 = vmatmul.mubr.msk.f32.gmra.mrb[38].mxu1 %vm1086_vm13, %v20941_v46  ;;  %v20992_v46 = vld [vmem:[#allocation76_spill] sm:$0xff] }
 0xd77   :  { %14416 = vmatprep.mubr.msk.f32.mxu1 %vm1086_vm13, %v20942_v0  ;;  %v20993_v0 = vld [vmem:[#allocation79_spill] sm:$0xff] }
 0xd7a   :  { %14417 = vmatmul.mubr.msk.f32.gmra.mrb[40].mxu1 %vm1086_vm13, %v20943_v21  ;;  %v20994_v21 = vld [vmem:[#allocation88_spill] sm:$0xff] }
 0xd7b   :  { %14419 = vmatprep.mubr.msk.f32.mxu1 %vm1086_vm13, %v20944_v52  ;;  %v20995_v52 = vld [vmem:[#allocation91_spill] sm:$0xff] }
 0xd7e   :  { %14420 = vmatmul.mubr.msk.f32.gmra.mrb[42].mxu1 %vm1086_vm13, %v20945_v49  ;;  %v20996_v49 = vld [vmem:[#allocation101_spill] sm:$0xff] }
 0xd7f   :  { %14422 = vmatprep.mubr.msk.f32.mxu1 %vm1086_vm13, %v20946_v44  ;;  %v20997_v44 = vld [vmem:[#allocation106_spill] sm:$0xff] }
 0xd82   :  { %14423 = vmatmul.mubr.msk.f32.gmra.mrb[44].mxu1 %vm1086_vm13, %v20947_v36  ;;  %v20998_v36 = vld [vmem:[#allocation119_spill] sm:$0xff] }
 0xd83   :  { %14425 = vmatprep.mubr.msk.f32.mxu1 %vm1086_vm13, %v20948_v14  ;;  %v20999_v14 = vld [vmem:[#allocation124_spill] sm:$0xff] }
 0xd86   :  { %14426 = vmatmul.mubr.msk.f32.gmra.mrb[46].mxu1 %vm1086_vm13, %v20949_v15  ;;  %v21000_v15 = vld [vmem:[#allocation136_spill] sm:$0xff] }
 0xd87   :  { %14428 = vmatprep.mubr.msk.f32.mxu1 %vm1086_vm13, %v20950_v58  ;;  %v21001_v58 = vld [vmem:[#allocation137_spill] sm:$0xff] }
 0xd8a   :  { %14429 = vmatmul.mubr.msk.f32.gmra.mrb[48].mxu1 %vm1086_vm13, %v20951_v55  ;;  %v21002_v55 = vld [vmem:[#allocation149_spill] sm:$0xff] }
 0xd8b   :  { %14431 = vmatprep.mubr.msk.f32.mxu1 %vm1086_vm13, %v20952_v62  ;;  %v21005_v62 = vld [vmem:[#allocation155_spill] sm:$0xff] }
 0xd8e   :  { %14432 = vmatmul.mubr.msk.f32.gmra.mrb[50].mxu1 %vm1086_vm13, %v20953_v38  ;;  %v21007_v38 = vld [vmem:[#allocation162_spill] sm:$0xff] }
 0xd8f   :  { %14434 = vmatprep.mubr.msk.f32.mxu1 %vm1086_vm13, %v20954_v63  ;;  %v21008_v63 = vld [vmem:[#allocation166_spill] sm:$0xff] }
 0xd92   :  { %14435 = vmatmul.mubr.msk.f32.gmra.mrb[52].mxu1 %vm1086_vm13, %v20955_v47  ;;  %v21009_v47 = vld [vmem:[#allocation167_spill] sm:$0xff] }
 0xd93   :  { %14437 = vmatprep.mubr.msk.f32.mxu1 %vm1086_vm13, %v20956_v30  ;;  %v21010_v30 = vld [vmem:[#allocation173_spill] sm:$0xff] }
 0xd96   :  { %14438 = vmatmul.mubr.msk.f32.gmra.mrb[54].mxu1 %vm1086_vm13, %v20957_v6  ;;  %v21011_v6 = vld [vmem:[#allocation174_spill] sm:$0xff] }
 0xd97   :  { %14440 = vmatprep.mubr.msk.f32.mxu1 %vm1086_vm13, %v20958_v25  ;;  %v21012_v25 = vld [vmem:[#allocation178_spill] sm:$0xff] }
 0xd9a   :  { %14441 = vmatmul.mubr.msk.f32.gmra.mrb[56].mxu1 %vm1086_vm13, %v20959_v60  ;;  %v21013_v60 = vld [vmem:[#allocation179_spill] sm:$0xff] }
 0xd9b   :  { %14443 = vmatprep.mubr.msk.f32.mxu1 %vm1086_vm13, %v20960_v35  ;;  %v21014_v35 = vld [vmem:[#allocation185_spill] sm:$0xff] }
 0xd9e   :  { %14444 = vmatmul.mubr.msk.f32.gmra.mrb[58].mxu1 %vm1086_vm13, %v20961_v41  ;;  %v21015_v41 = vld [vmem:[#allocation186_spill] sm:$0xff] }
 0xd9f   :  { %14446 = vmatprep.mubr.msk.f32.mxu1 %vm1086_vm13, %v20962_v17  ;;  %v21016_v17 = vld [vmem:[#allocation193_spill] sm:$0xff] }
 0xda2   :  { %14447 = vmatmul.mubr.msk.f32.gmra.mrb[60].mxu1 %vm1086_vm13, %v20963_v59  ;;  %v21017_v59 = vld [vmem:[#allocation194_spill] sm:$0xff] }
 0xda3   :  { %14449 = vmatprep.mubr.msk.f32.mxu1 %vm1086_vm13, %v20964_v56  ;;  %v21018_v56 = vld [vmem:[#allocation200_spill] sm:$0xff] }
 0xda6   :  { %14450 = vmatmul.mubr.msk.f32.gmra.mrb[62].mxu1 %vm1086_vm13, %v20965_v7  ;;  %v21019_v7 = vld [vmem:[#allocation201_spill] sm:$0xff] }
 0xda7   :  { %14452 = vmatprep.mubr.msk.f32.mxu1 %vm1086_vm13, %v20966_v29  ;;  %v21020_v29 = vld [vmem:[#allocation206_spill] sm:$0xff] }
 0xdaa   :  { %14453 = vmatmul.mubr.msk.f32.gmra.mrb[64].mxu1 %vm1086_vm13, %v20967_v42  ;;  %v21021_v42 = vld [vmem:[#allocation207_spill] sm:$0xff] }
 0xdab   :  { %14455 = vmatprep.mubr.msk.f32.mxu1 %vm1086_vm13, %v20968_v8  ;;  %v21022_v8 = vld [vmem:[#allocation211_spill] sm:$0xff] }
 0xdae   :  { %14456 = vmatmul.mubr.msk.f32.gmra.mrb[66].mxu1 %vm1086_vm13, %v20969_v24  ;;  %v21023_v24 = vld [vmem:[#allocation212_spill] sm:$0xff] }
 0xdaf   :  { %14458 = vmatprep.mubr.msk.f32.mxu1 %vm1086_vm13, %v20970_v2  ;;  %v21024_v2 = vrot.slane %v19207_v43, 3 }
 0xdb2   :  { %14459 = vmatmul.mubr.msk.f32.gmra.mrb[68].mxu1 %vm1086_vm13, %v20971_v26  ;;  %v21025_v26 = vld [vmem:[#allocation120_spill] sm:$0xff] }
 0xdb3   :  { %14461 = vmatprep.mubr.msk.f32.mxu1 %vm1086_vm13, %v20972_v9  ;;  %v21026_v9 = vld [vmem:[#allocation133_spill] sm:$0xff] }
 0xdb6   :  { %14462 = vmatmul.mubr.msk.f32.gmra.mrb[70].mxu1 %vm1086_vm13, %v20973_v31  ;;  %v21027_v31 = vld [vmem:[#allocation138_spill] sm:$0xff] }
 0xdb7   :  { %14464 = vmatprep.mubr.msk.f32.mxu1 %vm1086_vm13, %v20974_v12  ;;  %v21028_v12 = vld [vmem:[#allocation77_spill] sm:$0xff] }
 0xdba   :  { %14465 = vmatmul.mubr.msk.f32.gmra.mrb[72].mxu1 %vm1086_vm13, %v20975_v10  ;;  %v21031_v10 = vld [vmem:[#allocation90_spill] sm:$0xff] }
 0xdbb   :  { %14467 = vmatprep.mubr.msk.f32.mxu1 %vm1086_vm13, %v20976_v39  ;;  %v21032_v39 = vld [vmem:[#allocation104_spill] sm:$0xff] }
 0xdbe   :  { %14468 = vmatmul.mubr.msk.f32.gmra.mrb[74].mxu1 %vm1086_vm13, %v19212_v3  ;;  %v20980_v3 = vld [vmem:[#allocation127_spill] sm:$0xff] }
 0xdbf   :  { %14470 = vmatprep.mubr.msk.f32.mxu1 %vm1086_vm13, %v20977_v1  ;;  %v21033_v1 = vld [vmem:[#allocation105_spill] sm:$0xff] }
 0xdc2   :  { %14471 = vmatmul.mubr.msk.f32.gmra.mrb[76].mxu1 %vm1086_vm13, %v19244_v37  ;;  %v20982_v37 = vld [vmem:[#allocation145_spill] sm:$0xff] }
 0xdc3   :  { %14473 = vmatprep.mubr.msk.f32.mxu1 %vm1086_vm13, %v19249_v13  ;;  %v20983_v13 = vld [vmem:[#allocation75_spill] sm:$0xff] }
 0xdc6   :  { %14474 = vmatmul.mubr.msk.f32.gmra.mrb[78].mxu1 %vm1086_vm13, %v20978_v19  ;;  %v21036_v19 = vld [vmem:[#allocation140_spill] sm:$0xff] }
 0xdc7   :  { %14484 = vmatprep.mubr.msk.f32.mxu1 %vm1086_vm13, %v20979_v33  ;;  %v21037_v33 = vld [vmem:[#allocation141_spill] sm:$0xff] }
 0xdca   :  { %14485 = vmatmul.mubr.msk.f32.vlgmr.msra.gmra.mrb[32].mxu1 %vm1086_vm13, %v20980_v3  ;;  %v21039_v3 = vld [vmem:[#allocation83_spill] sm:$0xff] }
 0xdcb   :  { %14487 = vmatprep.mubr.msk.f32.mxu1 %vm1086_vm13, %v20981_v51  ;;  %15363 = vmatpush3.bf16.msra.mxu1 %v15360_v61  ;;  %v21006_v61 = vld [vmem:[#allocation161_spill] sm:$0xff]  ;;  %v21040_v51 = vld [vmem:[#allocation92_spill] sm:$0xff] }
 0xdcc   :  { %15365 = vmatprep.subr.bf16.mxu1 %v15364_v45 }
 0xdce   :  { %14488 = vmatmul.mubr.msk.f32.gmra.mrb[34].mxu1 %vm1086_vm13, %v20982_v37  ;;  %v21041_v37 = vld [vmem:[#allocation95_spill] sm:$0xff] }
 0xdcf   :  { %14490 = vmatprep.mubr.msk.f32.mxu1 %vm1086_vm13, %v20983_v13  ;;  %15367 = vmatpush3.bf16.msra.mxu1 %v15364_v45  ;;  %v21038_v45 = vld [vmem:[#allocation80_spill] sm:$0xff]  ;;  %v21042_v13 = vld [vmem:[#allocation107_spill] sm:$0xff] }
 0xdd2   :  { %14491 = vmatmul.mubr.msk.f32.gmra.mrb[36].mxu1 %vm1086_vm13, %v20984_v11  ;;  %v21043_v11 = vld [vmem:[#allocation112_spill] sm:$0xff] }
 0xdd3   :  { %14493 = vmatprep.mubr.msk.f32.mxu1 %vm1086_vm13, %v20985_v40  ;;  %v21044_v40 = vld [vmem:[#allocation125_spill] sm:$0xff] }
 0xdd6   :  { %14494 = vmatmul.mubr.msk.f32.gmra.mrb[38].mxu1 %vm1086_vm13, %v20986_v28  ;;  %v21045_v28 = vld [vmem:[#allocation142_spill] sm:$0xff] }
 0xdd7   :  { %14496 = vmatprep.mubr.msk.f32.mxu1 %vm1086_vm13, %v20987_v18  ;;  %v21046_v18 = vld [vmem:[#allocation143_spill] sm:$0xff] }
 0xdda   :  { %14497 = vmatmul.mubr.msk.f32.gmra.mrb[40].mxu1 %vm1086_vm13, %v20988_v54  ;;  %v21047_v54 = vld [vmem:[#allocation73_spill] sm:$0xff] }
 0xddb   :  { %14499 = vmatprep.mubr.msk.f32.mxu1 %vm1086_vm13, %v20989_v23  ;;  %v21048_v23 = vld [vmem:[#allocation151_spill] sm:$0xff] }
 0xdde   :  { %14500 = vmatmul.mubr.msk.f32.gmra.mrb[42].mxu1 %vm1086_vm13, %v20990_v16  ;;  %v21049_v16 = vld [vmem:[#allocation156_spill] sm:$0xff] }
 0xddf   :  { %14502 = vmatprep.mubr.msk.f32.mxu1 %vm1086_vm13, %v20991_v20  ;;  %v21050_v20 = vld [vmem:[#allocation157_spill] sm:$0xff] }
 0xde2   :  { %14503 = vmatmul.mubr.msk.f32.gmra.mrb[44].mxu1 %vm1086_vm13, %v20992_v46  ;;  %v21051_v46 = vld [vmem:[#allocation158_spill] sm:$0xff] }
 0xde3   :  { %14505 = vmatprep.mubr.msk.f32.mxu1 %vm1086_vm13, %v20993_v0  ;;  %v21052_v0 = vld [vmem:[#allocation163_spill] sm:$0xff] }
 0xde6   :  { %14506 = vmatmul.mubr.msk.f32.gmra.mrb[46].mxu1 %vm1086_vm13, %v20994_v21  ;;  %v21053_v21 = vld [vmem:[#allocation168_spill] sm:$0xff] }
 0xde7   :  { %14508 = vmatprep.mubr.msk.f32.mxu1 %vm1086_vm13, %v20995_v52  ;;  %v21054_v52 = vld [vmem:[#allocation169_spill] sm:$0xff] }
 0xdea   :  { %14509 = vmatmul.mubr.msk.f32.gmra.mrb[48].mxu1 %vm1086_vm13, %v20996_v49  ;;  %v21055_v49 = vld [vmem:[#allocation170_spill] sm:$0xff] }
 0xdeb   :  { %14511 = vmatprep.mubr.msk.f32.mxu1 %vm1086_vm13, %v20997_v44  ;;  %v21056_v44 = vld [vmem:[#allocation175_spill] sm:$0xff] }
 0xdee   :  { %14512 = vmatmul.mubr.msk.f32.gmra.mrb[50].mxu1 %vm1086_vm13, %v20998_v36  ;;  %v21057_v36 = vld [vmem:[#allocation180_spill] sm:$0xff] }
 0xdef   :  { %14514 = vmatprep.mubr.msk.f32.mxu1 %vm1086_vm13, %v20999_v14  ;;  %v21058_v14 = vld [vmem:[#allocation181_spill] sm:$0xff] }
 0xdf2   :  { %14515 = vmatmul.mubr.msk.f32.gmra.mrb[52].mxu1 %vm1086_vm13, %v21000_v15  ;;  %v21060_v15 = vld [vmem:[#allocation187_spill] sm:$0xff] }
 0xdf3   :  { %14517 = vmatprep.mubr.msk.f32.mxu1 %vm1086_vm13, %v21001_v58  ;;  %v21061_v58 = vld [vmem:[#allocation188_spill] sm:$0xff] }
 0xdf6   :  { %14518 = vmatmul.mubr.msk.f32.gmra.mrb[54].mxu1 %vm1086_vm13, %v21002_v55  ;;  %v21063_v55 = vld [vmem:[#allocation195_spill] sm:$0xff] }
 0xdf7   :  { %14520 = vmatprep.mubr.msk.f32.mxu1 %vm1086_vm13, %v21003_v50  ;;  %v21064_v50 = vld [vmem:[#allocation196_spill] sm:$0xff] }
 0xdfa   :  { %14521 = vmatmul.mubr.msk.f32.gmra.mrb[56].mxu1 %vm1086_vm13, %v21004_v34  ;;  %v21065_v34 = vld [vmem:[#allocation202_spill] sm:$0xff] }
 0xdfb   :  { %14523 = vmatprep.mubr.msk.f32.mxu1 %vm1086_vm13, %v21005_v62  ;;  %v21066_v62 = vld [vmem:[#allocation203_spill] sm:$0xff] }
 0xdfe   :  { %14524 = vmatmul.mubr.msk.f32.gmra.mrb[58].mxu1 %vm1086_vm13, %v21006_v61  ;;  %v21067_v61 = vld [vmem:[#allocation208_spill] sm:$0xff] }
 0xdff   :  { %14526 = vmatprep.mubr.msk.f32.mxu1 %vm1086_vm13, %v21007_v38  ;;  %v21068_v38 = vld [vmem:[#allocation209_spill] sm:$0xff] }
 0xe02   :  { %14527 = vmatmul.mubr.msk.f32.gmra.mrb[60].mxu1 %vm1086_vm13, %v21008_v63  ;;  %v21069_v63 = vld [vmem:[#allocation213_spill] sm:$0xff] }
 0xe03   :  { %14529 = vmatprep.mubr.msk.f32.mxu1 %vm1086_vm13, %v21009_v47  ;;  %v21070_v47 = vld [vmem:[#allocation214_spill] sm:$0xff] }
 0xe06   :  { %14530 = vmatmul.mubr.msk.f32.gmra.mrb[62].mxu1 %vm1086_vm13, %v21010_v30  ;;  %v8042_v30 = vld [vmem:[%s21059_s14 + $0x8] sm:$0xff] }
 0xe07   :  { %14532 = vmatprep.mubr.msk.f32.mxu1 %vm1086_vm13, %v21011_v6  ;;  %8198 = vmatprep.mubr.f32.mxu0 %v8042_v30  ;;  %v19674_v6 = vld [vmem:[%s21062_s5] ss:$0 sm:$0xff] }
 0xe0a   :  { %14533 = vmatmul.mubr.msk.f32.gmra.mrb[64].mxu1 %vm1086_vm13, %v21012_v25 }
 0xe0b   :  { %14535 = vmatprep.mubr.msk.f32.mxu1 %vm1086_vm13, %v21013_v60 }
 0xe0e   :  { %14536 = vmatmul.mubr.msk.f32.gmra.mrb[66].mxu1 %vm1086_vm13, %v21014_v35 }
 0xe0f   :  { %14538 = vmatprep.mubr.msk.f32.mxu1 %vm1086_vm13, %v21015_v41 }
 0xe12   :  { %14539 = vmatmul.mubr.msk.f32.gmra.mrb[68].mxu1 %vm1086_vm13, %v21016_v17 }
 0xe13   :  { %14541 = vmatprep.mubr.msk.f32.mxu1 %vm1086_vm13, %v21017_v59 }
 0xe16   :  { %14542 = vmatmul.mubr.msk.f32.gmra.mrb[70].mxu1 %vm1086_vm13, %v21018_v56 }
 0xe17   :  { %14544 = vmatprep.mubr.msk.f32.mxu1 %vm1086_vm13, %v21019_v7 }
 0xe1a   :  { %14545 = vmatmul.mubr.msk.f32.gmra.mrb[72].mxu1 %vm1086_vm13, %v21020_v29 }
 0xe1b   :  { %14547 = vmatprep.mubr.msk.f32.mxu1 %vm1086_vm13, %v21021_v42 }
 0xe1e   :  { %14548 = vmatmul.mubr.msk.f32.gmra.mrb[74].mxu1 %vm1086_vm13, %v21022_v8 }
 0xe1f   :  { %14550 = vmatprep.mubr.msk.f32.mxu1 %vm1086_vm13, %v21023_v24 }
 0xe22   :  { %14551 = vmatmul.mubr.msk.f32.gmra.mrb[76].mxu1 %vm1086_vm13, %v19253_v27  ;;  %v21029_v27 = vld [vmem:[#allocation78_spill] sm:$0xff] }
 0xe23   :  { %14553 = vmatprep.mubr.msk.f32.mxu1 %vm1086_vm13, %v19258_v53  ;;  %v21030_v53 = vld [vmem:[#allocation89_spill] sm:$0xff] }
 0xe26   :  { %14554 = vmatmul.mubr.msk.f32.gmra.mrb[78].mxu1 %vm1086_vm13, %v21024_v2 }
 0xe27   :  { %14564 = vmatprep.mubr.msk.f32.mxu1 %vm1086_vm13, %v21025_v26 }
 0xe2a   :  { %14565 = vmatmul.mubr.msk.f32.vlgmr.msra.gmra.mrb[32].mxu1 %vm1086_vm13, %v21026_v9 }
 0xe2b   :  { %14567 = vmatprep.mubr.msk.f32.mxu1 %vm1086_vm13, %v21027_v31 }
 0xe2e   :  { %14568 = vmatmul.mubr.msk.f32.gmra.mrb[34].mxu1 %vm1086_vm13, %v21028_v12 }
 0xe2f   :  { %14570 = vmatprep.mubr.msk.f32.mxu1 %vm1086_vm13, %v21029_v27 }
 0xe32   :  { %14571 = vmatmul.mubr.msk.f32.gmra.mrb[36].mxu1 %vm1086_vm13, %v21030_v53 }
 0xe33   :  { %14573 = vmatprep.mubr.msk.f32.mxu1 %vm1086_vm13, %v21031_v10 }
 0xe36   :  { %14574 = vmatmul.mubr.msk.f32.gmra.mrb[38].mxu1 %vm1086_vm13, %v21032_v39 }
 0xe37   :  { %14576 = vmatprep.mubr.msk.f32.mxu1 %vm1086_vm13, %v21033_v1 }
 0xe3a   :  { %14577 = vmatmul.mubr.msk.f32.gmra.mrb[40].mxu1 %vm1086_vm13, %v21034_v32 }
 0xe3b   :  { %14579 = vmatprep.mubr.msk.f32.mxu1 %vm1086_vm13, %v21035_v4 }
 0xe3e   :  { %14580 = vmatmul.mubr.msk.f32.gmra.mrb[42].mxu1 %vm1086_vm13, %v21036_v19 }
 0xe3f   :  { %14582 = vmatprep.mubr.msk.f32.mxu1 %vm1086_vm13, %v21037_v33 }
 0xe42   :  { %14583 = vmatmul.mubr.msk.f32.gmra.mrb[44].mxu1 %vm1086_vm13, %v21038_v45 }
 0xe43   :  { %14585 = vmatprep.mubr.msk.f32.mxu1 %vm1086_vm13, %v21039_v3 }
 0xe46   :  { %14586 = vmatmul.mubr.msk.f32.gmra.mrb[46].mxu1 %vm1086_vm13, %v21040_v51 }
 0xe47   :  { %14588 = vmatprep.mubr.msk.f32.mxu1 %vm1086_vm13, %v21041_v37 }
 0xe4a   :  { %14589 = vmatmul.mubr.msk.f32.gmra.mrb[48].mxu1 %vm1086_vm13, %v21042_v13 }
 0xe4b   :  { %14591 = vmatprep.mubr.msk.f32.mxu1 %vm1086_vm13, %v21043_v11 }
 0xe4e   :  { %14592 = vmatmul.mubr.msk.f32.gmra.mrb[50].mxu1 %vm1086_vm13, %v21044_v40 }
 0xe4f   :  { %14594 = vmatprep.mubr.msk.f32.mxu1 %vm1086_vm13, %v21045_v28 }
 0xe52   :  { %14595 = vmatmul.mubr.msk.f32.gmra.mrb[52].mxu1 %vm1086_vm13, %v21046_v18 }
 0xe53   :  { %14597 = vmatprep.mubr.msk.f32.mxu1 %vm1086_vm13, %v21047_v54 }
 0xe56   :  { %14598 = vmatmul.mubr.msk.f32.gmra.mrb[54].mxu1 %vm1086_vm13, %v21048_v23 }
 0xe57   :  { %14600 = vmatprep.mubr.msk.f32.mxu1 %vm1086_vm13, %v21049_v16 }
 0xe5a   :  { %14601 = vmatmul.mubr.msk.f32.gmra.mrb[56].mxu1 %vm1086_vm13, %v21050_v20 }
 0xe5b   :  { %14603 = vmatprep.mubr.msk.f32.mxu1 %vm1086_vm13, %v21051_v46 }
 0xe5e   :  { %14604 = vmatmul.mubr.msk.f32.gmra.mrb[58].mxu1 %vm1086_vm13, %v21052_v0 }
 0xe5f   :  { %14606 = vmatprep.mubr.msk.f32.mxu1 %vm1086_vm13, %v21053_v21 }
 0xe62   :  { %14607 = vmatmul.mubr.msk.f32.gmra.mrb[60].mxu1 %vm1086_vm13, %v21054_v52 }
 0xe63   :  { %14609 = vmatprep.mubr.msk.f32.mxu1 %vm1086_vm13, %v21055_v49 }
 0xe66   :  { %14610 = vmatmul.mubr.msk.f32.gmra.mrb[62].mxu1 %vm1086_vm13, %v21056_v44 }
 0xe67   :  { %14612 = vmatprep.mubr.msk.f32.mxu1 %vm1086_vm13, %v21057_v36 }
 0xe6a   :  { %14613 = vmatmul.mubr.msk.f32.gmra.mrb[64].mxu1 %vm1086_vm13, %v21058_v14 }
 0xe6b   :  { %14615 = vmatprep.mubr.msk.f32.mxu1 %vm1086_vm13, %v21060_v15 }
 0xe6e   :  { %14616 = vmatmul.mubr.msk.f32.gmra.mrb[66].mxu1 %vm1086_vm13, %v21061_v58 }
 0xe6f   :  { %14618 = vmatprep.mubr.msk.f32.mxu1 %vm1086_vm13, %v21063_v55 }
 0xe72   :  { %14619 = vmatmul.mubr.msk.f32.gmra.mrb[68].mxu1 %vm1086_vm13, %v21064_v50 }
 0xe73   :  { %14621 = vmatprep.mubr.msk.f32.mxu1 %vm1086_vm13, %v21065_v34 }
 0xe76   :  { %14622 = vmatmul.mubr.msk.f32.gmra.mrb[70].mxu1 %vm1086_vm13, %v21066_v62 }
 0xe77   :  { %14624 = vmatprep.mubr.msk.f32.mxu1 %vm1086_vm13, %v21067_v61 }
 0xe7a   :  { %14625 = vmatmul.mubr.msk.f32.gmra.mrb[72].mxu1 %vm1086_vm13, %v21068_v38 }
 0xe7b   :  { %14627 = vmatprep.mubr.msk.f32.mxu1 %vm1086_vm13, %v21069_v63 }
 0xe7e   :  { %14628 = vmatmul.mubr.msk.f32.gmra.mrb[74].mxu1 %vm1086_vm13, %v21070_v47 }
 0xe7f   :  { %14630 = vmatprep.mubr.msk.f32.mxu1 %vm1086_vm13, %v19261_v22 }
 0xe82   :  { %14631 = vmatmul.mubr.msk.f32.gmra.mrb[76].mxu1 %vm1086_vm13, %v19264_v57 }
 0xe83   :  { %14633 = vmatprep.mubr.msk.f32.mxu1 %vm1086_vm13, %v19273_v5 }
 0xe86   :  { %14634 = vmatmul.mubr.msk.f32.gmra.mrb[78].mxu1 %vm1086_vm13, %v7535_v48 }
 0xefd   :  { %v14566_v25 = vpop.f32.mrb[32].mxu1 }
 0xefe   :  { %v7994_v60 = vadd.f32 %v14566_v25, %v19674_v6  ;;  %v7699_v35 = vpop.f32.mrb[33].mxu1 }
 0xeff   :  { %v7993_v22 = vadd.f32 %v19674_v6, %v7699_v35 }
 0xf01   :  { %v15370_v41 = vpack.c.bf16 %v7994_v60, %v7993_v22  ;;  %v14569_v17 = vpop.f32.mrb[34].mxu1 }
 0xf02   :  { %v7996_v57 = vadd.f32 %v14569_v17, %v19674_v6  ;;  %v7709_v59 = vpop.f32.mrb[35].mxu1 }
 0xf03   :  { %v7995_v5 = vadd.f32 %v19674_v6, %v7709_v59 }
 0xf05   :  { %v15374_v43 = vpack.c.bf16 %v7996_v57, %v7995_v5  ;;  %v14572_v56 = vpop.f32.mrb[36].mxu1 }
 0xf06   :  { %v7998_v48 = vadd.f32 %v14572_v56, %v19674_v6  ;;  %v7719_v7 = vpop.f32.mrb[37].mxu1 }
 0xf07   :  { %v7997_v29 = vadd.f32 %v19674_v6, %v7719_v7 }
 0xf09   :  { %v15378_v42 = vpack.c.bf16 %v7998_v48, %v7997_v29  ;;  %v14575_v8 = vpop.f32.mrb[38].mxu1 }
 0xf0a   :  { %v8000_v24 = vadd.f32 %v14575_v8, %v19674_v6  ;;  %v7729_v2 = vpop.f32.mrb[39].mxu1 }
 0xf0b   :  { %v7999_v26 = vadd.f32 %v19674_v6, %v7729_v2 }
 0xf0d   :  { %v15382_v9 = vpack.c.bf16 %v8000_v24, %v7999_v26  ;;  %v14578_v31 = vpop.f32.mrb[40].mxu1 }
 0xf0e   :  { %v8002_v12 = vadd.f32 %v14578_v31, %v19674_v6  ;;  %v7739_v27 = vpop.f32.mrb[41].mxu1 }
 0xf0f   :  { %v8001_v53 = vadd.f32 %v19674_v6, %v7739_v27 }
 0xf11   :  { %v15386_v10 = vpack.c.bf16 %v8002_v12, %v8001_v53  ;;  %v14581_v39 = vpop.f32.mrb[42].mxu1  ;;  %v8041_v12 = vld [vmem:[%s21059_s14] sm:$0xff] }
 0xf12   :  { %v8004_v1 = vadd.f32 %v14581_v39, %v19674_v6  ;;  %v7749_v32 = vpop.f32.mrb[43].mxu1  ;;  %v8045_v39 = vld [vmem:[%s21059_s14 + $0x20] sm:$0xff] }
 0xf13   :  { %v8003_v4 = vadd.f32 %v19674_v6, %v7749_v32 }
 0xf15   :  { %v15390_v19 = vpack.c.bf16 %v8004_v1, %v8003_v4  ;;  %v14584_v33 = vpop.f32.mrb[44].mxu1 }
 0xf16   :  { %v8006_v45 = vadd.f32 %v14584_v33, %v19674_v6  ;;  %v7759_v3 = vpop.f32.mrb[45].mxu1 }
 0xf17   :  { %v8005_v51 = vadd.f32 %v19674_v6, %v7759_v3  ;;  %v8048_v3 = vld [vmem:[%s21059_s14 + $0x38] sm:$0xff] }
 0xf19   :  { %v15394_v37 = vpack.c.bf16 %v8006_v45, %v8005_v51  ;;  %v14587_v13 = vpop.f32.mrb[46].mxu1 }
 0xf1a   :  { %v19691_v11 = vadd.f32 %v14587_v13, %v19674_v6  ;;  %v7769_v40 = vpop.f32.mrb[47].mxu1 }
 0xf1b   :  { %v8007_v28 = vadd.f32 %v19674_v6, %v7769_v40 }
 0xf1d   :  { %v15398_v18 = vpack.c.bf16 %v19691_v11, %v8007_v28  ;;  %v14590_v54 = vpop.f32.mrb[48].mxu1  ;;  %v8047_v11 = vld [vmem:[%s21059_s14 + $0x30] sm:$0xff] }
 0xf1e   :  { %v8010_v23 = vadd.f32 %v14590_v54, %v19674_v6  ;;  %v7779_v16 = vpop.f32.mrb[49].mxu1 }
 0xf1f   :  { %v8009_v20 = vadd.f32 %v19674_v6, %v7779_v16 }
 0xf21   :  { %v15368_v46 = vpack.c.bf16 %v8010_v23, %v8009_v20  ;;  %v14593_v0 = vpop.f32.mrb[50].mxu1  ;;  %v8050_v20 = vld [vmem:[%s21059_s14 + $0x48] sm:$0xff] }
 0xf22   :  { %v8012_v21 = vadd.f32 %v14593_v0, %v19674_v6  ;;  %v7789_v52 = vpop.f32.mrb[51].mxu1 }
 0xf23   :  { %v8011_v49 = vadd.f32 %v19674_v6, %v7789_v52  ;;  %15369 = vmatprep.subr.bf16.mxu0 %v15368_v46 }
 0xf24   :  { %15371 = vmatpush3.bf16.msra.mxu0 %v15370_v41 }
 0xf25   :  { %v15372_v44 = vpack.c.bf16 %v8012_v21, %v8011_v49  ;;  %v14596_v36 = vpop.f32.mrb[52].mxu1  ;;  %v8054_v21 = vld [vmem:[%s21059_s14 + $0x68] sm:$0xff] }
 0xf26   :  { %v8014_v14 = vadd.f32 %v14596_v36, %v19674_v6  ;;  %v7799_v15 = vpop.f32.mrb[53].mxu1  ;;  %v8053_v36 = vld [vmem:[%s21059_s14 + $0x60] sm:$0xff] }
 0xf27   :  { %v8013_v58 = vadd.f32 %v19674_v6, %v7799_v15  ;;  %15373 = vmatprep.subr.bf16.mxu0 %v15372_v44 }
 0xf28   :  { %15375 = vmatpush3.bf16.msra.mxu0 %v15374_v43 }
 0xf29   :  { %v15376_v55 = vpack.c.bf16 %v8014_v14, %v8013_v58  ;;  %v14599_v50 = vpop.f32.mrb[54].mxu1  ;;  %v8057_v58 = vld [vmem:[%s21059_s14 + $0x80] sm:$0xff] }
 0xf2a   :  { %v8016_v34 = vadd.f32 %v14599_v50, %v19674_v6  ;;  %v7809_v62 = vpop.f32.mrb[55].mxu1 }
 0xf2b   :  { %v8015_v61 = vadd.f32 %v19674_v6, %v7809_v62  ;;  %15377 = vmatprep.subr.bf16.mxu0 %v15376_v55  ;;  %v8056_v62 = vld [vmem:[%s21059_s14 + $0x78] sm:$0xff] }
 0xf2c   :  { %15379 = vmatpush3.bf16.msra.mxu0 %v15378_v42 }
 0xf2d   :  { %v15380_v38 = vpack.c.bf16 %v8016_v34, %v8015_v61  ;;  %v14602_v63 = vpop.f32.mrb[56].mxu1 }
 0xf2e   :  { %v8018_v47 = vadd.f32 %v14602_v63, %v19674_v6  ;;  %v7819_v30 = vpop.f32.mrb[57].mxu1  ;;  %v8060_v63 = vld [vmem:[%s21059_s14 + $0x98] sm:$0xff] }
 0xf2f   :  { %v8017_v25 = vadd.f32 %v19674_v6, %v7819_v30  ;;  %15381 = vmatprep.subr.bf16.mxu0 %v15380_v38 }
 0xf30   :  { %15383 = vmatpush3.bf16.msra.mxu0 %v15382_v9 }
 0xf31   :  { %v15384_v60 = vpack.c.bf16 %v8018_v47, %v8017_v25  ;;  %v14605_v35 = vpop.f32.mrb[58].mxu1 }
 0xf32   :  { %v8020_v22 = vadd.f32 %v14605_v35, %v19674_v6  ;;  %v7829_v41 = vpop.f32.mrb[59].mxu1 }
 0xf33   :  { %v8019_v17 = vadd.f32 %v19674_v6, %v7829_v41  ;;  %15385 = vmatprep.subr.bf16.mxu0 %v15384_v60  ;;  %v8059_v60 = vld [vmem:[%s21059_s14 + $0x90] sm:$0xff] }
 0xf34   :  { %15387 = vmatpush3.bf16.msra.mxu0 %v15386_v10  ;;  %v21071_v10 = vmov 0.0|0.0   ;;  %v8063_v41 = vld [vmem:[%s21059_s14 + $0xb0] sm:$0xff] }
 0xf35   :  { %v15388_v57 = vpack.c.bf16 %v8020_v22, %v8019_v17  ;;  %v14608_v59 = vpop.f32.mrb[60].mxu1 }
 0xf36   :  { %v8022_v5 = vadd.f32 %v14608_v59, %v19674_v6  ;;  %v7839_v43 = vpop.f32.mrb[61].mxu1 }
 0xf37   :  { %v8021_v56 = vadd.f32 %v19674_v6, %v7839_v43  ;;  %15389 = vmatprep.subr.bf16.mxu0 %v15388_v57 }
 0xf38   :  { %15391 = vmatpush3.bf16.msra.mxu0 %v15390_v19  ;;  %v8044_v19 = vld [vmem:[%s21059_s14 + $0x18] sm:$0xff] }
 0xf39   :  { %v15392_v48 = vpack.c.bf16 %v8022_v5, %v8021_v56  ;;  %v14611_v7 = vpop.f32.mrb[62].mxu1  ;;  %v8062_v5 = vld [vmem:[%s21059_s14 + $0xa8] sm:$0xff] }
 0xf3a   :  { %v8024_v29 = vadd.f32 %v14611_v7, %v19674_v6  ;;  %v7849_v42 = vpop.f32.mrb[63].mxu1  ;;  %v8066_v56 = vld [vmem:[%s21059_s14 + $0xc8] sm:$0xff]  ;;  %v8069_v7 = vld [vmem:[%s21059_s14 + $0xe0] sm:$0xff] }
 0xf3b   :  { %v8023_v8 = vadd.f32 %v19674_v6, %v7849_v42  ;;  %15393 = vmatprep.subr.bf16.mxu0 %v15392_v48  ;;  %v8072_v42 = vld [vmem:[%s21059_s14 + $0xf8] sm:$0xff] }
 0xf3c   :  { %15395 = vmatpush3.bf16.msra.mxu0 %v15394_v37 }
 0xf3d   :  { %v15396_v24 = vpack.c.bf16 %v8024_v29, %v8023_v8  ;;  %v14614_v2 = vpop.f32.mrb[64].mxu1  ;;  %v8068_v29 = vld [vmem:[%s21059_s14 + $0xd8] sm:$0xff]  ;;  %v8071_v8 = vld [vmem:[%s21059_s14 + $0xf0] sm:$0xff] }
 0xf3e   :  { %v8026_v26 = vadd.f32 %v14614_v2, %v19674_v6  ;;  %v7859_v9 = vpop.f32.mrb[65].mxu1  ;;  %v8074_v2 = vld [vmem:[%s21059_s14 + $0x108] sm:$0xff] }
 0xf3f   :  { %v8025_v31 = vadd.f32 %v19674_v6, %v7859_v9  ;;  %15397 = vmatprep.subr.bf16.mxu0 %v15396_v24  ;;  %v8075_v24 = vld [vmem:[%s21059_s14 + $0x110] sm:$0xff]  ;;  %v8077_v9 = vld [vmem:[%s21059_s14 + $0x120] sm:$0xff] }
 0xf40   :  { %15399 = vmatpush3.bf16.msra.mxu0 %v15398_v18  ;;  %v8051_v18 = vld [vmem:[%s21059_s14 + $0x50] sm:$0xff] }
 0xf41   :  { %v15401_v27 = vpack.c.bf16 %v8026_v26, %v8025_v31  ;;  %v14617_v53 = vpop.f32.mrb[66].mxu1  ;;  %15400 = vmatprep.subr.bf16.mxu0 %v21071_v10  ;;  %v8078_v26 = vld [vmem:[%s21059_s14 + $0x128] sm:$0xff]  ;;  %v8081_v31 = vld [vmem:[%s21059_s14 + $0x140] sm:$0xff] }
 0xf42   :  { %v8028_v1 = vadd.f32 %v14617_v53, %v19674_v6  ;;  %v7869_v32 = vpop.f32.mrb[67].mxu1  ;;  %v8083_v53 = vld [vmem:[%s21059_s14 + $0x150] sm:$0xff] }
 0xf43   :  { %v8027_v4 = vadd.f32 %v19674_v6, %v7869_v32  ;;  %8199 = vmatmul.mubr.f32.vlgmr.msra.gmra.mrb[156].mxu0 %v8041_v12  ;;  %v8080_v12 = vld [vmem:[%s21059_s14 + $0x138] sm:$0xff]  ;;  %v8046_v32 = vld [vmem:[%s21059_s14 + $0x28] sm:$0xff] }
 0xf44   :  { %15402 = vmatpush3.bf16.msra.mxu0 %v15401_v27  ;;  %8203 = vmatprep.mubr.f32.mxu0 %v8045_v39  ;;  %v8084_v27 = vld [vmem:[%s21059_s14 + $0x158] sm:$0xff]  ;;  %v21073_v39 = vmov 0.0  }
 0xf45   :  { %v15404_v33 = vpack.c.bf16 %v8028_v1, %v8027_v4  ;;  %v14620_v45 = vpop.f32.mrb[68].mxu1  ;;  %15403 = vmatprep.subr.bf16.mxu0 %v21071_v10  ;;  %v8043_v1 = vld [vmem:[%s21059_s14 + $0x10] sm:$0xff]  ;;  %v8049_v4 = vld [vmem:[%s21059_s14 + $0x40] sm:$0xff] }
 0xf46   :  { %v8030_v51 = vadd.f32 %v14620_v45, %v19674_v6  ;;  %v7879_v37 = vpop.f32.mrb[69].mxu1  ;;  %v8058_v45 = vld [vmem:[%s21059_s14 + $0x88] sm:$0xff] }
 0xf47   :  { %v8029_v13 = vadd.f32 %v19674_v6, %v7879_v37  ;;  %8204 = vmatmul.mubr.f32.gmra.mrb[158].mxu0 %v8044_v19  ;;  %v8052_v19 = vld [vmem:[%s21059_s14 + $0x58] sm:$0xff]  ;;  %v8067_v37 = vld [vmem:[%s21059_s14 + $0xd0] sm:$0xff] }
 0xf48   :  { %15405 = vmatpush3.bf16.msra.mxu0 %v15404_v33  ;;  %8208 = vmatprep.mubr.f32.mxu0 %v8048_v3  ;;  %v8055_v33 = vld [vmem:[%s21059_s14 + $0x70] sm:$0xff]  ;;  %v8061_v3 = vld [vmem:[%s21059_s14 + $0xa0] sm:$0xff] }
 0xf49   :  { %v15407_v40 = vpack.c.bf16 %v8030_v51, %v8029_v13  ;;  %v14623_v28 = vpop.f32.mrb[70].mxu1  ;;  %15406 = vmatprep.subr.bf16.mxu0 %v21071_v10  ;;  %v8064_v51 = vld [vmem:[%s21059_s14 + $0xb8] sm:$0xff]  ;;  %v8070_v13 = vld [vmem:[%s21059_s14 + $0xe8] sm:$0xff] }
 0xf4a   :  { %v8032_v54 = vadd.f32 %v14623_v28, %v19674_v6  ;;  %v7889_v23 = vpop.f32.mrb[71].mxu1  ;;  %v8079_v28 = vld [vmem:[%s21059_s14 + $0x130] sm:$0xff] }
 0xf4b   :  { %v8031_v16 = vadd.f32 %v19674_v6, %v7889_v23  ;;  %8209 = vmatmul.mubr.f32.gmra.mrb[160].mxu0 %v8047_v11  ;;  %v8073_v11 = vld [vmem:[%s21059_s14 + $0x100] sm:$0xff] }
 0xf4c   :  { %15408 = vmatpush3.bf16.msra.mxu0 %v15407_v40  ;;  %8213 = vmatprep.mubr.f32.mxu0 %v8051_v18  ;;  %v8076_v40 = vld [vmem:[%s21059_s14 + $0x118] sm:$0xff]  ;;  %v8082_v18 = vld [vmem:[%s21059_s14 + $0x148] sm:$0xff]  ;;  %v8432_v23 = vld [vmem:[#allocation22 + $0x10] sm:$0xff] }
 0xf4d   :  { %v15410_v46 = vpack.c.bf16 %v8032_v54, %v8031_v16  ;;  %v14626_v0 = vpop.f32.mrb[72].mxu1  ;;  %15409 = vmatprep.subr.bf16.mxu0 %v21071_v10  ;;  %v8085_v54 = vld [vmem:[%s21059_s14 + $0x160] sm:$0xff]  ;;  %v8433_v16 = vld [vmem:[#allocation22 + $0x18] sm:$0xff] }
 0xf4e   :  { %v8034_v52 = vadd.f32 %v14626_v0, %v19674_v6  ;;  %v7899_v49 = vpop.f32.mrb[73].mxu1 }
 0xf4f   :  { %v8033_v44 = vadd.f32 %v19674_v6, %v7899_v49  ;;  %8214 = vmatmul.mubr.f32.gmra.mrb[162].mxu0 %v8050_v20  ;;  %v15426_v20 = vpack.c.bf16 %v8433_v16, %v8432_v23 }
 0xf50   :  { %15411 = vmatpush3.bf16.msra.mxu0 %v15410_v46  ;;  %8218 = vmatprep.mubr.f32.mxu0 %v8054_v21 }
 0xf51   :  { %v15413_v14 = vpack.c.bf16 %v8034_v52, %v8033_v44  ;;  %v14629_v15 = vpop.f32.mrb[74].mxu1  ;;  %15412 = vmatprep.subr.bf16.mxu0 %v21071_v10 }
 0xf52   :  { %v8036_v55 = vadd.f32 %v14629_v15, %v19674_v6  ;;  %v7909_v50 = vpop.f32.mrb[75].mxu1 }
 0xf53   :  { %v8035_v34 = vadd.f32 %v19674_v6, %v7909_v50  ;;  %8219 = vmatmul.mubr.f32.gmra.mrb[164].mxu0 %v8053_v36 }
 0xf54   :  { %15414 = vmatpush3.bf16.msra.mxu0 %v15413_v14  ;;  %8223 = vmatprep.mubr.f32.mxu0 %v8057_v58 }
 0xf55   :  { %v15416_v61 = vpack.c.bf16 %v8036_v55, %v8035_v34  ;;  %v14632_v38 = vpop.f32.mrb[76].mxu1  ;;  %15415 = vmatprep.subr.bf16.mxu0 %v21071_v10 }
 0xf56   :  { %v8038_v47 = vadd.f32 %v14632_v38, %v19674_v6  ;;  %v7919_v30 = vpop.f32.mrb[77].mxu1 }
 0xf57   :  { %v8037_v25 = vadd.f32 %v19674_v6, %v7919_v30  ;;  %8224 = vmatmul.mubr.f32.gmra.mrb[166].mxu0 %v8056_v62 }
 0xf58   :  { %15417 = vmatpush3.bf16.msra.mxu0 %v15416_v61  ;;  %8228 = vmatprep.mubr.f32.mxu0 %v8060_v63 }
 0xf59   :  { %v15419_v35 = vpack.c.bf16 %v8038_v47, %v8037_v25  ;;  %v14635_v22 = vpop.f32.mrb[78].mxu1  ;;  %15418 = vmatprep.subr.bf16.mxu0 %v21071_v10 }
 0xf5a   :  { %v8040_v17 = vadd.f32 %v14635_v22, %v19674_v6  ;;  %v7929_v57 = vpop.f32.mrb[79].mxu1 }
 0xf5b   :  { %v8039_v59 = vadd.f32 %v19674_v6, %v7929_v57  ;;  %8229 = vmatmul.mubr.f32.gmra.mrb[168].mxu0 %v8059_v60  ;;  %v8065_v6 = vld [vmem:[%s21059_s14 + $0xc0] sm:$0xff] }
 0xf5c   :  { %15420 = vmatpush3.bf16.msra.mxu0 %v15419_v35  ;;  %8233 = vmatprep.mubr.f32.mxu0 %v8063_v41 }
 0xf5d   :  { %v15422_v43 = vpack.c.bf16 %v8040_v17, %v8039_v59  ;;  %15421 = vmatprep.subr.bf16.mxu0 %v21071_v10 }
 0xf5f   :  { %8234 = vmatmul.mubr.f32.gmra.mrb[170].mxu0 %v8062_v5 }
 0xf60   :  { %15424 = vmatpush3.bf16.msk.msra.mxu0 %vm18012_vm4, %v15422_v43  ;;  %8238 = vmatprep.mubr.f32.mxu0 %v8066_v56  ;;  %vm21075_vm4 = vcmask 64512  }
 0xf61   :  { %15425 = vmatprep.subr.bf16.mxu0 %v21071_v10  ;;  %vm21077_vm8 = vmmov %vm21075_vm4 }
 0xf62   :  { %vm21078_vm7 = vmmov %vm21075_vm4 }
 0xf63   :  { %8239 = vmatmul.mubr.f32.gmra.mrb[172].mxu0 %v8065_v6  ;;  %vm21079_vm1 = vmmov %vm21075_vm4 }
 0xf64   :  { %8243 = vmatprep.mubr.f32.mxu0 %v8069_v7  ;;  %vm21080_vm2 = vmmov %vm21079_vm1 }
 0xf65   :  { %vm21081_vm10 = vmmov %vm21079_vm1 }
 0xf66   :  { %vm21082_vm11 = vmmov %vm21079_vm1 }
 0xf67   :  { %8244 = vmatmul.mubr.f32.gmra.mrb[174].mxu0 %v8068_v29 }
 0xf68   :  { %8248 = vmatprep.mubr.f32.mxu0 %v8072_v42 }
 0xf6b   :  { %8249 = vmatmul.mubr.f32.gmra.mrb[176].mxu0 %v8071_v8 }
 0xf6c   :  { %8253 = vmatprep.mubr.f32.mxu0 %v8075_v24 }
 0xf6f   :  { %8254 = vmatmul.mubr.f32.gmra.mrb[178].mxu0 %v8074_v2 }
 0xf70   :  { %8258 = vmatprep.mubr.f32.mxu0 %v8078_v26 }
 0xf73   :  { %8259 = vmatmul.mubr.f32.gmra.mrb[180].mxu0 %v8077_v9 }
 0xf74   :  { %8263 = vmatprep.mubr.f32.mxu0 %v8081_v31 }
 0xf77   :  { %8264 = vmatmul.mubr.f32.gmra.mrb[182].mxu0 %v8080_v12 }
 0xf78   :  { %8268 = vmatprep.mubr.f32.mxu0 %v8084_v27 }
 0xf7b   :  { %8269 = vmatmul.mubr.f32.gmra.mrb[184].mxu0 %v8083_v53 }
 0xf7c   :  { %14668 = vmatprep.mubr.msk.f32.mxu0 %vm16564_vm6, %v21073_v39 }
 0xf7f   :  { %14669 = vmatmul.mubr.msk.f32.vlgmr.msra.gmra.mrb[186].mxu0 %vm2893_vm15, %v8043_v1 }
 0xf80   :  { %14671 = vmatprep.mubr.msk.f32.mxu0 %vm16564_vm6, %v21073_v39  ;;  %15427 = vmatpush3.bf16.msra.mxu0 %v15426_v20 }
 0xf81   :  { %15428 = vmatprep.subr.bf16.mxu0 %v21071_v10 }
 0xf83   :  { %14672 = vmatmul.mubr.msk.f32.gmra.mrb[188].mxu0 %vm2893_vm15, %v8046_v32 }
 0xf84   :  { %14674 = vmatprep.mubr.msk.f32.mxu0 %vm16564_vm6, %v21073_v39 }
 0xf87   :  { %14675 = vmatmul.mubr.msk.f32.gmra.mrb[190].mxu0 %vm2893_vm15, %v8049_v4 }
 0xf88   :  { %14677 = vmatprep.mubr.msk.f32.mxu0 %vm16564_vm6, %v21073_v39 }
 0xf8b   :  { %14678 = vmatmul.mubr.msk.f32.gmra.mrb[192].mxu0 %vm2893_vm15, %v8052_v19 }
 0xf8c   :  { %14680 = vmatprep.mubr.msk.f32.mxu0 %vm16564_vm6, %v21073_v39 }
 0xf8f   :  { %14681 = vmatmul.mubr.msk.f32.gmra.mrb[194].mxu0 %vm2893_vm15, %v8055_v33 }
 0xf90   :  { %14683 = vmatprep.mubr.msk.f32.mxu0 %vm16564_vm6, %v21073_v39 }
 0xf93   :  { %14684 = vmatmul.mubr.msk.f32.gmra.mrb[196].mxu0 %vm2893_vm15, %v8058_v45 }
 0xf94   :  { %14686 = vmatprep.mubr.msk.f32.mxu0 %vm16564_vm6, %v21073_v39 }
 0xf97   :  { %14687 = vmatmul.mubr.msk.f32.gmra.mrb[198].mxu0 %vm2893_vm15, %v8061_v3 }
 0xf98   :  { %14689 = vmatprep.mubr.msk.f32.mxu0 %vm16564_vm6, %v21073_v39 }
 0xf9b   :  { %14690 = vmatmul.mubr.msk.f32.gmra.mrb[200].mxu0 %vm2893_vm15, %v8064_v51 }
 0xf9c   :  { %14692 = vmatprep.mubr.msk.f32.mxu0 %vm16564_vm6, %v21073_v39 }
 0xf9f   :  { %14693 = vmatmul.mubr.msk.f32.gmra.mrb[202].mxu0 %vm2893_vm15, %v8067_v37  ;;  %v8429_v37 = vld [vmem:[#allocation22] sm:$0xff] }
 0xfa0   :  { %14695 = vmatprep.mubr.msk.f32.mxu0 %vm16564_vm6, %v21073_v39 }
 0xfa3   :  { %14696 = vmatmul.mubr.msk.f32.gmra.mrb[204].mxu0 %vm2893_vm15, %v8070_v13  ;;  %v8430_v13 = vld [vmem:[#allocation22 + $0x8] sm:$0xff] }
 0xfa4   :  { %14698 = vmatprep.mubr.msk.f32.mxu0 %vm16564_vm6, %v21073_v39  ;;  %v15429_v16 = vpack.c.bf16 %v8430_v13, %v8429_v37 }
 0xfa7   :  { %14699 = vmatmul.mubr.msk.f32.gmra.mrb[206].mxu0 %vm2893_vm15, %v8073_v11 }
 0xfa8   :  { %14701 = vmatprep.mubr.msk.f32.mxu0 %vm16564_vm6, %v21073_v39 }
 0xfab   :  { %14702 = vmatmul.mubr.msk.f32.gmra.mrb[208].mxu0 %vm2893_vm15, %v8076_v40 }
 0xfac   :  { %14704 = vmatprep.mubr.msk.f32.mxu0 %vm16564_vm6, %v21073_v39 }
 0xfaf   :  { %14705 = vmatmul.mubr.msk.f32.gmra.mrb[210].mxu0 %vm2893_vm15, %v8079_v28 }
 0xfb0   :  { %14707 = vmatprep.mubr.msk.f32.mxu0 %vm16564_vm6, %v21073_v39 }
 0xfb3   :  { %14708 = vmatmul.mubr.msk.f32.gmra.mrb[212].mxu0 %vm2893_vm15, %v8082_v18 }
 0xfb4   :  { %14710 = vmatprep.mubr.msk.f32.mxu0 %vm16564_vm6, %v21073_v39 }
 0xfb7   :  { %14711 = vmatmul.mubr.msk.f32.gmra.mrb[214].mxu0 %vm2893_vm15, %v8085_v54  ;;  %vm9062_vm15 = vcmask 965632  }
 0xfb8   :  { %14717 = vmatprep.mubr.msk.f32.mxu0 %vm16564_vm6, %v21073_v39 }
0x1016   :  { %v13350_v46 = vpop.f32.mrb[156].mxu0 }
0x1017   :  { %v13351_v0 = vpop.f32.mrb[157].mxu0 }
0x1018   :  { %v13352_v21 = vadd.f32 %v13351_v0, %v13350_v46 }
0x101a   :  { %v13353_v52 = vpop.f32.mrb[158].mxu0 }
0x101b   :  { %v13354_v49 = vpop.f32.mrb[159].mxu0 }
0x101c   :  { %v13355_v44 = vadd.f32 %v13354_v49, %v13353_v52 }
0x101e   :  { %v13356_v36 = vpop.f32.mrb[160].mxu0 }
0x101f   :  { %v13357_v14 = vpop.f32.mrb[161].mxu0 }
0x1020   :  { %v13358_v15 = vadd.f32 %v13357_v14, %v13356_v36 }
0x1022   :  { %v13359_v58 = vpop.f32.mrb[162].mxu0 }
0x1023   :  { %v13360_v55 = vpop.f32.mrb[163].mxu0 }
0x1024   :  { %v13361_v50 = vadd.f32 %v13360_v55, %v13359_v58 }
0x1026   :  { %v13362_v34 = vpop.f32.mrb[164].mxu0 }
0x1027   :  { %v13363_v62 = vpop.f32.mrb[165].mxu0 }
0x1028   :  { %v13364_v61 = vadd.f32 %v13363_v62, %v13362_v34 }
0x102a   :  { %v13365_v38 = vpop.f32.mrb[166].mxu0 }
0x102b   :  { %v13366_v63 = vpop.f32.mrb[167].mxu0 }
0x102c   :  { %v19830_v47 = vadd.f32 %v13366_v63, %v13365_v38 }
0x102e   :  { %v13368_v30 = vpop.f32.mrb[168].mxu0 }
0x102f   :  { %v13369_v25 = vpop.f32.mrb[169].mxu0 }
0x1030   :  { %v19832_v60 = vadd.f32 %v13369_v25, %v13368_v30 }
0x1032   :  { %v13371_v35 = vpop.f32.mrb[170].mxu0 }
0x1033   :  { %v13372_v22 = vpop.f32.mrb[171].mxu0 }
0x1034   :  { %v19834_v41 = vadd.f32 %v13372_v22, %v13371_v35 }
0x1036   :  { %v13374_v17 = vpop.f32.mrb[172].mxu0 }
0x1037   :  { %v13375_v57 = vpop.f32.mrb[173].mxu0 }
0x1038   :  { %v19836_v59 = vadd.f32 %v13375_v57, %v13374_v17 }
0x103a   :  { %v13377_v5 = vpop.f32.mrb[174].mxu0 }
0x103b   :  { %v13378_v43 = vpop.f32.mrb[175].mxu0 }
0x103c   :  { %v19838_v56 = vadd.f32 %v13378_v43, %v13377_v5 }
0x103e   :  { %v13380_v48 = vpop.f32.mrb[176].mxu0 }
0x103f   :  { %v13381_v6 = vpop.f32.mrb[177].mxu0 }
0x1040   :  { %v19840_v7 = vadd.f32 %v13381_v6, %v13380_v48 }
0x1042   :  { %v13383_v29 = vpop.f32.mrb[178].mxu0 }
0x1043   :  { %v13384_v42 = vpop.f32.mrb[179].mxu0 }
0x1044   :  { %v19842_v8 = vadd.f32 %v13384_v42, %v13383_v29 }
0x1046   :  { %v13386_v24 = vpop.f32.mrb[180].mxu0 }
0x1047   :  { %v13387_v2 = vpop.f32.mrb[181].mxu0 }
0x1048   :  { %v19844_v26 = vadd.f32 %v13387_v2, %v13386_v24 }
0x104a   :  { %v13389_v9 = vpop.f32.mrb[182].mxu0 }
0x104b   :  { %v13390_v31 = vpop.f32.mrb[183].mxu0 }
0x104c   :  { %v19846_v12 = vadd.f32 %v13390_v31, %v13389_v9 }
0x104e   :  { %v13392_v27 = vpop.f32.mrb[184].mxu0 }
0x104f   :  { %v13393_v53 = vpop.f32.mrb[185].mxu0 }
0x1050   :  { %v19848_v1 = vadd.f32 %v13393_v53, %v13392_v27 }
0x1052   :  { %v8340_v32 = vpop.f32.mrb[186].mxu0 }
0x1053   :  { %v8341_v4 = vadd.f32 %v13352_v21, %v8340_v32  ;;  %v14670_v19 = vpop.f32.mrb[187].mxu0 }
0x1055   :  { %v19850_v45 = vmax.f32 %v8341_v4, 0.0 }
0x1056   :  { %v8345_v33 = vpop.f32.mrb[188].mxu0 }
0x1057   :  { %v8346_v3 = vadd.f32 %v13355_v44, %v8345_v33  ;;  %v14673_v51 = vpop.f32.mrb[189].mxu0  ;;  %v8449_v28 = vrot.slane %v19850_v45, 1 }
0x1059   :  { %v19852_v11 = vmax.f32 %v8346_v3, 0.0 }
0x105a   :  { %v8350_v40 = vpop.f32.mrb[190].mxu0 }
0x105b   :  { %v8450_v18 = vrot.slane %v19852_v11, 1  ;;  %v8351_v54 = vadd.f32 %v13358_v15, %v8350_v40  ;;  %v14676_v23 = vpop.f32.mrb[191].mxu0 }
0x105d   :  { %v19856_v20 = vmax.f32 %v8351_v54, 0.0  ;;  %v8451_v46 = vsel %vm1022_vm12, %v8449_v28, %v8450_v18 }
0x105e   :  { %v8355_v0 = vpop.f32.mrb[192].mxu0  ;;  %14718 = vmatmul.mubr.msk.f32.vlgmr.msra.gmra.mrb[216].mxu0 %vm3086_vm5, %v8451_v46 }
0x105f   :  { %v8452_v21 = vrot.slane %v19856_v20, 1  ;;  %v8356_v52 = vadd.f32 %v13361_v50, %v8355_v0  ;;  %v14679_v49 = vpop.f32.mrb[193].mxu0  ;;  %14720 = vmatprep.mubr.msk.f32.mxu0 %vm16564_vm6, %v21073_v39  ;;  %15430 = vmatpush3.bf16.msra.mxu0 %v15429_v16 }
0x1060   :  { %15431 = vmatprep.subr.bf16.mxu0 %v21071_v10 }
0x1061   :  { %v19864_v44 = vmax.f32 %v8356_v52, 0.0  ;;  %v8453_v36 = vsel %vm1022_vm12, %v8450_v18, %v8452_v21 }
0x1062   :  { %v8360_v14 = vpop.f32.mrb[194].mxu0  ;;  %14721 = vmatmul.mubr.msk.f32.gmra.mrb[218].mxu0 %vm3086_vm5, %v8453_v36 }
0x1063   :  { %v8454_v15 = vrot.slane %v19864_v44, 1  ;;  %v8361_v58 = vadd.f32 %v13364_v61, %v8360_v14  ;;  %v14682_v55 = vpop.f32.mrb[195].mxu0  ;;  %14723 = vmatprep.mubr.msk.f32.mxu0 %vm16564_vm6, %v21073_v39 }
0x1065   :  { %v19871_v50 = vmax.f32 %v8361_v58, 0.0  ;;  %v8455_v34 = vsel %vm1022_vm12, %v8452_v21, %v8454_v15 }
0x1066   :  { %v8365_v62 = vpop.f32.mrb[196].mxu0  ;;  %14724 = vmatmul.mubr.msk.f32.gmra.mrb[220].mxu0 %vm3086_vm5, %v8455_v34 }
0x1067   :  { %v8456_v38 = vrot.slane %v19871_v50, 1  ;;  %v8366_v63 = vadd.f32 %v19830_v47, %v8365_v62  ;;  %v14685_v30 = vpop.f32.mrb[197].mxu0  ;;  %14726 = vmatprep.mubr.msk.f32.mxu0 %vm16564_vm6, %v21073_v39 }
0x1069   :  { %v19879_v61 = vmax.f32 %v8366_v63, 0.0  ;;  %v8457_v25 = vsel %vm1022_vm12, %v8454_v15, %v8456_v38 }
0x106a   :  { %v8370_v35 = vpop.f32.mrb[198].mxu0  ;;  %14727 = vmatmul.mubr.msk.f32.gmra.mrb[222].mxu0 %vm3086_vm5, %v8457_v25 }
0x106b   :  { %v8458_v22 = vrot.slane %v19879_v61, 1  ;;  %v8371_v17 = vadd.f32 %v19832_v60, %v8370_v35  ;;  %v14688_v57 = vpop.f32.mrb[199].mxu0  ;;  %14729 = vmatprep.mubr.msk.f32.mxu0 %vm16564_vm6, %v21073_v39 }
0x106c   :  { %v8822_v57 = vrot.slane %v19852_v11, 2 }
0x106d   :  { %v19887_v47 = vmax.f32 %v8371_v17, 0.0  ;;  %v8459_v5 = vsel %vm1022_vm12, %v8456_v38, %v8458_v22 }
0x106e   :  { %v8375_v43 = vpop.f32.mrb[200].mxu0  ;;  %14730 = vmatmul.mubr.msk.f32.gmra.mrb[224].mxu0 %vm3086_vm5, %v8459_v5  ;;  %v8821_v5 = vrot.slane %v19850_v45, 2 }
0x106f   :  { %v8460_v48 = vrot.slane %v19887_v47, 1  ;;  %v8376_v6 = vadd.f32 %v19834_v41, %v8375_v43  ;;  %v14691_v29 = vpop.f32.mrb[201].mxu0  ;;  %14732 = vmatprep.mubr.msk.f32.mxu0 %vm16564_vm6, %v21073_v39 }
0x1070   :  { %v8823_v43 = vsel %vm752_vm0, %v8821_v5, %v8822_v57 }
0x1071   :  { %v19895_v60 = vmax.f32 %v8376_v6, 0.0  ;;  %v8461_v42 = vsel %vm1022_vm12, %v8458_v22, %v8460_v48  ;;  %v8820_v22 = vld [vmem:[#allocation22 + $0x28] sm:$0xff]  ;;  %v8826_v6 = vrot.slane %v19864_v44, 2 }
0x1072   :  { %v8380_v24 = vpop.f32.mrb[202].mxu0  ;;  %14733 = vmatmul.mubr.msk.f32.gmra.mrb[226].mxu0 %vm3086_vm5, %v8461_v42  ;;  %v8832_v42 = vrot.slane %v19887_v47, 2 }
0x1073   :  { %v8462_v2 = vrot.slane %v19895_v60, 1  ;;  %v8381_v9 = vadd.f32 %v19836_v59, %v8380_v24  ;;  %v14694_v31 = vpop.f32.mrb[203].mxu0  ;;  %14735 = vmatprep.mubr.msk.f32.mxu0 %vm16564_vm6, %v21073_v39  ;;  %v8834_v24 = vrot.slane %v19895_v60, 2 }
0x1075   :  { %v19903_v41 = vmax.f32 %v8381_v9, 0.0  ;;  %v8463_v27 = vsel %vm1022_vm12, %v8460_v48, %v8462_v2  ;;  %v8824_v48 = vrot.slane %v19856_v20, 2 }
0x1076   :  { %v8385_v53 = vpop.f32.mrb[204].mxu0  ;;  %14736 = vmatmul.mubr.msk.f32.gmra.mrb[228].mxu0 %vm3086_vm5, %v8463_v27 }
0x1077   :  { %v8464_v32 = vrot.slane %v19903_v41, 1  ;;  %v8386_v4 = vadd.f32 %v19838_v56, %v8385_v53  ;;  %v14697_v19 = vpop.f32.mrb[205].mxu0  ;;  %14738 = vmatprep.mubr.msk.f32.mxu0 %vm16564_vm6, %v21073_v39  ;;  %v8827_v29 = vsel %vm752_vm0, %v8824_v48, %v8826_v6 }
0x1079   :  { %v19911_v59 = vmax.f32 %v8386_v4, 0.0  ;;  %v8465_v33 = vsel %vm1022_vm12, %v8462_v2, %v8464_v32  ;;  %v8836_v2 = vrot.slane %v19903_v41, 2 }
0x107a   :  { %v8390_v3 = vpop.f32.mrb[206].mxu0  ;;  %14739 = vmatmul.mubr.msk.f32.gmra.mrb[230].mxu0 %vm3086_vm5, %v8465_v33 }
0x107b   :  { %v8466_v51 = vrot.slane %v19911_v59, 1  ;;  %v8391_v37 = vadd.f32 %v19840_v7, %v8390_v3  ;;  %v14700_v13 = vpop.f32.mrb[207].mxu0  ;;  %14741 = vmatprep.mubr.msk.f32.mxu0 %vm16564_vm6, %v21073_v39  ;;  %v8838_v9 = vrot.slane %v19911_v59, 2 }
0x107d   :  { %v19919_v56 = vmax.f32 %v8391_v37, 0.0  ;;  %v8467_v40 = vsel %vm1022_vm12, %v8464_v32, %v8466_v51 }
0x107e   :  { %v8395_v28 = vpop.f32.mrb[208].mxu0  ;;  %14742 = vmatmul.mubr.msk.f32.gmra.mrb[232].mxu0 %vm3086_vm5, %v8467_v40 }
0x107f   :  { %v8468_v18 = vrot.slane %v19919_v56, 1  ;;  %v8396_v54 = vadd.f32 %v19842_v8, %v8395_v28  ;;  %v14703_v23 = vpop.f32.mrb[209].mxu0  ;;  %14744 = vmatprep.mubr.msk.f32.mxu0 %vm16564_vm6, %v21073_v39  ;;  %v8840_v31 = vrot.slane %v19919_v56, 2 }
0x1081   :  { %v19927_v7 = vmax.f32 %v8396_v54, 0.0  ;;  %v8469_v16 = vsel %vm1022_vm12, %v8466_v51, %v8468_v18  ;;  %v8841_v53 = vsel %vm752_vm0, %v8838_v9, %v8840_v31 }
0x1082   :  { %v8400_v46 = vpop.f32.mrb[210].mxu0  ;;  %14745 = vmatmul.mubr.msk.f32.gmra.mrb[234].mxu0 %vm3086_vm5, %v8469_v16 }
0x1083   :  { %v8470_v0 = vrot.slane %v19927_v7, 1  ;;  %v8401_v21 = vadd.f32 %v19844_v26, %v8400_v46  ;;  %v14706_v52 = vpop.f32.mrb[211].mxu0  ;;  %14747 = vmatprep.mubr.msk.f32.mxu0 %vm16564_vm6, %v21073_v39  ;;  %v8842_v27 = vrot.slane %v19927_v7, 2 }
0x1085   :  { %v19935_v8 = vmax.f32 %v8401_v21, 0.0  ;;  %v8471_v49 = vsel %vm1022_vm12, %v8468_v18, %v8470_v0  ;;  %v8843_v4 = vsel %vm752_vm0, %v8840_v31, %v8842_v27 }
0x1086   :  { %v8405_v36 = vpop.f32.mrb[212].mxu0  ;;  %14748 = vmatmul.mubr.msk.f32.gmra.mrb[236].mxu0 %vm3086_vm5, %v8471_v49 }
0x1087   :  { %v8472_v14 = vrot.slane %v19935_v8, 1  ;;  %v8406_v15 = vadd.f32 %v19846_v12, %v8405_v36  ;;  %v14709_v58 = vpop.f32.mrb[213].mxu0  ;;  %14750 = vmatprep.mubr.msk.f32.mxu0 %vm16564_vm6, %v21073_v39  ;;  %v8844_v32 = vrot.slane %v19935_v8, 2 }
0x1089   :  { %v19943_v26 = vmax.f32 %v8406_v15, 0.0  ;;  %v8473_v55 = vsel %vm1022_vm12, %v8470_v0, %v8472_v14 }
0x108a   :  { %v8410_v34 = vpop.f32.mrb[214].mxu0  ;;  %14751 = vmatmul.mubr.msk.f32.gmra.mrb[238].mxu0 %vm3086_vm5, %v8473_v55 }
0x108b   :  { %v8474_v62 = vrot.slane %v19943_v26, 1  ;;  %v8411_v38 = vadd.f32 %v19848_v1, %v8410_v34  ;;  %14753 = vmatprep.mubr.msk.f32.mxu0 %vm16564_vm6, %v21073_v39  ;;  %v14712_v63 = vpop.f32.mrb[215].mxu0  ;;  %v8819_v1 = vld [vmem:[#allocation22 + $0x20] sm:$0xff]  ;;  %v8846_v19 = vrot.slane %v19943_v26, 2 }
0x108c   :  { %v15432_v17 = vpack.c.bf16 %v8820_v22, %v8819_v1 }
0x108d   :  { %v19951_v12 = vmax.f32 %v8411_v38, 0.0  ;;  %v8475_v30 = vsel %vm1022_vm12, %v8472_v14, %v8474_v62  ;;  %v8847_v3 = vsel %vm752_vm0, %v8844_v32, %v8846_v19 }
0x108e   :  { %14754 = vmatmul.mubr.msk.f32.gmra.mrb[240].mxu0 %vm3086_vm5, %v8475_v30 }
0x108f   :  { %v8476_v25 = vrot.slane %v19951_v12, 1  ;;  %14756 = vmatprep.mubr.msk.f32.mxu0 %vm16564_vm6, %v21073_v39  ;;  %v8848_v33 = vrot.slane %v19951_v12, 2 }
0x1091   :  { %v8477_v35 = vsel %vm1022_vm12, %v8474_v62, %v8476_v25  ;;  %v8849_v51 = vsel %vm752_vm0, %v8846_v19, %v8848_v33 }
0x1092   :  { %14757 = vmatmul.mubr.msk.f32.gmra.mrb[242].mxu0 %vm3086_vm5, %v8477_v35 }
0x1093   :  { %14759 = vmatprep.mubr.msk.f32.mxu0 %vm16564_vm6, %v21073_v39 }
0x1096   :  { %14760 = vmatmul.mubr.msk.f32.gmra.mrb[244].mxu0 %vm3086_vm5, %v8476_v25 }
0x1097   :  { %14766 = vmatprep.mubr.msk.f32.mxu0 %vm16564_vm6, %v21073_v39 }
0x109a   :  { %14767 = vmatmul.mubr.msk.f32.vlgmr.msra.gmra.mrb[246].mxu0 %vm3086_vm5, %v19850_v45  ;;  %v8828_v45 = vrot.slane %v19871_v50, 2 }
0x109b   :  { %14769 = vmatprep.mubr.msk.f32.mxu0 %vm16564_vm6, %v21073_v39  ;;  %15433 = vmatpush3.bf16.msra.mxu0 %v15432_v17 }
0x109c   :  { %15434 = vmatprep.subr.bf16.mxu0 %v21071_v10 }
0x109e   :  { %14770 = vmatmul.mubr.msk.f32.gmra.mrb[248].mxu0 %vm3086_vm5, %v19852_v11  ;;  %v8825_v11 = vsel %vm752_vm0, %v8822_v57, %v8824_v48 }
0x109f   :  { %14772 = vmatprep.mubr.msk.f32.mxu0 %vm16564_vm6, %v21073_v39 }
0x10a2   :  { %14773 = vmatmul.mubr.msk.f32.gmra.mrb[250].mxu0 %vm3086_vm5, %v19856_v20  ;;  %v8830_v20 = vrot.slane %v19879_v61, 2 }
0x10a3   :  { %14775 = vmatprep.mubr.msk.f32.mxu0 %vm16564_vm6, %v21073_v39 }
0x10a6   :  { %14776 = vmatmul.mubr.msk.f32.gmra.mrb[252].mxu0 %vm3086_vm5, %v19864_v44  ;;  %v8829_v44 = vsel %vm752_vm0, %v8826_v6, %v8828_v45 }
0x10a7   :  { %14778 = vmatprep.mubr.msk.f32.mxu0 %vm16564_vm6, %v21073_v39 }
0x10aa   :  { %14779 = vmatmul.mubr.msk.f32.gmra.mrb[254].mxu0 %vm3086_vm5, %v19871_v50  ;;  %v8831_v50 = vsel %vm752_vm0, %v8828_v45, %v8830_v20 }
0x10ab   :  { %14781 = vmatprep.mubr.msk.f32.mxu0 %vm16564_vm6, %v21073_v39 }
0x10ae   :  { %14782 = vmatmul.mubr.msk.f32.gmra.mrb[0].mxu0 %vm3086_vm5, %v19879_v61  ;;  %v8833_v61 = vsel %vm752_vm0, %v8830_v20, %v8832_v42 }
0x10af   :  { %14784 = vmatprep.mubr.msk.f32.mxu0 %vm16564_vm6, %v21073_v39 }
0x10b2   :  { %14785 = vmatmul.mubr.msk.f32.gmra.mrb[2].mxu0 %vm3086_vm5, %v19887_v47  ;;  %v8835_v47 = vsel %vm752_vm0, %v8832_v42, %v8834_v24 }
0x10b3   :  { %14787 = vmatprep.mubr.msk.f32.mxu0 %vm16564_vm6, %v21073_v39 }
0x10b6   :  { %14788 = vmatmul.mubr.msk.f32.gmra.mrb[4].mxu0 %vm3086_vm5, %v19895_v60  ;;  %v8837_v60 = vsel %vm752_vm0, %v8834_v24, %v8836_v2 }
0x10b7   :  { %14790 = vmatprep.mubr.msk.f32.mxu0 %vm16564_vm6, %v21073_v39 }
0x10ba   :  { %14791 = vmatmul.mubr.msk.f32.gmra.mrb[6].mxu0 %vm3086_vm5, %v19903_v41  ;;  %v8839_v41 = vsel %vm752_vm0, %v8836_v2, %v8838_v9 }
0x10bb   :  { %14793 = vmatprep.mubr.msk.f32.mxu0 %vm16564_vm6, %v21073_v39 }
0x10be   :  { %14794 = vmatmul.mubr.msk.f32.gmra.mrb[8].mxu0 %vm3086_vm5, %v19911_v59  ;;  %v8845_v59 = vsel %vm752_vm0, %v8842_v27, %v8844_v32 }
0x10bf   :  { %14796 = vmatprep.mubr.msk.f32.mxu0 %vm16564_vm6, %v21073_v39 }
0x10c2   :  { %14797 = vmatmul.mubr.msk.f32.gmra.mrb[10].mxu0 %vm3086_vm5, %v19919_v56 }
0x10c3   :  { %14799 = vmatprep.mubr.msk.f32.mxu0 %vm16564_vm6, %v21073_v39 }
0x10c6   :  { %14800 = vmatmul.mubr.msk.f32.gmra.mrb[12].mxu0 %vm3086_vm5, %v19927_v7 }
0x10c7   :  { %14802 = vmatprep.mubr.msk.f32.mxu0 %vm16564_vm6, %v21073_v39 }
0x10ca   :  { %14803 = vmatmul.mubr.msk.f32.gmra.mrb[14].mxu0 %vm3086_vm5, %v19935_v8 }
0x10cb   :  { %14805 = vmatprep.mubr.msk.f32.mxu0 %vm16564_vm6, %v21073_v39 }
0x10ce   :  { %14806 = vmatmul.mubr.msk.f32.gmra.mrb[16].mxu0 %vm3086_vm5, %v19943_v26 }
0x10cf   :  { %14808 = vmatprep.mubr.msk.f32.mxu0 %vm16564_vm6, %v21073_v39 }
0x10d2   :  { %14809 = vmatmul.mubr.msk.f32.gmra.mrb[18].mxu0 %vm3086_vm5, %v19951_v12 }
0x10d3   :  { %14815 = vmatprep.mubr.msk.f32.mxu0 %vm16564_vm6, %v21073_v39 }
0x10d6   :  { %14816 = vmatmul.mubr.msk.f32.vlgmr.msra.gmra.mrb[20].mxu0 %vm3086_vm5, %v8823_v43 }
0x10d7   :  { %14818 = vmatprep.mubr.msk.f32.mxu0 %vm16564_vm6, %v21073_v39 }
0x10da   :  { %14819 = vmatmul.mubr.msk.f32.gmra.mrb[22].mxu0 %vm3086_vm5, %v8825_v11 }
0x10db   :  { %14821 = vmatprep.mubr.msk.f32.mxu0 %vm16564_vm6, %v21073_v39 }
0x10de   :  { %14822 = vmatmul.mubr.msk.f32.gmra.mrb[24].mxu0 %vm3086_vm5, %v8827_v29 }
0x10df   :  { %14824 = vmatprep.mubr.msk.f32.mxu0 %vm16564_vm6, %v21073_v39 }
0x10e2   :  { %14825 = vmatmul.mubr.msk.f32.gmra.mrb[26].mxu0 %vm3086_vm5, %v8829_v44 }
0x10e3   :  { %14827 = vmatprep.mubr.msk.f32.mxu0 %vm16564_vm6, %v21073_v39 }
0x10e6   :  { %14828 = vmatmul.mubr.msk.f32.gmra.mrb[28].mxu0 %vm3086_vm5, %v8831_v50 }
0x10e7   :  { %14830 = vmatprep.mubr.msk.f32.mxu0 %vm16564_vm6, %v21073_v39 }
0x10ea   :  { %14831 = vmatmul.mubr.msk.f32.gmra.mrb[30].mxu0 %vm3086_vm5, %v8833_v61 }
0x10eb   :  { %14833 = vmatprep.mubr.msk.f32.mxu0 %vm16564_vm6, %v21073_v39 }
0x10ee   :  { %14834 = vmatmul.mubr.msk.f32.gmra.mrb[32].mxu0 %vm3086_vm5, %v8835_v47 }
0x10ef   :  { %14836 = vmatprep.mubr.msk.f32.mxu0 %vm16564_vm6, %v21073_v39 }
0x10f2   :  { %14837 = vmatmul.mubr.msk.f32.gmra.mrb[34].mxu0 %vm3086_vm5, %v8837_v60 }
0x10f3   :  { %14839 = vmatprep.mubr.msk.f32.mxu0 %vm16564_vm6, %v21073_v39 }
0x10f6   :  { %14840 = vmatmul.mubr.msk.f32.gmra.mrb[36].mxu0 %vm3086_vm5, %v8839_v41 }
0x10f7   :  { %14842 = vmatprep.mubr.msk.f32.mxu0 %vm16564_vm6, %v21073_v39 }
0x10fa   :  { %14843 = vmatmul.mubr.msk.f32.gmra.mrb[38].mxu0 %vm3086_vm5, %v8841_v53 }
0x10fb   :  { %14845 = vmatprep.mubr.msk.f32.mxu0 %vm16564_vm6, %v21073_v39 }
0x10fe   :  { %14846 = vmatmul.mubr.msk.f32.gmra.mrb[40].mxu0 %vm3086_vm5, %v8843_v4 }
0x10ff   :  { %14848 = vmatprep.mubr.msk.f32.mxu0 %vm16564_vm6, %v21073_v39 }
0x1102   :  { %14849 = vmatmul.mubr.msk.f32.gmra.mrb[42].mxu0 %vm3086_vm5, %v8845_v59 }
0x1103   :  { %14851 = vmatprep.mubr.msk.f32.mxu0 %vm16564_vm6, %v21073_v39 }
0x1106   :  { %14852 = vmatmul.mubr.msk.f32.gmra.mrb[44].mxu0 %vm3086_vm5, %v8847_v3 }
0x1107   :  { %14854 = vmatprep.mubr.msk.f32.mxu0 %vm16564_vm6, %v21073_v39 }
0x110a   :  { %14855 = vmatmul.mubr.msk.f32.gmra.mrb[46].mxu0 %vm3086_vm5, %v8849_v51 }
0x110b   :  { %14857 = vmatprep.mubr.msk.f32.mxu0 %vm16564_vm6, %v21073_v39 }
0x110e   :  { %14858 = vmatmul.mubr.msk.f32.gmra.mrb[48].mxu0 %vm3086_vm5, %v8848_v33  ;;  %vm21076_vm5 = vmmov %vm21075_vm4 }
0x110f   :  { %14890 = vmatprep.mubr.msk.f32.mxu0 %vm16564_vm6, %v21073_v39 }
0x1131   :  { %v8574_v37 = vpop.f32.mrb[216].mxu0 }
0x1132   :  { %v14719_v13 = vpop.f32.mrb[217].mxu0 }
0x1135   :  { %v8579_v56 = vpop.f32.mrb[218].mxu0 }
0x1136   :  { %v14722_v40 = vpop.f32.mrb[219].mxu0 }
0x1139   :  { %v8584_v28 = vpop.f32.mrb[220].mxu0 }
0x113a   :  { %v14725_v18 = vpop.f32.mrb[221].mxu0 }
0x113d   :  { %v8589_v54 = vpop.f32.mrb[222].mxu0 }
0x113e   :  { %v14728_v23 = vpop.f32.mrb[223].mxu0 }
0x1141   :  { %v8594_v7 = vpop.f32.mrb[224].mxu0 }
0x1142   :  { %v14731_v16 = vpop.f32.mrb[225].mxu0 }
0x1145   :  { %v8599_v46 = vpop.f32.mrb[226].mxu0 }
0x1146   :  { %v14734_v0 = vpop.f32.mrb[227].mxu0 }
0x1149   :  { %v8604_v21 = vpop.f32.mrb[228].mxu0 }
0x114a   :  { %v14737_v52 = vpop.f32.mrb[229].mxu0 }
0x114d   :  { %v8609_v8 = vpop.f32.mrb[230].mxu0 }
0x114e   :  { %v14740_v49 = vpop.f32.mrb[231].mxu0 }
0x1151   :  { %v8614_v36 = vpop.f32.mrb[232].mxu0 }
0x1152   :  { %v14743_v14 = vpop.f32.mrb[233].mxu0 }
0x1155   :  { %v8619_v15 = vpop.f32.mrb[234].mxu0 }
0x1156   :  { %v14746_v58 = vpop.f32.mrb[235].mxu0 }
0x1159   :  { %v8624_v26 = vpop.f32.mrb[236].mxu0 }
0x115a   :  { %v14749_v55 = vpop.f32.mrb[237].mxu0 }
0x115d   :  { %v8629_v34 = vpop.f32.mrb[238].mxu0 }
0x115e   :  { %v14752_v62 = vpop.f32.mrb[239].mxu0 }
0x1161   :  { %v8634_v38 = vpop.f32.mrb[240].mxu0 }
0x1162   :  { %v14755_v63 = vpop.f32.mrb[241].mxu0 }
0x1165   :  { %v8639_v12 = vpop.f32.mrb[242].mxu0 }
0x1166   :  { %v14758_v30 = vpop.f32.mrb[243].mxu0 }
0x1169   :  { %v8644_v25 = vpop.f32.mrb[244].mxu0 }
0x116a   :  { %v14761_v35 = vpop.f32.mrb[245].mxu0 }
0x116d   :  { %v8744_v1 = vpop.f32.mrb[246].mxu0 }
0x116e   :  { %v8745_v22 = vadd.f32 %v8744_v1, %v8574_v37  ;;  %v14768_v17 = vpop.f32.mrb[247].mxu0 }
0x1171   :  { %v8749_v57 = vpop.f32.mrb[248].mxu0 }
0x1172   :  { %v8750_v5 = vadd.f32 %v8749_v57, %v8579_v56  ;;  %v14771_v43 = vpop.f32.mrb[249].mxu0 }
0x1175   :  { %v8754_v48 = vpop.f32.mrb[250].mxu0 }
0x1176   :  { %v8755_v6 = vadd.f32 %v8754_v48, %v8584_v28  ;;  %v14774_v11 = vpop.f32.mrb[251].mxu0 }
0x1179   :  { %v8759_v45 = vpop.f32.mrb[252].mxu0 }
0x117a   :  { %v8760_v29 = vadd.f32 %v8759_v45, %v8589_v54  ;;  %v14777_v20 = vpop.f32.mrb[253].mxu0 }
0x117d   :  { %v8764_v44 = vpop.f32.mrb[254].mxu0 }
0x117e   :  { %v8765_v42 = vadd.f32 %v8764_v44, %v8594_v7  ;;  %v14780_v50 = vpop.f32.mrb[255].mxu0 }
0x1181   :  { %v8769_v24 = vpop.f32.mrb[0].mxu0 }
0x1182   :  { %v8770_v61 = vadd.f32 %v8769_v24, %v8599_v46  ;;  %v14783_v2 = vpop.f32.mrb[1].mxu0 }
0x1185   :  { %v8774_v47 = vpop.f32.mrb[2].mxu0 }
0x1186   :  { %v8775_v9 = vadd.f32 %v8774_v47, %v8604_v21  ;;  %v14786_v60 = vpop.f32.mrb[3].mxu0 }
0x1189   :  { %v8779_v31 = vpop.f32.mrb[4].mxu0 }
0x118a   :  { %v8780_v41 = vadd.f32 %v8779_v31, %v8609_v8  ;;  %v14789_v27 = vpop.f32.mrb[5].mxu0 }
0x118d   :  { %v8784_v53 = vpop.f32.mrb[6].mxu0 }
0x118e   :  { %v20100_v32 = vadd.f32 %v8784_v53, %v8614_v36  ;;  %v14792_v4 = vpop.f32.mrb[7].mxu0  ;;  %v20115_v36 = vld [vmem:[%s21074_s26] ss:$0 sm:$0xff] }
0x1191   :  { %v8789_v19 = vpop.f32.mrb[8].mxu0 }
0x1192   :  { %v20102_v59 = vadd.f32 %v8789_v19, %v8619_v15  ;;  %v14795_v33 = vpop.f32.mrb[9].mxu0 }
0x1195   :  { %v8794_v3 = vpop.f32.mrb[10].mxu0 }
0x1196   :  { %v20104_v51 = vadd.f32 %v8794_v3, %v8624_v26  ;;  %v14798_v37 = vpop.f32.mrb[11].mxu0 }
0x1199   :  { %v8799_v13 = vpop.f32.mrb[12].mxu0 }
0x119a   :  { %v20106_v56 = vadd.f32 %v8799_v13, %v8629_v34  ;;  %v14801_v40 = vpop.f32.mrb[13].mxu0 }
0x119d   :  { %v8804_v28 = vpop.f32.mrb[14].mxu0 }
0x119e   :  { %v20108_v18 = vadd.f32 %v8804_v28, %v8634_v38  ;;  %v14804_v54 = vpop.f32.mrb[15].mxu0 }
0x11a1   :  { %v8809_v23 = vpop.f32.mrb[16].mxu0 }
0x11a2   :  { %v20110_v7 = vadd.f32 %v8809_v23, %v8639_v12  ;;  %v14807_v16 = vpop.f32.mrb[17].mxu0 }
0x11a5   :  { %v8814_v46 = vpop.f32.mrb[18].mxu0 }
0x11a6   :  { %v20112_v0 = vadd.f32 %v8814_v46, %v8644_v25  ;;  %v14810_v21 = vpop.f32.mrb[19].mxu0 }
0x11a9   :  { %v8946_v52 = vpop.f32.mrb[20].mxu0 }
0x11aa   :  { %v9020_v8 = vadd.f32 %v8946_v52, %v8745_v22  ;;  %v14817_v49 = vpop.f32.mrb[21].mxu0 }
0x11ac   :  { %v9042_v26 = vadd.f32 %v20115_v36, %v9020_v8 }
0x11ad   :  { %v8951_v14 = vpop.f32.mrb[22].mxu0 }
0x11ae   :  { %v9021_v15 = vadd.f32 %v8951_v14, %v8750_v5  ;;  %v14820_v58 = vpop.f32.mrb[23].mxu0 }
0x11b0   :  { %v9043_v55 = vadd.f32 %v20115_v36, %v9021_v15 }
0x11b1   :  { %v8956_v34 = vpop.f32.mrb[24].mxu0 }
0x11b2   :  { %v15435_v62 = vpack.c.bf16 %v9043_v55, %v9042_v26  ;;  %v9022_v38 = vadd.f32 %v8956_v34, %v8755_v6  ;;  %v14823_v63 = vpop.f32.mrb[25].mxu0  ;;  %v9057_v34 = vld [vmem:[#allocation23] sm:$0xff] }
0x11b4   :  { %15436 = vmatpush3.bf16.msra.mxu0 %v15435_v62  ;;  %v9044_v35 = vadd.f32 %v20115_v36, %v9022_v38  ;;  %v9061_v62 = vld [vmem:[#allocation23 + $0x20] sm:$0xf]  ;;  %v9178_v38 = vld [vmem:[#allocation25 + $0x8] sm:$0xff] }
0x11b5   :  { %v8961_v12 = vpop.f32.mrb[26].mxu0  ;;  %15437 = vmatprep.subr.bf16.mxu0 %v21071_v10 }
0x11b6   :  { %v9023_v30 = vadd.f32 %v8961_v12, %v8760_v29  ;;  %v14826_v25 = vpop.f32.mrb[27].mxu0 }
0x11b8   :  { %v9045_v1 = vadd.f32 %v20115_v36, %v9023_v30 }
0x11b9   :  { %v8966_v22 = vpop.f32.mrb[28].mxu0 }
0x11ba   :  { %v15438_v17 = vpack.c.bf16 %v9045_v1, %v9044_v35  ;;  %v9024_v57 = vadd.f32 %v8966_v22, %v8765_v42  ;;  %v14829_v5 = vpop.f32.mrb[29].mxu0 }
0x11bb   :  { %v9176_v5 = vld [vmem:[#allocation25] sm:$0xff] }
0x11bc   :  { %15439 = vmatpush3.bf16.msra.mxu0 %v15438_v17  ;;  %v9046_v11 = vadd.f32 %v20115_v36, %v9024_v57 }
0x11bd   :  { %v8971_v43 = vpop.f32.mrb[30].mxu0  ;;  %15440 = vmatprep.subr.bf16.mxu0 %v21071_v10 }
0x11be   :  { %v9025_v48 = vadd.f32 %v8971_v43, %v8770_v61  ;;  %v14832_v6 = vpop.f32.mrb[31].mxu0 }
0x11c0   :  { %v9047_v45 = vadd.f32 %v20115_v36, %v9025_v48 }
0x11c1   :  { %v8976_v29 = vpop.f32.mrb[32].mxu0 }
0x11c2   :  { %v15441_v20 = vpack.c.bf16 %v9047_v45, %v9046_v11  ;;  %v9026_v44 = vadd.f32 %v8976_v29, %v8775_v9  ;;  %v14835_v50 = vpop.f32.mrb[33].mxu0 }
0x11c4   :  { %15442 = vmatpush3.bf16.msra.mxu0 %v15441_v20  ;;  %v9048_v47 = vadd.f32 %v20115_v36, %v9026_v44 }
0x11c5   :  { %v8981_v24 = vpop.f32.mrb[34].mxu0  ;;  %15443 = vmatprep.subr.bf16.mxu0 %v21071_v10 }
0x11c6   :  { %v9027_v42 = vadd.f32 %v8981_v24, %v8780_v41  ;;  %v14838_v2 = vpop.f32.mrb[35].mxu0 }
0x11c8   :  { %v9049_v60 = vadd.f32 %v20115_v36, %v9027_v42 }
0x11c9   :  { %v8986_v61 = vpop.f32.mrb[36].mxu0 }
0x11ca   :  { %v15444_v31 = vpack.c.bf16 %v9049_v60, %v9048_v47  ;;  %v9028_v27 = vadd.f32 %v8986_v61, %v20100_v32  ;;  %v14841_v53 = vpop.f32.mrb[37].mxu0 }
0x11cc   :  { %15445 = vmatpush3.bf16.msra.mxu0 %v15444_v31  ;;  %v9050_v33 = vadd.f32 %v20115_v36, %v9028_v27 }
0x11cd   :  { %v8991_v4 = vpop.f32.mrb[38].mxu0  ;;  %15446 = vmatprep.subr.bf16.mxu0 %v21071_v10 }
0x11ce   :  { %v9029_v9 = vadd.f32 %v8991_v4, %v20102_v59  ;;  %v14844_v19 = vpop.f32.mrb[39].mxu0 }
0x11d0   :  { %v9051_v41 = vadd.f32 %v20115_v36, %v9029_v9 }
0x11d1   :  { %v8996_v3 = vpop.f32.mrb[40].mxu0 }
0x11d2   :  { %v15447_v37 = vpack.c.bf16 %v9051_v41, %v9050_v33  ;;  %v9030_v13 = vadd.f32 %v8996_v3, %v20104_v51  ;;  %v14847_v40 = vpop.f32.mrb[41].mxu0 }
0x11d4   :  { %15448 = vmatpush3.bf16.msra.mxu0 %v15447_v37  ;;  %v9052_v23 = vadd.f32 %v20115_v36, %v9030_v13 }
0x11d5   :  { %v9001_v28 = vpop.f32.mrb[42].mxu0  ;;  %15449 = vmatprep.subr.bf16.mxu0 %v21071_v10 }
0x11d6   :  { %v9031_v32 = vadd.f32 %v9001_v28, %v20106_v56  ;;  %v14850_v54 = vpop.f32.mrb[43].mxu0  ;;  %v12545_v28 = vld [vmem:[%s21084_s19] ss:$0 sm:$0xff] }
0x11d8   :  { %v9053_v59 = vadd.f32 %v20115_v36, %v9031_v32 }
0x11d9   :  { %v9006_v16 = vpop.f32.mrb[44].mxu0 }
0x11da   :  { %v15450_v46 = vpack.c.bf16 %v9053_v59, %v9052_v23  ;;  %v9032_v21 = vadd.f32 %v9006_v16, %v20108_v18  ;;  %v14853_v52 = vpop.f32.mrb[45].mxu0 }
0x11dc   :  { %15451 = vmatpush3.bf16.msra.mxu0 %v15450_v46  ;;  %v9054_v14 = vadd.f32 %v20115_v36, %v9032_v21 }
0x11dd   :  { %v9011_v8 = vpop.f32.mrb[46].mxu0  ;;  %15452 = vmatprep.subr.bf16.mxu0 %v21071_v10 }
0x11de   :  { %v9033_v51 = vadd.f32 %v9011_v8, %v20110_v7  ;;  %v14856_v49 = vpop.f32.mrb[47].mxu0  ;;  %v9058_v7 = vld [vmem:[#allocation23 + $0x8] sm:$0xff] }
0x11e0   :  { %v9055_v56 = vadd.f32 %v20115_v36, %v9033_v51 }
0x11e1   :  { %v9016_v15 = vpop.f32.mrb[48].mxu0 }
0x11e2   :  { %v15453_v58 = vpack.c.bf16 %v9055_v56, %v9054_v14  ;;  %v9034_v26 = vadd.f32 %v9016_v15, %v20112_v0  ;;  %v14859_v55 = vpop.f32.mrb[49].mxu0  ;;  %v9059_v0 = vld [vmem:[#allocation23 + $0x10] sm:$0xff] }
0x11e4   :  { %15454 = vmatpush3.bf16.msra.mxu0 %v15453_v58  ;;  %v9056_v18 = vadd.f32 %v20115_v36, %v9034_v26  ;;  %v9060_v36 = vld [vmem:[#allocation23 + $0x18] sm:$0xff] }
0x11e5   :  { %14888 = vmatprep.subr.mxu0 %v21073_v39 }
0x11e8   :  { %14889 = vmatpush3.msk.msra.mxu0 %vm752_vm0, %v9056_v18 }
0x11e9   :  { %14891 = vmatmul.mubr.msk.f32.vlgmr.msra.gmra.mrb[50].mxu0 %vm9062_vm15, %v9057_v34  ;;  %14905 = vmatprep.subr.mxu0 %v21073_v39 }
0x11ea   :  { %14893 = vmatprep.mubr.msk.f32.mxu0 %vm16564_vm6, %v21073_v39  ;;  %14906 = vmatpush3.msra.mxu0 %v9178_v38 }
0x11eb   :  { %14922 = vmatprep.subr.mxu0 %v21073_v39 }
0x11ed   :  { %14894 = vmatmul.mubr.msk.f32.gmra.mrb[52].mxu0 %vm9062_vm15, %v9058_v7 }
0x11ee   :  { %14896 = vmatprep.mubr.msk.f32.mxu0 %vm16564_vm6, %v21073_v39 }
0x11f1   :  { %14897 = vmatmul.mubr.msk.f32.gmra.mrb[54].mxu0 %vm9062_vm15, %v9059_v0 }
0x11f2   :  { %14899 = vmatprep.mubr.msk.f32.mxu0 %vm16564_vm6, %v21073_v39 }
0x11f5   :  { %14900 = vmatmul.mubr.msk.f32.gmra.mrb[56].mxu0 %vm9062_vm15, %v9060_v36 }
0x11f6   :  { %14902 = vmatprep.mubr.msk.f32.mxu0 %vm16564_vm6, %v21073_v39 }
0x11f9   :  { %14903 = vmatmul.mubr.msk.f32.gmra.mrb[58].mxu0 %vm9062_vm15, %v9061_v62  ;;  %vm21083_vm15 = vmmov %vm21079_vm1 }
0x11fa   :  { %14907 = vmatprep.mubr.msk.f32.mxu0 %vm16564_vm6, %v21073_v39 }
0x12bc   :  { %v9147_v63 = vpop.f32.mrb[50].mxu0 }
0x12bd   :  { %v14892_v12 = vpop.f32.mrb[51].mxu0  ;;  %v20159_v30 = vmax.f32 %v9147_v63, 0.0 }
0x12bf   :  { %v9184_v22 = vrot.slane %v20159_v30, 1 }
0x12c0   :  { %v9152_v25 = vpop.f32.mrb[52].mxu0 }
0x12c1   :  { %v20161_v35 = vmax.f32 %v9152_v25, 0.0  ;;  %v14895_v1 = vpop.f32.mrb[53].mxu0 }
0x12c3   :  { %v9185_v17 = vrot.slane %v20161_v35, 1 }
0x12c4   :  { %v9157_v57 = vpop.f32.mrb[54].mxu0 }
0x12c5   :  { %v20166_v43 = vsel %vm1022_vm12, %v9184_v22, %v9185_v17  ;;  %v20168_v48 = vmax.f32 %v9157_v57, 0.0  ;;  %v14898_v6 = vpop.f32.mrb[55].mxu0 }
0x12c6   :  { %14908 = vmatmul.mubr.msk.f32.vlgmr.msra.gmra.mrb[60].mxu0 %vm21075_vm4, %v20166_v43  ;;  %vm21085_vm4 = vmmov %vm21079_vm1 }
0x12c7   :  { %v9187_v11 = vrot.slane %v20168_v48, 1  ;;  %14910 = vmatprep.mubr.msk.f32.mxu0 %vm16564_vm6, %v21073_v39  ;;  %14923 = vmatpush3.msra.mxu0 %v9176_v5 }
0x12c8   :  { %v9162_v45 = vpop.f32.mrb[56].mxu0  ;;  %15455 = vmatprep.subr.bf16.mxu0 %v21071_v10 }
0x12c9   :  { %v20176_v29 = vmax.f32 %v9162_v45, 0.0  ;;  %v20179_v20 = vsel %vm1022_vm12, %v9185_v17, %v9187_v11  ;;  %v14901_v44 = vpop.f32.mrb[57].mxu0 }
0x12ca   :  { %14911 = vmatmul.mubr.msk.f32.gmra.mrb[62].mxu0 %vm21076_vm5, %v20179_v20  ;;  %vm21086_vm5 = vmmov 1  }
0x12cb   :  { %v9189_v50 = vrot.slane %v20176_v29, 1  ;;  %14913 = vmatprep.mubr.msk.f32.mxu0 %vm16564_vm6, %v21073_v39 }
0x12cc   :  { %v9167_v24 = vpop.f32.mrb[58].mxu0 }
0x12cd   :  { %v20186_v42 = vmax.f32 %v9167_v24, 0.0  ;;  %v20189_v2 = vsel %vm1022_vm12, %v9187_v11, %v9189_v50  ;;  %v14904_v47 = vpop.f32.mrb[59].mxu0 }
0x12ce   :  { %14914 = vmatmul.mubr.msk.f32.gmra.mrb[64].mxu0 %vm21077_vm8, %v20189_v2  ;;  %vm20249_vm8 = vmpackc.low %vm1022_vm12, %vm21086_vm5 }
0x12cf   :  { %v20194_v60 = vrot.slane %v20186_v42, 1  ;;  %14916 = vmatprep.mubr.msk.f32.mxu0 %vm16564_vm6, %v21073_v39  ;;  %vm21095_vm5 = vmmov %vm21079_vm1 }
0x12d1   :  { %v20200_v61 = vsel %vm1022_vm12, %v9189_v50, %v20194_v60 }
0x12d2   :  { %14917 = vmatmul.mubr.msk.f32.gmra.mrb[66].mxu0 %vm21078_vm7, %v20200_v61  ;;  %vm9476_vm7 = vcmask 252928  }
0x12d3   :  { %14919 = vmatprep.mubr.msk.f32.mxu0 %vm16564_vm6, %v21073_v39 }
0x12d6   :  { %14920 = vmatmul.mubr.msk.f32.gmra.mrb[68].mxu0 %vm21079_vm1, %v20194_v60 }
0x12d7   :  { %14924 = vmatprep.mubr.msk.f32.mxu0 %vm16564_vm6, %v21073_v39 }
0x12da   :  { %14925 = vmatmul.mubr.msk.f32.vlgmr.msra.gmra.mrb[70].mxu0 %vm21080_vm2, %v20159_v30  ;;  %vm21090_vm2 = vmmov %vm21079_vm1 }
0x12db   :  { %14927 = vmatprep.mubr.msk.f32.mxu0 %vm16564_vm6, %v21073_v39 }
0x12de   :  { %14928 = vmatmul.mubr.msk.f32.gmra.mrb[72].mxu0 %vm21081_vm10, %v20161_v35  ;;  %vm21091_vm10 = vmmov %vm21079_vm1 }
0x12df   :  { %14930 = vmatprep.mubr.msk.f32.mxu0 %vm16564_vm6, %v21073_v39 }
0x12e2   :  { %14931 = vmatmul.mubr.msk.f32.gmra.mrb[74].mxu0 %vm21082_vm11, %v20168_v48  ;;  %vm21092_vm11 = vmmov %vm21079_vm1 }
0x12e3   :  { %14933 = vmatprep.mubr.msk.f32.mxu0 %vm16564_vm6, %v21073_v39 }
0x12e6   :  { %14934 = vmatmul.mubr.msk.f32.gmra.mrb[76].mxu0 %vm21083_vm15, %v20176_v29  ;;  %vm21093_vm15 = vmmov %vm21079_vm1 }
0x12e7   :  { %14936 = vmatprep.mubr.msk.f32.mxu0 %vm16564_vm6, %v21073_v39 }
0x12ea   :  { %14937 = vmatmul.mubr.msk.f32.gmra.mrb[78].mxu0 %vm21085_vm4, %v20186_v42  ;;  %vm21094_vm4 = vmmov %vm21079_vm1 }
0x12eb   :  { %14947 = vmatprep.mubr.msk.f32.mxu0 %vm16564_vm6, %v21073_v39 }
0x1399   :  { %v9269_v31 = vpop.f32.mrb[60].mxu0 }
0x139a   :  { %v14909_v27 = vpop.f32.mrb[61].mxu0 }
0x139d   :  { %v9274_v53 = vpop.f32.mrb[62].mxu0 }
0x139e   :  { %v14912_v4 = vpop.f32.mrb[63].mxu0 }
0x13a1   :  { %v9279_v9 = vpop.f32.mrb[64].mxu0 }
0x13a2   :  { %v14915_v19 = vpop.f32.mrb[65].mxu0 }
0x13a5   :  { %v9284_v33 = vpop.f32.mrb[66].mxu0 }
0x13a6   :  { %v14918_v41 = vpop.f32.mrb[67].mxu0 }
0x13a9   :  { %v9289_v3 = vpop.f32.mrb[68].mxu0 }
0x13aa   :  { %v14921_v37 = vpop.f32.mrb[69].mxu0 }
0x13ad   :  { %v9369_v13 = vpop.f32.mrb[70].mxu0 }
0x13ae   :  { %v9370_v40 = vadd.f32 %v9369_v13, %v9269_v31  ;;  %v14926_v32 = vpop.f32.mrb[71].mxu0 }
0x13b0   :  { %v9400_v54 = vadd.f32 %v12545_v28, %v9370_v40 }
0x13b1   :  { %v9374_v23 = vpop.f32.mrb[72].mxu0 }
0x13b2   :  { %v9375_v59 = vadd.f32 %v9374_v23, %v9274_v53  ;;  %v14929_v16 = vpop.f32.mrb[73].mxu0  ;;  %v9409_v21 = vrot.slane %v9400_v54, 1  ;;  %v9425_v52 = vrot.slane %v9400_v54, 2  ;;  %v9442_v8 = vrot.slane %v9400_v54, 3 }
0x13b3   :  { %v9459_v26 = vrot.slane %v9400_v54, 4 }
0x13b4   :  { %v9401_v46 = vadd.f32 %v12545_v28, %v9375_v59 }
0x13b5   :  { %v9379_v51 = vpop.f32.mrb[74].mxu0 }
0x13b6   :  { %v9410_v49 = vrot.slane %v9401_v46, 1  ;;  %v9426_v14 = vrot.slane %v9401_v46, 2  ;;  %v9443_v56 = vrot.slane %v9401_v46, 3  ;;  %v9380_v15 = vadd.f32 %v9379_v51, %v9279_v9  ;;  %v14932_v58 = vpop.f32.mrb[75].mxu0 }
0x13b7   :  { %v9460_v55 = vrot.slane %v9401_v46, 4 }
0x13b8   :  { %v9402_v18 = vadd.f32 %v12545_v28, %v9380_v15  ;;  %v9411_v34 = vsel %vm1022_vm12, %v9409_v21, %v9410_v49  ;;  %v9427_v7 = vsel %vm752_vm0, %v9425_v52, %v9426_v14  ;;  %v9444_v0 = vsel %vm2059_vm14, %v9442_v8, %v9443_v56 }
0x13b9   :  { %v9384_v36 = vpop.f32.mrb[76].mxu0  ;;  %v9420_v62 = vmax.f32 %v9400_v54, %v9411_v34  ;;  %v9461_v38 = vsel %vm2449_vm3, %v9459_v26, %v9460_v55 }
0x13ba   :  { %v9412_v63 = vrot.slane %v9402_v18, 1  ;;  %v9428_v12 = vrot.slane %v9402_v18, 2  ;;  %v9445_v25 = vrot.slane %v9402_v18, 3  ;;  %v9385_v1 = vadd.f32 %v9384_v36, %v9284_v33  ;;  %v14935_v22 = vpop.f32.mrb[77].mxu0  ;;  %v9552_v36 = vld [vmem:[#allocation26] sm:$0xff] }
0x13bb   :  { %v9438_v17 = vmax.f32 %v9420_v62, %v9427_v7  ;;  %v9462_v57 = vrot.slane %v9402_v18, 4  ;;  %v9554_v7 = vld [vmem:[#allocation26 + $0x8] sm:$0xff]  ;;  %v9742_v62 = vrot.slane %v20176_v29, 2 }
0x13bc   :  { %v9403_v5 = vadd.f32 %v12545_v28, %v9385_v1  ;;  %v9413_v6 = vsel %vm1022_vm12, %v9410_v49, %v9412_v63  ;;  %v9429_v11 = vsel %vm752_vm0, %v9426_v14, %v9428_v12  ;;  %v9446_v45 = vsel %vm2059_vm14, %v9443_v56, %v9445_v25 }
0x13bd   :  { %v9389_v44 = vpop.f32.mrb[78].mxu0  ;;  %v9421_v50 = vmax.f32 %v9401_v46, %v9413_v6  ;;  %v9455_v24 = vmax.f32 %v9438_v17, %v9444_v0  ;;  %v9463_v47 = vsel %vm2449_vm3, %v9460_v55, %v9462_v57  ;;  %v21089_v0 = vld [vmem:[#allocation103_spill] sm:$0xff] }
0x13be   :  { %v9414_v31 = vrot.slane %v9403_v5, 1  ;;  %v9430_v27 = vrot.slane %v9403_v5, 2  ;;  %v9447_v53 = vrot.slane %v9403_v5, 3  ;;  %v9464_v4 = vrot.slane %v9403_v5, 4  ;;  %v14938_v9 = vpop.f32.mrb[79].mxu0 }
0x13bf   :  { %v9390_v19 = vadd.f32 %v9389_v44, %v9289_v3  ;;  %v9439_v33 = vmax.f32 %v9421_v50, %v9429_v11  ;;  %v9472_v41 = vmax.f32 %v9455_v24, %v9461_v38 }
0x13c0   :  { %v9415_v37 = vsel %vm1022_vm12, %v9412_v63, %v9414_v31  ;;  %v9431_v13 = vsel %vm752_vm0, %v9428_v12, %v9430_v27  ;;  %v9448_v40 = vsel %vm2059_vm14, %v9445_v25, %v9447_v53  ;;  %v9465_v59 = vsel %vm2449_vm3, %v9462_v57, %v9464_v4 }
0x13c1   :  { %v9404_v32 = vadd.f32 %v12545_v28, %v9390_v19  ;;  %v9456_v54 = vmax.f32 %v9439_v33, %v9446_v45  ;;  %v9422_v23 = vmax.f32 %v9402_v18, %v9415_v37  ;;  %v9423_v8 = vmax.f32 %v9403_v5, %v9414_v31  ;;  %v9990_v18 = vld [vmem:[#allocation28] sm:$0xff] }
0x13c3   :  { %v9432_v16 = vrot.slane %v9404_v32, 2  ;;  %v9449_v46 = vrot.slane %v9404_v32, 3  ;;  %v9466_v21 = vrot.slane %v9404_v32, 4  ;;  %v9473_v52 = vmax.f32 %v9456_v54, %v9463_v47  ;;  %v12563_v54 = vld [vmem:[%s21102_s28] ss:$0 sm:$0xff] }
0x13c4   :  { %v9440_v51 = vmax.f32 %v9422_v23, %v9431_v13 }
0x13c5   :  { %v9433_v3 = vsel %vm752_vm0, %v9430_v27, %v9432_v16  ;;  %v9450_v49 = vsel %vm2059_vm14, %v9447_v53, %v9449_v46  ;;  %v9467_v14 = vsel %vm2449_vm3, %v9464_v4, %v9466_v21  ;;  %v15456_v56 = vpack.c.bf16 %v9473_v52, %v9472_v41 }
0x13c6   :  { %v9441_v15 = vmax.f32 %v9423_v8, %v9433_v3  ;;  %v9457_v58 = vmax.f32 %v9440_v51, %v9448_v40 }
0x13c7   :  { %15457 = vmatpush3.bf16.msra.mxu0 %v15456_v56 }
0x13c8   :  { %v9458_v28 = vmax.f32 %v9441_v15, %v9450_v49  ;;  %15458 = vmatprep.subr.bf16.mxu0 %v21071_v10  ;;  %v9474_v26 = vmax.f32 %v9457_v58, %v9465_v59 }
0x13ca   :  { %v9475_v55 = vmax.f32 %v9458_v28, %v9467_v14 }
0x13cc   :  { %v15459_v34 = vpack.c.bf16 %v9475_v55, %v9474_v26 }
0x13ce   :  { %15461 = vmatpush3.bf16.msk.msra.mxu0 %vm20249_vm8, %v15459_v34 }
0x13cf   :  { %14950 = vmatprep.subr.mxu0 %v21073_v39 }
0x13d1   :  { %14948 = vmatmul.mubr.msk.f32.vlgmr.msra.gmra.mrb[80].mxu0 %vm9476_vm7, %v21089_v0 }
0x13d2   :  { %14951 = vmatpush3.msra.mxu0 %v9554_v7  ;;  %14952 = vmatprep.mubr.msk.f32.mxu0 %vm16564_vm6, %v21073_v39 }
0x13d3   :  { %14967 = vmatprep.subr.mxu0 %v21073_v39 }
0x13d5   :  { %14953 = vmatmul.mubr.msk.f32.vlgmr.msra.gmra.mrb[82].mxu0 %vm21079_vm1, %v20166_v43  ;;  %v9736_v43 = vld [vmem:[#allocation26 + $0x10] sm:$0xff] }
0x13d6   :  { %14955 = vmatprep.mubr.msk.f32.mxu0 %vm16564_vm6, %v21073_v39  ;;  %14968 = vmatpush3.msra.mxu0 %v9552_v36 }
0x13d7   :  { %14984 = vmatprep.subr.mxu0 %v21073_v39 }
0x13d9   :  { %14956 = vmatmul.mubr.msk.f32.gmra.mrb[84].mxu0 %vm21090_vm2, %v20179_v20  ;;  %vm21096_vm2 = vmmov %vm21079_vm1  ;;  %v9738_v20 = vrot.slane %v20161_v35, 2 }
0x13da   :  { %14958 = vmatprep.mubr.msk.f32.mxu0 %vm16564_vm6, %v21073_v39 }
0x13dd   :  { %14959 = vmatmul.mubr.msk.f32.gmra.mrb[86].mxu0 %vm21091_vm10, %v20189_v2  ;;  %vm21097_vm10 = vmmov %vm21079_vm1  ;;  %v9737_v2 = vrot.slane %v20159_v30, 2 }
0x13de   :  { %14961 = vmatprep.mubr.msk.f32.mxu0 %vm16564_vm6, %v21073_v39 }
0x13e1   :  { %14962 = vmatmul.mubr.msk.f32.gmra.mrb[88].mxu0 %vm21092_vm11, %v20200_v61  ;;  %v9740_v61 = vrot.slane %v20168_v48, 2  ;;  %vm21098_vm11 = vmmov %vm21079_vm1 }
0x13e2   :  { %14964 = vmatprep.mubr.msk.f32.mxu0 %vm16564_vm6, %v21073_v39 }
0x13e3   :  { %v9743_v38 = vsel %vm752_vm0, %v9740_v61, %v9742_v62 }
0x13e5   :  { %14965 = vmatmul.mubr.msk.f32.gmra.mrb[90].mxu0 %vm21093_vm15, %v20194_v60  ;;  %v9739_v60 = vsel %vm752_vm0, %v9737_v2, %v9738_v20  ;;  %vm21099_vm15 = vmmov %vm21079_vm1 }
0x13e6   :  { %14969 = vmatprep.mubr.msk.f32.mxu0 %vm16564_vm6, %v21073_v39 }
0x13e9   :  { %14970 = vmatmul.mubr.msk.f32.vlgmr.msra.gmra.mrb[92].mxu0 %vm21094_vm4, %v20159_v30  ;;  %v9744_v30 = vrot.slane %v20186_v42, 2  ;;  %vm21100_vm4 = vmmov %vm21079_vm1 }
0x13ea   :  { %14972 = vmatprep.mubr.msk.f32.mxu0 %vm16564_vm6, %v21073_v39  ;;  %14985 = vmatpush3.msra.mxu0 %v9736_v43 }
0x13eb   :  { %15462 = vmatprep.subr.bf16.mxu0 %v21071_v10 }
0x13ed   :  { %14973 = vmatmul.mubr.msk.f32.gmra.mrb[94].mxu0 %vm21095_vm5, %v20161_v35  ;;  %v9741_v35 = vsel %vm752_vm0, %v9738_v20, %v9740_v61  ;;  %vm21101_vm5 = vmmov %vm21079_vm1 }
0x13ee   :  { %14975 = vmatprep.mubr.msk.f32.mxu0 %vm16564_vm6, %v21073_v39 }
0x13f1   :  { %14976 = vmatmul.mubr.msk.f32.gmra.mrb[96].mxu0 %vm21079_vm1, %v20168_v48  ;;  %v9745_v48 = vsel %vm752_vm0, %v9742_v62, %v9744_v30 }
0x13f2   :  { %14978 = vmatprep.mubr.msk.f32.mxu0 %vm16564_vm6, %v21073_v39 }
0x13f5   :  { %14979 = vmatmul.mubr.msk.f32.gmra.mrb[98].mxu0 %vm21096_vm2, %v20176_v29 }
0x13f6   :  { %14981 = vmatprep.mubr.msk.f32.mxu0 %vm16564_vm6, %v21073_v39 }
0x13f9   :  { %14982 = vmatmul.mubr.msk.f32.gmra.mrb[100].mxu0 %vm21097_vm10, %v20186_v42 }
0x13fa   :  { %14986 = vmatprep.mubr.msk.f32.mxu0 %vm16564_vm6, %v21073_v39 }
0x13fd   :  { %14987 = vmatmul.mubr.msk.f32.vlgmr.msra.gmra.mrb[102].mxu0 %vm21098_vm11, %v9739_v60  ;;  %vm11731_vm11 = vcmask 15360  }
0x13fe   :  { %14989 = vmatprep.mubr.msk.f32.mxu0 %vm16564_vm6, %v21073_v39 }
0x1401   :  { %14990 = vmatmul.mubr.msk.f32.gmra.mrb[104].mxu0 %vm21099_vm15, %v9741_v35  ;;  %vm11739_vm15 = vcmask 16384  }
0x1402   :  { %14992 = vmatprep.mubr.msk.f32.mxu0 %vm16564_vm6, %v21073_v39 }
0x1405   :  { %14993 = vmatmul.mubr.msk.f32.gmra.mrb[106].mxu0 %vm21100_vm4, %v9743_v38 }
0x1406   :  { %14995 = vmatprep.mubr.msk.f32.mxu0 %vm16564_vm6, %v21073_v39 }
0x1409   :  { %14996 = vmatmul.mubr.msk.f32.gmra.mrb[108].mxu0 %vm21101_vm5, %v9745_v48 }
0x140a   :  { %14998 = vmatprep.mubr.msk.f32.mxu0 %vm16564_vm6, %v21073_v39 }
0x140d   :  { %14999 = vmatmul.mubr.msk.f32.gmra.mrb[110].mxu0 %vm21079_vm1, %v9744_v30 }
0x140e   :  { %15009 = vmatprep.mubr.msk.f32.mxu0 %vm16564_vm6, %v21073_v39 }
0x14a4   :  { %v20327_v29 = vpop.f32.mrb[80].mxu0 }
0x14a5   :  { %v14949_v42 = vpop.f32.mrb[81].mxu0 }
0x14a8   :  { %v9621_v63 = vpop.f32.mrb[82].mxu0 }
0x14a9   :  { %v14954_v12 = vpop.f32.mrb[83].mxu0 }
0x14ac   :  { %v9626_v25 = vpop.f32.mrb[84].mxu0 }
0x14ad   :  { %v14957_v1 = vpop.f32.mrb[85].mxu0 }
0x14b0   :  { %v9631_v22 = vpop.f32.mrb[86].mxu0 }
0x14b1   :  { %v14960_v17 = vpop.f32.mrb[87].mxu0 }
0x14b4   :  { %v9636_v57 = vpop.f32.mrb[88].mxu0 }
0x14b5   :  { %v14963_v5 = vpop.f32.mrb[89].mxu0 }
0x14b8   :  { %v9641_v6 = vpop.f32.mrb[90].mxu0 }
0x14b9   :  { %v14966_v11 = vpop.f32.mrb[91].mxu0 }
0x14bc   :  { %v9711_v45 = vpop.f32.mrb[92].mxu0 }
0x14bd   :  { %v9712_v44 = vadd.f32 %v9711_v45, %v9621_v63  ;;  %v14971_v50 = vpop.f32.mrb[93].mxu0 }
0x14c0   :  { %v9716_v24 = vpop.f32.mrb[94].mxu0 }
0x14c1   :  { %v9717_v47 = vadd.f32 %v9716_v24, %v9626_v25  ;;  %v14974_v31 = vpop.f32.mrb[95].mxu0 }
0x14c4   :  { %v9721_v27 = vpop.f32.mrb[96].mxu0 }
0x14c5   :  { %v9722_v53 = vadd.f32 %v9721_v27, %v9631_v22  ;;  %v14977_v4 = vpop.f32.mrb[97].mxu0 }
0x14c8   :  { %v9726_v9 = vpop.f32.mrb[98].mxu0 }
0x14c9   :  { %v9727_v19 = vadd.f32 %v9726_v9, %v9636_v57  ;;  %v14980_v33 = vpop.f32.mrb[99].mxu0 }
0x14cc   :  { %v9731_v41 = vpop.f32.mrb[100].mxu0 }
0x14cd   :  { %v9732_v37 = vadd.f32 %v9731_v41, %v9641_v6  ;;  %v14983_v13 = vpop.f32.mrb[101].mxu0 }
0x14d0   :  { %v9822_v40 = vpop.f32.mrb[102].mxu0 }
0x14d1   :  { %v9846_v32 = vadd.f32 %v9822_v40, %v9712_v44  ;;  %v14988_v23 = vpop.f32.mrb[103].mxu0  ;;  %v9995_v40 = vld [vmem:[#allocation28 + $0x20] sm:$0xff] }
0x14d3   :  { %v9858_v59 = vadd.f32 %v12563_v54, %v9846_v32  ;;  %v9996_v32 = vld [vmem:[#allocation28 + $0x28] sm:$0xff] }
0x14d4   :  { %v9827_v16 = vpop.f32.mrb[104].mxu0  ;;  %v15470_v23 = vpack.c.bf16 %v9996_v32, %v9995_v40  ;;  %v21112_v40 = vld [vmem:[#allocation102_spill] sm:$0xff] }
0x14d5   :  { %v9847_v46 = vadd.f32 %v9827_v16, %v9717_v47  ;;  %v14991_v21 = vpop.f32.mrb[105].mxu0  ;;  %v9867_v8 = vrot.slane %v9858_v59, 1  ;;  %v9883_v51 = vrot.slane %v9858_v59, 2  ;;  %v9900_v3 = vrot.slane %v9858_v59, 3  ;;  %v9998_v16 = vld [vmem:[#allocation28 + $0x38] sm:$0xff] }
0x14d6   :  { %v9991_v21 = vld [vmem:[#allocation28 + $0x8] sm:$0xff]  ;;  %v10397_v32 = vsub.s32 0, %v21112_v40 }
0x14d7   :  { %v9859_v52 = vadd.f32 %v12563_v54, %v9847_v46 }
0x14d8   :  { %v9832_v49 = vpop.f32.mrb[106].mxu0 }
0x14d9   :  { %v9868_v14 = vrot.slane %v9859_v52, 1  ;;  %v9884_v56 = vrot.slane %v9859_v52, 2  ;;  %v9901_v15 = vrot.slane %v9859_v52, 3  ;;  %v9848_v58 = vadd.f32 %v9832_v49, %v9722_v53  ;;  %v14994_v28 = vpop.f32.mrb[107].mxu0 }
0x14da   :  { %v10157_v28 = vld [vmem:[#allocation29 + $0x18] sm:$0xff] }
0x14db   :  { %v9860_v26 = vadd.f32 %v12563_v54, %v9848_v58  ;;  %v9869_v55 = vsel %vm1022_vm12, %v9867_v8, %v9868_v14  ;;  %v9885_v34 = vsel %vm752_vm0, %v9883_v51, %v9884_v56  ;;  %v9902_v7 = vsel %vm2059_vm14, %v9900_v3, %v9901_v15  ;;  %v9992_v8 = vld [vmem:[#allocation28 + $0x10] sm:$0xff]  ;;  %v9993_v51 = vld [vmem:[#allocation28 + $0x18] sm:$0xff] }
0x14dc   :  { %v9837_v36 = vpop.f32.mrb[108].mxu0  ;;  %v9878_v43 = vmax.f32 %v9858_v59, %v9869_v55  ;;  %v9997_v59 = vld [vmem:[#allocation28 + $0x30] sm:$0xff]  ;;  %v10248_v55 = vld [vmem:[#allocation31] sm:$0xff] }
0x14dd   :  { %v9870_v20 = vrot.slane %v9860_v26, 1  ;;  %v9886_v2 = vrot.slane %v9860_v26, 2  ;;  %v9903_v60 = vrot.slane %v9860_v26, 3  ;;  %v9849_v61 = vadd.f32 %v9837_v36, %v9727_v19  ;;  %v14997_v62 = vpop.f32.mrb[109].mxu0  ;;  %v10156_v58 = vld [vmem:[#allocation29 + $0x10] sm:$0xff] }
0x14de   :  { %v9896_v35 = vmax.f32 %v9878_v43, %v9885_v34  ;;  %v15473_v46 = vpack.c.bf16 %v9998_v16, %v9997_v59  ;;  %v10249_v34 = vld [vmem:[#allocation31 + $0x8] sm:$0xff]  ;;  %v12568_v43 = vld [vmem:[%s21103_s2] ss:$0 sm:$0xff]  ;;  %v10251_v62 = vld [vmem:[#allocation31 + $0x18] sm:$0xff] }
0x14df   :  { %v9861_v30 = vadd.f32 %v12563_v54, %v9849_v61  ;;  %v9871_v38 = vsel %vm1022_vm12, %v9868_v14, %v9870_v20  ;;  %v9887_v48 = vsel %vm752_vm0, %v9884_v56, %v9886_v2  ;;  %v9904_v42 = vsel %vm2059_vm14, %v9901_v15, %v9903_v60  ;;  %v10154_v14 = vld [vmem:[#allocation29] sm:$0xff]  ;;  %v10155_v56 = vld [vmem:[#allocation29 + $0x8] sm:$0xff]  ;;  %v20416_v59 = vld [vmem:[%s21111_s17] sm:$0xff] }
0x14e0   :  { %v9842_v63 = vpop.f32.mrb[110].mxu0  ;;  %v9879_v12 = vmax.f32 %v9859_v52, %v9871_v38  ;;  %v9913_v25 = vmax.f32 %v9896_v35, %v9902_v7  ;;  %v15476_v52 = vpack.c.bf16 %v9991_v21, %v9990_v18  ;;  %v15482_v15 = vpack.c.bf16 %v10155_v56, %v10154_v14  ;;  %v12111_v38 = vld [vmem:[%s21105_s16] ss:$0 sm:$0xff]  ;;  %v20420_v21 = vld [vmem:[%s21111_s17 + $0x8] sm:$0x3] }
0x14e1   :  { %v9872_v1 = vrot.slane %v9861_v30, 1  ;;  %v9888_v22 = vrot.slane %v9861_v30, 2  ;;  %v9905_v17 = vrot.slane %v9861_v30, 3  ;;  %v9850_v57 = vadd.f32 %v9842_v63, %v9732_v37  ;;  %v15000_v5 = vpop.f32.mrb[111].mxu0 }
0x14e2   :  { %v9897_v6 = vmax.f32 %v9879_v12, %v9887_v48  ;;  %v15487_v7 = vpack.c.bf16 %v10249_v34, %v10248_v55  ;;  %v21108_v12 = vld [vmem:[#allocation109_spill] sm:$0xff]  ;;  %v12573_v5 = vld [vmem:[%s21106_s6] ss:$0 sm:$0xff] }
0x14e3   :  { %v9873_v11 = vsel %vm1022_vm12, %v9870_v20, %v9872_v1  ;;  %v9889_v45 = vsel %vm752_vm0, %v9886_v2, %v9888_v22  ;;  %v9862_v44 = vadd.f32 %v12563_v54, %v9850_v57  ;;  %v9906_v47 = vsel %vm2059_vm14, %v9903_v60, %v9905_v17  ;;  %v12610_v57 = vld [vmem:[%s16780_s3 + $0x60] sm:$0xff] }
0x14e4   :  { %v9880_v50 = vmax.f32 %v9860_v26, %v9873_v11  ;;  %v9914_v24 = vmax.f32 %v9897_v6, %v9904_v42  ;;  %v9881_v53 = vmax.f32 %v9861_v30, %v9872_v1  ;;  %v15485_v26 = vpack.c.bf16 %v10157_v28, %v10156_v58  ;;  %15488 = vmatprep.subr.bf16.mxu1 %v15487_v7  ;;  %v12569_v30 = vld [vmem:[%s21104_s13] ss:$0 sm:$0xff] }
0x14e5   :  { %v9890_v31 = vrot.slane %v9862_v44, 2  ;;  %v9907_v27 = vrot.slane %v9862_v44, 3  ;;  %15490 = vmatpush3.bf16.msra.mxu1 %v15487_v7  ;;  %v12574_v44 = vld [vmem:[%s21107_s21] ss:$0 sm:$0xff]  ;;  %vm10409_vm12 = vcmask 80896  }
0x14e6   :  { %v15463_v4 = vpack.c.bf16 %v9914_v24, %v9913_v25  ;;  %v9898_v9 = vmax.f32 %v9880_v50, %v9889_v45  ;;  %v4588_v25 = vadd.f32 %v12111_v38, %v21108_v12 }
0x14e7   :  { %v9891_v19 = vsel %vm752_vm0, %v9888_v22, %v9890_v31  ;;  %v9908_v33 = vsel %vm2059_vm14, %v9905_v17, %v9907_v27  ;;  %vm10344_vm0 = vcmask 254976   ;;  %vm10244_vm14 = vcmp.gt.f32.partialorder %v20416_v59, 0.0 }
0x14e8   :  { %v9899_v41 = vmax.f32 %v9881_v53, %v9891_v19  ;;  %15464 = vmatpush3.bf16.msra.mxu0 %v15463_v4  ;;  %v9915_v37 = vmax.f32 %v9898_v9, %v9906_v47 }
0x14e9   :  { %15465 = vmatprep.subr.bf16.mxu0 %v21071_v10 }
0x14ea   :  { %v9916_v13 = vmax.f32 %v9899_v41, %v9908_v33  ;;  %v20403_v41 = vld [vmem:[%s21110_s12] sm:$0xff] }
0x14ec   :  { %v15466_v54 = vpack.c.bf16 %v9916_v13, %v9915_v37  ;;  %v20406_v37 = vld [vmem:[%s21110_s12 + $0x8] sm:$0x3] }
0x14ee   :  { %15468 = vmatpush3.bf16.msk.msra.mxu0 %vm20249_vm8, %v15466_v54  ;;  %vm10245_vm8 = vcmp.gt.f32.partialorder %v20420_v21, 0.0 }
0x14ef   :  { %15469 = vmatprep.subr.bf16.mxu0 %v21071_v10 }
0x14f1   :  { %15010 = vmatmul.mubr.msk.f32.vlgmr.msra.gmra.mrb[112].mxu0 %vm9476_vm7, %v21089_v0  ;;  %v15479_v0 = vpack.c.bf16 %v9993_v51, %v9992_v8  ;;  %vm10413_vm7 = vcmask 74752  }
0x14f2   :  { %15471 = vmatpush3.bf16.msra.mxu0 %v15470_v23  ;;  %15020 = vmatprep.mubr.msk.f32.mxu0 %vm16564_vm6, %v21073_v39 }
0x14f3   :  { %15472 = vmatprep.subr.bf16.mxu0 %v21071_v10 }
0x14f6   :  { %15474 = vmatpush3.bf16.msra.mxu0 %v15473_v46 }
0x14f7   :  { %15475 = vmatprep.subr.bf16.mxu0 %v21071_v10 }
0x15c4   :  { %v9986_v3 = vpop.f32.mrb[112].mxu0 }
0x15c5   :  { %15021 = vmatmul.mubr.msk.f32.vlgmr.msra.gmra.mrb[114].mxu0 %vm1086_vm13, %v9986_v3  ;;  %v15011_v49 = vpop.f32.mrb[113].mxu0 }
0x15c6   :  { %15477 = vmatpush3.bf16.msra.mxu0 %v15476_v52  ;;  %15031 = vmatprep.mubr.msk.f32.mxu0 %vm16564_vm6, %v21073_v39 }
0x15c7   :  { %15478 = vmatprep.subr.bf16.mxu0 %v21071_v10 }
0x15ca   :  { %15480 = vmatpush3.bf16.msra.mxu0 %v15479_v0 }
0x15cb   :  { %15481 = vmatprep.subr.bf16.mxu0 %v21071_v10 }
0x15cd   :  { %15032 = vmatmul.mubr.msk.f32.vlgmr.msra.gmra.mrb[116].mxu0 %vm1086_vm13, %v20327_v29 }
0x15ce   :  { %15042 = vmatprep.mubr.msk.f32.mxu0 %vm16564_vm6, %v21073_v39  ;;  %15483 = vmatpush3.bf16.msra.mxu0 %v15482_v15 }
0x15cf   :  { %15484 = vmatprep.subr.bf16.mxu0 %v21071_v10  ;;  %v10250_v10 = vld [vmem:[#allocation31 + $0x10] sm:$0xff] }
0x15d0   :  { %v15491_v35 = vpack.c.bf16 %v10251_v62, %v10250_v10 }
0x15d2   :  { %15486 = vmatpush3.bf16.msra.mxu0 %v15485_v26  ;;  %15492 = vmatprep.subr.bf16.mxu1 %v15491_v35 }
0x15d3   :  { %15494 = vmatpush3.bf16.msra.mxu1 %v15491_v35  ;;  %v10714_v35 = vld [vmem:[%s16780_s3 + $0x20] sm:$0xff] }
0x1698   :  { %v10068_v29 = vpop.f32.mrb[114].mxu0 }
0x1699   :  { %v15022_v39 = vpop.f32.mrb[115].mxu0 }
0x16a0   :  { %v10141_v36 = vpop.f32.mrb[116].mxu0 }
0x16a1   :  { %v10142_v20 = vadd.f32 %v10141_v36, %v10068_v29  ;;  %v15033_v2 = vpop.f32.mrb[117].mxu0 }
0x16a2   :  { %v10609_v2 = vld [vmem:[#allocation32] sm:$0xff] }
0x16a3   :  { %v10152_v60 = vadd.f32 %v12568_v43, %v10142_v20 }
0x16a5   :  { %v10153_v61 = vmax.f32 %v10152_v60, 0.0  ;;  %v10610_v60 = vld [vmem:[#allocation32 + $0x8] sm:$0xff] }
0x16a7   :  { %15043 = vmatmul.mubr.msk.f32.vlgmr.msra.gmra.mrb[118].mxu0 %vm1086_vm13, %v10153_v61  ;;  %v15507_v61 = vpack.c.bf16 %v10610_v60, %v10609_v2 }
0x177a   :  { %v10234_v48 = vpop.f32.mrb[118].mxu0 }
0x177b   :  { %v10235_v42 = vadd.f32 %v12569_v30, %v10234_v48  ;;  %v15044_v63 = vpop.f32.mrb[119].mxu0  ;;  %v10715_v30 = vld [vmem:[%s16780_s3 + $0x28] sm:$0xff] }
0x177c   :  { %v15515_v38 = vpack.c.bf16 %v10715_v30, %v10714_v35  ;;  %v12597_v30 = vld [vmem:[%s21107_s21 + $0x1] ss:$0 sm:$0xff] }
0x177d   :  { %v20366_v1 = vrot.slane %v10235_v42, 4 }
0x177f   :  { %v20370_v22 = vsel %vm2449_vm3, %v4588_v25, %v20366_v1  ;;  %v10611_v25 = vld [vmem:[#allocation32 + $0x10] sm:$0xff] }
0x1780   :  { %15053 = vmatprep.mubr.msk.f32.mxu1 %vm1086_vm13, %v20370_v22  ;;  %v15501_v17 = vpack.c.bf16 %v20366_v1, %v20370_v22 }
0x1781   :  { %15054 = vmatmul.mubr.msk.f32.vlgmr.msra.gmra.mrb[80].mxu1 %vm1086_vm13, %v20366_v1 }
0x1782   :  { %15503 = vmatprep.subr.msk.bf16.mxu1 %vm18279_vm9, %v15501_v17  ;;  %15067 = vmatprep.mubr.msk.f32.mxu1 %vm10409_vm12, %v20403_v41 }
0x1783   :  { %15506 = vmatpush3.bf16.msk.msra.mxu1 %vm18279_vm9, %v15501_v17  ;;  %v10612_v17 = vld [vmem:[#allocation32 + $0x18] sm:$0xff] }
0x1784   :  { %15516 = vmatprep.subr.bf16.mxu1 %v15515_v38 }
0x1786   :  { %15068 = vmatmul.mubr.msk.f32.vlgmr.msra.gmra.mrb[82].mxu1 %vm10409_vm12, %v20406_v37 }
0x1787   :  { %15518 = vmatpush3.bf16.msra.mxu1 %v15515_v38 }
0x1854   :  { %v20383_v6 = vpop.f32.mrb[80].mxu1 }
0x1855   :  { %v20385_v11 = vpop.f32.mrb[81].mxu1  ;;  %v10340_v45 = vmul.f32 %v20383_v6, %v12573_v5  ;;  %v10356_v4 = vmul.f32 %v20383_v6, %v12574_v44 }
0x1856   :  { %v15495_v50 = vpack.c.bf16 %v20383_v6, %v20385_v11  ;;  %v10339_v24 = vmul.f32 %v12573_v5, %v20385_v11  ;;  %v10355_v27 = vmul.f32 %v12574_v44, %v20385_v11  ;;  %v10717_v44 = vld [vmem:[%s16780_s3 + $0x38] sm:$0xff] }
0x1857   :  { %v10345_v47 = vsel %vm10344_vm0, %v10340_v45, 0.0  ;;  %v10360_v9 = vsel %vm10344_vm0, %v10356_v4, 0.0  ;;  %v10716_v45 = vld [vmem:[%s16780_s3 + $0x30] sm:$0xff] }
0x1858   :  { %10346 = vadd.xlane.f32.xlu1 %v10345_v47  ;;  %15497 = vmatprep.subr.msk.bf16.mxu0 %vm18279_vm9, %v15495_v50  ;;  %v10341_v31 = vsel %vm1086_vm13, %v10339_v24, 0.0  ;;  %v10357_v53 = vsel %vm1086_vm13, %v10355_v27, 0.0  ;;  %v10710_v24 = vld [vmem:[%s16780_s3] sm:$0xff]  ;;  %v10711_v47 = vld [vmem:[%s16780_s3 + $0x8] sm:$0xff]  ;;  %v10712_v4 = vld [vmem:[%s16780_s3 + $0x10] sm:$0xff] }
0x1859   :  { %15500 = vmatpush3.bf16.msk.msra.mxu0 %vm18279_vm9, %v15495_v50  ;;  %10342 = vadd.xlane.f32.xlu0 %v10341_v31  ;;  %v15069_v10 = vpop.f32.mrb[82].mxu1  ;;  %v15519_v50 = vpack.c.bf16 %v10717_v44, %v10716_v45  ;;  %v15523_v31 = vpack.c.bf16 %v10711_v47, %v10710_v24  ;;  %v12575_v27 = vld [vmem:[%s21113_s25] ss:$0 sm:$0xff] }
0x185a   :  { %15508 = vmatprep.subr.bf16.mxu0 %v15507_v61  ;;  %v10600_v62 = vpop.f32.mrb[83].mxu1 }
0x185b   :  { %15520 = vmatprep.subr.bf16.mxu1 %v15519_v50 }
0x185c   :  { %15522 = vmatpush3.bf16.msra.mxu1 %v15519_v50 }
0x185d   :  { %10358 = vadd.xlane.f32.xlu0 %v10357_v53  ;;  %15524 = vmatprep.subr.bf16.mxu1 %v15523_v31 }
0x1861   :  { %10361 = vadd.xlane.f32.xlu0 %v10360_v9  ;;  %v10713_v9 = vld [vmem:[%s16780_s3 + $0x18] sm:$0xff] }
0x18e5   :  { %v10347_v33 = vpop.xlane.xlu1 %10346 }
0x18e6   :  { %v10343_v19 = vpop.xlane.xlu0 %10342 }
0x18e7   :  { %10363 = vxpose.xlu1.b32.start [1/2] (short) (narrow) %v10343_v19, 8 }
0x18ea   :  { %v10359_v13 = vpop.xlane.xlu0 %10358 }
0x18eb   :  { %10364 = vxpose.xlu1.b32.end [2/2] (short) (narrow) %v10347_v33, 8 }
0x18ee   :  { %v10362_v16 = vpop.xlane.xlu0 %10361 }
0x1967   :  { %v10379_v54 = vpop.trf.xlu1 }
0x1968   :  { %v10398_v23 = vrot.slane %v10379_v54, %v10397_v32  ;;  %v15527_v54 = vpack.c.bf16 %v10713_v9, %v10712_v4 }
0x196a   :  { %v10399_v46 = vadd.f32 %v10398_v23, %v10359_v13  ;;  %v10400_v18 = vadd.f32 %v10398_v23, %v10362_v16  ;;  %v10718_v23 = vld [vmem:[%s16780_s3 + $0x40] sm:$0xff]  ;;  %v10719_v16 = vld [vmem:[%s16780_s3 + $0x48] sm:$0xff] }
0x196c   :  { %vm10401_vm3 = vcmp.gt.f32.partialorder %v10399_v46, 0.0  ;;  %v10403_v52 = vmul.f32 0.2, %v10399_v46  ;;  %vm10402_vm6 = vcmp.gt.f32.partialorder %v10400_v18, 0.0  ;;  %v10404_v8 = vmul.f32 0.2, %v10400_v18 }
0x196e   :  { %v10405_v51 = vsel %vm10401_vm3, %v10399_v46, %v10403_v52  ;;  %v10406_v3 = vsel %vm10402_vm6, %v10400_v18, %v10404_v8  ;;  %v15531_v46 = vpack.c.bf16 %v10719_v16, %v10718_v23  ;;  %v10720_v8 = vld [vmem:[%s16780_s3 + $0x50] sm:$0xff] }
0x196f   :  { %v10407_v49 = vsel %vm10244_vm14, %v10405_v51, -1e+30  ;;  %v10408_v14 = vsel %vm10245_vm8, %v10406_v3, -1e+30  ;;  %v10721_v51 = vld [vmem:[%s16780_s3 + $0x58] sm:$0xff] }
0x1970   :  { %v10410_v0 = vsel %vm10409_vm12, %v10407_v49, -inf  ;;  %v10414_v56 = vsel %vm10413_vm7, %v10408_v14, -inf  ;;  %v12584_v3 = vld [vmem:[%s16775_s9] ss:$0 sm:$0xff] }
0x1971   :  { %10411 = vmax.xlane.f32.xlu0 %v10410_v0 }
0x1975   :  { %10415 = vmax.xlane.f32.xlu0 %v10414_v56 }
0x19fe   :  { %v10412_v15 = vpop.xlane.xlu0 %10411 }
0x19ff   :  { %v10417_v58 = vsub.f32 %v10407_v49, %v10412_v15 }
0x1a01   :  { %v10419_v28 = vmul.f32 1.442695, %v10417_v58 }
0x1a02   :  { %v10416_v26 = vpop.xlane.xlu0 %10415 }
0x1a03   :  { %16014 = vpow2.f32 %v10419_v28  ;;  %v10418_v55 = vsub.f32 %v10408_v14, %v10416_v26  ;;  %v15535_v14 = vpack.c.bf16 %v10721_v51, %v10720_v8  ;;  %v10973_v28 = vld [vmem:[#allocation31 + $0x20] sm:$0xff]  ;;  %v10974_v26 = vld [vmem:[#allocation31 + $0x28] sm:$0xff] }
0x1a05   :  { %v10421_v34 = vmul.f32 1.442695, %v10418_v55  ;;  %v10975_v55 = vld [vmem:[#allocation31 + $0x30] sm:$0xff] }
0x1a07   :  { %16016 = vpow2.f32 %v10421_v34  ;;  %v15539_v34 = vpack.c.bf16 %v10974_v26, %v10973_v28  ;;  %v11330_v26 = vld [vmem:[#allocation32 + $0x20] sm:$0xff] }
0x1a0d   :  { %v16015_v7 = vpop.eup %16014 }
0x1a0e   :  { %v10423_v29 = vsel %vm10244_vm14, %v16015_v7, 0.0  ;;  %v10976_v7 = vld [vmem:[#allocation31 + $0x38] sm:$0xff] }
0x1a0f   :  { %v10425_v39 = vsel %vm10409_vm12, %v10423_v29, 0.0 }
0x1a10   :  { %10426 = vadd.xlane.f32.xlu0 %v10425_v39 }
0x1a11   :  { %v16017_v36 = vpop.eup %16016 }
0x1a12   :  { %v10424_v43 = vsel %vm10245_vm8, %v16017_v36, 0.0 }
0x1a13   :  { %v10428_v20 = vsel %vm10413_vm7, %v10424_v43, 0.0 }
0x1a14   :  { %10429 = vadd.xlane.f32.xlu0 %v10428_v20 }
0x1a2a   :  { %10614 = vrot.lane.b32.xlu0 %v20385_v11, %s16565_s18  ;;  %v15511_v11 = vpack.c.bf16 %v10612_v17, %v10611_v25 }
0x1a2e   :  { %10616 = vrot.lane.b32.xlu0 %v20383_v6, %s16565_s18 }
0x1a9d   :  { %v10427_v48 = vpop.xlane.xlu0 %10426 }
0x1a9e   :  { %16018 = vrcp.f32 %v10427_v48 }
0x1aa1   :  { %v10430_v42 = vpop.xlane.xlu0 %10429 }
0x1aa2   :  { %16020 = vrcp.f32 %v10430_v42 }
0x1aa5   :  { %v10615_v18 = vpop.permute.xlu0 %10614 }
0x1aa8   :  { %v16019_v63 = vpop.eup %16018 }
0x1aa9   :  { %v10432_v12 = vmul.f32 %v16019_v63, %v10423_v29  ;;  %v10617_v15 = vpop.permute.xlu0 %10616  ;;  %v15543_v29 = vpack.c.bf16 %v10976_v7, %v10975_v55  ;;  %v11331_v55 = vld [vmem:[#allocation32 + $0x28] sm:$0xff] }
0x1aab   :  { %15060 = vmatprep.mubr.msk.f32.mxu0 %vm10409_vm12, %v10432_v12 }
0x1aac   :  { %v16021_v5 = vpop.eup %16020 }
0x1aad   :  { %v10434_v6 = vmul.f32 %v16021_v5, %v10424_v43 }
0x1aaf   :  { %15061 = vmatmul.mubr.msk.f32.vlgmr.msra.gmra.mrb[120].mxu0 %vm10409_vm12, %v10434_v6 }
0x1ab0   :  { %15510 = vmatpush3.bf16.msra.mxu0 %v15507_v61  ;;  %15078 = vmatprep.mubr.msk.f32.mxu0 %vm1086_vm13, %v10600_v62  ;;  %v12595_v61 = vld [vmem:[%s21106_s6 + $0x1] ss:$0 sm:$0xff] }
0x1ab1   :  { %15512 = vmatprep.subr.bf16.mxu0 %v15511_v11 }
0x1ab4   :  { %15514 = vmatpush3.bf16.msra.mxu0 %v15511_v11 }
0x1ab5   :  { %15540 = vmatprep.subr.bf16.mxu0 %v15539_v34 }
0x1ab7   :  { %15079 = vmatmul.mubr.msk.f32.vlgmr.msra.gmra.mrb[122].mxu0 %vm1086_vm13, %v15069_v10 }
0x1ab8   :  { %15542 = vmatpush3.bf16.msra.mxu0 %v15539_v34 }
0x1ab9   :  { %15544 = vmatprep.subr.bf16.mxu0 %v15543_v29 }
0x1abc   :  { %15546 = vmatpush3.bf16.msra.mxu0 %v15543_v29  ;;  %v15559_v29 = vpack.c.bf16 %v11331_v55, %v11330_v26 }
0x1b82   :  { %v15062_v53 = vpop.f32.mrb[120].mxu0 }
0x1b83   :  { %v10517_v19 = vpop.f32.mrb[121].mxu0  ;;  %v10523_v13 = vadd.f32 %v15062_v53, %v12575_v27 }
0x1b84   :  { %v10518_v33 = vadd.f32 %v12575_v27, %v10517_v19 }
0x1b86   :  { %15089 = vmatprep.mubr.msk.f32.mxu1 %vm1086_vm13, %v10518_v33 }
0x1b87   :  { %15090 = vmatmul.mubr.msk.f32.vlgmr.msra.gmra.mrb[84].mxu1 %vm1086_vm13, %v10523_v13 }
0x1b88   :  { %15526 = vmatpush3.bf16.msra.mxu1 %v15523_v31  ;;  %15100 = vmatprep.mubr.msk.f32.mxu1 %vm1086_vm13, %v20370_v22 }
0x1b89   :  { %15528 = vmatprep.subr.bf16.mxu1 %v15527_v54 }
0x1b8a   :  { %v15080_v52 = vpop.f32.mrb[122].mxu0 }
0x1b8b   :  { %v10692_v49 = vpop.f32.mrb[123].mxu0  ;;  %v10698_v22 = vadd.f32 %v15080_v52, %v10617_v15  ;;  %v12615_v15 = vld [vmem:[%s16780_s3 + $0x88] sm:$0xff] }
0x1b8c   :  { %v10693_v0 = vadd.f32 %v10692_v49, %v10615_v18  ;;  %15530 = vmatpush3.bf16.msra.mxu1 %v15527_v54 }
0x1b8d   :  { %15532 = vmatprep.subr.bf16.mxu1 %v15531_v46  ;;  %v10709_v58 = vadd.f32 %v12584_v3, %v10698_v22 }
0x1b8e   :  { %v10708_v56 = vadd.f32 %v12584_v3, %v10693_v0 }
0x1b8f   :  { %15101 = vmatmul.mubr.msk.f32.vlgmr.msra.gmra.mrb[84].mxu1 %vm1086_vm13, %v20366_v1  ;;  %v12591_v1 = vld [vmem:[%s16785_s15] ss:$0 sm:$0xff] }
0x1b90   :  { %15534 = vmatpush3.bf16.msra.mxu1 %v15531_v46  ;;  %15111 = vmatprep.mubr.msk.f32.mxu1 %vm1086_vm13, %v10708_v56  ;;  %v12614_v56 = vld [vmem:[%s16780_s3 + $0x80] sm:$0xff] }
0x1b91   :  { %15536 = vmatprep.subr.bf16.mxu1 %v15535_v14  ;;  %v15567_v22 = vpack.c.bf16 %v12615_v15, %v12614_v56 }
0x1b94   :  { %15538 = vmatpush3.bf16.msra.mxu1 %v15535_v14 }
0x1b95   :  { %15568 = vmatprep.subr.bf16.mxu1 %v15567_v22 }
0x1b97   :  { %15112 = vmatmul.mubr.msk.f32.vlgmr.msra.gmra.mrb[84].mxu1 %vm1086_vm13, %v10709_v58 }
0x1b98   :  { %15570 = vmatpush3.bf16.msra.mxu1 %v15567_v22 }
0x1c6a   :  { %v15113_v39 = vpop.f32.mrb[84].mxu1 }
0x1c6b   :  { %v10969_v36 = vadd.f32 %v15113_v39, %v12591_v1  ;;  %v10950_v43 = vpop.f32.mrb[85].mxu1  ;;  %v12617_v39 = vld [vmem:[%s16780_s3 + $0x98] sm:$0xff] }
0x1c6c   :  { %v10968_v20 = vadd.f32 %v12591_v1, %v10950_v43  ;;  %v12616_v1 = vld [vmem:[%s16780_s3 + $0x90] sm:$0xff] }
0x1c6d   :  { %v15571_v43 = vpack.c.bf16 %v12617_v39, %v12616_v1 }
0x1c6e   :  { %16022 = vtanh.f32 %v10968_v20  ;;  %v11333_v20 = vld [vmem:[#allocation32 + $0x38] sm:$0xff] }
0x1c6f   :  { %16024 = vtanh.f32 %v10969_v36  ;;  %v11332_v36 = vld [vmem:[#allocation32 + $0x30] sm:$0xff]  ;;  %15572 = vmatprep.subr.bf16.mxu1 %v15571_v43 }
0x1c70   :  { %15574 = vmatpush3.bf16.msra.mxu1 %v15571_v43 }
0x1c78   :  { %v20466_v2 = vpop.eup %16022 }
0x1c79   :  { %v20468_v60 = vpop.eup %16024  ;;  %15122 = vmatprep.mubr.msk.f32.mxu0 %vm1086_vm13, %v20466_v2 }
0x1c7a   :  { %15123 = vmatmul.mubr.msk.f32.vlgmr.msra.gmra.mrb[124].mxu0 %vm1086_vm13, %v20468_v60  ;;  %v20482_v12 = vpack.c.bf16 %v20468_v60, %v20466_v2 }
0x1d4d   :  { %v15124_v10 = vpop.f32.mrb[124].mxu0 }
0x1d4e   :  { %v11049_v62 = vpop.f32.mrb[125].mxu0  ;;  %v11067_v35 = vmul.f32 %v15124_v10, %v12595_v61  ;;  %v11083_v25 = vmul.f32 %v15124_v10, %v12597_v30 }
0x1d4f   :  { %v15547_v38 = vpack.c.bf16 %v15124_v10, %v11049_v62  ;;  %v11066_v48 = vmul.f32 %v12595_v61, %v11049_v62  ;;  %v11082_v5 = vmul.f32 %v12597_v30, %v11049_v62  ;;  %v15563_v61 = vpack.c.bf16 %v11333_v20, %v11332_v36  ;;  %v12612_v30 = vld [vmem:[%s16780_s3 + $0x70] sm:$0xff] }
0x1d50   :  { %v11071_v42 = vsel %vm10344_vm0, %v11067_v35, 0.0  ;;  %v11087_v17 = vsel %vm10344_vm0, %v11083_v25, 0.0  ;;  %v12618_v25 = vld [vmem:[%s16780_s3 + $0xa0] sm:$0xff] }
0x1d51   :  { %11072 = vadd.xlane.f32.xlu1 %v11071_v42  ;;  %15549 = vmatprep.subr.msk.bf16.mxu0 %vm18279_vm9, %v15547_v38  ;;  %v11068_v63 = vsel %vm1086_vm13, %v11066_v48, 0.0  ;;  %v11084_v6 = vsel %vm1086_vm13, %v11082_v5, 0.0 }
0x1d52   :  { %15552 = vmatpush3.bf16.msk.msra.mxu0 %vm18279_vm9, %v15547_v38  ;;  %11069 = vadd.xlane.f32.xlu0 %v11068_v63  ;;  %v12613_v38 = vld [vmem:[%s16780_s3 + $0x78] sm:$0xff] }
0x1d53   :  { %15555 = vmatprep.subr.msk.bf16.mxu0 %vm18279_vm9, %v20482_v12 }
0x1d56   :  { %11088 = vadd.xlane.f32.xlu0 %v11087_v17  ;;  %v12619_v17 = vld [vmem:[%s16780_s3 + $0xa8] sm:$0xff] }
0x1d5a   :  { %11085 = vadd.xlane.f32.xlu0 %v11084_v6  ;;  %v15583_v6 = vpack.c.bf16 %v12619_v17, %v12618_v25 }
0x1dde   :  { %v11073_v45 = vpop.xlane.xlu1 %11072 }
0x1ddf   :  { %v11070_v11 = vpop.xlane.xlu0 %11069 }
0x1de0   :  { %11090 = vxpose.xlu0.b32.start [1/2] (short) (narrow) %v11070_v11, 8  ;;  %v12620_v11 = vld [vmem:[%s16780_s3 + $0xb0] sm:$0xff] }
0x1de3   :  { %v11089_v44 = vpop.xlane.xlu0 %11088 }
0x1de4   :  { %11091 = vxpose.xlu0.b32.end [2/2] (short) (narrow) %v11073_v45, 8  ;;  %v12621_v45 = vld [vmem:[%s16780_s3 + $0xb8] sm:$0xff] }
0x1de7   :  { %v11086_v50 = vpop.xlane.xlu0 %11085 }
0x1e60   :  { %v11106_v24 = vpop.trf.xlu0 }
0x1e61   :  { %v11125_v47 = vrot.slane %v11106_v24, %v10397_v32 }
0x1e63   :  { %v11126_v31 = vadd.f32 %v11125_v47, %v11086_v50  ;;  %v11127_v27 = vadd.f32 %v11125_v47, %v11089_v44  ;;  %v15587_v44 = vpack.c.bf16 %v12621_v45, %v12620_v11 }
0x1e65   :  { %vm11128_vm2 = vcmp.gt.f32.partialorder %v11126_v31, 0.0  ;;  %v11130_v53 = vmul.f32 0.2, %v11126_v31  ;;  %vm11129_vm10 = vcmp.gt.f32.partialorder %v11127_v27, 0.0  ;;  %v11131_v4 = vmul.f32 0.2, %v11127_v27 }
0x1e67   :  { %v11132_v9 = vsel %vm11128_vm2, %v11126_v31, %v11130_v53  ;;  %v11133_v19 = vsel %vm11129_vm10, %v11127_v27, %v11131_v4  ;;  %v12609_v31 = vld [vmem:[%s16775_s9 + $0x1] ss:$0 sm:$0xff]  ;;  %s12633_s9 = sld [smem:[#allocation4 + $0x2]] }
0x1e68   :  { %v11134_v33 = vsel %vm10244_vm14, %v11132_v9, -1e+30  ;;  %v11135_v54 = vsel %vm10245_vm8, %v11133_v19, -1e+30 }
0x1e69   :  { %v11136_v13 = vsel %vm10409_vm12, %v11134_v33, -inf  ;;  %v11139_v40 = vsel %vm10413_vm7, %v11135_v54, -inf }
0x1e6a   :  { %11137 = vmax.xlane.f32.xlu1 %v11136_v13 }
0x1e6d   :  { %s11721_s0 = scalar_lea.vmem [#allocation2], %s12633_s9 }
0x1e6e   :  { %11140 = vmax.xlane.f32.xlu1 %v11139_v40 }
0x1ef7   :  { %v11138_v32 = vpop.xlane.xlu1 %11137 }
0x1ef8   :  { %v11142_v23 = vsub.f32 %v11134_v33, %v11138_v32 }
0x1efa   :  { %v11144_v16 = vmul.f32 1.442695, %v11142_v23 }
0x1efb   :  { %v11141_v46 = vpop.xlane.xlu1 %11140 }
0x1efc   :  { %16026 = vpow2.f32 %v11144_v16  ;;  %v11143_v18 = vsub.f32 %v11135_v54, %v11141_v46 }
0x1efe   :  { %v11146_v52 = vmul.f32 1.442695, %v11143_v18 }
0x1f00   :  { %16028 = vpow2.f32 %v11146_v52 }
0x1f06   :  { %v16027_v8 = vpop.eup %16026 }
0x1f07   :  { %v11148_v51 = vsel %vm10244_vm14, %v16027_v8, 0.0 }
0x1f08   :  { %v11150_v3 = vsel %vm10409_vm12, %v11148_v51, 0.0 }
0x1f09   :  { %11151 = vadd.xlane.f32.xlu1 %v11150_v3 }
0x1f0a   :  { %v16029_v49 = vpop.eup %16028 }
0x1f0b   :  { %v11149_v0 = vsel %vm10245_vm8, %v16029_v49, 0.0 }
0x1f0c   :  { %v11153_v14 = vsel %vm10413_vm7, %v11149_v0, 0.0 }
0x1f0d   :  { %11154 = vadd.xlane.f32.xlu1 %v11153_v14 }
0x1f1e   :  { %11335 = vrot.lane.b32.xlu1 %v11049_v62, %s16565_s18 }
0x1f22   :  { %11337 = vrot.lane.b32.xlu1 %v15124_v10, %s16565_s18  ;;  %v12611_v10 = vld [vmem:[%s16780_s3 + $0x68] sm:$0xff]  ;;  %s12631_s3 = sld [smem:[#allocation4 + $0x1]] }
0x1f96   :  { %v11152_v59 = vpop.xlane.xlu1 %11151 }
0x1f97   :  { %16030 = vrcp.f32 %v11152_v59 }
0x1f9a   :  { %v11155_v58 = vpop.xlane.xlu1 %11154 }
0x1f9b   :  { %16032 = vrcp.f32 %v11155_v58 }
0x1f9e   :  { %v11336_v50 = vpop.permute.xlu1 %11335 }
0x1fa1   :  { %v16031_v21 = vpop.eup %16030 }
0x1fa2   :  { %v11157_v28 = vmul.f32 %v16031_v21, %v11148_v51  ;;  %v11338_v24 = vpop.permute.xlu1 %11337 }
0x1fa4   :  { %15129 = vmatprep.mubr.msk.f32.mxu0 %vm10409_vm12, %v11157_v28 }
0x1fa5   :  { %v16033_v34 = vpop.eup %16032 }
0x1fa6   :  { %v11159_v7 = vmul.f32 %v16033_v34, %v11149_v0 }
0x1fa8   :  { %15130 = vmatmul.mubr.msk.f32.vlgmr.msra.gmra.mrb[126].mxu0 %vm10409_vm12, %v11159_v7 }
0x1fa9   :  { %15558 = vmatpush3.bf16.msk.msra.mxu0 %vm18279_vm9, %v20482_v12  ;;  %15136 = vmatprep.mubr.msk.f32.mxu0 %vm10409_vm12, %v20403_v41  ;;  %v15575_v41 = vpack.c.bf16 %v12611_v10, %v12610_v57  ;;  %v15579_v12 = vpack.c.bf16 %v12613_v38, %v12612_v30  ;;  %vm11705_vm9 = vcmask 253952  }
0x1faa   :  { %15560 = vmatprep.subr.bf16.mxu0 %v15559_v29 }
0x1fab   :  { %15576 = vmatprep.subr.bf16.mxu1 %v15575_v41 }
0x1fac   :  { %15137 = vmatmul.mubr.msk.f32.vlgmr.msra.gmra.mrb[128].mxu0 %vm10409_vm12, %v20406_v37  ;;  %v12599_v37 = vld [vmem:[%s21113_s25 + $0x1] ss:$0 sm:$0xff] }
0x1fad   :  { %15562 = vmatpush3.bf16.msra.mxu0 %v15559_v29 }
0x1fae   :  { %15564 = vmatprep.subr.bf16.mxu0 %v15563_v61 }
0x1fb1   :  { %15566 = vmatpush3.bf16.msra.mxu0 %v15563_v61 }
0x207b   :  { %v15131_v62 = vpop.f32.mrb[126].mxu0 }
0x207c   :  { %v11243_v35 = vpop.f32.mrb[127].mxu0  ;;  %v11249_v42 = vadd.f32 %v15131_v62, %v12599_v37 }
0x207d   :  { %v11244_v48 = vadd.f32 %v12599_v37, %v11243_v35 }
0x207f   :  { %v15138_v63 = vpop.f32.mrb[128].mxu0  ;;  %15158 = vmatprep.mubr.msk.f32.mxu1 %vm1086_vm13, %v11244_v48 }
0x2080   :  { %v11320_v5 = vpop.f32.mrb[129].mxu0  ;;  %15159 = vmatmul.mubr.msk.f32.vlgmr.msra.gmra.mrb[86].mxu1 %vm1086_vm13, %v11249_v42 }
0x2081   :  { %15147 = vmatprep.mubr.msk.f32.mxu0 %vm1086_vm13, %v11320_v5  ;;  %15578 = vmatpush3.bf16.msra.mxu1 %v15575_v41 }
0x2082   :  { %15169 = vmatprep.mubr.msk.f32.mxu1 %vm1086_vm13, %v20466_v2  ;;  %15148 = vmatmul.mubr.msk.f32.vlgmr.msra.gmra.mrb[130].mxu0 %vm1086_vm13, %v15138_v63 }
0x2083   :  { %15580 = vmatprep.subr.bf16.mxu1 %v15579_v12 }
0x2085   :  { %15582 = vmatpush3.bf16.msra.mxu1 %v15579_v12 }
0x2086   :  { %15584 = vmatprep.subr.bf16.mxu1 %v15583_v6 }
0x2088   :  { %15170 = vmatmul.mubr.msk.f32.vlgmr.msra.gmra.mrb[86].mxu1 %vm1086_vm13, %v20468_v60  ;;  %v12629_v60 = vld [vmem:[%s16785_s15 + $0x1] ss:$0 sm:$0xff]  ;;  %s11711_s15 = scalar_lea.vmem [#allocation2], %s12631_s3 }
0x2089   :  { %15586 = vmatpush3.bf16.msra.mxu1 %v15583_v6 }
0x208a   :  { %15588 = vmatprep.subr.bf16.mxu1 %v15587_v44 }
0x208d   :  { %15590 = vmatpush3.bf16.msra.mxu1 %v15587_v44 }
0x2155   :  { %v15149_v2 = vpop.f32.mrb[130].mxu0 }
0x2156   :  { %v11419_v47 = vadd.f32 %v15149_v2, %v11338_v24  ;;  %v11413_v27 = vpop.f32.mrb[131].mxu0 }
0x2157   :  { %v11414_v53 = vadd.f32 %v11413_v27, %v11336_v50 }
0x2158   :  { %v11431_v9 = vadd.f32 %v12609_v31, %v11419_v47 }
0x2159   :  { %v11430_v4 = vadd.f32 %v12609_v31, %v11414_v53 }
0x215b   :  { %15180 = vmatprep.mubr.msk.f32.mxu1 %vm1086_vm13, %v11430_v4 }
0x215c   :  { %15181 = vmatmul.mubr.msk.f32.vlgmr.msra.gmra.mrb[86].mxu1 %vm1086_vm13, %v11431_v9 }
0x222f   :  { %v15182_v19 = vpop.f32.mrb[86].mxu1 }
0x2230   :  { %v11693_v33 = vadd.f32 %v15182_v19, %v12629_v60  ;;  %v11673_v13 = vpop.f32.mrb[87].mxu1 }
0x2231   :  { %v11692_v54 = vadd.f32 %v12629_v60, %v11673_v13 }
0x2232   :  { %16034 = vtanh.f32 %v11693_v33 }
0x2233   :  { %16036 = vtanh.f32 %v11692_v54 }
0x223c   :  { %v16035_v40 = vpop.eup %16034 }
0x223d   :  { %v16037_v32 = vpop.eup %16036  ;;  %11697 = vst.msk [vmem:[#allocation2 + $0x8] sm:$0x3] %vm10344_vm0, %v16035_v40 }
0x223e   :  { %11696 = vst.msk [vmem:[#allocation2] sm:$0xff] %vm1086_vm13, %v16037_v32  ;;  %vm11729_vm13 = vcmask 7168  }
0x2245   :  { %v11712_v23 = vld [vmem:[%s11711_s15] sm:$0x1] }
0x2246   :  { %v11714_v16 = vld [vmem:[%s11713_s27] sm:$0x1] }
0x2247   :  { %v11701_v46 = vld [vmem:[%s11700_s10] sm:$0x1]  ;;  %v11715_v18 = vmul.f32 %v11714_v16, %v11712_v23 }
0x2248   :  { %v11703_v52 = vld [vmem:[%s11702_s11] sm:$0x1] }
0x2249   :  { %v11722_v8 = vld [vmem:[%s11721_s0] sm:$0x1]  ;;  %v11704_v3 = vmul.f32 %v11703_v52, %v11701_v46  ;;  %v11716_v49 = vsel %vm11705_vm9, %v11715_v18, 0.0 }
0x224a   :  { %v11724_v51 = vld [vmem:[%s11723_s30] sm:$0x1]  ;;  %11717 = vadd.xlane.f32.xlu0 %v11716_v49 }
0x224b   :  { %v11706_v0 = vsel %vm11705_vm9, %v11704_v3, 0.0  ;;  %v11725_v14 = vmul.f32 %v11724_v51, %v11722_v8 }
0x224c   :  { %11707 = vadd.xlane.f32.xlu1 %v11706_v0 }
0x224d   :  { %v11726_v56 = vsel %vm11705_vm9, %v11725_v14, 0.0 }
0x2250   :  { %11727 = vadd.xlane.f32.xlu1 %v11726_v56 }
0x22d7   :  { %v11718_v22 = vpop.xlane.xlu0 %11717 }
0x22d9   :  { %v11708_v15 = vpop.xlane.xlu1 %11707 }
0x22da   :  { %v11730_v59 = vsel %vm11729_vm13, %v11708_v15, %v11718_v22 }
0x22dd   :  { %v11728_v58 = vpop.xlane.xlu1 %11727 }
0x22de   :  { %v11732_v21 = vsel %vm11731_vm11, %v11730_v59, %v11728_v58 }
0x22df   :  { %v12635_v28 = vmul.f32 -1.442695, %v11732_v21 }
0x22e1   :  { %16038 = vpow2.f32 %v12635_v28 }
0x22eb   :  { %v16039_v26 = vpop.eup %16038 }
0x22ec   :  { %v11736_v55 = vadd.f32 1.0, %v16039_v26 }
0x22ee   :  { %16040 = vrcp.f32 %v11736_v55 }
0x22f8   :  { %v16041_v34 = vpop.eup %16040 }
0x22f9   :  { %11740 = vst.msk [vmem:[#allocation34] sm:$0x1] %vm11739_vm15, %v16041_v34 }
0x22fa   :  { %16459 = shalt.err (!%p16456_p11)
}
0x22fb   :  { %s16460_s14 = scalar_lea.hbm %s16790_s22, 16 }
0x22fc   :  { %p16461_p12 = scmp.ne.s32.totalorder %s16790_s22, %s16460_s14  ;;  %p16464_p13 = scmp.lt.u32.totalorder %s16460_s14, %s16790_s22 }
0x22fe   :  { %p16466_p0 = pnand %p16464_p13, %p16461_p12 }
0x2300   :  { %16469 = shalt.err (!%p16466_p0)
}
0x2301   :  { %11750 = dma.vmem_to_hbm [thread:$0]  %s11748_s29, 16, %s16790_s22, [#allocation7]  }
0x2302   :  { %16492 = dma.done.wait [#allocation7], 16  }
0x2303   :  { %16493 = vsyncadd [#allocation7], 4294967280 }
0x2304   :  { %11754 = vsyncpa [#allocation6], 1 }
0x2305   :  { %11755 = vsyncpa [#allocation9], 1 }
0x2306   :  { %11756 = vsyncpa [#allocation12], 1 }
0x2307   :  { %11757 = vsyncpa [#allocation15], 1 }
0x2308   :  { %11758 = vsyncpa [#allocation18], 1 }
0x2309   :  { %11759 = vsyncpa [#allocation21], 1 }
0x230a   :  { %11760 = vsyncpa [#allocation24], 1 }
0x230b   :  { %11761 = vsyncpa [#allocation27], 1 }
0x230c   :  { %11762 = vsyncpa [#allocation30], 1 }
0x230d   :  { %11763 = vsyncpa [#allocation33], 1 }
0x230e   :  { %11764 = vsyncpa [#allocation7], 1 }

</bundles_post_ra>
